<compile_context>
chip_gen: v7x
topology: tpu7x:2x2x1
jax: 0.10.0
libtpu: 0.0.40
codegen_flags: <defaults>
</compile_context>

<pallas_src>
import jax
import jax.numpy as jnp
from jax.experimental import pallas as pl
from jax.experimental.pallas import tpu as pltpu

D_IN = 768
D_MODEL = 256
FFN_HIDDEN = 768
N_HEAD = 4
N_LAYERS = 4
VOCAB = 101          # num_embeddings for rank embeddings
PAD_V = 128          # padded stride for the fused (retrieval|reranking) table
LN_EPS = 1e-5        # torch.nn.LayerNorm default
HD = N_HEAD * D_MODEL   # 1024 (d_k == d_model per head in this model)


def _layer_norm(x, g, b, eps=LN_EPS):
    mu = jnp.mean(x, axis=-1, keepdims=True)
    var = jnp.mean(jnp.square(x - mu), axis=-1, keepdims=True)
    return (x - mu) * jax.lax.rsqrt(var + eps) * g + b


# ---------------------------------------------------------------------------
# Fully fused HLATR forward kernel (one grid step == TB batches)
# ---------------------------------------------------------------------------
def _hlatr_fused_kernel(
        # per-batch-block inputs
        x_ref, rid_ref, sid_ref, mask_ref,
        # embed / input-projection params
        w_in_ref, b_in_ref, emb_tab_ref, ln0_g_ref, ln0_b_ref,
        # stacked per-layer encoder params  (leading axis = layer)
        wqkv_ref, bqkv_ref, wo_ref, bo_ref, g1_ref, be1_ref,
        wf1_ref, bf1_ref, wf2_ref, bf2_ref, g2_ref, be2_ref,
        # cls head
        wcls_ref, bcls_ref,
        # output
        o_ref):
    TB, L, _ = x_ref.shape
    N = TB * L
    inv_sqrt_d = 1.0 / float(D_MODEL) ** 0.5   # d_tensor == d_model per head

    # ---- Linear(768->256) + fused rank-embedding lookup + LayerNorm --------
    x = x_ref[...].reshape(N, D_IN)                                   # bf16
    h = jnp.dot(x, w_in_ref[...], preferred_element_type=jnp.float32) + b_in_ref[...]

    rid = rid_ref[...].reshape(N, 1)
    sid = sid_ref[...].reshape(N, 1)
    col = jax.lax.broadcasted_iota(jnp.int32, (N, 2 * PAD_V), 1)
    two_hot = jnp.logical_or(col == rid, col == sid + PAD_V).astype(jnp.bfloat16)
    h = h + jnp.dot(two_hot, emb_tab_ref[...], preferred_element_type=jnp.float32)

    h = _layer_norm(h, ln0_g_ref[...], ln0_b_ref[...])                # f32 [N, D]

    mask = mask_ref[...]                                              # [TB, 1, L] f32

    # ---- 4 encoder layers, activations resident (no HBM round trips) -------
    def layer_body(l, h2d):
        xb = h2d.astype(jnp.bfloat16)
        qkv = (jnp.dot(xb, wqkv_ref[l], preferred_element_type=jnp.float32)
               + bqkv_ref[l])                                         # [N, 3*HD]
        q = (qkv[:, 0:HD] * inv_sqrt_d).reshape(TB, L, HD).astype(jnp.bfloat16)
        k = qkv[:, HD:2 * HD].reshape(TB, L, HD).astype(jnp.bfloat16)
        v = qkv[:, 2 * HD:3 * HD].reshape(TB, L, HD).astype(jnp.bfloat16)

        ctx_heads = []
        for hh in range(N_HEAD):
            sl = slice(hh * D_MODEL, (hh + 1) * D_MODEL)
            s = jnp.einsum('bqd,bkd->bqk', q[:, :, sl], k[:, :, sl],
                           preferred_element_type=jnp.float32)        # [TB,L,L]
            s = jnp.where(mask == 0.0, jnp.float32(-10000.0), s)
            s = s - jnp.max(s, axis=-1, keepdims=True)
            p = jnp.exp(s)
            p = p * pl.reciprocal(jnp.sum(p, axis=-1, keepdims=True), approx=True)
            ch = jnp.einsum('bqk,bkd->bqd', p.astype(jnp.bfloat16), v[:, :, sl],
                            preferred_element_type=jnp.float32)       # [TB,L,D]
            ctx_heads.append(ch)
        # concat(heads) @ Wo in one deep-K matmul
        ctx = jnp.concatenate(ctx_heads, axis=-1).reshape(N, HD)
        attn = (jnp.dot(ctx.astype(jnp.bfloat16), wo_ref[l],
                        preferred_element_type=jnp.float32) + bo_ref[l])

        h1 = _layer_norm(attn + h2d, g1_ref[l], be1_ref[l])

        f = (jnp.dot(h1.astype(jnp.bfloat16), wf1_ref[l],
                     preferred_element_type=jnp.float32) + bf1_ref[l])
        f = jnp.maximum(f, 0.0)
        f = (jnp.dot(f.astype(jnp.bfloat16), wf2_ref[l],
                     preferred_element_type=jnp.float32) + bf2_ref[l])
        return _layer_norm(f + h1, g2_ref[l], be2_ref[l])

    h = jax.lax.fori_loop(0, N_LAYERS, layer_body, h)

    # ---- cls head Linear(256 -> 1): VPU mul + lane reduce (no N=1 matmul) ---
    h3 = h.reshape(TB, L, D_MODEL)
    w_cls = wcls_ref[...].reshape(1, 1, D_MODEL)
    logits = jnp.sum(h3 * w_cls, axis=-1) + bcls_ref[...]             # [TB, L]
    o_ref[...] = logits.astype(o_ref.dtype)


# ---------------------------------------------------------------------------
# Wrapper
# ---------------------------------------------------------------------------
def _full_spec(shape):
    zeros = (0,) * len(shape)
    return pl.BlockSpec(shape, lambda b, z=zeros: z)


def _choose_tb(B, L):
    """Pick batches-per-grid-step: ~256 rows per step to fill the MXU.
    Keep >=2 grid steps when it is free (v7x has 2 TensorCores)."""
    tb = max(1, 256 // L)
    if tb >= B:
        if B % 16 == 0 and (B // 2) * L >= 128:
            return B // 2        # 2+ steps, still >=128 MXU rows each
        return B                 # single step: block == full batch extent
    return max(8, (tb // 8) * 8)  # multi-step: sublane-friendly multiple of 8


def hlatr_forward(params, inputs, masks, retrieval_ranks, reranking_ranks):
    B, L, _ = inputs.shape
    TB = _choose_tb(B, L)
    n_blocks = -(-B // TB)
    B_pad = n_blocks * TB

    def pad_b(a, value=0):
        if B_pad == B:
            return a
        pad = [(0, B_pad - B)] + [(0, 0)] * (a.ndim - 1)
        return jnp.pad(a, pad, constant_values=value)

    x = pad_b(inputs).astype(jnp.bfloat16)                       # [B_pad, L, 768]
    rid = pad_b(retrieval_ranks.astype(jnp.int32)).reshape(B_pad, L, 1)
    sid = pad_b(reranking_ranks.astype(jnp.int32)).reshape(B_pad, L, 1)
    mask3 = pad_b(masks.astype(jnp.float32), value=1).reshape(B_pad, 1, L)

    bf16 = lambda a: a.astype(jnp.bfloat16)

    out = pl.pallas_call(
        _hlatr_fused_kernel,
        out_shape=jax.ShapeDtypeStruct((B_pad, L), jnp.float32),
        grid=(n_blocks,),
        in_specs=[
            pl.BlockSpec((TB, L, D_IN), lambda b: (b, 0, 0)),
            pl.BlockSpec((TB, L, 1), lambda b: (b, 0, 0)),
            pl.BlockSpec((TB, L, 1), lambda b: (b, 0, 0)),
            pl.BlockSpec((TB, 1, L), lambda b: (b, 0, 0)),
            _full_spec((D_IN, D_MODEL)), _full_spec((1, D_MODEL)),
            _full_spec((2 * PAD_V, D_MODEL)),
            _full_spec((1, D_MODEL)), _full_spec((1, D_MODEL)),
            _full_spec((N_LAYERS, D_MODEL, 3 * HD)), _full_spec((N_LAYERS, 1, 3 * HD)),
            _full_spec((N_LAYERS, HD, D_MODEL)), _full_spec((N_LAYERS, 1, D_MODEL)),
            _full_spec((N_LAYERS, 1, D_MODEL)), _full_spec((N_LAYERS, 1, D_MODEL)),
            _full_spec((N_LAYERS, D_MODEL, FFN_HIDDEN)), _full_spec((N_LAYERS, 1, FFN_HIDDEN)),
            _full_spec((N_LAYERS, FFN_HIDDEN, D_MODEL)), _full_spec((N_LAYERS, 1, D_MODEL)),
            _full_spec((N_LAYERS, 1, D_MODEL)), _full_spec((N_LAYERS, 1, D_MODEL)),
            _full_spec((1, D_MODEL)), _full_spec((1, 1)),
        ],
        out_specs=pl.BlockSpec((TB, L), lambda b: (b, 0)),
        compiler_params=pltpu.CompilerParams(
            dimension_semantics=("parallel",),
            vmem_limit_bytes=48 * 1024 * 1024),
    )(x, rid, sid, mask3,
      bf16(params['w_in']), params['b_in'],
      bf16(params['emb_tab']), params['ln0_g'], params['ln0_b'],
      bf16(params['wqkv']), params['bqkv'], bf16(params['wo']), params['bo'],
      params['g1'], params['be1'],
      bf16(params['wf1']), params['bf1'], bf16(params['wf2']), params['bf2'],
      params['g2'], params['be2'],
      params['w_cls'], params['b_cls'])

    return out[:B]


# ---------------------------------------------------------------------------
# Deterministic synthetic parameters (shapes match HLATR.__init__)
# ---------------------------------------------------------------------------
def init_params(key):
    keys = jax.random.split(key, 3 + N_LAYERS + 1)

    def dense(k, n_in, n_out):
        return jax.random.normal(k, (n_in, n_out), jnp.float32) * 0.02

    p = {}
    p['w_in'] = dense(keys[0], D_IN, D_MODEL)                     # Linear(768, 256)
    p['b_in'] = jnp.zeros((1, D_MODEL), jnp.float32)

    rtab = dense(keys[1], VOCAB, D_MODEL).at[0].set(0.0)          # padding_idx=0
    stab = dense(keys[2], VOCAB, D_MODEL).at[0].set(0.0)
    emb_tab = jnp.zeros((2 * PAD_V, D_MODEL), jnp.float32)        # fused table
    emb_tab = emb_tab.at[:VOCAB].set(rtab).at[PAD_V:PAD_V + VOCAB].set(stab)
    p['emb_tab'] = emb_tab

    p['ln0_g'] = jnp.ones((1, D_MODEL), jnp.float32)
    p['ln0_b'] = jnp.zeros((1, D_MODEL), jnp.float32)

    wqkv, wo, wf1, wf2 = [], [], [], []
    for i in range(N_LAYERS):
        lk = jax.random.split(keys[3 + i], 6)
        wq = dense(lk[0], D_MODEL, HD)       # W_Q: Linear(256, 1024)
        wk = dense(lk[1], D_MODEL, HD)
        wv = dense(lk[2], D_MODEL, HD)
        wqkv.append(jnp.concatenate([wq, wk, wv], axis=1))        # fused QKV
        wo.append(dense(lk[3], HD, D_MODEL))                      # ffw: Linear(1024, 256)
        wf1.append(dense(lk[4], D_MODEL, FFN_HIDDEN))
        wf2.append(dense(lk[5], FFN_HIDDEN, D_MODEL))
    p['wqkv'] = jnp.stack(wqkv)                                   # [4, 256, 3072]
    p['bqkv'] = jnp.zeros((N_LAYERS, 1, 3 * HD), jnp.float32)
    p['wo'] = jnp.stack(wo)                                       # [4, 1024, 256]
    p['bo'] = jnp.zeros((N_LAYERS, 1, D_MODEL), jnp.float32)
    p['g1'] = jnp.ones((N_LAYERS, 1, D_MODEL), jnp.float32)
    p['be1'] = jnp.zeros((N_LAYERS, 1, D_MODEL), jnp.float32)
    p['wf1'] = jnp.stack(wf1)                                     # [4, 256, 768]
    p['bf1'] = jnp.zeros((N_LAYERS, 1, FFN_HIDDEN), jnp.float32)
    p['wf2'] = jnp.stack(wf2)                                     # [4, 768, 256]
    p['bf2'] = jnp.zeros((N_LAYERS, 1, D_MODEL), jnp.float32)
    p['g2'] = jnp.ones((N_LAYERS, 1, D_MODEL), jnp.float32)
    p['be2'] = jnp.zeros((N_LAYERS, 1, D_MODEL), jnp.float32)

    p['w_cls'] = dense(keys[3 + N_LAYERS], 1, D_MODEL)            # Linear(256,1) stored [1,256]
    p['b_cls'] = jnp.zeros((1, 1), jnp.float32)
    return p


if __name__ == "__main__":
    B, L = 2, 8
    key = jax.random.PRNGKey(0)
    kp, kx, kr, ks = jax.random.split(key, 4)

    params = init_params(kp)
    inputs = jax.random.normal(kx, (B, L, D_IN), jnp.float32)
    masks = jnp.ones((B, L), jnp.float32).at[1, -2:].set(0.0)     # some padded keys
    retrieval_ranks = jax.random.randint(kr, (B, L), 1, VOCAB, jnp.int32)
    reranking_ranks = jax.random.randint(ks, (B, L), 1, VOCAB, jnp.int32)

    logits = hlatr_forward(params, inputs, masks, retrieval_ranks, reranking_ranks)
    jax.block_until_ready(logits)
    assert logits.shape == (B, L) and logits.dtype == jnp.float32
    print("KERNEL_OK")
</pallas_src>

<mosaic_0001>
module attributes {stable_mosaic.version = 11 : i64} {
  func.func @_hlatr_fused_kernel(%arg0: i32, %arg1: memref<2x8x768xbf16, #tpu.memory_space<vmem>>, %arg2: memref<2x8x1xi32, #tpu.memory_space<vmem>>, %arg3: memref<2x8x1xi32, #tpu.memory_space<vmem>>, %arg4: memref<2x1x8xf32, #tpu.memory_space<vmem>>, %arg5: memref<768x256xbf16, #tpu.memory_space<vmem>>, %arg6: memref<1x256xf32, #tpu.memory_space<vmem>>, %arg7: memref<256x256xbf16, #tpu.memory_space<vmem>>, %arg8: memref<1x256xf32, #tpu.memory_space<vmem>>, %arg9: memref<1x256xf32, #tpu.memory_space<vmem>>, %arg10: memref<4x256x3072xbf16, #tpu.memory_space<vmem>>, %arg11: memref<4x1x3072xf32, #tpu.memory_space<vmem>>, %arg12: memref<4x1024x256xbf16, #tpu.memory_space<vmem>>, %arg13: memref<4x1x256xf32, #tpu.memory_space<vmem>>, %arg14: memref<4x1x256xf32, #tpu.memory_space<vmem>>, %arg15: memref<4x1x256xf32, #tpu.memory_space<vmem>>, %arg16: memref<4x256x768xbf16, #tpu.memory_space<vmem>>, %arg17: memref<4x1x768xf32, #tpu.memory_space<vmem>>, %arg18: memref<4x768x256xbf16, #tpu.memory_space<vmem>>, %arg19: memref<4x1x256xf32, #tpu.memory_space<vmem>>, %arg20: memref<4x1x256xf32, #tpu.memory_space<vmem>>, %arg21: memref<4x1x256xf32, #tpu.memory_space<vmem>>, %arg22: memref<1x256xf32, #tpu.memory_space<vmem>>, %arg23: memref<1x1xf32, #tpu.memory_space<vmem>>, %arg24: memref<2x8xf32, #tpu.memory_space<vmem>>) attributes {dimension_semantics = [#tpu.dimension_semantics<parallel>], iteration_bounds = array<i64: 1>, scalar_prefetch = 0 : i64, scratch_operands = 0 : i64, tpu.core_type = #tpu.core_type<tc>, window_params = [{transform_indices = @transform_0, window_bounds = array<i64: 2, 8, 768>}, {transform_indices = @transform_1, window_bounds = array<i64: 2, 8, 1>}, {transform_indices = @transform_2, window_bounds = array<i64: 2, 8, 1>}, {transform_indices = @transform_3, window_bounds = array<i64: 2, 1, 8>}, {pipeline_mode = #tpu.pipeline_mode<synchronous>, transform_indices = @transform_4, window_bounds = array<i64: 768, 256>}, {pipeline_mode = #tpu.pipeline_mode<synchronous>, transform_indices = @transform_5, window_bounds = array<i64: 1, 256>}, {pipeline_mode = #tpu.pipeline_mode<synchronous>, transform_indices = @transform_6, window_bounds = array<i64: 256, 256>}, {pipeline_mode = #tpu.pipeline_mode<synchronous>, transform_indices = @transform_7, window_bounds = array<i64: 1, 256>}, {pipeline_mode = #tpu.pipeline_mode<synchronous>, transform_indices = @transform_8, window_bounds = array<i64: 1, 256>}, {pipeline_mode = #tpu.pipeline_mode<synchronous>, transform_indices = @transform_9, window_bounds = array<i64: 4, 256, 3072>}, {pipeline_mode = #tpu.pipeline_mode<synchronous>, transform_indices = @transform_10, window_bounds = array<i64: 4, 1, 3072>}, {pipeline_mode = #tpu.pipeline_mode<synchronous>, transform_indices = @transform_11, window_bounds = array<i64: 4, 1024, 256>}, {pipeline_mode = #tpu.pipeline_mode<synchronous>, transform_indices = @transform_12, window_bounds = array<i64: 4, 1, 256>}, {pipeline_mode = #tpu.pipeline_mode<synchronous>, transform_indices = @transform_13, window_bounds = array<i64: 4, 1, 256>}, {pipeline_mode = #tpu.pipeline_mode<synchronous>, transform_indices = @transform_14, window_bounds = array<i64: 4, 1, 256>}, {pipeline_mode = #tpu.pipeline_mode<synchronous>, transform_indices = @transform_15, window_bounds = array<i64: 4, 256, 768>}, {pipeline_mode = #tpu.pipeline_mode<synchronous>, transform_indices = @transform_16, window_bounds = array<i64: 4, 1, 768>}, {pipeline_mode = #tpu.pipeline_mode<synchronous>, transform_indices = @transform_17, window_bounds = array<i64: 4, 768, 256>}, {pipeline_mode = #tpu.pipeline_mode<synchronous>, transform_indices = @transform_18, window_bounds = array<i64: 4, 1, 256>}, {pipeline_mode = #tpu.pipeline_mode<synchronous>, transform_indices = @transform_19, window_bounds = array<i64: 4, 1, 256>}, {pipeline_mode = #tpu.pipeline_mode<synchronous>, transform_indices = @transform_20, window_bounds = array<i64: 4, 1, 256>}, {pipeline_mode = #tpu.pipeline_mode<synchronous>, transform_indices = @transform_21, window_bounds = array<i64: 1, 256>}, {pipeline_mode = #tpu.pipeline_mode<synchronous>, transform_indices = @transform_22, window_bounds = array<i64: 1, 1>}, {transform_indices = @transform_23, window_bounds = array<i64: 2, 8>}]} {
    %c0 = arith.constant 0 : index
    %c0_0 = arith.constant 0 : index
    %c0_1 = arith.constant 0 : index
    %0 = vector.load %arg1[%c0, %c0_0, %c0_1] : memref<2x8x768xbf16, #tpu.memory_space<vmem>>, vector<2x8x768xbf16>
    %1 = vector.shape_cast %0 : vector<2x8x768xbf16> to vector<16x768xbf16>
    %c0_2 = arith.constant 0 : index
    %c0_3 = arith.constant 0 : index
    %2 = vector.load %arg5[%c0_2, %c0_3] : memref<768x256xbf16, #tpu.memory_space<vmem>>, vector<768x256xbf16>
    %cst = arith.constant dense<0.000000e+00> : vector<16x256xf32>
    %3 = tpu.matmul %1, %2, %cst {dimension_numbers = #tpu.dot_dimension_numbers<[1], [0], [0], [1], [0, 0, 1, 1], [], []>} : vector<16x768xbf16>, vector<768x256xbf16>, vector<16x256xf32> -> vector<16x256xf32>
    %c0_4 = arith.constant 0 : index
    %c0_5 = arith.constant 0 : index
    %4 = vector.load %arg6[%c0_4, %c0_5] : memref<1x256xf32, #tpu.memory_space<vmem>>, vector<1x256xf32>
    %5 = vector.broadcast %4 : vector<1x256xf32> to vector<16x256xf32>
    %6 = arith.addf %3, %5 : vector<16x256xf32>
    %c0_6 = arith.constant 0 : index
    %c0_7 = arith.constant 0 : index
    %c0_8 = arith.constant 0 : index
    %7 = vector.load %arg2[%c0_6, %c0_7, %c0_8] : memref<2x8x1xi32, #tpu.memory_space<vmem>>, vector<2x8x1xi32>
    %8 = vector.shape_cast %7 : vector<2x8x1xi32> to vector<16x1xi32>
    %c0_9 = arith.constant 0 : index
    %c0_10 = arith.constant 0 : index
    %c0_11 = arith.constant 0 : index
    %9 = vector.load %arg3[%c0_9, %c0_10, %c0_11] : memref<2x8x1xi32, #tpu.memory_space<vmem>>, vector<2x8x1xi32>
    %10 = vector.shape_cast %9 : vector<2x8x1xi32> to vector<16x1xi32>
    %11 = tpu.iota {dimensions = array<i32: 1>} : vector<16x256xi32>
    %12 = vector.broadcast %8 : vector<16x1xi32> to vector<16x256xi32>
    %13 = arith.cmpi eq, %11, %12 : vector<16x256xi32>
    %c128_i32 = arith.constant 128 : i32
    %14 = vector.broadcast %c128_i32 : i32 to vector<16x1xi32>
    %15 = arith.addi %10, %14 : vector<16x1xi32>
    %16 = vector.broadcast %15 : vector<16x1xi32> to vector<16x256xi32>
    %17 = arith.cmpi eq, %11, %16 : vector<16x256xi32>
    %18 = arith.ori %13, %17 : vector<16x256xi1>
    %19 = arith.extui %18 : vector<16x256xi1> to vector<16x256xi32>
    %20 = arith.sitofp %19 : vector<16x256xi32> to vector<16x256xf32>
    %21 = arith.truncf %20 : vector<16x256xf32> to vector<16x256xbf16>
    %c0_12 = arith.constant 0 : index
    %c0_13 = arith.constant 0 : index
    %22 = vector.load %arg7[%c0_12, %c0_13] : memref<256x256xbf16, #tpu.memory_space<vmem>>, vector<256x256xbf16>
    %cst_14 = arith.constant dense<0.000000e+00> : vector<16x256xf32>
    %23 = tpu.matmul %21, %22, %cst_14 {dimension_numbers = #tpu.dot_dimension_numbers<[1], [0], [0], [1], [0, 0, 1, 1], [], []>} : vector<16x256xbf16>, vector<256x256xbf16>, vector<16x256xf32> -> vector<16x256xf32>
    %24 = arith.addf %6, %23 : vector<16x256xf32>
    %c0_15 = arith.constant 0 : index
    %c0_16 = arith.constant 0 : index
    %25 = vector.load %arg8[%c0_15, %c0_16] : memref<1x256xf32, #tpu.memory_space<vmem>>, vector<1x256xf32>
    %c0_17 = arith.constant 0 : index
    %c0_18 = arith.constant 0 : index
    %26 = vector.load %arg9[%c0_17, %c0_18] : memref<1x256xf32, #tpu.memory_space<vmem>>, vector<1x256xf32>
    %cst_19 = arith.constant dense<0.000000e+00> : vector<16xf32>
    %27 = vector.multi_reduction <add>, %24, %cst_19 [1] : vector<16x256xf32> to vector<16xf32>
    %28 = vector.shape_cast %27 : vector<16xf32> to vector<16x1xf32>
    %cst_20 = arith.constant 2.560000e+02 : f32
    %29 = vector.broadcast %cst_20 : f32 to vector<16x1xf32>
    %30 = arith.divf %28, %29 : vector<16x1xf32>
    %31 = vector.broadcast %30 : vector<16x1xf32> to vector<16x256xf32>
    %32 = arith.subf %24, %31 : vector<16x256xf32>
    %33 = arith.mulf %32, %32 : vector<16x256xf32>
    %cst_21 = arith.constant dense<0.000000e+00> : vector<16xf32>
    %34 = vector.multi_reduction <add>, %33, %cst_21 [1] : vector<16x256xf32> to vector<16xf32>
    %35 = vector.shape_cast %34 : vector<16xf32> to vector<16x1xf32>
    %cst_22 = arith.constant 2.560000e+02 : f32
    %36 = vector.broadcast %cst_22 : f32 to vector<16x1xf32>
    %37 = arith.divf %35, %36 : vector<16x1xf32>
    %38 = vector.broadcast %30 : vector<16x1xf32> to vector<16x256xf32>
    %39 = arith.subf %24, %38 : vector<16x256xf32>
    %cst_23 = arith.constant 9.99999974E-6 : f32
    %40 = vector.broadcast %cst_23 : f32 to vector<16x1xf32>
    %41 = arith.addf %37, %40 : vector<16x1xf32>
    %42 = math.rsqrt %41 : vector<16x1xf32>
    %43 = vector.broadcast %42 : vector<16x1xf32> to vector<16x256xf32>
    %44 = arith.mulf %39, %43 : vector<16x256xf32>
    %45 = vector.broadcast %25 : vector<1x256xf32> to vector<16x256xf32>
    %46 = arith.mulf %44, %45 : vector<16x256xf32>
    %47 = vector.broadcast %26 : vector<1x256xf32> to vector<16x256xf32>
    %48 = arith.addf %46, %47 : vector<16x256xf32>
    %c0_24 = arith.constant 0 : index
    %c0_25 = arith.constant 0 : index
    %c0_26 = arith.constant 0 : index
    %49 = vector.load %arg4[%c0_24, %c0_25, %c0_26] : memref<2x1x8xf32, #tpu.memory_space<vmem>>, vector<2x1x8xf32>
    %c0_i32 = arith.constant 0 : i32
    %c4_i32 = arith.constant 4 : i32
    %50 = arith.addi %c0_i32, %c4_i32 : i32
    %c1_i32 = arith.constant 1 : i32
    %51 = scf.for %arg25 = %c0_i32 to %50 step %c1_i32 iter_args(%arg26 = %48) -> (vector<16x256xf32>)  : i32 {
      %62 = arith.truncf %arg26 : vector<16x256xf32> to vector<16x256xbf16>
      %63 = arith.index_cast %arg25 : i32 to index
      %c0_35 = arith.constant 0 : index
      %c0_36 = arith.constant 0 : index
      %64 = vector.load %arg10[%63, %c0_35, %c0_36] : memref<4x256x3072xbf16, #tpu.memory_space<vmem>>, vector<1x256x3072xbf16>
      %65 = vector.shape_cast %64 : vector<1x256x3072xbf16> to vector<256x3072xbf16>
      %cst_37 = arith.constant dense<0.000000e+00> : vector<16x3072xf32>
      %66 = tpu.matmul %62, %65, %cst_37 {dimension_numbers = #tpu.dot_dimension_numbers<[1], [0], [0], [1], [0, 0, 1, 1], [], []>} : vector<16x256xbf16>, vector<256x3072xbf16>, vector<16x3072xf32> -> vector<16x3072xf32>
      %67 = arith.index_cast %arg25 : i32 to index
      %c0_38 = arith.constant 0 : index
      %c0_39 = arith.constant 0 : index
      %68 = vector.load %arg11[%67, %c0_38, %c0_39] : memref<4x1x3072xf32, #tpu.memory_space<vmem>>, vector<1x1x3072xf32>
      %69 = vector.shape_cast %68 : vector<1x1x3072xf32> to vector<1x3072xf32>
      %70 = vector.broadcast %69 : vector<1x3072xf32> to vector<16x3072xf32>
      %71 = arith.addf %66, %70 : vector<16x3072xf32>
      %72 = vector.extract_strided_slice %71 {offsets = [0, 0], sizes = [16, 1024], strides = [1, 1]} : vector<16x3072xf32> to vector<16x1024xf32>
      %cst_40 = arith.constant 6.250000e-02 : f32
      %73 = vector.broadcast %cst_40 : f32 to vector<16x1024xf32>
      %74 = arith.mulf %72, %73 : vector<16x1024xf32>
      %75 = vector.shape_cast %74 : vector<16x1024xf32> to vector<2x8x1024xf32>
      %76 = arith.truncf %75 : vector<2x8x1024xf32> to vector<2x8x1024xbf16>
      %77 = vector.extract_strided_slice %71 {offsets = [0, 1024], sizes = [16, 1024], strides = [1, 1]} : vector<16x3072xf32> to vector<16x1024xf32>
      %78 = vector.shape_cast %77 : vector<16x1024xf32> to vector<2x8x1024xf32>
      %79 = arith.truncf %78 : vector<2x8x1024xf32> to vector<2x8x1024xbf16>
      %80 = vector.extract_strided_slice %71 {offsets = [0, 2048], sizes = [16, 1024], strides = [1, 1]} : vector<16x3072xf32> to vector<16x1024xf32>
      %81 = vector.shape_cast %80 : vector<16x1024xf32> to vector<2x8x1024xf32>
      %82 = arith.truncf %81 : vector<2x8x1024xf32> to vector<2x8x1024xbf16>
      %83 = vector.extract_strided_slice %76 {offsets = [0, 0, 0], sizes = [2, 8, 256], strides = [1, 1, 1]} : vector<2x8x1024xbf16> to vector<2x8x256xbf16>
      %84 = vector.extract_strided_slice %79 {offsets = [0, 0, 0], sizes = [2, 8, 256], strides = [1, 1, 1]} : vector<2x8x1024xbf16> to vector<2x8x256xbf16>
      "tpu.trace_start"() <{level = 10 : i32, message = "bqd,bkd->bqk"}> : () -> ()
      %cst_41 = arith.constant dense<0.000000e+00> : vector<2x8x8xf32>
      %85 = tpu.matmul %83, %84, %cst_41 {dimension_numbers = #tpu.dot_dimension_numbers<[2], [2], [1], [1], [0, 0, 0, 1, 1, 1], [0], [0]>} : vector<2x8x256xbf16>, vector<2x8x256xbf16>, vector<2x8x8xf32> -> vector<2x8x8xf32>
      %cst_42 = arith.constant 0.000000e+00 : f32
      "tpu.trace_stop"() : () -> ()
      %86 = vector.broadcast %cst_42 : f32 to vector<2x1x8xf32>
      %87 = arith.cmpf oeq, %49, %86 : vector<2x1x8xf32>
      %cst_43 = arith.constant -1.000000e+04 : f32
      %88 = vector.shape_cast %87 : vector<2x1x8xi1> to vector<2x1x8xi1>
      %89 = vector.broadcast %88 : vector<2x1x8xi1> to vector<2x8x8xi1>
      %90 = vector.broadcast %cst_43 : f32 to vector<2x8x8xf32>
      %91 = arith.select %89, %90, %85 : vector<2x8x8xi1>, vector<2x8x8xf32>
      %cst_44 = arith.constant dense<0xFF800000> : vector<2x8xf32>
      %92 = vector.multi_reduction <maximumf>, %91, %cst_44 [2] : vector<2x8x8xf32> to vector<2x8xf32>
      %93 = vector.shape_cast %92 : vector<2x8xf32> to vector<2x8x1xf32>
      %94 = vector.broadcast %93 : vector<2x8x1xf32> to vector<2x8x8xf32>
      %95 = arith.subf %91, %94 : vector<2x8x8xf32>
      %96 = math.exp %95 : vector<2x8x8xf32>
      %cst_45 = arith.constant dense<0.000000e+00> : vector<2x8xf32>
      %97 = vector.multi_reduction <add>, %96, %cst_45 [2] : vector<2x8x8xf32> to vector<2x8xf32>
      %98 = vector.shape_cast %97 : vector<2x8xf32> to vector<2x8x1xf32>
      %99 = tpu.reciprocal %98 {approx = true} : vector<2x8x1xf32> -> vector<2x8x1xf32>
      %100 = vector.broadcast %99 : vector<2x8x1xf32> to vector<2x8x8xf32>
      %101 = arith.mulf %96, %100 : vector<2x8x8xf32>
      %102 = arith.truncf %101 : vector<2x8x8xf32> to vector<2x8x8xbf16>
      %103 = vector.extract_strided_slice %82 {offsets = [0, 0, 0], sizes = [2, 8, 256], strides = [1, 1, 1]} : vector<2x8x1024xbf16> to vector<2x8x256xbf16>
      "tpu.trace_start"() <{level = 10 : i32, message = "bqk,bkd->bqd"}> : () -> ()
      %cst_46 = arith.constant dense<0.000000e+00> : vector<2x8x256xf32>
      %104 = tpu.matmul %102, %103, %cst_46 {dimension_numbers = #tpu.dot_dimension_numbers<[2], [1], [1], [2], [0, 0, 0, 1, 1, 2], [0], [0]>} : vector<2x8x8xbf16>, vector<2x8x256xbf16>, vector<2x8x256xf32> -> vector<2x8x256xf32>
      "tpu.trace_stop"() : () -> ()
      %105 = vector.extract_strided_slice %76 {offsets = [0, 0, 256], sizes = [2, 8, 256], strides = [1, 1, 1]} : vector<2x8x1024xbf16> to vector<2x8x256xbf16>
      %106 = vector.extract_strided_slice %79 {offsets = [0, 0, 256], sizes = [2, 8, 256], strides = [1, 1, 1]} : vector<2x8x1024xbf16> to vector<2x8x256xbf16>
      "tpu.trace_start"() <{level = 10 : i32, message = "bqd,bkd->bqk"}> : () -> ()
      %cst_47 = arith.constant dense<0.000000e+00> : vector<2x8x8xf32>
      %107 = tpu.matmul %105, %106, %cst_47 {dimension_numbers = #tpu.dot_dimension_numbers<[2], [2], [1], [1], [0, 0, 0, 1, 1, 1], [0], [0]>} : vector<2x8x256xbf16>, vector<2x8x256xbf16>, vector<2x8x8xf32> -> vector<2x8x8xf32>
      %cst_48 = arith.constant 0.000000e+00 : f32
      "tpu.trace_stop"() : () -> ()
      %108 = vector.broadcast %cst_48 : f32 to vector<2x1x8xf32>
      %109 = arith.cmpf oeq, %49, %108 : vector<2x1x8xf32>
      %cst_49 = arith.constant -1.000000e+04 : f32
      %110 = vector.shape_cast %109 : vector<2x1x8xi1> to vector<2x1x8xi1>
      %111 = vector.broadcast %110 : vector<2x1x8xi1> to vector<2x8x8xi1>
      %112 = vector.broadcast %cst_49 : f32 to vector<2x8x8xf32>
      %113 = arith.select %111, %112, %107 : vector<2x8x8xi1>, vector<2x8x8xf32>
      %cst_50 = arith.constant dense<0xFF800000> : vector<2x8xf32>
      %114 = vector.multi_reduction <maximumf>, %113, %cst_50 [2] : vector<2x8x8xf32> to vector<2x8xf32>
      %115 = vector.shape_cast %114 : vector<2x8xf32> to vector<2x8x1xf32>
      %116 = vector.broadcast %115 : vector<2x8x1xf32> to vector<2x8x8xf32>
      %117 = arith.subf %113, %116 : vector<2x8x8xf32>
      %118 = math.exp %117 : vector<2x8x8xf32>
      %cst_51 = arith.constant dense<0.000000e+00> : vector<2x8xf32>
      %119 = vector.multi_reduction <add>, %118, %cst_51 [2] : vector<2x8x8xf32> to vector<2x8xf32>
      %120 = vector.shape_cast %119 : vector<2x8xf32> to vector<2x8x1xf32>
      %121 = tpu.reciprocal %120 {approx = true} : vector<2x8x1xf32> -> vector<2x8x1xf32>
      %122 = vector.broadcast %121 : vector<2x8x1xf32> to vector<2x8x8xf32>
      %123 = arith.mulf %118, %122 : vector<2x8x8xf32>
      %124 = arith.truncf %123 : vector<2x8x8xf32> to vector<2x8x8xbf16>
      %125 = vector.extract_strided_slice %82 {offsets = [0, 0, 256], sizes = [2, 8, 256], strides = [1, 1, 1]} : vector<2x8x1024xbf16> to vector<2x8x256xbf16>
      "tpu.trace_start"() <{level = 10 : i32, message = "bqk,bkd->bqd"}> : () -> ()
      %cst_52 = arith.constant dense<0.000000e+00> : vector<2x8x256xf32>
      %126 = tpu.matmul %124, %125, %cst_52 {dimension_numbers = #tpu.dot_dimension_numbers<[2], [1], [1], [2], [0, 0, 0, 1, 1, 2], [0], [0]>} : vector<2x8x8xbf16>, vector<2x8x256xbf16>, vector<2x8x256xf32> -> vector<2x8x256xf32>
      "tpu.trace_stop"() : () -> ()
      %127 = vector.extract_strided_slice %76 {offsets = [0, 0, 512], sizes = [2, 8, 256], strides = [1, 1, 1]} : vector<2x8x1024xbf16> to vector<2x8x256xbf16>
      %128 = vector.extract_strided_slice %79 {offsets = [0, 0, 512], sizes = [2, 8, 256], strides = [1, 1, 1]} : vector<2x8x1024xbf16> to vector<2x8x256xbf16>
      "tpu.trace_start"() <{level = 10 : i32, message = "bqd,bkd->bqk"}> : () -> ()
      %cst_53 = arith.constant dense<0.000000e+00> : vector<2x8x8xf32>
      %129 = tpu.matmul %127, %128, %cst_53 {dimension_numbers = #tpu.dot_dimension_numbers<[2], [2], [1], [1], [0, 0, 0, 1, 1, 1], [0], [0]>} : vector<2x8x256xbf16>, vector<2x8x256xbf16>, vector<2x8x8xf32> -> vector<2x8x8xf32>
      %cst_54 = arith.constant 0.000000e+00 : f32
      "tpu.trace_stop"() : () -> ()
      %130 = vector.broadcast %cst_54 : f32 to vector<2x1x8xf32>
      %131 = arith.cmpf oeq, %49, %130 : vector<2x1x8xf32>
      %cst_55 = arith.constant -1.000000e+04 : f32
      %132 = vector.shape_cast %131 : vector<2x1x8xi1> to vector<2x1x8xi1>
      %133 = vector.broadcast %132 : vector<2x1x8xi1> to vector<2x8x8xi1>
      %134 = vector.broadcast %cst_55 : f32 to vector<2x8x8xf32>
      %135 = arith.select %133, %134, %129 : vector<2x8x8xi1>, vector<2x8x8xf32>
      %cst_56 = arith.constant dense<0xFF800000> : vector<2x8xf32>
      %136 = vector.multi_reduction <maximumf>, %135, %cst_56 [2] : vector<2x8x8xf32> to vector<2x8xf32>
      %137 = vector.shape_cast %136 : vector<2x8xf32> to vector<2x8x1xf32>
      %138 = vector.broadcast %137 : vector<2x8x1xf32> to vector<2x8x8xf32>
      %139 = arith.subf %135, %138 : vector<2x8x8xf32>
      %140 = math.exp %139 : vector<2x8x8xf32>
      %cst_57 = arith.constant dense<0.000000e+00> : vector<2x8xf32>
      %141 = vector.multi_reduction <add>, %140, %cst_57 [2] : vector<2x8x8xf32> to vector<2x8xf32>
      %142 = vector.shape_cast %141 : vector<2x8xf32> to vector<2x8x1xf32>
      %143 = tpu.reciprocal %142 {approx = true} : vector<2x8x1xf32> -> vector<2x8x1xf32>
      %144 = vector.broadcast %143 : vector<2x8x1xf32> to vector<2x8x8xf32>
      %145 = arith.mulf %140, %144 : vector<2x8x8xf32>
      %146 = arith.truncf %145 : vector<2x8x8xf32> to vector<2x8x8xbf16>
      %147 = vector.extract_strided_slice %82 {offsets = [0, 0, 512], sizes = [2, 8, 256], strides = [1, 1, 1]} : vector<2x8x1024xbf16> to vector<2x8x256xbf16>
      "tpu.trace_start"() <{level = 10 : i32, message = "bqk,bkd->bqd"}> : () -> ()
      %cst_58 = arith.constant dense<0.000000e+00> : vector<2x8x256xf32>
      %148 = tpu.matmul %146, %147, %cst_58 {dimension_numbers = #tpu.dot_dimension_numbers<[2], [1], [1], [2], [0, 0, 0, 1, 1, 2], [0], [0]>} : vector<2x8x8xbf16>, vector<2x8x256xbf16>, vector<2x8x256xf32> -> vector<2x8x256xf32>
      "tpu.trace_stop"() : () -> ()
      %149 = vector.extract_strided_slice %76 {offsets = [0, 0, 768], sizes = [2, 8, 256], strides = [1, 1, 1]} : vector<2x8x1024xbf16> to vector<2x8x256xbf16>
      %150 = vector.extract_strided_slice %79 {offsets = [0, 0, 768], sizes = [2, 8, 256], strides = [1, 1, 1]} : vector<2x8x1024xbf16> to vector<2x8x256xbf16>
      "tpu.trace_start"() <{level = 10 : i32, message = "bqd,bkd->bqk"}> : () -> ()
      %cst_59 = arith.constant dense<0.000000e+00> : vector<2x8x8xf32>
      %151 = tpu.matmul %149, %150, %cst_59 {dimension_numbers = #tpu.dot_dimension_numbers<[2], [2], [1], [1], [0, 0, 0, 1, 1, 1], [0], [0]>} : vector<2x8x256xbf16>, vector<2x8x256xbf16>, vector<2x8x8xf32> -> vector<2x8x8xf32>
      %cst_60 = arith.constant 0.000000e+00 : f32
      "tpu.trace_stop"() : () -> ()
      %152 = vector.broadcast %cst_60 : f32 to vector<2x1x8xf32>
      %153 = arith.cmpf oeq, %49, %152 : vector<2x1x8xf32>
      %cst_61 = arith.constant -1.000000e+04 : f32
      %154 = vector.shape_cast %153 : vector<2x1x8xi1> to vector<2x1x8xi1>
      %155 = vector.broadcast %154 : vector<2x1x8xi1> to vector<2x8x8xi1>
      %156 = vector.broadcast %cst_61 : f32 to vector<2x8x8xf32>
      %157 = arith.select %155, %156, %151 : vector<2x8x8xi1>, vector<2x8x8xf32>
      %cst_62 = arith.constant dense<0xFF800000> : vector<2x8xf32>
      %158 = vector.multi_reduction <maximumf>, %157, %cst_62 [2] : vector<2x8x8xf32> to vector<2x8xf32>
      %159 = vector.shape_cast %158 : vector<2x8xf32> to vector<2x8x1xf32>
      %160 = vector.broadcast %159 : vector<2x8x1xf32> to vector<2x8x8xf32>
      %161 = arith.subf %157, %160 : vector<2x8x8xf32>
      %162 = math.exp %161 : vector<2x8x8xf32>
      %cst_63 = arith.constant dense<0.000000e+00> : vector<2x8xf32>
      %163 = vector.multi_reduction <add>, %162, %cst_63 [2] : vector<2x8x8xf32> to vector<2x8xf32>
      %164 = vector.shape_cast %163 : vector<2x8xf32> to vector<2x8x1xf32>
      %165 = tpu.reciprocal %164 {approx = true} : vector<2x8x1xf32> -> vector<2x8x1xf32>
      %166 = vector.broadcast %165 : vector<2x8x1xf32> to vector<2x8x8xf32>
      %167 = arith.mulf %162, %166 : vector<2x8x8xf32>
      %168 = arith.truncf %167 : vector<2x8x8xf32> to vector<2x8x8xbf16>
      %169 = vector.extract_strided_slice %82 {offsets = [0, 0, 768], sizes = [2, 8, 256], strides = [1, 1, 1]} : vector<2x8x1024xbf16> to vector<2x8x256xbf16>
      "tpu.trace_start"() <{level = 10 : i32, message = "bqk,bkd->bqd"}> : () -> ()
      %cst_64 = arith.constant dense<0.000000e+00> : vector<2x8x256xf32>
      %170 = tpu.matmul %168, %169, %cst_64 {dimension_numbers = #tpu.dot_dimension_numbers<[2], [1], [1], [2], [0, 0, 0, 1, 1, 2], [0], [0]>} : vector<2x8x8xbf16>, vector<2x8x256xbf16>, vector<2x8x256xf32> -> vector<2x8x256xf32>
      "tpu.trace_stop"() : () -> ()
      %171 = tpu.concatenate %104, %126, %148, %170 in 2 : vector<2x8x256xf32>, vector<2x8x256xf32>, vector<2x8x256xf32>, vector<2x8x256xf32> -> vector<2x8x1024xf32>
      %172 = vector.shape_cast %171 : vector<2x8x1024xf32> to vector<16x1024xf32>
      %173 = arith.truncf %172 : vector<16x1024xf32> to vector<16x1024xbf16>
      %174 = arith.index_cast %arg25 : i32 to index
      %c0_65 = arith.constant 0 : index
      %c0_66 = arith.constant 0 : index
      %175 = vector.load %arg12[%174, %c0_65, %c0_66] : memref<4x1024x256xbf16, #tpu.memory_space<vmem>>, vector<1x1024x256xbf16>
      %176 = vector.shape_cast %175 : vector<1x1024x256xbf16> to vector<1024x256xbf16>
      %cst_67 = arith.constant dense<0.000000e+00> : vector<16x256xf32>
      %177 = tpu.matmul %173, %176, %cst_67 {dimension_numbers = #tpu.dot_dimension_numbers<[1], [0], [0], [1], [0, 0, 1, 1], [], []>} : vector<16x1024xbf16>, vector<1024x256xbf16>, vector<16x256xf32> -> vector<16x256xf32>
      %178 = arith.index_cast %arg25 : i32 to index
      %c0_68 = arith.constant 0 : index
      %c0_69 = arith.constant 0 : index
      %179 = vector.load %arg13[%178, %c0_68, %c0_69] : memref<4x1x256xf32, #tpu.memory_space<vmem>>, vector<1x1x256xf32>
      %180 = vector.shape_cast %179 : vector<1x1x256xf32> to vector<1x256xf32>
      %181 = vector.broadcast %180 : vector<1x256xf32> to vector<16x256xf32>
      %182 = arith.addf %177, %181 : vector<16x256xf32>
      %183 = arith.addf %182, %arg26 : vector<16x256xf32>
      %184 = arith.index_cast %arg25 : i32 to index
      %c0_70 = arith.constant 0 : index
      %c0_71 = arith.constant 0 : index
      %185 = vector.load %arg14[%184, %c0_70, %c0_71] : memref<4x1x256xf32, #tpu.memory_space<vmem>>, vector<1x1x256xf32>
      %186 = vector.shape_cast %185 : vector<1x1x256xf32> to vector<1x256xf32>
      %187 = arith.index_cast %arg25 : i32 to index
      %c0_72 = arith.constant 0 : index
      %c0_73 = arith.constant 0 : index
      %188 = vector.load %arg15[%187, %c0_72, %c0_73] : memref<4x1x256xf32, #tpu.memory_space<vmem>>, vector<1x1x256xf32>
      %189 = vector.shape_cast %188 : vector<1x1x256xf32> to vector<1x256xf32>
      %cst_74 = arith.constant dense<0.000000e+00> : vector<16xf32>
      %190 = vector.multi_reduction <add>, %183, %cst_74 [1] : vector<16x256xf32> to vector<16xf32>
      %191 = vector.shape_cast %190 : vector<16xf32> to vector<16x1xf32>
      %cst_75 = arith.constant 2.560000e+02 : f32
      %192 = vector.broadcast %cst_75 : f32 to vector<16x1xf32>
      %193 = arith.divf %191, %192 : vector<16x1xf32>
      %194 = vector.broadcast %193 : vector<16x1xf32> to vector<16x256xf32>
      %195 = arith.subf %183, %194 : vector<16x256xf32>
      %196 = arith.mulf %195, %195 : vector<16x256xf32>
      %cst_76 = arith.constant dense<0.000000e+00> : vector<16xf32>
      %197 = vector.multi_reduction <add>, %196, %cst_76 [1] : vector<16x256xf32> to vector<16xf32>
      %198 = vector.shape_cast %197 : vector<16xf32> to vector<16x1xf32>
      %cst_77 = arith.constant 2.560000e+02 : f32
      %199 = vector.broadcast %cst_77 : f32 to vector<16x1xf32>
      %200 = arith.divf %198, %199 : vector<16x1xf32>
      %201 = vector.broadcast %193 : vector<16x1xf32> to vector<16x256xf32>
      %202 = arith.subf %183, %201 : vector<16x256xf32>
      %cst_78 = arith.constant 9.99999974E-6 : f32
      %203 = vector.broadcast %cst_78 : f32 to vector<16x1xf32>
      %204 = arith.addf %200, %203 : vector<16x1xf32>
      %205 = math.rsqrt %204 : vector<16x1xf32>
      %206 = vector.broadcast %205 : vector<16x1xf32> to vector<16x256xf32>
      %207 = arith.mulf %202, %206 : vector<16x256xf32>
      %208 = vector.broadcast %186 : vector<1x256xf32> to vector<16x256xf32>
      %209 = arith.mulf %207, %208 : vector<16x256xf32>
      %210 = vector.broadcast %189 : vector<1x256xf32> to vector<16x256xf32>
      %211 = arith.addf %209, %210 : vector<16x256xf32>
      %212 = arith.truncf %211 : vector<16x256xf32> to vector<16x256xbf16>
      %213 = arith.index_cast %arg25 : i32 to index
      %c0_79 = arith.constant 0 : index
      %c0_80 = arith.constant 0 : index
      %214 = vector.load %arg16[%213, %c0_79, %c0_80] : memref<4x256x768xbf16, #tpu.memory_space<vmem>>, vector<1x256x768xbf16>
      %215 = vector.shape_cast %214 : vector<1x256x768xbf16> to vector<256x768xbf16>
      %cst_81 = arith.constant dense<0.000000e+00> : vector<16x768xf32>
      %216 = tpu.matmul %212, %215, %cst_81 {dimension_numbers = #tpu.dot_dimension_numbers<[1], [0], [0], [1], [0, 0, 1, 1], [], []>} : vector<16x256xbf16>, vector<256x768xbf16>, vector<16x768xf32> -> vector<16x768xf32>
      %217 = arith.index_cast %arg25 : i32 to index
      %c0_82 = arith.constant 0 : index
      %c0_83 = arith.constant 0 : index
      %218 = vector.load %arg17[%217, %c0_82, %c0_83] : memref<4x1x768xf32, #tpu.memory_space<vmem>>, vector<1x1x768xf32>
      %219 = vector.shape_cast %218 : vector<1x1x768xf32> to vector<1x768xf32>
      %220 = vector.broadcast %219 : vector<1x768xf32> to vector<16x768xf32>
      %221 = arith.addf %216, %220 : vector<16x768xf32>
      %cst_84 = arith.constant 0.000000e+00 : f32
      %222 = vector.broadcast %cst_84 : f32 to vector<16x768xf32>
      %223 = arith.maximumf %221, %222 : vector<16x768xf32>
      %224 = arith.truncf %223 : vector<16x768xf32> to vector<16x768xbf16>
      %225 = arith.index_cast %arg25 : i32 to index
      %c0_85 = arith.constant 0 : index
      %c0_86 = arith.constant 0 : index
      %226 = vector.load %arg18[%225, %c0_85, %c0_86] : memref<4x768x256xbf16, #tpu.memory_space<vmem>>, vector<1x768x256xbf16>
      %227 = vector.shape_cast %226 : vector<1x768x256xbf16> to vector<768x256xbf16>
      %cst_87 = arith.constant dense<0.000000e+00> : vector<16x256xf32>
      %228 = tpu.matmul %224, %227, %cst_87 {dimension_numbers = #tpu.dot_dimension_numbers<[1], [0], [0], [1], [0, 0, 1, 1], [], []>} : vector<16x768xbf16>, vector<768x256xbf16>, vector<16x256xf32> -> vector<16x256xf32>
      %229 = arith.index_cast %arg25 : i32 to index
      %c0_88 = arith.constant 0 : index
      %c0_89 = arith.constant 0 : index
      %230 = vector.load %arg19[%229, %c0_88, %c0_89] : memref<4x1x256xf32, #tpu.memory_space<vmem>>, vector<1x1x256xf32>
      %231 = vector.shape_cast %230 : vector<1x1x256xf32> to vector<1x256xf32>
      %232 = vector.broadcast %231 : vector<1x256xf32> to vector<16x256xf32>
      %233 = arith.addf %228, %232 : vector<16x256xf32>
      %234 = arith.addf %233, %211 : vector<16x256xf32>
      %235 = arith.index_cast %arg25 : i32 to index
      %c0_90 = arith.constant 0 : index
      %c0_91 = arith.constant 0 : index
      %236 = vector.load %arg20[%235, %c0_90, %c0_91] : memref<4x1x256xf32, #tpu.memory_space<vmem>>, vector<1x1x256xf32>
      %237 = vector.shape_cast %236 : vector<1x1x256xf32> to vector<1x256xf32>
      %238 = arith.index_cast %arg25 : i32 to index
      %c0_92 = arith.constant 0 : index
      %c0_93 = arith.constant 0 : index
      %239 = vector.load %arg21[%238, %c0_92, %c0_93] : memref<4x1x256xf32, #tpu.memory_space<vmem>>, vector<1x1x256xf32>
      %240 = vector.shape_cast %239 : vector<1x1x256xf32> to vector<1x256xf32>
      %cst_94 = arith.constant dense<0.000000e+00> : vector<16xf32>
      %241 = vector.multi_reduction <add>, %234, %cst_94 [1] : vector<16x256xf32> to vector<16xf32>
      %242 = vector.shape_cast %241 : vector<16xf32> to vector<16x1xf32>
      %cst_95 = arith.constant 2.560000e+02 : f32
      %243 = vector.broadcast %cst_95 : f32 to vector<16x1xf32>
      %244 = arith.divf %242, %243 : vector<16x1xf32>
      %245 = vector.broadcast %244 : vector<16x1xf32> to vector<16x256xf32>
      %246 = arith.subf %234, %245 : vector<16x256xf32>
      %247 = arith.mulf %246, %246 : vector<16x256xf32>
      %cst_96 = arith.constant dense<0.000000e+00> : vector<16xf32>
      %248 = vector.multi_reduction <add>, %247, %cst_96 [1] : vector<16x256xf32> to vector<16xf32>
      %249 = vector.shape_cast %248 : vector<16xf32> to vector<16x1xf32>
      %cst_97 = arith.constant 2.560000e+02 : f32
      %250 = vector.broadcast %cst_97 : f32 to vector<16x1xf32>
      %251 = arith.divf %249, %250 : vector<16x1xf32>
      %252 = vector.broadcast %244 : vector<16x1xf32> to vector<16x256xf32>
      %253 = arith.subf %234, %252 : vector<16x256xf32>
      %cst_98 = arith.constant 9.99999974E-6 : f32
      %254 = vector.broadcast %cst_98 : f32 to vector<16x1xf32>
      %255 = arith.addf %251, %254 : vector<16x1xf32>
      %256 = math.rsqrt %255 : vector<16x1xf32>
      %257 = vector.broadcast %256 : vector<16x1xf32> to vector<16x256xf32>
      %258 = arith.mulf %253, %257 : vector<16x256xf32>
      %259 = vector.broadcast %237 : vector<1x256xf32> to vector<16x256xf32>
      %260 = arith.mulf %258, %259 : vector<16x256xf32>
      %261 = vector.broadcast %240 : vector<1x256xf32> to vector<16x256xf32>
      %262 = arith.addf %260, %261 : vector<16x256xf32>
      scf.yield %262 : vector<16x256xf32>
    }
    %c4_i32_27 = arith.constant 4 : i32
    %52 = vector.shape_cast %51 : vector<16x256xf32> to vector<2x8x256xf32>
    %c0_28 = arith.constant 0 : index
    %c0_29 = arith.constant 0 : index
    %53 = vector.load %arg22[%c0_28, %c0_29] : memref<1x256xf32, #tpu.memory_space<vmem>>, vector<1x256xf32>
    %54 = vector.shape_cast %53 : vector<1x256xf32> to vector<1x1x256xf32>
    %55 = vector.broadcast %54 : vector<1x1x256xf32> to vector<2x8x256xf32>
    %56 = arith.mulf %52, %55 : vector<2x8x256xf32>
    %cst_30 = arith.constant dense<0.000000e+00> : vector<2x8xf32>
    %57 = vector.multi_reduction <add>, %56, %cst_30 [2] : vector<2x8x256xf32> to vector<2x8xf32>
    %c0_31 = arith.constant 0 : index
    %c0_32 = arith.constant 0 : index
    %58 = vector.load %arg23[%c0_31, %c0_32] : memref<1x1xf32, #tpu.memory_space<vmem>>, vector<1x1xf32>
    %59 = vector.broadcast %58 : vector<1x1xf32> to vector<2x8xf32>
    %60 = arith.addf %57, %59 : vector<2x8xf32>
    %c0_33 = arith.constant 0 : index
    %c0_34 = arith.constant 0 : index
    %61 = vector.load %arg24[%c0_33, %c0_34] : memref<2x8xf32, #tpu.memory_space<vmem>>, vector<2x8xf32>
    tpu.vector_store %arg24[%c0_33, %c0_34], %60 {strides = array<i32>} : memref<2x8xf32, #tpu.memory_space<vmem>>, vector<2x8xf32>,
    return
  }
  func.func @transform_0(%arg0: i32) -> (i32, i32, i32) {
    %c0_i32 = arith.constant 0 : i32
    %c0_i32_0 = arith.constant 0 : i32
    %c0_i32_1 = arith.constant 0 : i32
    return %arg0, %c0_i32, %c0_i32_0 : i32, i32, i32
  }
  func.func @transform_1(%arg0: i32) -> (i32, i32, i32) {
    %c0_i32 = arith.constant 0 : i32
    %c0_i32_0 = arith.constant 0 : i32
    %c0_i32_1 = arith.constant 0 : i32
    return %arg0, %c0_i32, %c0_i32_0 : i32, i32, i32
  }
  func.func @transform_2(%arg0: i32) -> (i32, i32, i32) {
    %c0_i32 = arith.constant 0 : i32
    %c0_i32_0 = arith.constant 0 : i32
    %c0_i32_1 = arith.constant 0 : i32
    return %arg0, %c0_i32, %c0_i32_0 : i32, i32, i32
  }
  func.func @transform_3(%arg0: i32) -> (i32, i32, i32) {
    %c0_i32 = arith.constant 0 : i32
    %c0_i32_0 = arith.constant 0 : i32
    %c0_i32_1 = arith.constant 0 : i32
    return %arg0, %c0_i32, %c0_i32_0 : i32, i32, i32
  }
  func.func @transform_4(%arg0: i32) -> (i32, i32) {
    %c0_i32 = arith.constant 0 : i32
    %c0_i32_0 = arith.constant 0 : i32
    %c0_i32_1 = arith.constant 0 : i32
    return %c0_i32, %c0_i32_0 : i32, i32
  }
  func.func @transform_5(%arg0: i32) -> (i32, i32) {
    %c0_i32 = arith.constant 0 : i32
    %c0_i32_0 = arith.constant 0 : i32
    %c0_i32_1 = arith.constant 0 : i32
    return %c0_i32, %c0_i32_0 : i32, i32
  }
  func.func @transform_6(%arg0: i32) -> (i32, i32) {
    %c0_i32 = arith.constant 0 : i32
    %c0_i32_0 = arith.constant 0 : i32
    %c0_i32_1 = arith.constant 0 : i32
    return %c0_i32, %c0_i32_0 : i32, i32
  }
  func.func @transform_7(%arg0: i32) -> (i32, i32) {
    %c0_i32 = arith.constant 0 : i32
    %c0_i32_0 = arith.constant 0 : i32
    %c0_i32_1 = arith.constant 0 : i32
    return %c0_i32, %c0_i32_0 : i32, i32
  }
  func.func @transform_8(%arg0: i32) -> (i32, i32) {
    %c0_i32 = arith.constant 0 : i32
    %c0_i32_0 = arith.constant 0 : i32
    %c0_i32_1 = arith.constant 0 : i32
    return %c0_i32, %c0_i32_0 : i32, i32
  }
  func.func @transform_9(%arg0: i32) -> (i32, i32, i32) {
    %c0_i32 = arith.constant 0 : i32
    %c0_i32_0 = arith.constant 0 : i32
    %c0_i32_1 = arith.constant 0 : i32
    %c0_i32_2 = arith.constant 0 : i32
    return %c0_i32, %c0_i32_0, %c0_i32_1 : i32, i32, i32
  }
  func.func @transform_10(%arg0: i32) -> (i32, i32, i32) {
    %c0_i32 = arith.constant 0 : i32
    %c0_i32_0 = arith.constant 0 : i32
    %c0_i32_1 = arith.constant 0 : i32
    %c0_i32_2 = arith.constant 0 : i32
    return %c0_i32, %c0_i32_0, %c0_i32_1 : i32, i32, i32
  }
  func.func @transform_11(%arg0: i32) -> (i32, i32, i32) {
    %c0_i32 = arith.constant 0 : i32
    %c0_i32_0 = arith.constant 0 : i32
    %c0_i32_1 = arith.constant 0 : i32
    %c0_i32_2 = arith.constant 0 : i32
    return %c0_i32, %c0_i32_0, %c0_i32_1 : i32, i32, i32
  }
  func.func @transform_12(%arg0: i32) -> (i32, i32, i32) {
    %c0_i32 = arith.constant 0 : i32
    %c0_i32_0 = arith.constant 0 : i32
    %c0_i32_1 = arith.constant 0 : i32
    %c0_i32_2 = arith.constant 0 : i32
    return %c0_i32, %c0_i32_0, %c0_i32_1 : i32, i32, i32
  }
  func.func @transform_13(%arg0: i32) -> (i32, i32, i32) {
    %c0_i32 = arith.constant 0 : i32
    %c0_i32_0 = arith.constant 0 : i32
    %c0_i32_1 = arith.constant 0 : i32
    %c0_i32_2 = arith.constant 0 : i32
    return %c0_i32, %c0_i32_0, %c0_i32_1 : i32, i32, i32
  }
  func.func @transform_14(%arg0: i32) -> (i32, i32, i32) {
    %c0_i32 = arith.constant 0 : i32
    %c0_i32_0 = arith.constant 0 : i32
    %c0_i32_1 = arith.constant 0 : i32
    %c0_i32_2 = arith.constant 0 : i32
    return %c0_i32, %c0_i32_0, %c0_i32_1 : i32, i32, i32
  }
  func.func @transform_15(%arg0: i32) -> (i32, i32, i32) {
    %c0_i32 = arith.constant 0 : i32
    %c0_i32_0 = arith.constant 0 : i32
    %c0_i32_1 = arith.constant 0 : i32
    %c0_i32_2 = arith.constant 0 : i32
    return %c0_i32, %c0_i32_0, %c0_i32_1 : i32, i32, i32
  }
  func.func @transform_16(%arg0: i32) -> (i32, i32, i32) {
    %c0_i32 = arith.constant 0 : i32
    %c0_i32_0 = arith.constant 0 : i32
    %c0_i32_1 = arith.constant 0 : i32
    %c0_i32_2 = arith.constant 0 : i32
    return %c0_i32, %c0_i32_0, %c0_i32_1 : i32, i32, i32
  }
  func.func @transform_17(%arg0: i32) -> (i32, i32, i32) {
    %c0_i32 = arith.constant 0 : i32
    %c0_i32_0 = arith.constant 0 : i32
    %c0_i32_1 = arith.constant 0 : i32
    %c0_i32_2 = arith.constant 0 : i32
    return %c0_i32, %c0_i32_0, %c0_i32_1 : i32, i32, i32
  }
  func.func @transform_18(%arg0: i32) -> (i32, i32, i32) {
    %c0_i32 = arith.constant 0 : i32
    %c0_i32_0 = arith.constant 0 : i32
    %c0_i32_1 = arith.constant 0 : i32
    %c0_i32_2 = arith.constant 0 : i32
    return %c0_i32, %c0_i32_0, %c0_i32_1 : i32, i32, i32
  }
  func.func @transform_19(%arg0: i32) -> (i32, i32, i32) {
    %c0_i32 = arith.constant 0 : i32
    %c0_i32_0 = arith.constant 0 : i32
    %c0_i32_1 = arith.constant 0 : i32
    %c0_i32_2 = arith.constant 0 : i32
    return %c0_i32, %c0_i32_0, %c0_i32_1 : i32, i32, i32
  }
  func.func @transform_20(%arg0: i32) -> (i32, i32, i32) {
    %c0_i32 = arith.constant 0 : i32
    %c0_i32_0 = arith.constant 0 : i32
    %c0_i32_1 = arith.constant 0 : i32
    %c0_i32_2 = arith.constant 0 : i32
    return %c0_i32, %c0_i32_0, %c0_i32_1 : i32, i32, i32
  }
  func.func @transform_21(%arg0: i32) -> (i32, i32) {
    %c0_i32 = arith.constant 0 : i32
    %c0_i32_0 = arith.constant 0 : i32
    %c0_i32_1 = arith.constant 0 : i32
    return %c0_i32, %c0_i32_0 : i32, i32
  }
  func.func @transform_22(%arg0: i32) -> (i32, i32) {
    %c0_i32 = arith.constant 0 : i32
    %c0_i32_0 = arith.constant 0 : i32
    %c0_i32_1 = arith.constant 0 : i32
    return %c0_i32, %c0_i32_0 : i32, i32
  }
  func.func @transform_23(%arg0: i32) -> (i32, i32) {
    %c0_i32 = arith.constant 0 : i32
    %c0_i32_0 = arith.constant 0 : i32
    return %arg0, %c0_i32 : i32, i32
  }
}

</mosaic_0001>

<bundles_post_ra>
// kernel: tpu_custom_call.1
= control target key start
LH: loop header
LB: loop body
LE: loop exit
PB: predicated region body
PF: predicated region fallthrough
CT: control target
= control target key end

     0   :  { %s11977_s0 = inlined_call_operand.hbm [shape: bf16[2,8,768], index: 0, kind: input, shape index: {}]   ;;  %s11978_s1 = inlined_call_operand.vmem [shape: s32[2,8,1], index: 1, kind: input, shape index: {}]   ;;  %s11979_s2 = inlined_call_operand.vmem [shape: s32[2,8,1], index: 2, kind: input, shape index: {}]   ;;  %s11980_s3 = inlined_call_operand.hbm [shape: f32[2,1,8], index: 3, kind: input, shape index: {}]   ;;  %s11981_s4 = inlined_call_operand.hbm [shape: bf16[768,256], index: 4, kind: input, shape index: {}]   ;;  %s11982_s5 = inlined_call_operand.hbm [shape: f32[1,256], index: 5, kind: input, shape index: {}]   ;;  %s11983_s6 = inlined_call_operand.hbm [shape: bf16[256,256], index: 6, kind: input, shape index: {}]   ;;  %s11984_s7 = inlined_call_operand.hbm [shape: f32[1,256], index: 7, kind: input, shape index: {}]   ;;  %s11985_s8 = inlined_call_operand.hbm [shape: f32[1,256], index: 8, kind: input, shape index: {}]   ;;  %s11986_s9 = inlined_call_operand.hbm [shape: bf16[4,256,3072], index: 9, kind: input, shape index: {}]   ;;  %s11987_s10 = inlined_call_operand.hbm [shape: f32[4,1,3072], index: 10, kind: input, shape index: {}]   ;;  %s11988_s11 = inlined_call_operand.hbm [shape: bf16[4,1024,256], index: 11, kind: input, shape index: {}]   ;;  %s11989_s12 = inlined_call_operand.hbm [shape: f32[4,1,256], index: 12, kind: input, shape index: {}]   ;;  %s11990_s13 = inlined_call_operand.hbm [shape: f32[4,1,256], index: 13, kind: input, shape index: {}]   ;;  %s11991_s14 = inlined_call_operand.hbm [shape: f32[4,1,256], index: 14, kind: input, shape index: {}]   ;;  %s11992_s15 = inlined_call_operand.hbm [shape: bf16[4,256,768], index: 15, kind: input, shape index: {}]   ;;  %s11993_s16 = inlined_call_operand.hbm [shape: f32[4,1,768], index: 16, kind: input, shape index: {}]   ;;  %s11994_s17 = inlined_call_operand.hbm [shape: bf16[4,768,256], index: 17, kind: input, shape index: {}]   ;;  %s11995_s18 = inlined_call_operand.hbm [shape: f32[4,1,256], index: 18, kind: input, shape index: {}]   ;;  %s11996_s19 = inlined_call_operand.hbm [shape: f32[4,1,256], index: 19, kind: input, shape index: {}]   ;;  %s11997_s20 = inlined_call_operand.hbm [shape: f32[4,1,256], index: 20, kind: input, shape index: {}]   ;;  %s11998_s21 = inlined_call_operand.hbm [shape: f32[1,256], index: 21, kind: input, shape index: {}]   ;;  %s11999_s22 = inlined_call_operand.<no memory space> [shape: f32[1,1], index: 22, kind: input, shape index: {}]   ;;  %s12000_s23 = inlined_call_operand.hbm [shape: f32[2,8], index: 23, kind: output, shape index: {}]  }
   0x1   :  { %12020 = sst [smem:[#allocation55_spill]] %s11977_s0  ;;  %v28_v0 = vstv %s11999_s22 }
   0x2   :  { %12021 = sst [smem:[#allocation56_spill]] %s11978_s1  ;;  %29 = vst [vmem:[#allocation2] sm:$0x1] %v28_v0 }
   0x3   :  { %12022 = sst [smem:[#allocation57_spill]] %s11979_s2 }
   0x4   :  { %12023 = sst [smem:[#allocation58_spill]] %s11980_s3 }
   0x5   :  { %12024 = sst [smem:[#allocation59_spill]] %s11981_s4 }
   0x6   :  { %12025 = sst [smem:[#allocation60_spill]] %s11982_s5 }
   0x7   :  { %12026 = sst [smem:[#allocation61_spill]] %s11983_s6 }
   0x8   :  { %12027 = sst [smem:[#allocation62_spill]] %s11984_s7 }
   0x9   :  { %12028 = sst [smem:[#allocation63_spill]] %s11998_s21 }
   0xa   :  { %12029 = sst [smem:[#allocation64_spill]] %s12000_s23 }
   0xb   :  { %30 = vsyncpa [#allocation4], 0 }
   0xc   :  { %31 = vsyncpa [#allocation7], 0 }
   0xd   :  { %32 = vsyncpa [#allocation10], 0 }
   0xe   :  { %33 = vsyncpa [#allocation13], 0 }
   0xf   :  { %34 = vsyncpa [#allocation16], 0 }
  0x10   :  { %35 = vsyncpa [#allocation19], 0 }
  0x11   :  { %36 = vsyncpa [#allocation22], 0 }
  0x12   :  { %37 = vsyncpa [#allocation25], 0 }
  0x13   :  { %38 = vsyncpa [#allocation28], 0 }
  0x14   :  { %39 = vsyncpa [#allocation31], 0 }
  0x15   :  { %40 = vsyncpa [#allocation34], 0 }
  0x16   :  { %41 = vsyncpa [#allocation5], 0  ;;  %s10260_s24 = smov [#allocation6]   ;;  %s12030_s26 = sld [smem:[#allocation58_spill]] }
  0x17   :  { %s63_s25 = sshll.u32 %s10260_s24, 4  ;;  %s64_s25 = int_to_ptr.vmem [resolvable:$true] %s63_s25 }
  0x1c   :  { %s9734_s22 = scalar_lea.hbm %s12030_s26, 32 }
  0x1d   :  { %p9735_p0 = scmp.ne.s32.totalorder %s12030_s26, %s9734_s22  ;;  %p9738_p1 = scmp.lt.u32.totalorder %s9734_s22, %s12030_s26 }
  0x1f   :  { %p9740_p2 = pnand %p9738_p1, %p9735_p0 }
  0x21   :  { %9743 = shalt.err (!%p9740_p2)
}
  0x22   :  { %s9744_s28 = scalar_lea.vmem %s64_s25, 32  ;;  %p9749_p4 = scmp.lt.s32.totalorder %s64_s25, %s64_s25 }
  0x23   :  { %p9745_p3 = scmp.ne.s32.totalorder %s64_s25, %s9744_s28  ;;  %p9750_p5 = scmp.lt.s32.totalorder %s9744_s28, %s9744_s28 }
  0x25   :  { %p9751_p6 = por %p9750_p5, %p9749_p4 }
  0x27   :  { %p9752_p7 = pnand %p9751_p6, %p9745_p3 }
  0x29   :  { %9755 = shalt.err (!%p9752_p7)
}
  0x2a   :  { %s10261_s29 = smov 16   ;;  %s10262_s3 = smov 1  }
  0x2b   :  { %69 = dma.hbm_to_vmem [thread:$0]  %s12030_s26, 32, %s64_s25, [#allocation7], %s10261_s29, %s10261_s29, %s10262_s3  }
  0x2c   :  { %s10263_s30 = smov [#allocation9]   ;;  %s10264_s5 = smov [#allocation12]  }
  0x2d   :  { %s88_s24 = sshll.u32 %s10263_s30, 4  ;;  %s110_s1 = sshll.u32 %s10264_s5, 4  ;;  %s89_s24 = int_to_ptr.vmem [resolvable:$true] %s88_s24  ;;  %s111_s1 = int_to_ptr.vmem [resolvable:$true] %s110_s1 }
  0x2e   :  { %s12031_s6 = sld [smem:[#allocation60_spill]] }
  0x34   :  { %s9756_s27 = scalar_lea.hbm %s12031_s6, 32 }
  0x35   :  { %p9757_p8 = scmp.ne.s32.totalorder %s12031_s6, %s9756_s27  ;;  %p9760_p9 = scmp.lt.u32.totalorder %s9756_s27, %s12031_s6 }
  0x37   :  { %p9762_p10 = pnand %p9760_p9, %p9757_p8 }
  0x39   :  { %9765 = shalt.err (!%p9762_p10)
}
  0x3a   :  { %s9766_s25 = scalar_lea.vmem %s89_s24, 32  ;;  %p9771_p12 = scmp.lt.s32.totalorder %s89_s24, %s89_s24 }
  0x3b   :  { %p9767_p11 = scmp.ne.s32.totalorder %s89_s24, %s9766_s25  ;;  %p9772_p13 = scmp.lt.s32.totalorder %s9766_s25, %s9766_s25 }
  0x3d   :  { %p9773_p0 = por %p9772_p13, %p9771_p12 }
  0x3f   :  { %p9774_p1 = pnand %p9773_p0, %p9767_p11 }
  0x41   :  { %9777 = shalt.err (!%p9774_p1)
}
  0x42   :  { %91 = dma.hbm_to_vmem [thread:$0]  %s12031_s6, 32, %s89_s24, [#allocation10]  }
  0x43   :  { %s12032_s4 = sld [smem:[#allocation62_spill]] }
  0x49   :  { %s9778_s30 = scalar_lea.hbm %s12032_s4, 32 }
  0x4a   :  { %p9779_p2 = scmp.ne.s32.totalorder %s12032_s4, %s9778_s30  ;;  %p9782_p3 = scmp.lt.u32.totalorder %s9778_s30, %s12032_s4 }
  0x4c   :  { %p9784_p4 = pnand %p9782_p3, %p9779_p2 }
  0x4e   :  { %9787 = shalt.err (!%p9784_p4)
}
  0x4f   :  { %s9788_s2 = scalar_lea.vmem %s111_s1, 32  ;;  %p9793_p6 = scmp.lt.s32.totalorder %s111_s1, %s111_s1 }
  0x50   :  { %p9789_p5 = scmp.ne.s32.totalorder %s111_s1, %s9788_s2  ;;  %p9794_p7 = scmp.lt.s32.totalorder %s9788_s2, %s9788_s2 }
  0x52   :  { %p9795_p8 = por %p9794_p7, %p9793_p6 }
  0x54   :  { %p9796_p9 = pnand %p9795_p8, %p9789_p5 }
  0x56   :  { %9799 = shalt.err (!%p9796_p9)
}
  0x57   :  { %113 = dma.hbm_to_vmem [thread:$0]  %s12032_s4, 32, %s111_s1, [#allocation13]  }
  0x58   :  { %s10265_s27 = smov [#allocation15]   ;;  %s9800_s26 = scalar_lea.hbm %s11986_s9, 196608 }
  0x59   :  { %s129_s7 = sshll.u32 %s10265_s27, 4  ;;  %p9801_p10 = scmp.ne.s32.totalorder %s11986_s9, %s9800_s26  ;;  %s130_s7 = int_to_ptr.vmem [resolvable:$true] %s129_s7 }
  0x5a   :  { %p9804_p11 = scmp.lt.u32.totalorder %s9800_s26, %s11986_s9 }
  0x5c   :  { %p9806_p12 = pnand %p9804_p11, %p9801_p10 }
  0x5e   :  { %9809 = shalt.err (!%p9806_p12)
}
  0x5f   :  { %s9810_s21 = scalar_lea.vmem %s130_s7, 196608  ;;  %p9815_p0 = scmp.lt.s32.totalorder %s130_s7, %s130_s7 }
  0x60   :  { %p9811_p13 = scmp.ne.s32.totalorder %s130_s7, %s9810_s21  ;;  %p9816_p1 = scmp.lt.s32.totalorder %s9810_s21, %s9810_s21 }
  0x62   :  { %p9817_p2 = por %p9816_p1, %p9815_p0 }
  0x64   :  { %p9818_p3 = pnand %p9817_p2, %p9811_p13 }
  0x66   :  { %9821 = shalt.err (!%p9818_p3)
}
  0x67   :  { %s10266_s1 = smov 1536   ;;  %s10267_s4 = smov 96  }
  0x68   :  { %135 = dma.hbm_to_vmem [thread:$0]  %s11986_s9, 196608, %s130_s7, [#allocation16], %s10266_s1, %s10266_s1, %s10267_s4  }
  0x69   :  { %s10268_s22 = smov [#allocation18]   ;;  %s9822_s27 = scalar_lea.hbm %s11988_s11, 65536 }
  0x6a   :  { %s153_s2 = sshll.u32 %s10268_s22, 4  ;;  %p9823_p4 = scmp.ne.s32.totalorder %s11988_s11, %s9822_s27  ;;  %s154_s2 = int_to_ptr.vmem [resolvable:$true] %s153_s2 }
  0x6b   :  { %p9826_p5 = scmp.lt.u32.totalorder %s9822_s27, %s11988_s11 }
  0x6d   :  { %p9828_p6 = pnand %p9826_p5, %p9823_p4 }
  0x6f   :  { %9831 = shalt.err (!%p9828_p6)
}
  0x70   :  { %s9832_s3 = scalar_lea.vmem %s154_s2, 65536  ;;  %p9837_p8 = scmp.lt.s32.totalorder %s154_s2, %s154_s2 }
  0x71   :  { %p9833_p7 = scmp.ne.s32.totalorder %s154_s2, %s9832_s3  ;;  %p9838_p9 = scmp.lt.s32.totalorder %s9832_s3, %s9832_s3 }
  0x73   :  { %p9839_p10 = por %p9838_p9, %p9837_p8 }
  0x75   :  { %p9840_p11 = pnand %p9839_p10, %p9833_p7 }
  0x77   :  { %9843 = shalt.err (!%p9840_p11)
}
  0x78   :  { %s10269_s9 = smov 128   ;;  %s10270_s7 = smov 8  }
  0x79   :  { %159 = dma.hbm_to_vmem [thread:$0]  %s11988_s11, 65536, %s154_s2, [#allocation19], %s10269_s9, %s10269_s9, %s10270_s7  }
  0x7a   :  { %s10271_s21 = smov [#allocation21]   ;;  %s9844_s22 = scalar_lea.hbm %s11990_s13, 128 }
  0x7b   :  { %s177_s1 = sshll.u32 %s10271_s21, 4  ;;  %p9845_p12 = scmp.ne.s32.totalorder %s11990_s13, %s9844_s22  ;;  %s178_s1 = int_to_ptr.vmem [resolvable:$true] %s177_s1 }
  0x7c   :  { %p9848_p13 = scmp.lt.u32.totalorder %s9844_s22, %s11990_s13 }
  0x7e   :  { %p9850_p0 = pnand %p9848_p13, %p9845_p12 }
  0x80   :  { %9853 = shalt.err (!%p9850_p0)
}
  0x81   :  { %s9854_s25 = scalar_lea.vmem %s178_s1, 128  ;;  %p9859_p2 = scmp.lt.s32.totalorder %s178_s1, %s178_s1 }
  0x82   :  { %p9855_p1 = scmp.ne.s32.totalorder %s178_s1, %s9854_s25  ;;  %p9860_p3 = scmp.lt.s32.totalorder %s9854_s25, %s9854_s25 }
  0x84   :  { %p9861_p4 = por %p9860_p3, %p9859_p2 }
  0x86   :  { %p9862_p5 = pnand %p9861_p4, %p9855_p1 }
  0x88   :  { %9865 = shalt.err (!%p9862_p5)
}
  0x89   :  { %s10272_s11 = smov 32   ;;  %s10273_s2 = smov 2  }
  0x8a   :  { %183 = dma.hbm_to_vmem [thread:$0]  %s11990_s13, 128, %s178_s1, [#allocation22], %s10272_s11, %s10272_s11, %s10273_s2  }
  0x8b   :  { %s10274_s3 = smov [#allocation24]   ;;  %s10275_s30 = smov [#allocation27]  }
  0x8c   :  { %s201_s0 = sshll.u32 %s10274_s3, 4  ;;  %s225_s21 = sshll.u32 %s10275_s30, 4  ;;  %s202_s0 = int_to_ptr.vmem [resolvable:$true] %s201_s0  ;;  %s10497_s21 = int_to_ptr.vmem [resolvable:$true] %s225_s21 }
  0x8d   :  { %s9866_s22 = scalar_lea.hbm %s11992_s15, 49152 }
  0x8e   :  { %p9867_p6 = scmp.ne.s32.totalorder %s11992_s15, %s9866_s22  ;;  %p9870_p7 = scmp.lt.u32.totalorder %s9866_s22, %s11992_s15 }
  0x90   :  { %p9872_p8 = pnand %p9870_p7, %p9867_p6 }
  0x92   :  { %9875 = shalt.err (!%p9872_p8)
}
  0x93   :  { %s9876_s13 = scalar_lea.vmem %s202_s0, 49152  ;;  %p9881_p10 = scmp.lt.s32.totalorder %s202_s0, %s202_s0 }
  0x94   :  { %p9877_p9 = scmp.ne.s32.totalorder %s202_s0, %s9876_s13  ;;  %p9882_p11 = scmp.lt.s32.totalorder %s9876_s13, %s9876_s13 }
  0x96   :  { %p9883_p12 = por %p9882_p11, %p9881_p10 }
  0x98   :  { %p9884_p13 = pnand %p9883_p12, %p9877_p9 }
  0x9a   :  { %9887 = shalt.err (!%p9884_p13)
}
  0x9b   :  { %s10276_s1 = smov 384   ;;  %s10277_s25 = smov 24  }
  0x9c   :  { %207 = dma.hbm_to_vmem [thread:$0]  %s11992_s15, 49152, %s202_s0, [#allocation25], %s10276_s1, %s10276_s1, %s10277_s25  }
  0x9d   :  { %s9888_s23 = scalar_lea.hbm %s11994_s17, 49152 }
  0x9e   :  { %p9889_p0 = scmp.ne.s32.totalorder %s11994_s17, %s9888_s23  ;;  %p9892_p1 = scmp.lt.u32.totalorder %s9888_s23, %s11994_s17 }
  0xa0   :  { %p9894_p2 = pnand %p9892_p1, %p9889_p0 }
  0xa2   :  { %9897 = shalt.err (!%p9894_p2)
}
  0xa3   :  { %s9898_s27 = scalar_lea.vmem %s10497_s21, 49152  ;;  %p9903_p4 = scmp.lt.s32.totalorder %s10497_s21, %s10497_s21 }
  0xa4   :  { %p9899_p3 = scmp.ne.s32.totalorder %s10497_s21, %s9898_s27  ;;  %p9904_p5 = scmp.lt.s32.totalorder %s9898_s27, %s9898_s27 }
  0xa6   :  { %p9905_p6 = por %p9904_p5, %p9903_p4 }
  0xa8   :  { %p9906_p7 = pnand %p9905_p6, %p9899_p3 }
  0xaa   :  { %9909 = shalt.err (!%p9906_p7)
}
  0xab   :  { %231 = dma.hbm_to_vmem [thread:$0]  %s11994_s17, 49152, %s10497_s21, [#allocation28], %s10269_s9, %s10269_s9, %s10270_s7  }
  0xac   :  { %s10278_s28 = smov [#allocation30]   ;;  %s10279_s26 = smov [#allocation3]  }
  0xad   :  { %s249_s13 = sshll.u32 %s10278_s28, 4  ;;  %s47_s29 = sshll.u32 %s10279_s26, 4  ;;  %s250_s13 = int_to_ptr.vmem [resolvable:$true] %s249_s13  ;;  %s10534_s29 = int_to_ptr.vmem [resolvable:$true] %s47_s29 }
  0xae   :  { %s9910_s23 = scalar_lea.hbm %s11996_s19, 128 }
  0xaf   :  { %p9911_p8 = scmp.ne.s32.totalorder %s11996_s19, %s9910_s23  ;;  %p9914_p9 = scmp.lt.u32.totalorder %s9910_s23, %s11996_s19 }
  0xb1   :  { %p9916_p10 = pnand %p9914_p9, %p9911_p8 }
  0xb3   :  { %9919 = shalt.err (!%p9916_p10)
}
  0xb4   :  { %s9920_s17 = scalar_lea.vmem %s250_s13, 128  ;;  %p9925_p12 = scmp.lt.s32.totalorder %s250_s13, %s250_s13 }
  0xb5   :  { %p9921_p11 = scmp.ne.s32.totalorder %s250_s13, %s9920_s17  ;;  %p9926_p13 = scmp.lt.s32.totalorder %s9920_s17, %s9920_s17 }
  0xb7   :  { %p9927_p0 = por %p9926_p13, %p9925_p12 }
  0xb9   :  { %p9928_p1 = pnand %p9927_p0, %p9921_p11 }
  0xbb   :  { %9931 = shalt.err (!%p9928_p1)
}
  0xbc   :  { %255 = dma.hbm_to_vmem [thread:$0]  %s11996_s19, 128, %s250_s13, [#allocation31], %s10272_s11, %s10272_s11, %s10273_s2  }
  0xbd   :  { %s12033_s28 = sld [smem:[#allocation55_spill]] }
  0xc3   :  { %s9932_s26 = scalar_lea.hbm %s12033_s28, 768 }
  0xc4   :  { %p9933_p2 = scmp.ne.s32.totalorder %s12033_s28, %s9932_s26  ;;  %p9936_p3 = scmp.lt.u32.totalorder %s9932_s26, %s12033_s28 }
  0xc6   :  { %p9938_p4 = pnand %p9936_p3, %p9933_p2 }
  0xc8   :  { %9941 = shalt.err (!%p9938_p4)
}
  0xc9   :  { %s9942_s22 = scalar_lea.vmem %s10534_s29, 768  ;;  %p9947_p6 = scmp.lt.s32.totalorder %s10534_s29, %s10534_s29 }
  0xca   :  { %p9943_p5 = scmp.ne.s32.totalorder %s10534_s29, %s9942_s22  ;;  %p9948_p7 = scmp.lt.s32.totalorder %s9942_s22, %s9942_s22 }
  0xcc   :  { %p9949_p8 = por %p9948_p7, %p9947_p6 }
  0xce   :  { %p9950_p9 = pnand %p9949_p8, %p9943_p5 }
  0xd0   :  { %9953 = shalt.err (!%p9950_p9)
}
  0xd1   :  { %53 = dma.hbm_to_vmem [thread:$0]  %s12033_s28, 768, %s10534_s29, [#allocation4], %s10276_s1, %s10276_s1, %s10277_s25  }
  0xd2   :  { %s10280_s24 = smov [#allocation8]   ;;  %s10281_s17 = smov [#allocation11]  }
  0xd3   :  { %s75_s6 = sshll.u32 %s10280_s24, 4  ;;  %s97_s21 = sshll.u32 %s10281_s17, 4  ;;  %s76_s6 = int_to_ptr.vmem [resolvable:$true] %s75_s6  ;;  %s10571_s21 = int_to_ptr.vmem [resolvable:$true] %s97_s21 }
  0xd4   :  { %s12034_s0 = sld [smem:[#allocation59_spill]] }
  0xda   :  { %s9954_s26 = scalar_lea.hbm %s12034_s0, 12288 }
  0xdb   :  { %p9955_p10 = scmp.ne.s32.totalorder %s12034_s0, %s9954_s26  ;;  %p9958_p11 = scmp.lt.u32.totalorder %s9954_s26, %s12034_s0 }
  0xdd   :  { %p9960_p12 = pnand %p9958_p11, %p9955_p10 }
  0xdf   :  { %9963 = shalt.err (!%p9960_p12)
}
  0xe0   :  { %s9964_s29 = scalar_lea.vmem %s76_s6, 12288  ;;  %p9969_p0 = scmp.lt.s32.totalorder %s76_s6, %s76_s6 }
  0xe1   :  { %p9965_p13 = scmp.ne.s32.totalorder %s76_s6, %s9964_s29  ;;  %p9970_p1 = scmp.lt.s32.totalorder %s9964_s29, %s9964_s29 }
  0xe3   :  { %p9971_p2 = por %p9970_p1, %p9969_p0 }
  0xe5   :  { %p9972_p3 = pnand %p9971_p2, %p9965_p13 }
  0xe7   :  { %9975 = shalt.err (!%p9972_p3)
}
  0xe8   :  { %81 = dma.hbm_to_vmem [thread:$0]  %s12034_s0, 12288, %s76_s6, [#allocation7], %s10269_s9, %s10269_s9, %s10270_s7  }
  0xe9   :  { %s12035_s24 = sld [smem:[#allocation61_spill]] }
  0xef   :  { %s9976_s17 = scalar_lea.hbm %s12035_s24, 4096 }
  0xf0   :  { %p9977_p4 = scmp.ne.s32.totalorder %s12035_s24, %s9976_s17  ;;  %p9980_p5 = scmp.lt.u32.totalorder %s9976_s17, %s12035_s24 }
  0xf2   :  { %p9982_p6 = pnand %p9980_p5, %p9977_p4 }
  0xf4   :  { %9985 = shalt.err (!%p9982_p6)
}
  0xf5   :  { %s9986_s30 = scalar_lea.vmem %s10571_s21, 4096  ;;  %p9991_p8 = scmp.lt.s32.totalorder %s10571_s21, %s10571_s21 }
  0xf6   :  { %p9987_p7 = scmp.ne.s32.totalorder %s10571_s21, %s9986_s30  ;;  %p9992_p9 = scmp.lt.s32.totalorder %s9986_s30, %s9986_s30 }
  0xf8   :  { %p9993_p10 = por %p9992_p9, %p9991_p8 }
  0xfa   :  { %p9994_p11 = pnand %p9993_p10, %p9987_p7 }
  0xfc   :  { %9997 = shalt.err (!%p9994_p11)
}
  0xfd   :  { %103 = dma.hbm_to_vmem [thread:$0]  %s12035_s24, 4096, %s10571_s21, [#allocation10], %s10269_s9, %s10269_s9, %s10270_s7  }
  0xfe   :  { %s10282_s23 = smov [#allocation14]   ;;  %s10283_s29 = smov [#allocation17]  }
  0xff   :  { %s120_s5 = sshll.u32 %s10282_s23, 4  ;;  %s141_s28 = sshll.u32 %s10283_s29, 4  ;;  %s121_s5 = int_to_ptr.vmem [resolvable:$true] %s120_s5  ;;  %s10608_s28 = int_to_ptr.vmem [resolvable:$true] %s141_s28 }
 0x100   :  { %s9998_s13 = scalar_lea.hbm %s11985_s8, 32 }
 0x101   :  { %p9999_p12 = scmp.ne.s32.totalorder %s11985_s8, %s9998_s13  ;;  %p10002_p13 = scmp.lt.u32.totalorder %s9998_s13, %s11985_s8 }
 0x103   :  { %p10004_p0 = pnand %p10002_p13, %p9999_p12 }
 0x105   :  { %10007 = shalt.err (!%p10004_p0)
}
 0x106   :  { %s10008_s9 = scalar_lea.vmem %s121_s5, 32  ;;  %p10013_p2 = scmp.lt.s32.totalorder %s121_s5, %s121_s5 }
 0x107   :  { %p10009_p1 = scmp.ne.s32.totalorder %s121_s5, %s10008_s9  ;;  %p10014_p3 = scmp.lt.s32.totalorder %s10008_s9, %s10008_s9 }
 0x109   :  { %p10015_p4 = por %p10014_p3, %p10013_p2 }
 0x10b   :  { %p10016_p5 = pnand %p10015_p4, %p10009_p1 }
 0x10d   :  { %10019 = shalt.err (!%p10016_p5)
}
 0x10e   :  { %123 = dma.hbm_to_vmem [thread:$0]  %s11985_s8, 32, %s121_s5, [#allocation13]  }
 0x10f   :  { %s10020_s30 = scalar_lea.hbm %s11987_s10, 1536 }
 0x110   :  { %p10021_p6 = scmp.ne.s32.totalorder %s11987_s10, %s10020_s30  ;;  %p10024_p7 = scmp.lt.u32.totalorder %s10020_s30, %s11987_s10 }
 0x112   :  { %p10026_p8 = pnand %p10024_p7, %p10021_p6 }
 0x114   :  { %10029 = shalt.err (!%p10026_p8)
}
 0x115   :  { %s10030_s22 = scalar_lea.vmem %s10608_s28, 1536  ;;  %p10035_p10 = scmp.lt.s32.totalorder %s10608_s28, %s10608_s28 }
 0x116   :  { %p10031_p9 = scmp.ne.s32.totalorder %s10608_s28, %s10030_s22  ;;  %p10036_p11 = scmp.lt.s32.totalorder %s10030_s22, %s10030_s22 }
 0x118   :  { %p10037_p12 = por %p10036_p11, %p10035_p10 }
 0x11a   :  { %p10038_p13 = pnand %p10037_p12, %p10031_p9 }
 0x11c   :  { %10041 = shalt.err (!%p10038_p13)
}
 0x11d   :  { %147 = dma.hbm_to_vmem [thread:$0]  %s11987_s10, 1536, %s10608_s28, [#allocation16], %s10276_s1, %s10276_s1, %s10277_s25  }
 0x11e   :  { %s10284_s19 = smov [#allocation20]   ;;  %s10285_s17 = smov [#allocation23]  }
 0x11f   :  { %s165_s13 = sshll.u32 %s10284_s19, 4  ;;  %s189_s27 = sshll.u32 %s10285_s17, 4  ;;  %s166_s13 = int_to_ptr.vmem [resolvable:$true] %s165_s13  ;;  %s10642_s27 = int_to_ptr.vmem [resolvable:$true] %s189_s27 }
 0x120   :  { %s10042_s9 = scalar_lea.hbm %s11989_s12, 128 }
 0x121   :  { %p10043_p0 = scmp.ne.s32.totalorder %s11989_s12, %s10042_s9  ;;  %p10046_p1 = scmp.lt.u32.totalorder %s10042_s9, %s11989_s12 }
 0x123   :  { %p10048_p2 = pnand %p10046_p1, %p10043_p0 }
 0x125   :  { %10051 = shalt.err (!%p10048_p2)
}
 0x126   :  { %s10052_s10 = scalar_lea.vmem %s166_s13, 128  ;;  %p10057_p4 = scmp.lt.s32.totalorder %s166_s13, %s166_s13 }
 0x127   :  { %p10053_p3 = scmp.ne.s32.totalorder %s166_s13, %s10052_s10  ;;  %p10058_p5 = scmp.lt.s32.totalorder %s10052_s10, %s10052_s10 }
 0x129   :  { %p10059_p6 = por %p10058_p5, %p10057_p4 }
 0x12b   :  { %p10060_p7 = pnand %p10059_p6, %p10053_p3 }
 0x12d   :  { %10063 = shalt.err (!%p10060_p7)
}
 0x12e   :  { %171 = dma.hbm_to_vmem [thread:$0]  %s11989_s12, 128, %s166_s13, [#allocation19], %s10272_s11, %s10272_s11, %s10273_s2  }
 0x12f   :  { %s10064_s6 = scalar_lea.hbm %s11991_s14, 128 }
 0x130   :  { %p10065_p8 = scmp.ne.s32.totalorder %s11991_s14, %s10064_s6  ;;  %p10068_p9 = scmp.lt.u32.totalorder %s10064_s6, %s11991_s14 }
 0x132   :  { %p10070_p10 = pnand %p10068_p9, %p10065_p8 }
 0x134   :  { %10073 = shalt.err (!%p10070_p10)
}
 0x135   :  { %s10074_s8 = scalar_lea.vmem %s10642_s27, 128  ;;  %p10079_p12 = scmp.lt.s32.totalorder %s10642_s27, %s10642_s27 }
 0x136   :  { %p10075_p11 = scmp.ne.s32.totalorder %s10642_s27, %s10074_s8  ;;  %p10080_p13 = scmp.lt.s32.totalorder %s10074_s8, %s10074_s8 }
 0x138   :  { %p10081_p0 = por %p10080_p13, %p10079_p12 }
 0x13a   :  { %p10082_p1 = pnand %p10081_p0, %p10075_p11 }
 0x13c   :  { %10085 = shalt.err (!%p10082_p1)
}
 0x13d   :  { %195 = dma.hbm_to_vmem [thread:$0]  %s11991_s14, 128, %s10642_s27, [#allocation22], %s10272_s11, %s10272_s11, %s10273_s2  }
 0x13e   :  { %s10286_s19 = smov [#allocation26]   ;;  %s10287_s17 = smov [#allocation29]  }
 0x13f   :  { %s213_s13 = sshll.u32 %s10286_s19, 4  ;;  %s237_s15 = sshll.u32 %s10287_s17, 4  ;;  %s214_s13 = int_to_ptr.vmem [resolvable:$true] %s213_s13  ;;  %s238_s15 = int_to_ptr.vmem [resolvable:$true] %s237_s15 }
 0x140   :  { %s10086_s7 = scalar_lea.hbm %s11993_s16, 384 }
 0x141   :  { %p10087_p2 = scmp.ne.s32.totalorder %s11993_s16, %s10086_s7  ;;  %p10090_p3 = scmp.lt.u32.totalorder %s10086_s7, %s11993_s16 }
 0x143   :  { %p10092_p4 = pnand %p10090_p3, %p10087_p2 }
 0x145   :  { %10095 = shalt.err (!%p10092_p4)
}
 0x146   :  { %s10096_s14 = scalar_lea.vmem %s214_s13, 384  ;;  %p10101_p6 = scmp.lt.s32.totalorder %s214_s13, %s214_s13 }
 0x147   :  { %p10097_p5 = scmp.ne.s32.totalorder %s214_s13, %s10096_s14  ;;  %p10102_p7 = scmp.lt.s32.totalorder %s10096_s14, %s10096_s14 }
 0x149   :  { %p10103_p8 = por %p10102_p7, %p10101_p6 }
 0x14b   :  { %p10104_p9 = pnand %p10103_p8, %p10097_p5 }
 0x14d   :  { %10107 = shalt.err (!%p10104_p9)
}
 0x14e   :  { %s10288_s27 = smov 6   ;;  %s10108_s6 = scalar_lea.hbm %s11995_s18, 128 }
 0x14f   :  { %219 = dma.hbm_to_vmem [thread:$0]  %s11993_s16, 384, %s214_s13, [#allocation25], %s10267_s4, %s10267_s4, %s10288_s27  }
 0x150   :  { %p10109_p10 = scmp.ne.s32.totalorder %s11995_s18, %s10108_s6  ;;  %p10112_p11 = scmp.lt.u32.totalorder %s10108_s6, %s11995_s18 }
 0x152   :  { %p10114_p12 = pnand %p10112_p11, %p10109_p10 }
 0x154   :  { %10117 = shalt.err (!%p10114_p12)
}
 0x155   :  { %s10118_s8 = scalar_lea.vmem %s238_s15, 128  ;;  %p10123_p0 = scmp.lt.s32.totalorder %s238_s15, %s238_s15 }
 0x156   :  { %p10119_p13 = scmp.ne.s32.totalorder %s238_s15, %s10118_s8  ;;  %p10124_p1 = scmp.lt.s32.totalorder %s10118_s8, %s10118_s8 }
 0x158   :  { %p10125_p2 = por %p10124_p1, %p10123_p0 }
 0x15a   :  { %p10126_p3 = pnand %p10125_p2, %p10119_p13 }
 0x15c   :  { %10129 = shalt.err (!%p10126_p3)
}
 0x15d   :  { %243 = dma.hbm_to_vmem [thread:$0]  %s11995_s18, 128, %s238_s15, [#allocation28], %s10272_s11, %s10272_s11, %s10273_s2  }
 0x15e   :  { %s10289_s12 = smov [#allocation32]   ;;  %s10290_s19 = smov [#allocation33]  }
 0x15f   :  { %s261_s5 = sshll.u32 %s10289_s12, 4  ;;  %s274_s13 = sshll.u32 %s10290_s19, 4  ;;  %s262_s5 = int_to_ptr.vmem [resolvable:$true] %s261_s5  ;;  %s275_s13 = int_to_ptr.vmem [resolvable:$true] %s274_s13 }
 0x160   :  { %s10130_s9 = scalar_lea.hbm %s11997_s20, 128 }
 0x161   :  { %p10131_p4 = scmp.ne.s32.totalorder %s11997_s20, %s10130_s9  ;;  %p10134_p5 = scmp.lt.u32.totalorder %s10130_s9, %s11997_s20 }
 0x163   :  { %p10136_p6 = pnand %p10134_p5, %p10131_p4 }
 0x165   :  { %10139 = shalt.err (!%p10136_p6)
}
 0x166   :  { %s10140_s18 = scalar_lea.vmem %s262_s5, 128  ;;  %p10145_p8 = scmp.lt.s32.totalorder %s262_s5, %s262_s5 }
 0x167   :  { %p10141_p7 = scmp.ne.s32.totalorder %s262_s5, %s10140_s18  ;;  %p10146_p9 = scmp.lt.s32.totalorder %s10140_s18, %s10140_s18 }
 0x169   :  { %p10147_p10 = por %p10146_p9, %p10145_p8 }
 0x16b   :  { %p10148_p11 = pnand %p10147_p10, %p10141_p7 }
 0x16d   :  { %10151 = shalt.err (!%p10148_p11)
}
 0x16e   :  { %267 = dma.hbm_to_vmem [thread:$0]  %s11997_s20, 128, %s262_s5, [#allocation31], %s10272_s11, %s10272_s11, %s10273_s2  }
 0x16f   :  { %s12036_s1 = sld [smem:[#allocation63_spill]] }
 0x175   :  { %s10152_s25 = scalar_lea.hbm %s12036_s1, 32 }
 0x176   :  { %p10153_p12 = scmp.ne.s32.totalorder %s12036_s1, %s10152_s25  ;;  %p10156_p13 = scmp.lt.u32.totalorder %s10152_s25, %s12036_s1 }
 0x178   :  { %p10158_p0 = pnand %p10156_p13, %p10153_p12 }
 0x17a   :  { %10161 = shalt.err (!%p10158_p0)
}
 0x17b   :  { %s10162_s23 = scalar_lea.vmem %s275_s13, 32  ;;  %p10167_p2 = scmp.lt.s32.totalorder %s275_s13, %s275_s13 }
 0x17c   :  { %p10163_p1 = scmp.ne.s32.totalorder %s275_s13, %s10162_s23  ;;  %p10168_p3 = scmp.lt.s32.totalorder %s10162_s23, %s10162_s23 }
 0x17e   :  { %p10169_p4 = por %p10168_p3, %p10167_p2 }
 0x180   :  { %p10170_p5 = pnand %p10169_p4, %p10163_p1 }
 0x182   :  { %10173 = shalt.err (!%p10170_p5)
}
 0x183   :  { %277 = dma.hbm_to_vmem [thread:$0]  %s12036_s1, 32, %s275_s13, [#allocation34]  }
 0x184   :  { %10216 = dma.done.wait [#allocation4], 768  }
 0x185   :  { %10217 = vsyncadd [#allocation4], 4294966528 }
 0x186   :  { %10218 = dma.done.wait [#allocation7], 12320  }
 0x187   :  { %10219 = vsyncadd [#allocation7], 4294954976 }
 0x188   :  { %10220 = dma.done.wait [#allocation10], 4128  }
 0x189   :  { %10221 = vsyncadd [#allocation10], 4294963168 }
 0x18a   :  { %10222 = dma.done.wait [#allocation13], 64  }
 0x18b   :  { %10223 = vsyncadd [#allocation13], 4294967232 }
 0x18c   :  { %10224 = dma.done.wait [#allocation16], 198144  }
 0x18d   :  { %10225 = vsyncadd [#allocation16], 4294769152 }
 0x18e   :  { %10226 = dma.done.wait [#allocation19], 65664  }
 0x18f   :  { %10227 = vsyncadd [#allocation19], 4294901632 }
 0x190   :  { %10228 = dma.done.wait [#allocation22], 256  }
 0x191   :  { %10229 = vsyncadd [#allocation22], 4294967040 }
 0x192   :  { %10230 = dma.done.wait [#allocation25], 49536  }
 0x193   :  { %10231 = vsyncadd [#allocation25], 4294917760 }
 0x194   :  { %10232 = dma.done.wait [#allocation28], 49280  }
 0x195   :  { %10233 = vsyncadd [#allocation28], 4294918016 }
 0x196   :  { %10234 = dma.done.wait [#allocation31], 256  }
 0x197   :  { %10235 = vsyncadd [#allocation31], 4294967040 }
 0x198   :  { %10236 = dma.done.wait [#allocation34], 32  }
 0x199   :  { %10237 = vsyncadd [#allocation34], 4294967264  ;;  %v12011_v1 = vmov 0   ;;  %v10737_v2 = vld [vmem:[#allocation6] sm:$0x1]  ;;  %s12039_s22 = sld [smem:[#allocation56_spill]] }
 0x19a   :  { %9004 = vset.pattern.permute.xlu0 %v12011_v1  ;;  %9005 = vset.pattern.permute.xlu1 %v12011_v1  ;;  %12037 = vst [vmem:[#allocation48_spill] sm:$0xff] %v10737_v2  ;;  %v10739_v3 = vld [vmem:[#allocation6 + $0x1] sm:$0x1]  ;;  %s12040_s4 = sld [smem:[#allocation57_spill]]  ;;  %v9006_v7 = vld [vmem:[#allocation8 + $0x4] ss:$8 sps:$4 sm:$0xff]  }
 0x19b   :  { %12038 = vst [vmem:[#allocation49_spill] sm:$0xff] %v10739_v3  ;;  %v9008_v8 = vld [vmem:[#allocation8] ss:$8 sps:$4 sm:$0xff]   ;;  %965 = vmatprep.subr.bf16.mxu1 %v9006_v7  ;;  %v9009_v12 = vld [vmem:[#allocation8 + $0x14] ss:$8 sps:$4 sm:$0xff]   ;;  %s10782_s17 = smov 0  }
 0x19c   :  { %966 = vmatpush1.bf16.msra.mxu1 %v9008_v8  ;;  %v9011_v13 = vld [vmem:[#allocation8 + $0x10] ss:$8 sps:$4 sm:$0xff]   ;;  %v9012_v14 = vld [vmem:[#allocation8 + $0x24] ss:$8 sps:$4 sm:$0xff]   ;;  %v9017_v16 = vld [vmem:[#allocation8 + $0x200] ss:$8 sps:$4 sm:$0xff]  }
 0x19d   :  { %967 = vmatprep.subr.bf16.mxu1 %v9009_v12  ;;  %v9014_v15 = vld [vmem:[#allocation8 + $0x204] ss:$8 sps:$4 sm:$0xff]   ;;  %v9016_v17 = vld [vmem:[#allocation8 + $0x20] ss:$8 sps:$4 sm:$0xff]   ;;  %v9020_v18 = vld [vmem:[#allocation8 + $0x214] ss:$8 sps:$4 sm:$0xff]  }
 0x19e   :  { %1051 = vmatprep.subr.bf16.mxu0 %v9014_v15  ;;  %v9023_v19 = vld [vmem:[#allocation8 + $0x210] ss:$8 sps:$4 sm:$0xff]   ;;  %v9018_v20 = vld [vmem:[#allocation8 + $0x34] ss:$8 sps:$4 sm:$0xff]   ;;  %v9026_v21 = vld [vmem:[#allocation8 + $0x224] ss:$8 sps:$4 sm:$0xff]  }
 0x19f   :  { %v1094_v4 = vld [vmem:[%s12039_s22] sm:$0xff]  ;;  %v1095_v9 = vld [vmem:[%s12039_s22 + $0x8] sm:$0xff]  ;;  %1052 = vmatpush1.bf16.msra.mxu0 %v9017_v16  ;;  %v9029_v23 = vld [vmem:[#allocation8 + $0x220] ss:$8 sps:$4 sm:$0xff]  }
 0x1a0   :  { %1102 = vperm.xlu0 %9004, %v1094_v4   ;;  %v1096_v5 = vld [vmem:[%s12040_s4] sm:$0xff]  ;;  %v1097_v10 = vld [vmem:[%s12040_s4 + $0x8] sm:$0xff]  ;;  %968 = vmatpush1.bf16.msra.mxu1 %v9011_v13  ;;  %v9028_v26 = vld [vmem:[#allocation8 + $0x40] ss:$8 sps:$4 sm:$0xff]  }
 0x1a1   :  { %v1111_v6 = vadd.s32 128, %v1096_v5  ;;  %v1112_v11 = vadd.s32 128, %v1097_v10  ;;  %969 = vmatprep.subr.bf16.mxu1 %v9012_v14  ;;  %1053 = vmatprep.subr.bf16.mxu0 %v9020_v18  ;;  %v9022_v22 = vld [vmem:[#allocation8 + $0x30] ss:$8 sps:$4 sm:$0xff]   ;;  %v9024_v24 = vld [vmem:[#allocation8 + $0x44] ss:$8 sps:$4 sm:$0xff]  }
 0x1a2   :  { %v9032_v25 = vld [vmem:[#allocation8 + $0x234] ss:$8 sps:$4 sm:$0xff]   ;;  %v9035_v28 = vld [vmem:[#allocation8 + $0x230] ss:$8 sps:$4 sm:$0xff]   ;;  %v9038_v29 = vld [vmem:[#allocation8 + $0x244] ss:$8 sps:$4 sm:$0xff]  }
 0x1a3   :  { %1114 = vperm.xlu1 %9005, %v1111_v6   ;;  %1054 = vmatpush1.bf16.msra.mxu0 %v9023_v19  ;;  %v9030_v27 = vld [vmem:[#allocation8 + $0x54] ss:$8 sps:$4 sm:$0xff]   ;;  %v9034_v30 = vld [vmem:[#allocation8 + $0x50] ss:$8 sps:$4 sm:$0xff]   ;;  %v9041_v31 = vld [vmem:[#allocation8 + $0x240] ss:$8 sps:$4 sm:$0xff]  }
 0x1a4   :  { %1105 = vperm.xlu0 %9004, %v1095_v9   ;;  %970 = vmatpush1.bf16.msra.mxu1 %v9016_v17  ;;  %v9036_v32 = vld [vmem:[#allocation8 + $0x64] ss:$8 sps:$4 sm:$0xff]   ;;  %v9044_v33 = vld [vmem:[#allocation8 + $0x254] ss:$8 sps:$4 sm:$0xff]   ;;  %v9040_v34 = vld [vmem:[#allocation8 + $0x60] ss:$8 sps:$4 sm:$0xff]  }
 0x1a5   :  { %971 = vmatprep.subr.bf16.mxu1 %v9018_v20  ;;  %1055 = vmatprep.subr.bf16.mxu0 %v9026_v21  ;;  %v9042_v35 = vld [vmem:[#allocation8 + $0x74] ss:$8 sps:$4 sm:$0xff]   ;;  %v9047_v36 = vld [vmem:[#allocation8 + $0x250] ss:$8 sps:$4 sm:$0xff]   ;;  %v9050_v37 = vld [vmem:[#allocation8 + $0x264] ss:$8 sps:$4 sm:$0xff]  }
 0x1a6   :  { %v9046_v38 = vld [vmem:[#allocation8 + $0x70] ss:$8 sps:$4 sm:$0xff]   ;;  %v9053_v39 = vld [vmem:[#allocation8 + $0x260] ss:$8 sps:$4 sm:$0xff]   ;;  %v9048_v40 = vld [vmem:[#allocation8 + $0x84] ss:$8 sps:$4 sm:$0xff]  }
 0x1a7   :  { %1117 = vperm.xlu1 %9005, %v1112_v11   ;;  %1056 = vmatpush1.bf16.msra.mxu0 %v9029_v23  ;;  %v9056_v41 = vld [vmem:[#allocation8 + $0x274] ss:$8 sps:$4 sm:$0xff]   ;;  %v9052_v42 = vld [vmem:[#allocation8 + $0x80] ss:$8 sps:$4 sm:$0xff]   ;;  %v9059_v44 = vld [vmem:[#allocation8 + $0x270] ss:$8 sps:$4 sm:$0xff]  }
 0x1a8   :  { %972 = vmatpush1.bf16.msra.mxu1 %v9022_v22  ;;  %1057 = vmatprep.subr.bf16.mxu0 %v9032_v25  ;;  %v9054_v43 = vld [vmem:[#allocation8 + $0x94] ss:$8 sps:$4 sm:$0xff]   ;;  %v9062_v45 = vld [vmem:[#allocation8 + $0x284] ss:$8 sps:$4 sm:$0xff]   ;;  %v9058_v46 = vld [vmem:[#allocation8 + $0x90] ss:$8 sps:$4 sm:$0xff]  }
 0x1a9   :  { %973 = vmatprep.subr.bf16.mxu1 %v9024_v24  ;;  %v9065_v47 = vld [vmem:[#allocation8 + $0x280] ss:$8 sps:$4 sm:$0xff]   ;;  %v9060_v48 = vld [vmem:[#allocation8 + $0xa4] ss:$8 sps:$4 sm:$0xff]   ;;  %v9068_v49 = vld [vmem:[#allocation8 + $0x294] ss:$8 sps:$4 sm:$0xff]  }
 0x1aa   :  { %v9064_v50 = vld [vmem:[#allocation8 + $0xa0] ss:$8 sps:$4 sm:$0xff]   ;;  %v9066_v51 = vld [vmem:[#allocation8 + $0xb4] ss:$8 sps:$4 sm:$0xff]   ;;  %v9071_v52 = vld [vmem:[#allocation8 + $0x290] ss:$8 sps:$4 sm:$0xff]  }
 0x1ab   :  { %1058 = vmatpush1.bf16.msra.mxu0 %v9035_v28  ;;  %v9074_v53 = vld [vmem:[#allocation8 + $0x2a4] ss:$8 sps:$4 sm:$0xff]   ;;  %v9070_v55 = vld [vmem:[#allocation8 + $0xb0] ss:$8 sps:$4 sm:$0xff]   ;;  %v9077_v57 = vld [vmem:[#allocation8 + $0x2a0] ss:$8 sps:$4 sm:$0xff]  }
 0x1ac   :  { %974 = vmatpush1.bf16.msra.mxu1 %v9028_v26  ;;  %1059 = vmatprep.subr.bf16.mxu0 %v9038_v29  ;;  %v9098_v54 = vld [vmem:[#allocation3 + $0x4] ss:$24 sps:$4 sm:$0xff]   ;;  %v9116_v63 = vld [vmem:[#allocation3 + $0x14] ss:$24 sps:$4 sm:$0xff]   ;;  %v9096_v15 = vld [vmem:[#allocation3] ss:$24 sps:$4 sm:$0xff]  }
 0x1ad   :  { %975 = vmatprep.subr.bf16.mxu1 %v9030_v27  ;;  %v9072_v56 = vld [vmem:[#allocation8 + $0xc4] ss:$8 sps:$4 sm:$0xff]   ;;  %v9080_v58 = vld [vmem:[#allocation8 + $0x2b4] ss:$8 sps:$4 sm:$0xff]   ;;  %997 = vmatprep.mubr.bf16.mxu1 %v9098_v54  ;;  %v9076_v59 = vld [vmem:[#allocation8 + $0xc0] ss:$8 sps:$4 sm:$0xff]  }
 0x1ae   :  { %v9078_v60 = vld [vmem:[#allocation8 + $0xd4] ss:$8 sps:$4 sm:$0xff]   ;;  %v9083_v61 = vld [vmem:[#allocation8 + $0x2b0] ss:$8 sps:$4 sm:$0xff]   ;;  %v9086_v62 = vld [vmem:[#allocation8 + $0x2c4] ss:$8 sps:$4 sm:$0xff]   ;;  %1083 = vmatprep.mubr.bf16.mxu0 %v9116_v63 }
 0x1af   :  { %1060 = vmatpush1.bf16.msra.mxu0 %v9041_v31  ;;  %v9082_v0 = vld [vmem:[#allocation8 + $0xd0] ss:$8 sps:$4 sm:$0xff]   ;;  %v9084_v4 = vld [vmem:[#allocation8 + $0xe4] ss:$8 sps:$4 sm:$0xff]   ;;  %v9089_v5 = vld [vmem:[#allocation8 + $0x2c0] ss:$8 sps:$4 sm:$0xff]  }
 0x1b0   :  { %976 = vmatpush1.bf16.msra.mxu1 %v9034_v30  ;;  %1061 = vmatprep.subr.bf16.mxu0 %v9044_v33  ;;  %v9092_v6 = vld [vmem:[#allocation8 + $0x2d4] ss:$8 sps:$4 sm:$0xff]   ;;  %v9088_v7 = vld [vmem:[#allocation8 + $0xe0] ss:$8 sps:$4 sm:$0xff]   ;;  %v9095_v9 = vld [vmem:[#allocation8 + $0x2d0] ss:$8 sps:$4 sm:$0xff]  }
 0x1b1   :  { %977 = vmatprep.subr.bf16.mxu1 %v9036_v32  ;;  %v9090_v8 = vld [vmem:[#allocation8 + $0xf4] ss:$8 sps:$4 sm:$0xff]   ;;  %v9102_v10 = vld [vmem:[#allocation8 + $0x2e4] ss:$8 sps:$4 sm:$0xff]   ;;  %v9094_v11 = vld [vmem:[#allocation8 + $0xf0] ss:$8 sps:$4 sm:$0xff]  }
 0x1b2   :  { %v9101_v12 = vld [vmem:[#allocation8 + $0x104] ss:$8 sps:$4 sm:$0xff]   ;;  %v9104_v13 = vld [vmem:[#allocation8 + $0x2e0] ss:$8 sps:$4 sm:$0xff]   ;;  %v9108_v14 = vld [vmem:[#allocation8 + $0x2f4] ss:$8 sps:$4 sm:$0xff]  }
 0x1b3   :  { %1062 = vmatpush1.bf16.msra.mxu0 %v9047_v36  ;;  %v9099_v16 = vld [vmem:[#allocation8 + $0x100] ss:$8 sps:$4 sm:$0xff]   ;;  %v9107_v17 = vld [vmem:[#allocation8 + $0x114] ss:$8 sps:$4 sm:$0xff]   ;;  %v9110_v18 = vld [vmem:[#allocation8 + $0x2f0] ss:$8 sps:$4 sm:$0xff]  }
 0x1b4   :  { %978 = vmatpush1.bf16.msra.mxu1 %v9040_v34  ;;  %1063 = vmatprep.subr.bf16.mxu0 %v9050_v37  ;;  %v9119_v19 = vld [vmem:[#allocation11 + $0x4] ss:$8 sps:$4 sm:$0xff]   ;;  %v9114_v21 = vld [vmem:[#allocation3 + $0x10] ss:$24 sps:$4 sm:$0xff]   ;;  %v9117_v23 = vld [vmem:[#allocation11] ss:$8 sps:$4 sm:$0xff]  }
 0x1b5   :  { %979 = vmatprep.subr.bf16.mxu1 %v9042_v35  ;;  %v9105_v20 = vld [vmem:[#allocation8 + $0x110] ss:$8 sps:$4 sm:$0xff]   ;;  %v9113_v22 = vld [vmem:[#allocation8 + $0x124] ss:$8 sps:$4 sm:$0xff]   ;;  %v9111_v25 = vld [vmem:[#allocation8 + $0x120] ss:$8 sps:$4 sm:$0xff]  }
 0x1b6   :  { %v9125_v24 = vld [vmem:[#allocation11 + $0x14] ss:$8 sps:$4 sm:$0xff]   ;;  %v9123_v27 = vld [vmem:[#allocation11 + $0x10] ss:$8 sps:$4 sm:$0xff]   ;;  %v9131_v28 = vld [vmem:[#allocation11 + $0x24] ss:$8 sps:$4 sm:$0xff]  }
 0x1b7   :  { %1064 = vmatpush1.bf16.msra.mxu0 %v9053_v39  ;;  %v9122_v26 = vld [vmem:[#allocation8 + $0x134] ss:$8 sps:$4 sm:$0xff]   ;;  %v9120_v29 = vld [vmem:[#allocation8 + $0x130] ss:$8 sps:$4 sm:$0xff]   ;;  %v9128_v30 = vld [vmem:[#allocation8 + $0x144] ss:$8 sps:$4 sm:$0xff]  }
 0x1b8   :  { %980 = vmatpush1.bf16.msra.mxu1 %v9046_v38  ;;  %1065 = vmatprep.subr.bf16.mxu0 %v9056_v41  ;;  %v9129_v31 = vld [vmem:[#allocation11 + $0x20] ss:$8 sps:$4 sm:$0xff]   ;;  %v9137_v32 = vld [vmem:[#allocation11 + $0x34] ss:$8 sps:$4 sm:$0xff]   ;;  %v9135_v35 = vld [vmem:[#allocation11 + $0x30] ss:$8 sps:$4 sm:$0xff]  }
 0x1b9   :  { %981 = vmatprep.subr.bf16.mxu1 %v9048_v40  ;;  %v9126_v33 = vld [vmem:[#allocation8 + $0x140] ss:$8 sps:$4 sm:$0xff]   ;;  %v9134_v34 = vld [vmem:[#allocation8 + $0x154] ss:$8 sps:$4 sm:$0xff]   ;;  %v9132_v37 = vld [vmem:[#allocation8 + $0x150] ss:$8 sps:$4 sm:$0xff]  }
 0x1ba   :  { %v9143_v36 = vld [vmem:[#allocation11 + $0x44] ss:$8 sps:$4 sm:$0xff]   ;;  %v9141_v39 = vld [vmem:[#allocation11 + $0x40] ss:$8 sps:$4 sm:$0xff]   ;;  %v9149_v40 = vld [vmem:[#allocation11 + $0x54] ss:$8 sps:$4 sm:$0xff]  }
 0x1bb   :  { %1066 = vmatpush1.bf16.msra.mxu0 %v9059_v44  ;;  %v9140_v38 = vld [vmem:[#allocation8 + $0x164] ss:$8 sps:$4 sm:$0xff]   ;;  %v9138_v41 = vld [vmem:[#allocation8 + $0x160] ss:$8 sps:$4 sm:$0xff]   ;;  %v9147_v44 = vld [vmem:[#allocation11 + $0x50] ss:$8 sps:$4 sm:$0xff]  }
 0x1bc   :  { %982 = vmatpush1.bf16.msra.mxu1 %v9052_v42  ;;  %1067 = vmatprep.subr.bf16.mxu0 %v9062_v45  ;;  %v9200_v42 = vld [vmem:[#allocation3 + $0xc] ss:$24 sps:$4 sm:$0xff]   ;;  %v9155_v45 = vld [vmem:[#allocation11 + $0x64] ss:$8 sps:$4 sm:$0xff]   ;;  %v9177_v63 = vld [vmem:[#allocation11 + $0xa0] ss:$8 sps:$4 sm:$0xff]  }
 0x1bd   :  { %983 = vmatprep.subr.bf16.mxu1 %v9054_v43  ;;  %v9146_v43 = vld [vmem:[#allocation8 + $0x174] ss:$8 sps:$4 sm:$0xff]   ;;  %v9156_v54 = vld [vmem:[#allocation8 + $0x190] ss:$8 sps:$4 sm:$0xff]  }
 0x1bf   :  { %1068 = vmatpush1.bf16.msra.mxu0 %v9065_v47  ;;  %v9153_v47 = vld [vmem:[#allocation11 + $0x60] ss:$8 sps:$4 sm:$0xff]  }
 0x1c0   :  { %984 = vmatpush1.bf16.msra.mxu1 %v9058_v46  ;;  %1069 = vmatprep.subr.bf16.mxu0 %v9068_v49  ;;  %v9144_v46 = vld [vmem:[#allocation8 + $0x170] ss:$8 sps:$4 sm:$0xff]  }
 0x1c1   :  { %985 = vmatprep.subr.bf16.mxu1 %v9060_v48  ;;  %v9152_v48 = vld [vmem:[#allocation8 + $0x184] ss:$8 sps:$4 sm:$0xff]   ;;  %v9161_v49 = vld [vmem:[#allocation11 + $0x74] ss:$8 sps:$4 sm:$0xff]  }
 0x1c3   :  { %1070 = vmatpush1.bf16.msra.mxu0 %v9071_v52  ;;  %v9158_v52 = vld [vmem:[#allocation8 + $0x194] ss:$8 sps:$4 sm:$0xff]  }
 0x1c4   :  { %986 = vmatpush1.bf16.msra.mxu1 %v9064_v50  ;;  %1071 = vmatprep.subr.bf16.mxu0 %v9074_v53  ;;  %v9150_v50 = vld [vmem:[#allocation8 + $0x180] ss:$8 sps:$4 sm:$0xff]  }
 0x1c5   :  { %987 = vmatprep.subr.bf16.mxu1 %v9066_v51  ;;  %v9159_v51 = vld [vmem:[#allocation11 + $0x70] ss:$8 sps:$4 sm:$0xff]   ;;  %v9167_v53 = vld [vmem:[#allocation11 + $0x84] ss:$8 sps:$4 sm:$0xff]  }
 0x1c7   :  { %1072 = vmatpush1.bf16.msra.mxu0 %v9077_v57  ;;  %v9173_v57 = vld [vmem:[#allocation11 + $0x94] ss:$8 sps:$4 sm:$0xff]  }
 0x1c8   :  { %988 = vmatpush1.bf16.msra.mxu1 %v9070_v55  ;;  %1073 = vmatprep.subr.bf16.mxu0 %v9080_v58  ;;  %v9165_v55 = vld [vmem:[#allocation11 + $0x80] ss:$8 sps:$4 sm:$0xff]  }
 0x1c9   :  { %989 = vmatprep.subr.bf16.mxu1 %v9072_v56  ;;  %v9164_v56 = vld [vmem:[#allocation8 + $0x1a4] ss:$8 sps:$4 sm:$0xff]   ;;  %v9162_v58 = vld [vmem:[#allocation8 + $0x1a0] ss:$8 sps:$4 sm:$0xff]  }
 0x1cb   :  { %1074 = vmatpush1.bf16.msra.mxu0 %v9083_v61  ;;  %v9179_v61 = vld [vmem:[#allocation11 + $0xa4] ss:$8 sps:$4 sm:$0xff]  }
 0x1cc   :  { %990 = vmatpush1.bf16.msra.mxu1 %v9076_v59  ;;  %1075 = vmatprep.subr.bf16.mxu0 %v9086_v62  ;;  %v9171_v59 = vld [vmem:[#allocation11 + $0x90] ss:$8 sps:$4 sm:$0xff]  }
 0x1cd   :  { %991 = vmatprep.subr.bf16.mxu1 %v9078_v60  ;;  %v9170_v60 = vld [vmem:[#allocation8 + $0x1b4] ss:$8 sps:$4 sm:$0xff]   ;;  %v9168_v62 = vld [vmem:[#allocation8 + $0x1b0] ss:$8 sps:$4 sm:$0xff]  }
 0x1cf   :  { %1076 = vmatpush1.bf16.msra.mxu0 %v9089_v5  ;;  %v9174_v5 = vld [vmem:[#allocation8 + $0x1c0] ss:$8 sps:$4 sm:$0xff]  }
 0x1d0   :  { %992 = vmatpush1.bf16.msra.mxu1 %v9082_v0  ;;  %1077 = vmatprep.subr.bf16.mxu0 %v9092_v6  ;;  %v9176_v0 = vld [vmem:[#allocation8 + $0x1c4] ss:$8 sps:$4 sm:$0xff]   ;;  %v9183_v6 = vld [vmem:[#allocation11 + $0xb0] ss:$8 sps:$4 sm:$0xff]  }
 0x1d1   :  { %993 = vmatprep.subr.bf16.mxu1 %v9084_v4  ;;  %v9185_v4 = vld [vmem:[#allocation11 + $0xb4] ss:$8 sps:$4 sm:$0xff]  }
 0x1d3   :  { %1078 = vmatpush1.bf16.msra.mxu0 %v9095_v9  ;;  %v9180_v9 = vld [vmem:[#allocation8 + $0x1d0] ss:$8 sps:$4 sm:$0xff]  }
 0x1d4   :  { %994 = vmatpush1.bf16.msra.mxu1 %v9088_v7  ;;  %1079 = vmatprep.subr.bf16.mxu0 %v9102_v10  ;;  %v9182_v7 = vld [vmem:[#allocation8 + $0x1d4] ss:$8 sps:$4 sm:$0xff]   ;;  %v9189_v10 = vld [vmem:[#allocation11 + $0xc0] ss:$8 sps:$4 sm:$0xff]  }
 0x1d5   :  { %995 = vmatprep.subr.bf16.mxu1 %v9090_v8  ;;  %v9191_v8 = vld [vmem:[#allocation11 + $0xc4] ss:$8 sps:$4 sm:$0xff]  }
 0x1d7   :  { %1080 = vmatpush1.bf16.msra.mxu0 %v9104_v13  ;;  %v9186_v13 = vld [vmem:[#allocation8 + $0x1e0] ss:$8 sps:$4 sm:$0xff]  }
 0x1d8   :  { %996 = vmatpush1.bf16.msra.mxu1 %v9094_v11  ;;  %1081 = vmatprep.subr.bf16.mxu0 %v9108_v14  ;;  %v9188_v11 = vld [vmem:[#allocation8 + $0x1e4] ss:$8 sps:$4 sm:$0xff]   ;;  %v9195_v14 = vld [vmem:[#allocation11 + $0xd0] ss:$8 sps:$4 sm:$0xff]  }
 0x1d9   :  { %1008 = vmatprep.subr.bf16.mxu1 %v9101_v12  ;;  %v9197_v12 = vld [vmem:[#allocation11 + $0xd4] ss:$8 sps:$4 sm:$0xff]  }
 0x1db   :  { %998 = vmatmul.mubr.bf16.vlgmr.msra.gmra.mrb[0].mxu1 %v9096_v15  ;;  %1082 = vmatpush1.bf16.msra.mxu0 %v9110_v18  ;;  %v445_v15 = vlaneseq  ;;  %v9192_v18 = vld [vmem:[#allocation8 + $0x1f0] ss:$8 sps:$4 sm:$0xff]  }
 0x1dc   :  { %1009 = vmatpush1.bf16.msra.mxu1 %v9099_v16  ;;  %1329 = vmatprep.subr.bf16.mxu0 %v9119_v19  ;;  %v9194_v16 = vld [vmem:[#allocation8 + $0x1f4] ss:$8 sps:$4 sm:$0xff]  }
 0x1dd   :  { %1010 = vmatprep.subr.bf16.mxu1 %v9107_v17  ;;  %1040 = vmatprep.mubr.bf16.mxu1 %v9200_v42  ;;  %v9203_v17 = vld [vmem:[#allocation11 + $0xe4] ss:$8 sps:$4 sm:$0xff]   ;;  %v10753_v19 = vand.u32 127, %v445_v15 }
 0x1de   :  { %1084 = vmatmul.mubr.bf16.vlgmr.msra.gmra.mrb[0].mxu0 %v9114_v21  ;;  %v9206_v21 = vld [vmem:[#allocation11 + $0xf4] ss:$8 sps:$4 sm:$0xff]  }
 0x1df   :  { %1330 = vmatpush1.bf16.msra.mxu0 %v9117_v23  ;;  %12041 = vst [vmem:[#allocation50_spill] sm:$0xff] %v10753_v19  ;;  %v9198_v23 = vld [vmem:[#allocation3 + $0x8] ss:$24 sps:$4 sm:$0xff]  }
 0x1e0   :  { %1011 = vmatpush1.bf16.msra.mxu1 %v9105_v20  ;;  %1331 = vmatprep.subr.bf16.mxu0 %v9125_v24  ;;  %v9201_v20 = vld [vmem:[#allocation11 + $0xe0] ss:$8 sps:$4 sm:$0xff]   ;;  %v1100_v24 = vadd.s32 128, %v10753_v19 }
 0x1e1   :  { %1012 = vmatprep.subr.bf16.mxu1 %v9113_v22 }
 0x1e3   :  { %1332 = vmatpush1.bf16.msra.mxu0 %v9123_v27 }
 0x1e4   :  { %1013 = vmatpush1.bf16.msra.mxu1 %v9111_v25  ;;  %1333 = vmatprep.subr.bf16.mxu0 %v9131_v28  ;;  %v9204_v25 = vld [vmem:[#allocation11 + $0xf0] ss:$8 sps:$4 sm:$0xff]  }
 0x1e5   :  { %1014 = vmatprep.subr.bf16.mxu1 %v9122_v26 }
 0x1e7   :  { %1334 = vmatpush1.bf16.msra.mxu0 %v9129_v31 }
 0x1e8   :  { %1015 = vmatpush1.bf16.msra.mxu1 %v9120_v29  ;;  %1335 = vmatprep.subr.bf16.mxu0 %v9137_v32  ;;  %v10292_v29 = vmov 1.0|1.0   ;;  %v443_v32 = vld [vmem:[#allocation9] sm:$0x3] }
 0x1e9   :  { %1016 = vmatprep.subr.bf16.mxu1 %v9128_v30  ;;  %v10760_v30 = vshrl.u32 %v445_v15, 7 }
 0x1eb   :  { %1336 = vmatpush1.bf16.msra.mxu0 %v9135_v35  ;;  %v10763_v31 = vsub.s32 1, %v10760_v30  ;;  %v10767_v35 = vsub.s32 0, %v10760_v30 }
 0x1ec   :  { %1017 = vmatpush1.bf16.msra.mxu1 %v9126_v33  ;;  %1337 = vmatprep.subr.bf16.mxu0 %v9143_v36 }
 0x1ed   :  { %1018 = vmatprep.subr.bf16.mxu1 %v9134_v34  ;;  %v452_v33 = vrot.slane %v443_v32, %v10763_v31 }
 0x1ef   :  { %1338 = vmatpush1.bf16.msra.mxu0 %v9141_v39 }
 0x1f0   :  { %1019 = vmatpush1.bf16.msra.mxu1 %v9132_v37  ;;  %1339 = vmatprep.subr.bf16.mxu0 %v9149_v40 }
 0x1f1   :  { %1020 = vmatprep.subr.bf16.mxu1 %v9140_v38 }
 0x1f3   :  { %1340 = vmatpush1.bf16.msra.mxu0 %v9147_v44 }
 0x1f4   :  { %1021 = vmatpush1.bf16.msra.mxu1 %v9138_v41  ;;  %1341 = vmatprep.subr.bf16.mxu0 %v9155_v45  ;;  %v448_v41 = vrot.slane %v443_v32, %v10767_v35 }
 0x1f5   :  { %1022 = vmatprep.subr.bf16.mxu1 %v9146_v43 }
 0x1f7   :  { %1342 = vmatpush1.bf16.msra.mxu0 %v9153_v47 }
 0x1f8   :  { %1023 = vmatpush1.bf16.msra.mxu1 %v9144_v46  ;;  %1343 = vmatprep.subr.bf16.mxu0 %v9161_v49 }
 0x1f9   :  { %1024 = vmatprep.subr.bf16.mxu1 %v9152_v48 }
 0x1fb   :  { %1344 = vmatpush1.bf16.msra.mxu0 %v9159_v51 }
 0x1fc   :  { %1025 = vmatpush1.bf16.msra.mxu1 %v9150_v50  ;;  %1345 = vmatprep.subr.bf16.mxu0 %v9167_v53 }
 0x1fd   :  { %1026 = vmatprep.subr.bf16.mxu1 %v9158_v52 }
 0x1ff   :  { %1346 = vmatpush1.bf16.msra.mxu0 %v9165_v55 }
 0x200   :  { %1027 = vmatpush1.bf16.msra.mxu1 %v9156_v54  ;;  %1347 = vmatprep.subr.bf16.mxu0 %v9173_v57 }
 0x201   :  { %1028 = vmatprep.subr.bf16.mxu1 %v9164_v56 }
 0x203   :  { %1348 = vmatpush1.bf16.msra.mxu0 %v9171_v59 }
 0x204   :  { %1029 = vmatpush1.bf16.msra.mxu1 %v9162_v58  ;;  %1349 = vmatprep.subr.bf16.mxu0 %v9179_v61 }
 0x205   :  { %1030 = vmatprep.subr.bf16.mxu1 %v9170_v60 }
 0x207   :  { %1350 = vmatpush1.bf16.msra.mxu0 %v9177_v63 }
 0x208   :  { %1031 = vmatpush1.bf16.msra.mxu1 %v9168_v62  ;;  %1351 = vmatprep.subr.bf16.mxu0 %v9185_v4 }
 0x209   :  { %1032 = vmatprep.subr.bf16.mxu1 %v9176_v0 }
 0x20b   :  { %1352 = vmatpush1.bf16.msra.mxu0 %v9183_v6 }
 0x20c   :  { %1033 = vmatpush1.bf16.msra.mxu1 %v9174_v5  ;;  %1353 = vmatprep.subr.bf16.mxu0 %v9191_v8 }
 0x20d   :  { %1034 = vmatprep.subr.bf16.mxu1 %v9182_v7 }
 0x20f   :  { %1354 = vmatpush1.bf16.msra.mxu0 %v9189_v10 }
 0x210   :  { %1035 = vmatpush1.bf16.msra.mxu1 %v9180_v9  ;;  %1355 = vmatprep.subr.bf16.mxu0 %v9197_v12 }
 0x211   :  { %1036 = vmatprep.subr.bf16.mxu1 %v9188_v11 }
 0x213   :  { %1356 = vmatpush1.bf16.msra.mxu0 %v9195_v14  ;;  %v1377_v14 = vld [vmem:[#allocation14] sm:$0x3] }
 0x214   :  { %1037 = vmatpush1.bf16.msra.mxu1 %v9186_v13  ;;  %1357 = vmatprep.subr.bf16.mxu0 %v9203_v17  ;;  %v1376_v13 = vld [vmem:[#allocation12] sm:$0x3] }
 0x215   :  { %1038 = vmatprep.subr.bf16.mxu1 %v9194_v16  ;;  %v1415_v15 = vrot.slane %v1376_v13, %v10767_v35  ;;  %v1419_v16 = vrot.slane %v1376_v13, %v10763_v31 }
 0x217   :  { %1358 = vmatpush1.bf16.msra.mxu0 %v9201_v20  ;;  %v1434_v20 = vrot.slane %v1377_v14, %v10763_v31 }
 0x218   :  { %1039 = vmatpush1.bf16.msra.mxu1 %v9192_v18  ;;  %1359 = vmatprep.subr.bf16.mxu0 %v9206_v21  ;;  %v1430_v18 = vrot.slane %v1377_v14, %v10767_v35 }
 0x21b   :  { %1041 = vmatmul.mubr.bf16.vlgmr.msra.gmra.mrb[0].mxu1 %v9198_v23  ;;  %1360 = vmatpush1.bf16.msra.mxu0 %v9204_v25 }
 0x21f   :  { %v1103_v22 = vpop.permute.xlu0 %1102 }
 0x220   :  { %vm1107_vm0 = vcmp.eq.s32.totalorder %v10753_v19, %v1103_v22  ;;  %vm1108_vm2 = vcmp.eq.s32.totalorder %v1100_v24, %v1103_v22 }
 0x222   :  { %v1115_v26 = vpop.permute.xlu1 %1114 }
 0x223   :  { %vm1119_vm1 = vcmp.eq.s32.totalorder %v10753_v19, %v1115_v26  ;;  %vm1120_vm3 = vcmp.eq.s32.totalorder %v1100_v24, %v1115_v26  ;;  %v1106_v27 = vpop.permute.xlu0 %1105 }
 0x224   :  { %vm1123_vm4 = vmor %vm1107_vm0, %vm1119_vm1  ;;  %vm1109_vm6 = vcmp.eq.s32.totalorder %v10753_v19, %v1106_v27  ;;  %vm1110_vm9 = vcmp.eq.s32.totalorder %v1100_v24, %v1106_v27 }
 0x225   :  { %vm1124_vm5 = vmor %vm1108_vm2, %vm1120_vm3 }
 0x226   :  { %v1118_v28 = vpop.permute.xlu1 %1117 }
 0x227   :  { %vm1121_vm7 = vcmp.eq.s32.totalorder %v10753_v19, %v1118_v28  ;;  %vm1122_vm8 = vcmp.eq.s32.totalorder %v1100_v24, %v1118_v28 }
 0x228   :  { %vm1125_vm10 = vmor %vm1109_vm6, %vm1121_vm7 }
 0x229   :  { %vm1126_vm11 = vmor %vm1110_vm9, %vm1122_vm8 }
 0x22a   :  { %vm8152_vm12 = vmpackc.low %vm1125_vm10, %vm1123_vm4 }
 0x22b   :  { %vm8150_vm13 = vmpackc.low %vm1126_vm11, %vm1124_vm5 }
 0x22c   :  { %8151 = vmatprep.mubr.msk.bf16.mxu0 %vm8150_vm13, %v10292_v29 }
 0x22d   :  { %8153 = vmatmul.mubr.msk.bf16.vlgmr.msra.gmra.mrb[0].mxu0 %vm8152_vm12, %v10292_v29 }
 0x2ee   :  { %v1042_v34 = vpop.f32.mrb[0].mxu1 }
 0x2ef   :  { %v1044_v36 = vpop.f32.mrb[1].mxu1  ;;  %v8885_v42 = vadd.f32 %v1042_v34, %v448_v41 }
 0x2f0   :  { %v8887_v37 = vadd.f32 %v1044_v36, %v452_v33  ;;  %v1046_v38 = vpop.f32.mrb[2].mxu1 }
 0x2f1   :  { %v1048_v39 = vpop.f32.mrb[3].mxu1  ;;  %v8889_v44 = vadd.f32 %v1046_v38, %v448_v41 }
 0x2f2   :  { %v8891_v40 = vadd.f32 %v1048_v39, %v452_v33 }
 0x300   :  { %v1363_v43 = vpop.f32.mrb[0].mxu0 }
 0x301   :  { %v8886_v45 = vadd.f32 %v8885_v42, %v1363_v43  ;;  %v1365_v46 = vpop.f32.mrb[1].mxu0 }
 0x302   :  { %v8888_v47 = vadd.f32 %v8887_v37, %v1365_v46  ;;  %v1367_v48 = vpop.f32.mrb[2].mxu0 }
 0x303   :  { %v8890_v49 = vadd.f32 %v8889_v44, %v1367_v48  ;;  %v1369_v50 = vpop.f32.mrb[3].mxu0 }
 0x304   :  { %v8892_v51 = vadd.f32 %v8891_v40, %v1369_v50  ;;  %v1378_v52 = vadd.f32 %v8888_v47, %v8886_v45 }
 0x306   :  { %1379 = vadd.xlane.f32.xlu0 %v1378_v52  ;;  %v1381_v53 = vadd.f32 %v8892_v51, %v8890_v49 }
 0x308   :  { %1382 = vadd.xlane.f32.xlu1 %v1381_v53 }
 0x393   :  { %v1380_v54 = vpop.xlane.xlu0 %1379 }
 0x394   :  { %v1385_v55 = vmul.f32 0.00390625, %v1380_v54 }
 0x395   :  { %v1383_v56 = vpop.xlane.xlu1 %1382 }
 0x396   :  { %v1387_v57 = vsub.f32 %v8886_v45, %v1385_v55  ;;  %v1388_v58 = vsub.f32 %v8888_v47, %v1385_v55  ;;  %v1386_v59 = vmul.f32 0.00390625, %v1383_v56 }
 0x398   :  { %v1389_v60 = vsub.f32 %v8890_v49, %v1386_v59  ;;  %v1390_v61 = vsub.f32 %v8892_v51, %v1386_v59  ;;  %v1391_v62 = vmul.f32 %v1387_v57, %v1387_v57  ;;  %v1392_v63 = vmul.f32 %v1388_v58, %v1388_v58 }
 0x39a   :  { %v1395_v0 = vadd.f32 %v1392_v63, %v1391_v62  ;;  %v1393_v4 = vmul.f32 %v1389_v60, %v1389_v60  ;;  %v1394_v5 = vmul.f32 %v1390_v61, %v1390_v61 }
 0x39c   :  { %1396 = vadd.xlane.f32.xlu0 %v1395_v0  ;;  %v1398_v6 = vadd.f32 %v1394_v5, %v1393_v4 }
 0x3a0   :  { %1399 = vadd.xlane.f32.xlu0 %v1398_v6 }
 0x429   :  { %v1397_v7 = vpop.xlane.xlu0 %1396 }
 0x42a   :  { %v1401_v8 = vmul.f32 0.00390625, %v1397_v7 }
 0x42c   :  { %v1403_v9 = vadd.f32 1e-05, %v1401_v8 }
 0x42d   :  { %v1400_v10 = vpop.xlane.xlu0 %1399 }
 0x42e   :  { %9207 = vrsqrt.f32 %v1403_v9  ;;  %v1402_v11 = vmul.f32 0.00390625, %v1400_v10 }
 0x430   :  { %v1404_v12 = vadd.f32 1e-05, %v1402_v11 }
 0x432   :  { %9209 = vrsqrt.f32 %v1404_v12 }
 0x438   :  { %v9208_v17 = vpop.eup %9207 }
 0x439   :  { %v1407_v21 = vmul.f32 %v9208_v17, %v1387_v57  ;;  %v1408_v22 = vmul.f32 %v9208_v17, %v1388_v58 }
 0x43b   :  { %v1422_v23 = vmul.f32 %v1415_v15, %v1407_v21  ;;  %v1423_v24 = vmul.f32 %v1419_v16, %v1408_v22 }
 0x43c   :  { %v9210_v25 = vpop.eup %9209 }
 0x43d   :  { %v1437_v26 = vadd.f32 %v1430_v18, %v1422_v23   ;;  %v1438_v27 = vadd.f32 %v1434_v20, %v1423_v24   ;;  %v1409_v28 = vmul.f32 %v9210_v25, %v1389_v60  ;;  %v1410_v29 = vmul.f32 %v9210_v25, %v1390_v61 }
 0x43f   :  { %v1424_v32 = vmul.f32 %v1415_v15, %v1409_v28  ;;  %v1425_v33 = vmul.f32 %v1419_v16, %v1410_v29 }
 0x441   :  { %v1439_v34 = vadd.f32 %v1430_v18, %v1424_v32   ;;  %v1440_v36 = vadd.f32 %v1434_v20, %v1425_v33  }
 0x442 LB: > { %12042 = vst [vmem:[#allocation51_spill] sm:$0xff] %v10242_v36  ;;  %12043 = vst [vmem:[#allocation52_spill] sm:$0xff] %v10246_v34  ;;  %s8881_s26 = smul.u32 3072, %s10258_s17  ;;  %v10802_v37 = vpack.c.bf16 %v10242_v36, %v10250_v27  ;;  %vm4594_vm14 = vcmask 1043456   ;;  %v12045_v2 = vld [vmem:[#allocation48_spill] sm:$0xff]  ;;  %v12046_v3 = vld [vmem:[#allocation49_spill] sm:$0xff]  ;;  %s10258_s17 = sphi %s10782_s17, %s1448_s17   ;;  %v10254_v26 = vphi %v1437_v26, %v12060_v26   ;;  %v10250_v27 = vphi %v1438_v27, %v12059_v27   ;;  %v10246_v34 = vphi %v1439_v34, %v12058_v34   ;;  %v10242_v36 = vphi %v1440_v36, %v12057_v36  }
 0x443   : > { %s1842_s7 = smul.u32 24, %s10258_s17  ;;  %vm4550_vm15 = vcmp.eq.f32.partialorder %v12045_v2, 0.0  ;;  %vm4551_vm0 = vcmp.eq.f32.partialorder %v12046_v3, 0.0  ;;  %vm4566_vm2 = vcmask 64512   ;;  %s8882_s24 = sshll.u32 %s10258_s17, 10 }
 0x444   : > { %3922 = vmatprep.mubr.bf16.mxu0 %v10802_v37  ;;  %4051 = vmatprep.mubr.bf16.mxu1 %v10802_v37  ;;  %s10806_s9 = scalar_lea.vmem [#allocation15], %s8881_s26  ;;  %s11531_s3 = scalar_lea.vmem [#allocation18], %s8882_s24 }
 0x445   : > { %v1458_v38 = vld [vmem:[%s10806_s9] sm:$0xff]  ;;  %v1461_v40 = vld [vmem:[%s10806_s9 + $0x18] sm:$0xff]  ;;  %s11109_s21 = scalar_lea.vmem [#allocation17], %s1842_s7  ;;  %s11682_s18 = sshll.u32 %s10258_s17, 1 }
 0x446   : > { %v1470_v39 = vld [vmem:[%s10806_s9 + $0x60] sm:$0xff]  ;;  %v1473_v42 = vld [vmem:[%s10806_s9 + $0x78] sm:$0xff]  ;;  %s5450_s15 = scalar_lea.vmem [#allocation20], %s11682_s18  ;;  %s8883_s10 = smul.u32 768, %s10258_s17 }
 0x447   : > { %v8156_v41 = vcombine.high %v1458_v38, %v1470_v39  ;;  %v8155_v43 = vcombine.low %v1458_v38, %v1470_v39  ;;  %v1482_v44 = vld [vmem:[%s10806_s9 + $0xc0] sm:$0xff]  ;;  %v8162_v46 = vcombine.high %v1461_v40, %v1473_v42  ;;  %v8161_v47 = vcombine.low %v1461_v40, %v1473_v42  ;;  %v1485_v49 = vld [vmem:[%s10806_s9 + $0xd8] sm:$0xff]  ;;  %s6279_s27 = scalar_lea.vmem [#allocation21], %s11682_s18  ;;  %s6281_s1 = scalar_lea.vmem [#allocation23], %s11682_s18 }
 0x448   : > { %v1494_v45 = vld [vmem:[%s10806_s9 + $0x120] sm:$0xff]  ;;  %v1497_v50 = vld [vmem:[%s10806_s9 + $0x138] sm:$0xff]  ;;  %s11694_s14 = scalar_lea.vmem [#allocation24], %s8883_s10  ;;  %s11759_s25 = scalar_lea.vmem [#allocation27], %s8883_s10 }
 0x449   : > { %v8180_v48 = vcombine.high %v1482_v44, %v1494_v45  ;;  %v1506_v51 = vld [vmem:[%s10806_s9 + $0x180] sm:$0xff]  ;;  %3890 = vmatprep.subr.bf16.mxu0 %v8156_v41  ;;  %v8186_v52 = vcombine.high %v1485_v49, %v1497_v50  ;;  %v1509_v54 = vld [vmem:[%s10806_s9 + $0x198] sm:$0xff]  ;;  %4019 = vmatprep.subr.bf16.mxu1 %v8162_v46  ;;  %v8179_v56 = vcombine.low %v1482_v44, %v1494_v45  ;;  %s6446_s28 = smul.u32 6, %s10258_s17  ;;  %s7205_s6 = scalar_lea.vmem [#allocation29], %s11682_s18 }
 0x44a   : > { %v1518_v53 = vld [vmem:[%s10806_s9 + $0x1e0] sm:$0xff]  ;;  %v1521_v55 = vld [vmem:[%s10806_s9 + $0x1f8] sm:$0xff]  ;;  %3891 = vmatpush1.bf16.msra.mxu0 %v8155_v43  ;;  %4020 = vmatpush1.bf16.msra.mxu1 %v8161_v47  ;;  %v8185_v57 = vcombine.low %v1485_v49, %v1497_v50  ;;  %s7831_s0 = scalar_lea.vmem [#allocation30], %s11682_s18  ;;  %s7833_s23 = scalar_lea.vmem [#allocation32], %s11682_s18 }
 0x44b   : > { %3892 = vmatprep.subr.bf16.mxu0 %v8180_v48  ;;  %v8204_v58 = vcombine.high %v1506_v51, %v1518_v53  ;;  %4021 = vmatprep.subr.bf16.mxu1 %v8186_v52  ;;  %v8210_v59 = vcombine.high %v1509_v54, %v1521_v55  ;;  %v1530_v60 = vld [vmem:[%s10806_s9 + $0x240] sm:$0xff]  ;;  %v1533_v62 = vld [vmem:[%s10806_s9 + $0x258] sm:$0xff]  ;;  %v8203_v0 = vcombine.low %v1506_v51, %v1518_v53  ;;  %s6447_s30 = scalar_lea.vmem [#allocation26], %s6446_s28  ;;  %s1448_s17 = sadd.s32 1, %s10258_s17  }
 0x44c   : > { %v1542_v61 = vld [vmem:[%s10806_s9 + $0x2a0] sm:$0xff]  ;;  %v1545_v63 = vld [vmem:[%s10806_s9 + $0x2b8] sm:$0xff]  ;;  %v8209_v4 = vcombine.low %v1509_v54, %v1521_v55  ;;  %p1445_p6 = scmp.ge.s32.totalorder %s1448_s17, 4  }
 0x44d   : > { %v8228_v5 = vcombine.high %v1530_v60, %v1542_v61  ;;  %v8234_v6 = vcombine.high %v1533_v62, %v1545_v63  ;;  %v1554_v7 = vld [vmem:[%s10806_s9 + $0x300] sm:$0xff]  ;;  %v1557_v9 = vld [vmem:[%s10806_s9 + $0x318] sm:$0xff]  ;;  %v8227_v11 = vcombine.low %v1530_v60, %v1542_v61  ;;  %v8233_v12 = vcombine.low %v1533_v62, %v1545_v63  ;;  %s10294_s20 = smov (%p1445_p6), [#allocation35]  }
 0x44e   : > { %3893 = vmatpush1.bf16.msra.mxu0 %v8179_v56  ;;  %4022 = vmatpush1.bf16.msra.mxu1 %v8185_v57  ;;  %v1566_v8 = vld [vmem:[%s10806_s9 + $0x360] sm:$0xff]  ;;  %v1569_v10 = vld [vmem:[%s10806_s9 + $0x378] sm:$0xff]  ;;  %s7952_s11 = sshll.u32 (%p1445_p6), %s10294_s20, 4  ;;  %vm7941_vm4 = vcmask (%p1445_p6), 1041409   ;;  %vm7944_vm5 = vcmask (%p1445_p6), 58368   ;;  %s7953_s11 = int_to_ptr.vmem [resolvable:$true] %s7952_s11 }
 0x44f   : > { %3894 = vmatprep.subr.bf16.mxu0 %v8204_v58  ;;  %4023 = vmatprep.subr.bf16.mxu1 %v8210_v59  ;;  %v8252_v13 = vcombine.high %v1554_v7, %v1566_v8  ;;  %v8258_v14 = vcombine.high %v1557_v9, %v1569_v10  ;;  %v1578_v15 = vld [vmem:[%s10806_s9 + $0x3c0] sm:$0xff]  ;;  %v1581_v17 = vld [vmem:[%s10806_s9 + $0x3d8] sm:$0xff]  ;;  %v8251_v20 = vcombine.low %v1554_v7, %v1566_v8  ;;  %s10174_s2 = scalar_lea.vmem (%p1445_p6), %s7953_s11, 32  ;;  %p10179_p8 = scmp.lt.s32.totalorder (%p1445_p6), %s7953_s11, %s7953_s11 }
 0x450   : > { %v1590_v16 = vld [vmem:[%s10806_s9 + $0x420] sm:$0xff]  ;;  %v1593_v18 = vld [vmem:[%s10806_s9 + $0x438] sm:$0xff]  ;;  %v8257_v21 = vcombine.low %v1557_v9, %v1569_v10  ;;  %p10175_p7 = scmp.ne.s32.totalorder (%p1445_p6), %s7953_s11, %s10174_s2  ;;  %p10180_p9 = scmp.lt.s32.totalorder (%p1445_p6), %s10174_s2, %s10174_s2 }
 0x451   : > { %v8276_v22 = vcombine.high %v1578_v15, %v1590_v16  ;;  %v8282_v23 = vcombine.high %v1581_v17, %v1593_v18  ;;  %v1602_v24 = vld [vmem:[%s10806_s9 + $0x480] sm:$0xff]  ;;  %v1605_v28 = vld [vmem:[%s10806_s9 + $0x498] sm:$0xff]  ;;  %v8275_v32 = vcombine.low %v1578_v15, %v1590_v16  ;;  %v8281_v33 = vcombine.low %v1581_v17, %v1593_v18 }
 0x452   : > { %3895 = vmatpush1.bf16.msra.mxu0 %v8203_v0  ;;  %4024 = vmatpush1.bf16.msra.mxu1 %v8209_v4  ;;  %v1614_v25 = vld [vmem:[%s10806_s9 + $0x4e0] sm:$0xff]  ;;  %v1617_v29 = vld [vmem:[%s10806_s9 + $0x4f8] sm:$0xff]  ;;  %p10181_p10 = por (%p1445_p6), %p10180_p9, %p10179_p8 }
 0x453   : > { %3896 = vmatprep.subr.bf16.mxu0 %v8228_v5  ;;  %4025 = vmatprep.subr.bf16.mxu1 %v8234_v6  ;;  %v8300_v38 = vcombine.high %v1602_v24, %v1614_v25  ;;  %v8306_v39 = vcombine.high %v1605_v28, %v1617_v29  ;;  %v1626_v40 = vld [vmem:[%s10806_s9 + $0x540] sm:$0xff]  ;;  %v1629_v42 = vld [vmem:[%s10806_s9 + $0x558] sm:$0xff]  ;;  %v8299_v44 = vcombine.low %v1602_v24, %v1614_v25 }
 0x454   : > { %v1638_v41 = vld [vmem:[%s10806_s9 + $0x5a0] sm:$0xff]  ;;  %v1641_v43 = vld [vmem:[%s10806_s9 + $0x5b8] sm:$0xff]  ;;  %v8305_v45 = vcombine.low %v1605_v28, %v1617_v29  ;;  %p10182_p11 = pnand (%p1445_p6), %p10181_p10, %p10175_p7 }
 0x455   : > { %v8324_v46 = vcombine.high %v1626_v40, %v1638_v41  ;;  %v8330_v47 = vcombine.high %v1629_v42, %v1641_v43  ;;  %v1650_v48 = vld [vmem:[%s10806_s9 + $0x600] sm:$0xff]  ;;  %v1653_v50 = vld [vmem:[%s10806_s9 + $0x618] sm:$0xff]  ;;  %v8323_v52 = vcombine.low %v1626_v40, %v1638_v41  ;;  %v8329_v53 = vcombine.low %v1629_v42, %v1641_v43 }
 0x456   : > { %3897 = vmatpush1.bf16.msra.mxu0 %v8227_v11  ;;  %4026 = vmatpush1.bf16.msra.mxu1 %v8233_v12  ;;  %v1662_v49 = vld [vmem:[%s10806_s9 + $0x660] sm:$0xff]  ;;  %v1665_v51 = vld [vmem:[%s10806_s9 + $0x678] sm:$0xff] }
 0x457   : > { %3898 = vmatprep.subr.bf16.mxu0 %v8252_v13  ;;  %4027 = vmatprep.subr.bf16.mxu1 %v8258_v14  ;;  %v8348_v54 = vcombine.high %v1650_v48, %v1662_v49  ;;  %v8354_v55 = vcombine.high %v1653_v50, %v1665_v51  ;;  %v1674_v56 = vld [vmem:[%s10806_s9 + $0x6c0] sm:$0xff]  ;;  %v1677_v58 = vld [vmem:[%s10806_s9 + $0x6d8] sm:$0xff]  ;;  %v8347_v60 = vcombine.low %v1650_v48, %v1662_v49 }
 0x458   : > { %v1686_v57 = vld [vmem:[%s10806_s9 + $0x720] sm:$0xff]  ;;  %v1689_v59 = vld [vmem:[%s10806_s9 + $0x738] sm:$0xff]  ;;  %v8353_v61 = vcombine.low %v1653_v50, %v1665_v51 }
 0x459   : > { %v8372_v62 = vcombine.high %v1674_v56, %v1686_v57  ;;  %v8378_v63 = vcombine.high %v1677_v58, %v1689_v59  ;;  %v1698_v0 = vld [vmem:[%s10806_s9 + $0x780] sm:$0xff]  ;;  %v1701_v5 = vld [vmem:[%s10806_s9 + $0x798] sm:$0xff]  ;;  %v8371_v7 = vcombine.low %v1674_v56, %v1686_v57  ;;  %v8377_v8 = vcombine.low %v1677_v58, %v1689_v59 }
 0x45a   : > { %3899 = vmatpush1.bf16.msra.mxu0 %v8251_v20  ;;  %4028 = vmatpush1.bf16.msra.mxu1 %v8257_v21  ;;  %v1710_v4 = vld [vmem:[%s10806_s9 + $0x7e0] sm:$0xff]  ;;  %v1713_v6 = vld [vmem:[%s10806_s9 + $0x7f8] sm:$0xff] }
 0x45b   : > { %3900 = vmatprep.subr.bf16.mxu0 %v8276_v22  ;;  %4029 = vmatprep.subr.bf16.mxu1 %v8282_v23  ;;  %v8396_v9 = vcombine.high %v1698_v0, %v1710_v4  ;;  %v8402_v10 = vcombine.high %v1701_v5, %v1713_v6  ;;  %v1722_v11 = vld [vmem:[%s10806_s9 + $0x840] sm:$0xff]  ;;  %v1725_v13 = vld [vmem:[%s10806_s9 + $0x858] sm:$0xff]  ;;  %v8395_v15 = vcombine.low %v1698_v0, %v1710_v4 }
 0x45c   : > { %v1734_v12 = vld [vmem:[%s10806_s9 + $0x8a0] sm:$0xff]  ;;  %v1737_v14 = vld [vmem:[%s10806_s9 + $0x8b8] sm:$0xff]  ;;  %v8401_v16 = vcombine.low %v1701_v5, %v1713_v6 }
 0x45d   : > { %v8420_v17 = vcombine.high %v1722_v11, %v1734_v12  ;;  %v8426_v18 = vcombine.high %v1725_v13, %v1737_v14  ;;  %v1746_v20 = vld [vmem:[%s10806_s9 + $0x900] sm:$0xff]  ;;  %v1749_v22 = vld [vmem:[%s10806_s9 + $0x918] sm:$0xff]  ;;  %v8419_v24 = vcombine.low %v1722_v11, %v1734_v12  ;;  %v8425_v25 = vcombine.low %v1725_v13, %v1737_v14  ;;  %v1499_v11 = vld [vmem:[%s10806_s9 + $0x148] sm:$0xff] }
 0x45e   : > { %3901 = vmatpush1.bf16.msra.mxu0 %v8275_v32  ;;  %4030 = vmatpush1.bf16.msra.mxu1 %v8281_v33  ;;  %v1758_v21 = vld [vmem:[%s10806_s9 + $0x960] sm:$0xff]  ;;  %v1761_v23 = vld [vmem:[%s10806_s9 + $0x978] sm:$0xff] }
 0x45f   : > { %3902 = vmatprep.subr.bf16.mxu0 %v8300_v38  ;;  %4031 = vmatprep.subr.bf16.mxu1 %v8306_v39  ;;  %v8444_v28 = vcombine.high %v1746_v20, %v1758_v21  ;;  %v8450_v29 = vcombine.high %v1749_v22, %v1761_v23  ;;  %v1770_v32 = vld [vmem:[%s10806_s9 + $0x9c0] sm:$0xff]  ;;  %v1773_v38 = vld [vmem:[%s10806_s9 + $0x9d8] sm:$0xff]  ;;  %v8443_v40 = vcombine.low %v1746_v20, %v1758_v21  ;;  %v1523_v20 = vld [vmem:[%s10806_s9 + $0x208] sm:$0xff] }
 0x460   : > { %v1782_v33 = vld [vmem:[%s10806_s9 + $0xa20] sm:$0xff]  ;;  %v1785_v39 = vld [vmem:[%s10806_s9 + $0xa38] sm:$0xff]  ;;  %v8449_v41 = vcombine.low %v1749_v22, %v1761_v23 }
 0x461   : > { %v8468_v42 = vcombine.high %v1770_v32, %v1782_v33  ;;  %v8474_v43 = vcombine.high %v1773_v38, %v1785_v39  ;;  %v8467_v48 = vcombine.low %v1770_v32, %v1782_v33  ;;  %v8473_v49 = vcombine.low %v1773_v38, %v1785_v39  ;;  %v1547_v32 = vld [vmem:[%s10806_s9 + $0x2c8] sm:$0xff] }
 0x462   : > { %3903 = vmatpush1.bf16.msra.mxu0 %v8299_v44  ;;  %4032 = vmatpush1.bf16.msra.mxu1 %v8305_v45  ;;  %v1794_v44 = vld [vmem:[%s10806_s9 + $0xa80] sm:$0xff] }
 0x463   : > { %3904 = vmatprep.subr.bf16.mxu0 %v8324_v46  ;;  %4033 = vmatprep.subr.bf16.mxu1 %v8330_v47  ;;  %v1806_v45 = vld [vmem:[%s10806_s9 + $0xae0] sm:$0xff]  ;;  %v1797_v46 = vld [vmem:[%s10806_s9 + $0xa98] sm:$0xff] }
 0x464   : > { %v1809_v47 = vld [vmem:[%s10806_s9 + $0xaf8] sm:$0xff]  ;;  %v8492_v50 = vcombine.high %v1794_v44, %v1806_v45  ;;  %v8491_v56 = vcombine.low %v1794_v44, %v1806_v45  ;;  %v1571_v44 = vld [vmem:[%s10806_s9 + $0x388] sm:$0xff] }
 0x465   : > { %v8498_v51 = vcombine.high %v1797_v46, %v1809_v47  ;;  %v8497_v57 = vcombine.low %v1797_v46, %v1809_v47 }
 0x466   : > { %3905 = vmatpush1.bf16.msra.mxu0 %v8323_v52  ;;  %4034 = vmatpush1.bf16.msra.mxu1 %v8329_v53  ;;  %v1818_v52 = vld [vmem:[%s10806_s9 + $0xb40] sm:$0xff] }
 0x467   : > { %3906 = vmatprep.subr.bf16.mxu0 %v8348_v54  ;;  %4035 = vmatprep.subr.bf16.mxu1 %v8354_v55  ;;  %v1830_v53 = vld [vmem:[%s10806_s9 + $0xba0] sm:$0xff]  ;;  %v1821_v54 = vld [vmem:[%s10806_s9 + $0xb58] sm:$0xff] }
 0x468   : > { %v1833_v55 = vld [vmem:[%s10806_s9 + $0xbb8] sm:$0xff]  ;;  %v8516_v58 = vcombine.high %v1818_v52, %v1830_v53  ;;  %v8515_v0 = vcombine.low %v1818_v52, %v1830_v53  ;;  %v1595_v52 = vld [vmem:[%s10806_s9 + $0x448] sm:$0xff] }
 0x469   : > { %v8522_v59 = vcombine.high %v1821_v54, %v1833_v55  ;;  %v8521_v4 = vcombine.low %v1821_v54, %v1833_v55 }
 0x46a   : > { %3907 = vmatpush1.bf16.msra.mxu0 %v8347_v60  ;;  %4036 = vmatpush1.bf16.msra.mxu1 %v8353_v61  ;;  %v1459_v60 = vld [vmem:[%s10806_s9 + $0x8] sm:$0xff] }
 0x46b   : > { %3908 = vmatprep.subr.bf16.mxu0 %v8372_v62  ;;  %4037 = vmatprep.subr.bf16.mxu1 %v8378_v63  ;;  %v1471_v61 = vld [vmem:[%s10806_s9 + $0x68] sm:$0xff] }
 0x46c   : > { %v1463_v62 = vld [vmem:[%s10806_s9 + $0x28] sm:$0xff]  ;;  %v8158_v5 = vcombine.high %v1459_v60, %v1471_v61  ;;  %v8157_v12 = vcombine.low %v1459_v60, %v1471_v61 }
 0x46d   : > { %v1475_v63 = vld [vmem:[%s10806_s9 + $0x88] sm:$0xff] }
 0x46e   : > { %3909 = vmatpush1.bf16.msra.mxu0 %v8371_v7  ;;  %4038 = vmatpush1.bf16.msra.mxu1 %v8377_v8  ;;  %v8166_v6 = vcombine.high %v1463_v62, %v1475_v63  ;;  %v1483_v7 = vld [vmem:[%s10806_s9 + $0xc8] sm:$0xff]  ;;  %v8165_v13 = vcombine.low %v1463_v62, %v1475_v63 }
 0x46f   : > { %3910 = vmatprep.subr.bf16.mxu0 %v8396_v9  ;;  %4039 = vmatprep.subr.bf16.mxu1 %v8402_v10  ;;  %v1495_v8 = vld [vmem:[%s10806_s9 + $0x128] sm:$0xff]  ;;  %v10880_v9 = vpack.c.bf16 %v10246_v34, %v10254_v26 }
 0x470   : > { %v1487_v10 = vld [vmem:[%s10806_s9 + $0xe8] sm:$0xff]  ;;  %v8182_v14 = vcombine.high %v1483_v7, %v1495_v8  ;;  %v8181_v21 = vcombine.low %v1483_v7, %v1495_v8 }
 0x471   : > { %v8189_v22 = vcombine.low %v1487_v10, %v1499_v11  ;;  %v1619_v60 = vld [vmem:[%s10806_s9 + $0x508] sm:$0xff] }
 0x472   : > { %3911 = vmatpush1.bf16.msra.mxu0 %v8395_v15  ;;  %4040 = vmatpush1.bf16.msra.mxu1 %v8401_v16  ;;  %v8190_v15 = vcombine.high %v1487_v10, %v1499_v11  ;;  %v1507_v16 = vld [vmem:[%s10806_s9 + $0x188] sm:$0xff] }
 0x473   : > { %3912 = vmatprep.subr.bf16.mxu0 %v8420_v17  ;;  %4041 = vmatprep.subr.bf16.mxu1 %v8426_v18  ;;  %v1519_v17 = vld [vmem:[%s10806_s9 + $0x1e8] sm:$0xff] }
 0x474   : > { %v1511_v18 = vld [vmem:[%s10806_s9 + $0x1a8] sm:$0xff]  ;;  %v8206_v23 = vcombine.high %v1507_v16, %v1519_v17  ;;  %v8205_v33 = vcombine.low %v1507_v16, %v1519_v17 }
 0x475   : > { %v8213_v38 = vcombine.low %v1511_v18, %v1523_v20  ;;  %v1643_v7 = vld [vmem:[%s10806_s9 + $0x5c8] sm:$0xff] }
 0x476   : > { %3913 = vmatpush1.bf16.msra.mxu0 %v8419_v24  ;;  %4042 = vmatpush1.bf16.msra.mxu1 %v8425_v25  ;;  %v8214_v24 = vcombine.high %v1511_v18, %v1523_v20  ;;  %v1531_v25 = vld [vmem:[%s10806_s9 + $0x248] sm:$0xff] }
 0x477   : > { %3914 = vmatprep.subr.bf16.mxu0 %v8444_v28  ;;  %4043 = vmatprep.subr.bf16.mxu1 %v8450_v29  ;;  %v1543_v28 = vld [vmem:[%s10806_s9 + $0x2a8] sm:$0xff] }
 0x478   : > { %v1535_v29 = vld [vmem:[%s10806_s9 + $0x268] sm:$0xff]  ;;  %v8230_v39 = vcombine.high %v1531_v25, %v1543_v28  ;;  %v8229_v45 = vcombine.low %v1531_v25, %v1543_v28 }
 0x479   : > { %v8237_v46 = vcombine.low %v1535_v29, %v1547_v32  ;;  %v1667_v16 = vld [vmem:[%s10806_s9 + $0x688] sm:$0xff] }
 0x47a   : > { %3915 = vmatpush1.bf16.msra.mxu0 %v8443_v40  ;;  %4044 = vmatpush1.bf16.msra.mxu1 %v8449_v41  ;;  %v8238_v40 = vcombine.high %v1535_v29, %v1547_v32  ;;  %v1555_v41 = vld [vmem:[%s10806_s9 + $0x308] sm:$0xff] }
 0x47b   : > { %3916 = vmatprep.subr.bf16.mxu0 %v8468_v42  ;;  %4045 = vmatprep.subr.bf16.mxu1 %v8474_v43  ;;  %v1567_v42 = vld [vmem:[%s10806_s9 + $0x368] sm:$0xff] }
 0x47c   : > { %v1559_v43 = vld [vmem:[%s10806_s9 + $0x328] sm:$0xff]  ;;  %v8254_v47 = vcombine.high %v1555_v41, %v1567_v42  ;;  %v8253_v53 = vcombine.low %v1555_v41, %v1567_v42 }
 0x47d   : > { %v8261_v54 = vcombine.low %v1559_v43, %v1571_v44  ;;  %v1691_v25 = vld [vmem:[%s10806_s9 + $0x748] sm:$0xff] }
 0x47e   : > { %3917 = vmatpush1.bf16.msra.mxu0 %v8467_v48  ;;  %4046 = vmatpush1.bf16.msra.mxu1 %v8473_v49  ;;  %v8262_v48 = vcombine.high %v1559_v43, %v1571_v44  ;;  %v1579_v49 = vld [vmem:[%s10806_s9 + $0x3c8] sm:$0xff] }
 0x47f   : > { %3918 = vmatprep.subr.bf16.mxu0 %v8492_v50  ;;  %4047 = vmatprep.subr.bf16.mxu1 %v8498_v51  ;;  %v1591_v50 = vld [vmem:[%s10806_s9 + $0x428] sm:$0xff] }
 0x480   : > { %v1583_v51 = vld [vmem:[%s10806_s9 + $0x3e8] sm:$0xff]  ;;  %v8278_v55 = vcombine.high %v1579_v49, %v1591_v50  ;;  %v8277_v61 = vcombine.low %v1579_v49, %v1591_v50 }
 0x481   : > { %v8285_v62 = vcombine.low %v1583_v51, %v1595_v52  ;;  %v1715_v41 = vld [vmem:[%s10806_s9 + $0x808] sm:$0xff] }
 0x482   : > { %3919 = vmatpush1.bf16.msra.mxu0 %v8491_v56  ;;  %4048 = vmatpush1.bf16.msra.mxu1 %v8497_v57  ;;  %v8286_v56 = vcombine.high %v1583_v51, %v1595_v52  ;;  %v1603_v57 = vld [vmem:[%s10806_s9 + $0x488] sm:$0xff] }
 0x483   : > { %3920 = vmatprep.subr.bf16.mxu0 %v8516_v58  ;;  %4049 = vmatprep.subr.bf16.mxu1 %v8522_v59  ;;  %v1615_v58 = vld [vmem:[%s10806_s9 + $0x4e8] sm:$0xff] }
 0x484   : > { %v1607_v59 = vld [vmem:[%s10806_s9 + $0x4a8] sm:$0xff]  ;;  %v8302_v63 = vcombine.high %v1603_v57, %v1615_v58  ;;  %v8301_v8 = vcombine.low %v1603_v57, %v1615_v58 }
 0x485   : > { %v8309_v10 = vcombine.low %v1607_v59, %v1619_v60  ;;  %v1739_v49 = vld [vmem:[%s10806_s9 + $0x8c8] sm:$0xff] }
 0x486   : > { %3921 = vmatpush1.bf16.msra.mxu0 %v8515_v0  ;;  %4050 = vmatpush1.bf16.msra.mxu1 %v8521_v4  ;;  %v8310_v0 = vcombine.high %v1607_v59, %v1619_v60  ;;  %v1627_v4 = vld [vmem:[%s10806_s9 + $0x548] sm:$0xff] }
 0x487   : > { %3933 = vmatprep.subr.bf16.mxu0 %v8158_v5  ;;  %4105 = vmatprep.subr.bf16.mxu1 %v8166_v6  ;;  %v1639_v5 = vld [vmem:[%s10806_s9 + $0x5a8] sm:$0xff] }
 0x488   : > { %v1631_v6 = vld [vmem:[%s10806_s9 + $0x568] sm:$0xff]  ;;  %v8326_v11 = vcombine.high %v1627_v4, %v1639_v5  ;;  %v8325_v17 = vcombine.low %v1627_v4, %v1639_v5 }
 0x489   : > { %3923 = vmatmul.mubr.bf16.vlgmr.msra.gmra.mrb[0].mxu0 %v10880_v9  ;;  %4052 = vmatmul.mubr.bf16.vlgmr.msra.gmra.mrb[0].mxu1 %v10880_v9  ;;  %v8333_v18 = vcombine.low %v1631_v6, %v1643_v7  ;;  %v1763_v57 = vld [vmem:[%s10806_s9 + $0x988] sm:$0xff] }
 0x48a   : > { %3934 = vmatpush1.bf16.msra.mxu0 %v8157_v12  ;;  %4106 = vmatpush1.bf16.msra.mxu1 %v8165_v13  ;;  %v8334_v12 = vcombine.high %v1631_v6, %v1643_v7  ;;  %v1651_v13 = vld [vmem:[%s10806_s9 + $0x608] sm:$0xff] }
 0x48b   : > { %3935 = vmatprep.subr.bf16.mxu0 %v8182_v14  ;;  %4107 = vmatprep.subr.bf16.mxu1 %v8190_v15  ;;  %v1663_v14 = vld [vmem:[%s10806_s9 + $0x668] sm:$0xff] }
 0x48c   : > { %3965 = vmatprep.mubr.bf16.mxu0 %v10802_v37  ;;  %4137 = vmatprep.mubr.bf16.mxu1 %v10802_v37  ;;  %v1655_v15 = vld [vmem:[%s10806_s9 + $0x628] sm:$0xff]  ;;  %v8350_v20 = vcombine.high %v1651_v13, %v1663_v14  ;;  %v8349_v28 = vcombine.low %v1651_v13, %v1663_v14 }
 0x48d   : > { %v8357_v29 = vcombine.low %v1655_v15, %v1667_v16  ;;  %v1787_v4 = vld [vmem:[%s10806_s9 + $0xa48] sm:$0xff] }
 0x48e   : > { %3936 = vmatpush1.bf16.msra.mxu0 %v8181_v21  ;;  %4108 = vmatpush1.bf16.msra.mxu1 %v8189_v22  ;;  %v8358_v21 = vcombine.high %v1655_v15, %v1667_v16  ;;  %v1675_v22 = vld [vmem:[%s10806_s9 + $0x6c8] sm:$0xff] }
 0x48f   : > { %3937 = vmatprep.subr.bf16.mxu0 %v8206_v23  ;;  %4109 = vmatprep.subr.bf16.mxu1 %v8214_v24  ;;  %v1687_v23 = vld [vmem:[%s10806_s9 + $0x728] sm:$0xff] }
 0x490   : > { %v1679_v24 = vld [vmem:[%s10806_s9 + $0x6e8] sm:$0xff]  ;;  %v8374_v32 = vcombine.high %v1675_v22, %v1687_v23  ;;  %v8373_v42 = vcombine.low %v1675_v22, %v1687_v23 }
 0x491   : > { %v8381_v43 = vcombine.low %v1679_v24, %v1691_v25  ;;  %v1811_v13 = vld [vmem:[%s10806_s9 + $0xb08] sm:$0xff] }
 0x492   : > { %3938 = vmatpush1.bf16.msra.mxu0 %v8205_v33  ;;  %4110 = vmatpush1.bf16.msra.mxu1 %v8213_v38  ;;  %v8382_v33 = vcombine.high %v1679_v24, %v1691_v25  ;;  %v1699_v38 = vld [vmem:[%s10806_s9 + $0x788] sm:$0xff] }
 0x493   : > { %3939 = vmatprep.subr.bf16.mxu0 %v8230_v39  ;;  %4111 = vmatprep.subr.bf16.mxu1 %v8238_v40  ;;  %v1711_v39 = vld [vmem:[%s10806_s9 + $0x7e8] sm:$0xff] }
 0x494   : > { %v1703_v40 = vld [vmem:[%s10806_s9 + $0x7a8] sm:$0xff]  ;;  %v8398_v44 = vcombine.high %v1699_v38, %v1711_v39  ;;  %v8397_v50 = vcombine.low %v1699_v38, %v1711_v39  ;;  %v1477_v38 = vld [vmem:[%s10806_s9 + $0x98] sm:$0xff] }
 0x495   : > { %v8405_v51 = vcombine.low %v1703_v40, %v1715_v41  ;;  %v1835_v22 = vld [vmem:[%s10806_s9 + $0xbc8] sm:$0xff] }
 0x496   : > { %3940 = vmatpush1.bf16.msra.mxu0 %v8229_v45  ;;  %4112 = vmatpush1.bf16.msra.mxu1 %v8237_v46  ;;  %v8406_v45 = vcombine.high %v1703_v40, %v1715_v41  ;;  %v1723_v46 = vld [vmem:[%s10806_s9 + $0x848] sm:$0xff] }
 0x497   : > { %3941 = vmatprep.subr.bf16.mxu0 %v8254_v47  ;;  %4113 = vmatprep.subr.bf16.mxu1 %v8262_v48  ;;  %v1735_v47 = vld [vmem:[%s10806_s9 + $0x8a8] sm:$0xff] }
 0x498   : > { %v1727_v48 = vld [vmem:[%s10806_s9 + $0x868] sm:$0xff]  ;;  %v8422_v52 = vcombine.high %v1723_v46, %v1735_v47  ;;  %v8421_v58 = vcombine.low %v1723_v46, %v1735_v47  ;;  %v1501_v46 = vld [vmem:[%s10806_s9 + $0x158] sm:$0xff] }
 0x499   : > { %v8429_v59 = vcombine.low %v1727_v48, %v1739_v49 }
 0x49a   : > { %3942 = vmatpush1.bf16.msra.mxu0 %v8253_v53  ;;  %4114 = vmatpush1.bf16.msra.mxu1 %v8261_v54  ;;  %v8430_v53 = vcombine.high %v1727_v48, %v1739_v49  ;;  %v1747_v54 = vld [vmem:[%s10806_s9 + $0x908] sm:$0xff] }
 0x49b   : > { %3943 = vmatprep.subr.bf16.mxu0 %v8278_v55  ;;  %4115 = vmatprep.subr.bf16.mxu1 %v8286_v56  ;;  %v1759_v55 = vld [vmem:[%s10806_s9 + $0x968] sm:$0xff] }
 0x49c   : > { %v1751_v56 = vld [vmem:[%s10806_s9 + $0x928] sm:$0xff]  ;;  %v8446_v60 = vcombine.high %v1747_v54, %v1759_v55  ;;  %v8445_v5 = vcombine.low %v1747_v54, %v1759_v55  ;;  %v1525_v54 = vld [vmem:[%s10806_s9 + $0x218] sm:$0xff] }
 0x49d   : > { %v8453_v6 = vcombine.low %v1751_v56, %v1763_v57 }
 0x49e   : > { %3944 = vmatpush1.bf16.msra.mxu0 %v8277_v61  ;;  %4116 = vmatpush1.bf16.msra.mxu1 %v8285_v62  ;;  %v8454_v61 = vcombine.high %v1751_v56, %v1763_v57  ;;  %v1771_v62 = vld [vmem:[%s10806_s9 + $0x9c8] sm:$0xff] }
 0x49f   : > { %3945 = vmatprep.subr.bf16.mxu0 %v8302_v63  ;;  %4117 = vmatprep.subr.bf16.mxu1 %v8310_v0  ;;  %v1783_v63 = vld [vmem:[%s10806_s9 + $0xa28] sm:$0xff] }
 0x4a0   : > { %v1775_v0 = vld [vmem:[%s10806_s9 + $0x9e8] sm:$0xff]  ;;  %v8470_v7 = vcombine.high %v1771_v62, %v1783_v63  ;;  %v8469_v14 = vcombine.low %v1771_v62, %v1783_v63  ;;  %v1549_v62 = vld [vmem:[%s10806_s9 + $0x2d8] sm:$0xff] }
 0x4a1   : > { %v8477_v15 = vcombine.low %v1775_v0, %v1787_v4 }
 0x4a2   : > { %3946 = vmatpush1.bf16.msra.mxu0 %v8301_v8  ;;  %4118 = vmatpush1.bf16.msra.mxu1 %v8309_v10  ;;  %v8478_v8 = vcombine.high %v1775_v0, %v1787_v4  ;;  %v1795_v10 = vld [vmem:[%s10806_s9 + $0xa88] sm:$0xff] }
 0x4a3   : > { %3947 = vmatprep.subr.bf16.mxu0 %v8326_v11  ;;  %4119 = vmatprep.subr.bf16.mxu1 %v8334_v12  ;;  %v1807_v11 = vld [vmem:[%s10806_s9 + $0xae8] sm:$0xff] }
 0x4a4   : > { %v1799_v12 = vld [vmem:[%s10806_s9 + $0xaa8] sm:$0xff]  ;;  %v8494_v16 = vcombine.high %v1795_v10, %v1807_v11  ;;  %v8493_v23 = vcombine.low %v1795_v10, %v1807_v11  ;;  %v1573_v10 = vld [vmem:[%s10806_s9 + $0x398] sm:$0xff] }
 0x4a5   : > { %v8501_v24 = vcombine.low %v1799_v12, %v1811_v13 }
 0x4a6   : > { %3948 = vmatpush1.bf16.msra.mxu0 %v8325_v17  ;;  %4120 = vmatpush1.bf16.msra.mxu1 %v8333_v18  ;;  %v8502_v17 = vcombine.high %v1799_v12, %v1811_v13  ;;  %v1819_v18 = vld [vmem:[%s10806_s9 + $0xb48] sm:$0xff] }
 0x4a7   : > { %3949 = vmatprep.subr.bf16.mxu0 %v8350_v20  ;;  %4121 = vmatprep.subr.bf16.mxu1 %v8358_v21  ;;  %v1831_v20 = vld [vmem:[%s10806_s9 + $0xba8] sm:$0xff] }
 0x4a8   : > { %v1823_v21 = vld [vmem:[%s10806_s9 + $0xb68] sm:$0xff]  ;;  %v8518_v25 = vcombine.high %v1819_v18, %v1831_v20  ;;  %v8517_v39 = vcombine.low %v1819_v18, %v1831_v20  ;;  %v1597_v18 = vld [vmem:[%s10806_s9 + $0x458] sm:$0xff] }
 0x4a9   : > { %v8525_v40 = vcombine.low %v1823_v21, %v1835_v22 }
 0x4aa   : > { %3950 = vmatpush1.bf16.msra.mxu0 %v8349_v28  ;;  %4122 = vmatpush1.bf16.msra.mxu1 %v8357_v29  ;;  %v8526_v28 = vcombine.high %v1823_v21, %v1835_v22  ;;  %v1460_v29 = vld [vmem:[%s10806_s9 + $0x10] sm:$0xff] }
 0x4ab   : > { %3951 = vmatprep.subr.bf16.mxu0 %v8374_v32  ;;  %4123 = vmatprep.subr.bf16.mxu1 %v8382_v33  ;;  %v1472_v32 = vld [vmem:[%s10806_s9 + $0x70] sm:$0xff]  ;;  %v1465_v33 = vld [vmem:[%s10806_s9 + $0x38] sm:$0xff] }
 0x4ac   : > { %v8160_v41 = vcombine.high %v1460_v29, %v1472_v32  ;;  %v8159_v47 = vcombine.low %v1460_v29, %v1472_v32  ;;  %v8169_v48 = vcombine.low %v1465_v33, %v1477_v38  ;;  %v1621_v29 = vld [vmem:[%s10806_s9 + $0x518] sm:$0xff] }
 0x4ae   : > { %3952 = vmatpush1.bf16.msra.mxu0 %v8373_v42  ;;  %4124 = vmatpush1.bf16.msra.mxu1 %v8381_v43  ;;  %v8170_v42 = vcombine.high %v1465_v33, %v1477_v38  ;;  %v1484_v43 = vld [vmem:[%s10806_s9 + $0xd0] sm:$0xff] }
 0x4af   : > { %3953 = vmatprep.subr.bf16.mxu0 %v8398_v44  ;;  %4125 = vmatprep.subr.bf16.mxu1 %v8406_v45  ;;  %v1496_v44 = vld [vmem:[%s10806_s9 + $0x130] sm:$0xff]  ;;  %v1489_v45 = vld [vmem:[%s10806_s9 + $0xf8] sm:$0xff] }
 0x4b0   : > { %v8184_v49 = vcombine.high %v1484_v43, %v1496_v44  ;;  %v8183_v55 = vcombine.low %v1484_v43, %v1496_v44  ;;  %v8193_v56 = vcombine.low %v1489_v45, %v1501_v46  ;;  %v1645_v43 = vld [vmem:[%s10806_s9 + $0x5d8] sm:$0xff] }
 0x4b2   : > { %3954 = vmatpush1.bf16.msra.mxu0 %v8397_v50  ;;  %4126 = vmatpush1.bf16.msra.mxu1 %v8405_v51  ;;  %v8194_v50 = vcombine.high %v1489_v45, %v1501_v46  ;;  %v1508_v51 = vld [vmem:[%s10806_s9 + $0x190] sm:$0xff] }
 0x4b3   : > { %3955 = vmatprep.subr.bf16.mxu0 %v8422_v52  ;;  %4127 = vmatprep.subr.bf16.mxu1 %v8430_v53  ;;  %v1520_v52 = vld [vmem:[%s10806_s9 + $0x1f0] sm:$0xff]  ;;  %v1513_v53 = vld [vmem:[%s10806_s9 + $0x1b8] sm:$0xff] }
 0x4b4   : > { %v8208_v57 = vcombine.high %v1508_v51, %v1520_v52  ;;  %v8207_v63 = vcombine.low %v1508_v51, %v1520_v52  ;;  %v8217_v0 = vcombine.low %v1513_v53, %v1525_v54  ;;  %v1669_v51 = vld [vmem:[%s10806_s9 + $0x698] sm:$0xff] }
 0x4b6   : > { %3956 = vmatpush1.bf16.msra.mxu0 %v8421_v58  ;;  %4128 = vmatpush1.bf16.msra.mxu1 %v8429_v59  ;;  %v8218_v58 = vcombine.high %v1513_v53, %v1525_v54  ;;  %v1532_v59 = vld [vmem:[%s10806_s9 + $0x250] sm:$0xff] }
 0x4b7   : > { %3957 = vmatprep.subr.bf16.mxu0 %v8446_v60  ;;  %4129 = vmatprep.subr.bf16.mxu1 %v8454_v61  ;;  %v1544_v60 = vld [vmem:[%s10806_s9 + $0x2b0] sm:$0xff]  ;;  %v1537_v61 = vld [vmem:[%s10806_s9 + $0x278] sm:$0xff] }
 0x4b8   : > { %v8232_v4 = vcombine.high %v1532_v59, %v1544_v60  ;;  %v8231_v11 = vcombine.low %v1532_v59, %v1544_v60  ;;  %v8241_v12 = vcombine.low %v1537_v61, %v1549_v62  ;;  %v1693_v59 = vld [vmem:[%s10806_s9 + $0x758] sm:$0xff] }
 0x4ba   : > { %3958 = vmatpush1.bf16.msra.mxu0 %v8445_v5  ;;  %4130 = vmatpush1.bf16.msra.mxu1 %v8453_v6  ;;  %v8242_v5 = vcombine.high %v1537_v61, %v1549_v62  ;;  %v1556_v6 = vld [vmem:[%s10806_s9 + $0x310] sm:$0xff] }
 0x4bb   : > { %3959 = vmatprep.subr.bf16.mxu0 %v8470_v7  ;;  %4131 = vmatprep.subr.bf16.mxu1 %v8478_v8  ;;  %v1568_v7 = vld [vmem:[%s10806_s9 + $0x370] sm:$0xff]  ;;  %v1561_v8 = vld [vmem:[%s10806_s9 + $0x338] sm:$0xff] }
 0x4bc   : > { %v8256_v13 = vcombine.high %v1556_v6, %v1568_v7  ;;  %v8255_v20 = vcombine.low %v1556_v6, %v1568_v7  ;;  %v8265_v21 = vcombine.low %v1561_v8, %v1573_v10  ;;  %v1717_v6 = vld [vmem:[%s10806_s9 + $0x818] sm:$0xff] }
 0x4be   : > { %3960 = vmatpush1.bf16.msra.mxu0 %v8469_v14  ;;  %4132 = vmatpush1.bf16.msra.mxu1 %v8477_v15  ;;  %v8266_v14 = vcombine.high %v1561_v8, %v1573_v10  ;;  %v1580_v15 = vld [vmem:[%s10806_s9 + $0x3d0] sm:$0xff] }
 0x4bf   : > { %3961 = vmatprep.subr.bf16.mxu0 %v8494_v16  ;;  %4133 = vmatprep.subr.bf16.mxu1 %v8502_v17  ;;  %v1592_v16 = vld [vmem:[%s10806_s9 + $0x430] sm:$0xff]  ;;  %v1585_v17 = vld [vmem:[%s10806_s9 + $0x3f8] sm:$0xff] }
 0x4c0   : > { %v8280_v22 = vcombine.high %v1580_v15, %v1592_v16  ;;  %v8279_v32 = vcombine.low %v1580_v15, %v1592_v16  ;;  %v8289_v33 = vcombine.low %v1585_v17, %v1597_v18  ;;  %v1741_v15 = vld [vmem:[%s10806_s9 + $0x8d8] sm:$0xff] }
 0x4c2   : > { %3962 = vmatpush1.bf16.msra.mxu0 %v8493_v23  ;;  %4134 = vmatpush1.bf16.msra.mxu1 %v8501_v24  ;;  %v8290_v23 = vcombine.high %v1585_v17, %v1597_v18  ;;  %v1604_v24 = vld [vmem:[%s10806_s9 + $0x490] sm:$0xff] }
 0x4c3   : > { %3963 = vmatprep.subr.bf16.mxu0 %v8518_v25  ;;  %4135 = vmatprep.subr.bf16.mxu1 %v8526_v28  ;;  %v1616_v25 = vld [vmem:[%s10806_s9 + $0x4f0] sm:$0xff]  ;;  %v1609_v28 = vld [vmem:[%s10806_s9 + $0x4b8] sm:$0xff] }
 0x4c4   : > { %v8304_v38 = vcombine.high %v1604_v24, %v1616_v25  ;;  %v8303_v44 = vcombine.low %v1604_v24, %v1616_v25  ;;  %v8313_v45 = vcombine.low %v1609_v28, %v1621_v29  ;;  %v1765_v24 = vld [vmem:[%s10806_s9 + $0x998] sm:$0xff] }
 0x4c6   : > { %3964 = vmatpush1.bf16.msra.mxu0 %v8517_v39  ;;  %4136 = vmatpush1.bf16.msra.mxu1 %v8525_v40  ;;  %v8314_v39 = vcombine.high %v1609_v28, %v1621_v29  ;;  %v1628_v40 = vld [vmem:[%s10806_s9 + $0x550] sm:$0xff] }
 0x4c7   : > { %3976 = vmatprep.subr.bf16.mxu0 %v8160_v41  ;;  %4191 = vmatprep.subr.bf16.mxu1 %v8170_v42  ;;  %v1640_v41 = vld [vmem:[%s10806_s9 + $0x5b0] sm:$0xff]  ;;  %v1633_v42 = vld [vmem:[%s10806_s9 + $0x578] sm:$0xff] }
 0x4c8   : > { %v8328_v46 = vcombine.high %v1628_v40, %v1640_v41  ;;  %v8327_v52 = vcombine.low %v1628_v40, %v1640_v41  ;;  %v8337_v53 = vcombine.low %v1633_v42, %v1645_v43  ;;  %v1789_v40 = vld [vmem:[%s10806_s9 + $0xa58] sm:$0xff] }
 0x4c9   : > { %3966 = vmatmul.mubr.bf16.vlgmr.msra.gmra.mrb[4].mxu0 %v10880_v9  ;;  %4138 = vmatmul.mubr.bf16.vlgmr.msra.gmra.mrb[4].mxu1 %v10880_v9 }
 0x4ca   : > { %3977 = vmatpush1.bf16.msra.mxu0 %v8159_v47  ;;  %4192 = vmatpush1.bf16.msra.mxu1 %v8169_v48  ;;  %v8338_v47 = vcombine.high %v1633_v42, %v1645_v43  ;;  %v1652_v48 = vld [vmem:[%s10806_s9 + $0x610] sm:$0xff] }
 0x4cb   : > { %3978 = vmatprep.subr.bf16.mxu0 %v8184_v49  ;;  %4193 = vmatprep.subr.bf16.mxu1 %v8194_v50  ;;  %v1664_v49 = vld [vmem:[%s10806_s9 + $0x670] sm:$0xff]  ;;  %v1657_v50 = vld [vmem:[%s10806_s9 + $0x638] sm:$0xff] }
 0x4cc   : > { %4008 = vmatprep.mubr.bf16.mxu0 %v10802_v37  ;;  %4223 = vmatprep.mubr.bf16.mxu1 %v10802_v37  ;;  %v8352_v54 = vcombine.high %v1652_v48, %v1664_v49  ;;  %v8351_v60 = vcombine.low %v1652_v48, %v1664_v49  ;;  %v8361_v61 = vcombine.low %v1657_v50, %v1669_v51  ;;  %v1813_v48 = vld [vmem:[%s10806_s9 + $0xb18] sm:$0xff] }
 0x4ce   : > { %3979 = vmatpush1.bf16.msra.mxu0 %v8183_v55  ;;  %4194 = vmatpush1.bf16.msra.mxu1 %v8193_v56  ;;  %v8362_v55 = vcombine.high %v1657_v50, %v1669_v51  ;;  %v1676_v56 = vld [vmem:[%s10806_s9 + $0x6d0] sm:$0xff] }
 0x4cf   : > { %3980 = vmatprep.subr.bf16.mxu0 %v8208_v57  ;;  %4195 = vmatprep.subr.bf16.mxu1 %v8218_v58  ;;  %v1688_v57 = vld [vmem:[%s10806_s9 + $0x730] sm:$0xff]  ;;  %v1681_v58 = vld [vmem:[%s10806_s9 + $0x6f8] sm:$0xff] }
 0x4d0   : > { %v8376_v62 = vcombine.high %v1676_v56, %v1688_v57  ;;  %v8375_v7 = vcombine.low %v1676_v56, %v1688_v57  ;;  %v8385_v8 = vcombine.low %v1681_v58, %v1693_v59  ;;  %v1837_v56 = vld [vmem:[%s10806_s9 + $0xbd8] sm:$0xff] }
 0x4d2   : > { %3981 = vmatpush1.bf16.msra.mxu0 %v8207_v63  ;;  %4196 = vmatpush1.bf16.msra.mxu1 %v8217_v0  ;;  %v8386_v63 = vcombine.high %v1681_v58, %v1693_v59  ;;  %v1700_v0 = vld [vmem:[%s10806_s9 + $0x790] sm:$0xff] }
 0x4d3   : > { %3982 = vmatprep.subr.bf16.mxu0 %v8232_v4  ;;  %4197 = vmatprep.subr.bf16.mxu1 %v8242_v5  ;;  %v1712_v4 = vld [vmem:[%s10806_s9 + $0x7f0] sm:$0xff]  ;;  %v1705_v5 = vld [vmem:[%s10806_s9 + $0x7b8] sm:$0xff] }
 0x4d4   : > { %v8400_v10 = vcombine.high %v1700_v0, %v1712_v4  ;;  %v8399_v16 = vcombine.low %v1700_v0, %v1712_v4  ;;  %v8409_v17 = vcombine.low %v1705_v5, %v1717_v6  ;;  %v1479_v0 = vld [vmem:[%s10806_s9 + $0xa8] sm:$0xff] }
 0x4d6   : > { %3983 = vmatpush1.bf16.msra.mxu0 %v8231_v11  ;;  %4198 = vmatpush1.bf16.msra.mxu1 %v8241_v12  ;;  %v8410_v11 = vcombine.high %v1705_v5, %v1717_v6  ;;  %v1724_v12 = vld [vmem:[%s10806_s9 + $0x850] sm:$0xff] }
 0x4d7   : > { %3984 = vmatprep.subr.bf16.mxu0 %v8256_v13  ;;  %4199 = vmatprep.subr.bf16.mxu1 %v8266_v14  ;;  %v1736_v13 = vld [vmem:[%s10806_s9 + $0x8b0] sm:$0xff]  ;;  %v1729_v14 = vld [vmem:[%s10806_s9 + $0x878] sm:$0xff] }
 0x4d8   : > { %v8424_v18 = vcombine.high %v1724_v12, %v1736_v13  ;;  %v8423_v25 = vcombine.low %v1724_v12, %v1736_v13  ;;  %v8433_v28 = vcombine.low %v1729_v14, %v1741_v15  ;;  %v1503_v12 = vld [vmem:[%s10806_s9 + $0x168] sm:$0xff] }
 0x4da   : > { %3985 = vmatpush1.bf16.msra.mxu0 %v8255_v20  ;;  %4200 = vmatpush1.bf16.msra.mxu1 %v8265_v21  ;;  %v8434_v20 = vcombine.high %v1729_v14, %v1741_v15  ;;  %v1748_v21 = vld [vmem:[%s10806_s9 + $0x910] sm:$0xff] }
 0x4db   : > { %3986 = vmatprep.subr.bf16.mxu0 %v8280_v22  ;;  %4201 = vmatprep.subr.bf16.mxu1 %v8290_v23  ;;  %v1760_v22 = vld [vmem:[%s10806_s9 + $0x970] sm:$0xff]  ;;  %v1753_v23 = vld [vmem:[%s10806_s9 + $0x938] sm:$0xff] }
 0x4dc   : > { %v8448_v29 = vcombine.high %v1748_v21, %v1760_v22  ;;  %v8447_v41 = vcombine.low %v1748_v21, %v1760_v22  ;;  %v8457_v42 = vcombine.low %v1753_v23, %v1765_v24  ;;  %v1527_v21 = vld [vmem:[%s10806_s9 + $0x228] sm:$0xff] }
 0x4de   : > { %3987 = vmatpush1.bf16.msra.mxu0 %v8279_v32  ;;  %4202 = vmatpush1.bf16.msra.mxu1 %v8289_v33  ;;  %v8458_v32 = vcombine.high %v1753_v23, %v1765_v24  ;;  %v1772_v33 = vld [vmem:[%s10806_s9 + $0x9d0] sm:$0xff] }
 0x4df   : > { %3988 = vmatprep.subr.bf16.mxu0 %v8304_v38  ;;  %4203 = vmatprep.subr.bf16.mxu1 %v8314_v39  ;;  %v1784_v38 = vld [vmem:[%s10806_s9 + $0xa30] sm:$0xff]  ;;  %v1777_v39 = vld [vmem:[%s10806_s9 + $0x9f8] sm:$0xff] }
 0x4e0   : > { %v8472_v43 = vcombine.high %v1772_v33, %v1784_v38  ;;  %v8471_v49 = vcombine.low %v1772_v33, %v1784_v38  ;;  %v8481_v50 = vcombine.low %v1777_v39, %v1789_v40  ;;  %v1551_v33 = vld [vmem:[%s10806_s9 + $0x2e8] sm:$0xff] }
 0x4e2   : > { %3989 = vmatpush1.bf16.msra.mxu0 %v8303_v44  ;;  %4204 = vmatpush1.bf16.msra.mxu1 %v8313_v45  ;;  %v8482_v44 = vcombine.high %v1777_v39, %v1789_v40  ;;  %v1796_v45 = vld [vmem:[%s10806_s9 + $0xa90] sm:$0xff] }
 0x4e3   : > { %3990 = vmatprep.subr.bf16.mxu0 %v8328_v46  ;;  %4205 = vmatprep.subr.bf16.mxu1 %v8338_v47  ;;  %v1808_v46 = vld [vmem:[%s10806_s9 + $0xaf0] sm:$0xff]  ;;  %v1801_v47 = vld [vmem:[%s10806_s9 + $0xab8] sm:$0xff] }
 0x4e4   : > { %v8496_v51 = vcombine.high %v1796_v45, %v1808_v46  ;;  %v8495_v57 = vcombine.low %v1796_v45, %v1808_v46  ;;  %v8505_v58 = vcombine.low %v1801_v47, %v1813_v48  ;;  %v1575_v45 = vld [vmem:[%s10806_s9 + $0x3a8] sm:$0xff] }
 0x4e6   : > { %3991 = vmatpush1.bf16.msra.mxu0 %v8327_v52  ;;  %4206 = vmatpush1.bf16.msra.mxu1 %v8337_v53  ;;  %v8506_v52 = vcombine.high %v1801_v47, %v1813_v48  ;;  %v1820_v53 = vld [vmem:[%s10806_s9 + $0xb50] sm:$0xff] }
 0x4e7   : > { %3992 = vmatprep.subr.bf16.mxu0 %v8352_v54  ;;  %4207 = vmatprep.subr.bf16.mxu1 %v8362_v55  ;;  %v1832_v54 = vld [vmem:[%s10806_s9 + $0xbb0] sm:$0xff]  ;;  %v1825_v55 = vld [vmem:[%s10806_s9 + $0xb78] sm:$0xff] }
 0x4e8   : > { %v8520_v59 = vcombine.high %v1820_v53, %v1832_v54  ;;  %v8519_v4 = vcombine.low %v1820_v53, %v1832_v54  ;;  %v8529_v5 = vcombine.low %v1825_v55, %v1837_v56  ;;  %v1599_v53 = vld [vmem:[%s10806_s9 + $0x468] sm:$0xff] }
 0x4ea   : > { %3993 = vmatpush1.bf16.msra.mxu0 %v8351_v60  ;;  %4208 = vmatpush1.bf16.msra.mxu1 %v8361_v61  ;;  %v8530_v60 = vcombine.high %v1825_v55, %v1837_v56  ;;  %v1462_v61 = vld [vmem:[%s10806_s9 + $0x20] sm:$0xff] }
 0x4eb   : > { %3994 = vmatprep.subr.bf16.mxu0 %v8376_v62  ;;  %4209 = vmatprep.subr.bf16.mxu1 %v8386_v63  ;;  %v1474_v62 = vld [vmem:[%s10806_s9 + $0x80] sm:$0xff]  ;;  %v1467_v63 = vld [vmem:[%s10806_s9 + $0x48] sm:$0xff] }
 0x4ec   : > { %v8164_v6 = vcombine.high %v1462_v61, %v1474_v62  ;;  %v8163_v13 = vcombine.low %v1462_v61, %v1474_v62  ;;  %v8173_v14 = vcombine.low %v1467_v63, %v1479_v0  ;;  %v1623_v61 = vld [vmem:[%s10806_s9 + $0x528] sm:$0xff] }
 0x4ee   : > { %3995 = vmatpush1.bf16.msra.mxu0 %v8375_v7  ;;  %4210 = vmatpush1.bf16.msra.mxu1 %v8385_v8  ;;  %v8174_v7 = vcombine.high %v1467_v63, %v1479_v0  ;;  %v1486_v8 = vld [vmem:[%s10806_s9 + $0xe0] sm:$0xff] }
 0x4ef   : > { %3996 = vmatprep.subr.bf16.mxu0 %v8400_v10  ;;  %4211 = vmatprep.subr.bf16.mxu1 %v8410_v11  ;;  %v1498_v10 = vld [vmem:[%s10806_s9 + $0x140] sm:$0xff]  ;;  %v1491_v11 = vld [vmem:[%s10806_s9 + $0x108] sm:$0xff] }
 0x4f0   : > { %v8188_v15 = vcombine.high %v1486_v8, %v1498_v10  ;;  %v8187_v22 = vcombine.low %v1486_v8, %v1498_v10  ;;  %v8197_v23 = vcombine.low %v1491_v11, %v1503_v12  ;;  %v1647_v8 = vld [vmem:[%s10806_s9 + $0x5e8] sm:$0xff] }
 0x4f2   : > { %3997 = vmatpush1.bf16.msra.mxu0 %v8399_v16  ;;  %4212 = vmatpush1.bf16.msra.mxu1 %v8409_v17  ;;  %v8198_v16 = vcombine.high %v1491_v11, %v1503_v12  ;;  %v1510_v17 = vld [vmem:[%s10806_s9 + $0x1a0] sm:$0xff] }
 0x4f3   : > { %3998 = vmatprep.subr.bf16.mxu0 %v8424_v18  ;;  %4213 = vmatprep.subr.bf16.mxu1 %v8434_v20  ;;  %v1522_v18 = vld [vmem:[%s10806_s9 + $0x200] sm:$0xff]  ;;  %v1515_v20 = vld [vmem:[%s10806_s9 + $0x1c8] sm:$0xff] }
 0x4f4   : > { %v8212_v24 = vcombine.high %v1510_v17, %v1522_v18  ;;  %v8211_v38 = vcombine.low %v1510_v17, %v1522_v18  ;;  %v8221_v39 = vcombine.low %v1515_v20, %v1527_v21  ;;  %v1671_v17 = vld [vmem:[%s10806_s9 + $0x6a8] sm:$0xff] }
 0x4f6   : > { %3999 = vmatpush1.bf16.msra.mxu0 %v8423_v25  ;;  %4214 = vmatpush1.bf16.msra.mxu1 %v8433_v28  ;;  %v8222_v25 = vcombine.high %v1515_v20, %v1527_v21  ;;  %v1534_v28 = vld [vmem:[%s10806_s9 + $0x260] sm:$0xff] }
 0x4f7   : > { %4000 = vmatprep.subr.bf16.mxu0 %v8448_v29  ;;  %4215 = vmatprep.subr.bf16.mxu1 %v8458_v32  ;;  %v1546_v29 = vld [vmem:[%s10806_s9 + $0x2c0] sm:$0xff]  ;;  %v1539_v32 = vld [vmem:[%s10806_s9 + $0x288] sm:$0xff] }
 0x4f8   : > { %v8236_v40 = vcombine.high %v1534_v28, %v1546_v29  ;;  %v8235_v46 = vcombine.low %v1534_v28, %v1546_v29  ;;  %v8245_v47 = vcombine.low %v1539_v32, %v1551_v33  ;;  %v1695_v28 = vld [vmem:[%s10806_s9 + $0x768] sm:$0xff] }
 0x4fa   : > { %4001 = vmatpush1.bf16.msra.mxu0 %v8447_v41  ;;  %4216 = vmatpush1.bf16.msra.mxu1 %v8457_v42  ;;  %v8246_v41 = vcombine.high %v1539_v32, %v1551_v33  ;;  %v1558_v42 = vld [vmem:[%s10806_s9 + $0x320] sm:$0xff] }
 0x4fb   : > { %4002 = vmatprep.subr.bf16.mxu0 %v8472_v43  ;;  %4217 = vmatprep.subr.bf16.mxu1 %v8482_v44  ;;  %v1570_v43 = vld [vmem:[%s10806_s9 + $0x380] sm:$0xff]  ;;  %v1563_v44 = vld [vmem:[%s10806_s9 + $0x348] sm:$0xff] }
 0x4fc   : > { %v8260_v48 = vcombine.high %v1558_v42, %v1570_v43  ;;  %v8259_v54 = vcombine.low %v1558_v42, %v1570_v43  ;;  %v8269_v55 = vcombine.low %v1563_v44, %v1575_v45  ;;  %v1719_v42 = vld [vmem:[%s10806_s9 + $0x828] sm:$0xff] }
 0x4fe   : > { %4003 = vmatpush1.bf16.msra.mxu0 %v8471_v49  ;;  %4218 = vmatpush1.bf16.msra.mxu1 %v8481_v50  ;;  %v8270_v49 = vcombine.high %v1563_v44, %v1575_v45  ;;  %v1582_v50 = vld [vmem:[%s10806_s9 + $0x3e0] sm:$0xff] }
 0x4ff   : > { %4004 = vmatprep.subr.bf16.mxu0 %v8496_v51  ;;  %4219 = vmatprep.subr.bf16.mxu1 %v8506_v52  ;;  %v1594_v51 = vld [vmem:[%s10806_s9 + $0x440] sm:$0xff]  ;;  %v1587_v52 = vld [vmem:[%s10806_s9 + $0x408] sm:$0xff] }
 0x500   : > { %v8284_v56 = vcombine.high %v1582_v50, %v1594_v51  ;;  %v8283_v62 = vcombine.low %v1582_v50, %v1594_v51  ;;  %v8293_v63 = vcombine.low %v1587_v52, %v1599_v53  ;;  %v1743_v50 = vld [vmem:[%s10806_s9 + $0x8e8] sm:$0xff] }
 0x502   : > { %4005 = vmatpush1.bf16.msra.mxu0 %v8495_v57  ;;  %4220 = vmatpush1.bf16.msra.mxu1 %v8505_v58  ;;  %v8294_v57 = vcombine.high %v1587_v52, %v1599_v53  ;;  %v1606_v58 = vld [vmem:[%s10806_s9 + $0x4a0] sm:$0xff] }
 0x503   : > { %4006 = vmatprep.subr.bf16.mxu0 %v8520_v59  ;;  %4221 = vmatprep.subr.bf16.mxu1 %v8530_v60  ;;  %v1618_v59 = vld [vmem:[%s10806_s9 + $0x500] sm:$0xff]  ;;  %v1611_v60 = vld [vmem:[%s10806_s9 + $0x4c8] sm:$0xff] }
 0x504   : > { %v8308_v0 = vcombine.high %v1606_v58, %v1618_v59  ;;  %v8307_v10 = vcombine.low %v1606_v58, %v1618_v59  ;;  %v8317_v11 = vcombine.low %v1611_v60, %v1623_v61  ;;  %v1767_v58 = vld [vmem:[%s10806_s9 + $0x9a8] sm:$0xff] }
 0x506   : > { %4007 = vmatpush1.bf16.msra.mxu0 %v8519_v4  ;;  %4222 = vmatpush1.bf16.msra.mxu1 %v8529_v5  ;;  %v8318_v4 = vcombine.high %v1611_v60, %v1623_v61  ;;  %v1630_v5 = vld [vmem:[%s10806_s9 + $0x560] sm:$0xff] }
 0x507   : > { %4062 = vmatprep.subr.bf16.mxu0 %v8164_v6  ;;  %4277 = vmatprep.subr.bf16.mxu1 %v8174_v7  ;;  %v1642_v6 = vld [vmem:[%s10806_s9 + $0x5c0] sm:$0xff]  ;;  %v1635_v7 = vld [vmem:[%s10806_s9 + $0x588] sm:$0xff] }
 0x508   : > { %v8332_v12 = vcombine.high %v1630_v5, %v1642_v6  ;;  %v8331_v18 = vcombine.low %v1630_v5, %v1642_v6  ;;  %v8341_v20 = vcombine.low %v1635_v7, %v1647_v8  ;;  %v1791_v5 = vld [vmem:[%s10806_s9 + $0xa68] sm:$0xff] }
 0x509   : > { %4009 = vmatmul.mubr.bf16.vlgmr.msra.gmra.mrb[8].mxu0 %v10880_v9  ;;  %4224 = vmatmul.mubr.bf16.vlgmr.msra.gmra.mrb[8].mxu1 %v10880_v9 }
 0x50a   : > { %4063 = vmatpush1.bf16.msra.mxu0 %v8163_v13  ;;  %4278 = vmatpush1.bf16.msra.mxu1 %v8173_v14  ;;  %v8342_v13 = vcombine.high %v1635_v7, %v1647_v8  ;;  %v1654_v14 = vld [vmem:[%s10806_s9 + $0x620] sm:$0xff] }
 0x50b   : > { %4064 = vmatprep.subr.bf16.mxu0 %v8188_v15  ;;  %4279 = vmatprep.subr.bf16.mxu1 %v8198_v16  ;;  %v1666_v15 = vld [vmem:[%s10806_s9 + $0x680] sm:$0xff]  ;;  %v1659_v16 = vld [vmem:[%s10806_s9 + $0x648] sm:$0xff] }
 0x50c   : > { %4094 = vmatprep.mubr.bf16.mxu0 %v10802_v37  ;;  %4309 = vmatprep.mubr.bf16.mxu1 %v10802_v37  ;;  %v8356_v21 = vcombine.high %v1654_v14, %v1666_v15  ;;  %v8355_v29 = vcombine.low %v1654_v14, %v1666_v15  ;;  %v8365_v32 = vcombine.low %v1659_v16, %v1671_v17  ;;  %v1815_v14 = vld [vmem:[%s10806_s9 + $0xb28] sm:$0xff] }
 0x50e   : > { %4065 = vmatpush1.bf16.msra.mxu0 %v8187_v22  ;;  %4280 = vmatpush1.bf16.msra.mxu1 %v8197_v23  ;;  %v8366_v22 = vcombine.high %v1659_v16, %v1671_v17  ;;  %v1678_v23 = vld [vmem:[%s10806_s9 + $0x6e0] sm:$0xff] }
 0x50f   : > { %4066 = vmatprep.subr.bf16.mxu0 %v8212_v24  ;;  %4281 = vmatprep.subr.bf16.mxu1 %v8222_v25  ;;  %v1690_v24 = vld [vmem:[%s10806_s9 + $0x740] sm:$0xff]  ;;  %v1683_v25 = vld [vmem:[%s10806_s9 + $0x708] sm:$0xff] }
 0x510   : > { %v8380_v33 = vcombine.high %v1678_v23, %v1690_v24  ;;  %v8379_v43 = vcombine.low %v1678_v23, %v1690_v24  ;;  %v8389_v44 = vcombine.low %v1683_v25, %v1695_v28  ;;  %v1839_v23 = vld [vmem:[%s10806_s9 + $0xbe8] sm:$0xff] }
 0x512   : > { %4067 = vmatpush1.bf16.msra.mxu0 %v8211_v38  ;;  %4282 = vmatpush1.bf16.msra.mxu1 %v8221_v39  ;;  %v8390_v38 = vcombine.high %v1683_v25, %v1695_v28  ;;  %v1702_v39 = vld [vmem:[%s10806_s9 + $0x7a0] sm:$0xff] }
 0x513   : > { %4068 = vmatprep.subr.bf16.mxu0 %v8236_v40  ;;  %4283 = vmatprep.subr.bf16.mxu1 %v8246_v41  ;;  %v1714_v40 = vld [vmem:[%s10806_s9 + $0x800] sm:$0xff]  ;;  %v1707_v41 = vld [vmem:[%s10806_s9 + $0x7c8] sm:$0xff] }
 0x514   : > { %v8404_v45 = vcombine.high %v1702_v39, %v1714_v40  ;;  %v8403_v51 = vcombine.low %v1702_v39, %v1714_v40  ;;  %v8413_v52 = vcombine.low %v1707_v41, %v1719_v42  ;;  %v1481_v39 = vld [vmem:[%s10806_s9 + $0xb8] sm:$0xff] }
 0x516   : > { %4069 = vmatpush1.bf16.msra.mxu0 %v8235_v46  ;;  %4284 = vmatpush1.bf16.msra.mxu1 %v8245_v47  ;;  %v8414_v46 = vcombine.high %v1707_v41, %v1719_v42  ;;  %v1726_v47 = vld [vmem:[%s10806_s9 + $0x860] sm:$0xff] }
 0x517   : > { %4070 = vmatprep.subr.bf16.mxu0 %v8260_v48  ;;  %4285 = vmatprep.subr.bf16.mxu1 %v8270_v49  ;;  %v1738_v48 = vld [vmem:[%s10806_s9 + $0x8c0] sm:$0xff]  ;;  %v1731_v49 = vld [vmem:[%s10806_s9 + $0x888] sm:$0xff] }
 0x518   : > { %v8428_v53 = vcombine.high %v1726_v47, %v1738_v48  ;;  %v8427_v59 = vcombine.low %v1726_v47, %v1738_v48  ;;  %v8437_v60 = vcombine.low %v1731_v49, %v1743_v50  ;;  %v1505_v47 = vld [vmem:[%s10806_s9 + $0x178] sm:$0xff] }
 0x51a   : > { %4071 = vmatpush1.bf16.msra.mxu0 %v8259_v54  ;;  %4286 = vmatpush1.bf16.msra.mxu1 %v8269_v55  ;;  %v8438_v54 = vcombine.high %v1731_v49, %v1743_v50  ;;  %v1750_v55 = vld [vmem:[%s10806_s9 + $0x920] sm:$0xff] }
 0x51b   : > { %4072 = vmatprep.subr.bf16.mxu0 %v8284_v56  ;;  %4287 = vmatprep.subr.bf16.mxu1 %v8294_v57  ;;  %v1762_v56 = vld [vmem:[%s10806_s9 + $0x980] sm:$0xff]  ;;  %v1755_v57 = vld [vmem:[%s10806_s9 + $0x948] sm:$0xff] }
 0x51c   : > { %v8452_v61 = vcombine.high %v1750_v55, %v1762_v56  ;;  %v8451_v6 = vcombine.low %v1750_v55, %v1762_v56  ;;  %v8461_v7 = vcombine.low %v1755_v57, %v1767_v58  ;;  %v1529_v55 = vld [vmem:[%s10806_s9 + $0x238] sm:$0xff] }
 0x51e   : > { %4073 = vmatpush1.bf16.msra.mxu0 %v8283_v62  ;;  %4288 = vmatpush1.bf16.msra.mxu1 %v8293_v63  ;;  %v8462_v62 = vcombine.high %v1755_v57, %v1767_v58  ;;  %v1774_v63 = vld [vmem:[%s10806_s9 + $0x9e0] sm:$0xff] }
 0x51f   : > { %4074 = vmatprep.subr.bf16.mxu0 %v8308_v0  ;;  %4289 = vmatprep.subr.bf16.mxu1 %v8318_v4  ;;  %v1786_v0 = vld [vmem:[%s10806_s9 + $0xa40] sm:$0xff]  ;;  %v1779_v4 = vld [vmem:[%s10806_s9 + $0xa08] sm:$0xff] }
 0x520   : > { %v8476_v8 = vcombine.high %v1774_v63, %v1786_v0  ;;  %v8475_v15 = vcombine.low %v1774_v63, %v1786_v0  ;;  %v8485_v16 = vcombine.low %v1779_v4, %v1791_v5  ;;  %v1553_v63 = vld [vmem:[%s10806_s9 + $0x2f8] sm:$0xff] }
 0x522   : > { %4075 = vmatpush1.bf16.msra.mxu0 %v8307_v10  ;;  %4290 = vmatpush1.bf16.msra.mxu1 %v8317_v11  ;;  %v8486_v10 = vcombine.high %v1779_v4, %v1791_v5  ;;  %v1798_v11 = vld [vmem:[%s10806_s9 + $0xaa0] sm:$0xff] }
 0x523   : > { %4076 = vmatprep.subr.bf16.mxu0 %v8332_v12  ;;  %4291 = vmatprep.subr.bf16.mxu1 %v8342_v13  ;;  %v1810_v12 = vld [vmem:[%s10806_s9 + $0xb00] sm:$0xff]  ;;  %v1803_v13 = vld [vmem:[%s10806_s9 + $0xac8] sm:$0xff] }
 0x524   : > { %v8500_v17 = vcombine.high %v1798_v11, %v1810_v12  ;;  %v8499_v24 = vcombine.low %v1798_v11, %v1810_v12  ;;  %v8509_v25 = vcombine.low %v1803_v13, %v1815_v14  ;;  %v1577_v11 = vld [vmem:[%s10806_s9 + $0x3b8] sm:$0xff] }
 0x526   : > { %4077 = vmatpush1.bf16.msra.mxu0 %v8331_v18  ;;  %4292 = vmatpush1.bf16.msra.mxu1 %v8341_v20  ;;  %v8510_v18 = vcombine.high %v1803_v13, %v1815_v14  ;;  %v1822_v20 = vld [vmem:[%s10806_s9 + $0xb60] sm:$0xff] }
 0x527   : > { %4078 = vmatprep.subr.bf16.mxu0 %v8356_v21  ;;  %4293 = vmatprep.subr.bf16.mxu1 %v8366_v22  ;;  %v1834_v21 = vld [vmem:[%s10806_s9 + $0xbc0] sm:$0xff]  ;;  %v1827_v22 = vld [vmem:[%s10806_s9 + $0xb88] sm:$0xff] }
 0x528   : > { %v8524_v28 = vcombine.high %v1822_v20, %v1834_v21  ;;  %v8523_v40 = vcombine.low %v1822_v20, %v1834_v21  ;;  %v8533_v41 = vcombine.low %v1827_v22, %v1839_v23  ;;  %v1601_v20 = vld [vmem:[%s10806_s9 + $0x478] sm:$0xff] }
 0x52a   : > { %4079 = vmatpush1.bf16.msra.mxu0 %v8355_v29  ;;  %4294 = vmatpush1.bf16.msra.mxu1 %v8365_v32  ;;  %v8534_v29 = vcombine.high %v1827_v22, %v1839_v23  ;;  %v1464_v32 = vld [vmem:[%s10806_s9 + $0x30] sm:$0xff]  ;;  %v11112_v23 = vld [vmem:[%s11109_s21] sm:$0xff] }
 0x52b   : > { %4080 = vmatprep.subr.bf16.mxu0 %v8380_v33  ;;  %4295 = vmatprep.subr.bf16.mxu1 %v8390_v38  ;;  %v1476_v33 = vld [vmem:[%s10806_s9 + $0x90] sm:$0xff]  ;;  %v1469_v38 = vld [vmem:[%s10806_s9 + $0x58] sm:$0xff] }
 0x52c   : > { %v8168_v42 = vcombine.high %v1464_v32, %v1476_v33  ;;  %v8167_v48 = vcombine.low %v1464_v32, %v1476_v33  ;;  %v8177_v49 = vcombine.low %v1469_v38, %v1481_v39  ;;  %v1613_v32 = vld [vmem:[%s10806_s9 + $0x4d8] sm:$0xff] }
 0x52d   : > { %v1625_v33 = vld [vmem:[%s10806_s9 + $0x538] sm:$0xff] }
 0x52e   : > { %4081 = vmatpush1.bf16.msra.mxu0 %v8379_v43  ;;  %4296 = vmatpush1.bf16.msra.mxu1 %v8389_v44  ;;  %v8178_v43 = vcombine.high %v1469_v38, %v1481_v39  ;;  %v1488_v44 = vld [vmem:[%s10806_s9 + $0xf0] sm:$0xff]  ;;  %v11120_v38 = vrot.slane %v11112_v23, %v10763_v31 }
 0x52f   : > { %4082 = vmatprep.subr.bf16.mxu0 %v8404_v45  ;;  %4297 = vmatprep.subr.bf16.mxu1 %v8414_v46  ;;  %v1500_v45 = vld [vmem:[%s10806_s9 + $0x150] sm:$0xff]  ;;  %v1493_v46 = vld [vmem:[%s10806_s9 + $0x118] sm:$0xff] }
 0x530   : > { %v8192_v50 = vcombine.high %v1488_v44, %v1500_v45  ;;  %v8191_v56 = vcombine.low %v1488_v44, %v1500_v45  ;;  %v8201_v57 = vcombine.low %v1493_v46, %v1505_v47  ;;  %v1632_v44 = vld [vmem:[%s10806_s9 + $0x570] sm:$0xff] }
 0x531   : > { %v1644_v45 = vld [vmem:[%s10806_s9 + $0x5d0] sm:$0xff] }
 0x532   : > { %4083 = vmatpush1.bf16.msra.mxu0 %v8403_v51  ;;  %4298 = vmatpush1.bf16.msra.mxu1 %v8413_v52  ;;  %v8202_v51 = vcombine.high %v1493_v46, %v1505_v47  ;;  %v1512_v52 = vld [vmem:[%s10806_s9 + $0x1b0] sm:$0xff]  ;;  %v1637_v47 = vld [vmem:[%s10806_s9 + $0x598] sm:$0xff] }
 0x533   : > { %4084 = vmatprep.subr.bf16.mxu0 %v8428_v53  ;;  %4299 = vmatprep.subr.bf16.mxu1 %v8438_v54  ;;  %v1524_v53 = vld [vmem:[%s10806_s9 + $0x210] sm:$0xff]  ;;  %v1517_v54 = vld [vmem:[%s10806_s9 + $0x1d8] sm:$0xff] }
 0x534   : > { %v8216_v58 = vcombine.high %v1512_v52, %v1524_v53  ;;  %v8215_v0 = vcombine.low %v1512_v52, %v1524_v53  ;;  %v8225_v4 = vcombine.low %v1517_v54, %v1529_v55  ;;  %v8321_v53 = vcombine.low %v1613_v32, %v1625_v33 }
 0x536   : > { %4085 = vmatpush1.bf16.msra.mxu0 %v8427_v59  ;;  %4300 = vmatpush1.bf16.msra.mxu1 %v8437_v60  ;;  %v8226_v59 = vcombine.high %v1517_v54, %v1529_v55  ;;  %v1536_v60 = vld [vmem:[%s10806_s9 + $0x270] sm:$0xff]  ;;  %v8336_v54 = vcombine.high %v1632_v44, %v1644_v45 }
 0x537   : > { %4086 = vmatprep.subr.bf16.mxu0 %v8452_v61  ;;  %4301 = vmatprep.subr.bf16.mxu1 %v8462_v62  ;;  %v1548_v61 = vld [vmem:[%s10806_s9 + $0x2d0] sm:$0xff]  ;;  %v1541_v62 = vld [vmem:[%s10806_s9 + $0x298] sm:$0xff] }
 0x538   : > { %v8240_v5 = vcombine.high %v1536_v60, %v1548_v61  ;;  %v8239_v12 = vcombine.low %v1536_v60, %v1548_v61  ;;  %v8249_v13 = vcombine.low %v1541_v62, %v1553_v63  ;;  %v8335_v60 = vcombine.low %v1632_v44, %v1644_v45 }
 0x53a   : > { %4087 = vmatpush1.bf16.msra.mxu0 %v8451_v6  ;;  %4302 = vmatpush1.bf16.msra.mxu1 %v8461_v7  ;;  %v8250_v6 = vcombine.high %v1541_v62, %v1553_v63  ;;  %v1560_v7 = vld [vmem:[%s10806_s9 + $0x330] sm:$0xff] }
 0x53b   : > { %4088 = vmatprep.subr.bf16.mxu0 %v8476_v8  ;;  %4303 = vmatprep.subr.bf16.mxu1 %v8486_v10  ;;  %v1572_v8 = vld [vmem:[%s10806_s9 + $0x390] sm:$0xff]  ;;  %v1565_v10 = vld [vmem:[%s10806_s9 + $0x358] sm:$0xff] }
 0x53c   : > { %v8264_v14 = vcombine.high %v1560_v7, %v1572_v8  ;;  %v8263_v21 = vcombine.low %v1560_v7, %v1572_v8  ;;  %v8273_v22 = vcombine.low %v1565_v10, %v1577_v11 }
 0x53e   : > { %4089 = vmatpush1.bf16.msra.mxu0 %v8475_v15  ;;  %4304 = vmatpush1.bf16.msra.mxu1 %v8485_v16  ;;  %v8274_v15 = vcombine.high %v1565_v10, %v1577_v11  ;;  %v1584_v16 = vld [vmem:[%s10806_s9 + $0x3f0] sm:$0xff] }
 0x53f   : > { %4090 = vmatprep.subr.bf16.mxu0 %v8500_v17  ;;  %4305 = vmatprep.subr.bf16.mxu1 %v8510_v18  ;;  %v1596_v17 = vld [vmem:[%s10806_s9 + $0x450] sm:$0xff]  ;;  %v1589_v18 = vld [vmem:[%s10806_s9 + $0x418] sm:$0xff] }
 0x540   : > { %v8287_v39 = vcombine.low %v1584_v16, %v1596_v17 }
 0x542   : > { %4091 = vmatpush1.bf16.msra.mxu0 %v8499_v24  ;;  %4306 = vmatpush1.bf16.msra.mxu1 %v8509_v25  ;;  %v8288_v24 = vcombine.high %v1584_v16, %v1596_v17  ;;  %v8298_v25 = vcombine.high %v1589_v18, %v1601_v20 }
 0x543   : > { %4092 = vmatprep.subr.bf16.mxu0 %v8524_v28  ;;  %4307 = vmatprep.subr.bf16.mxu1 %v8534_v29  ;;  %v1608_v28 = vld [vmem:[%s10806_s9 + $0x4b0] sm:$0xff] }
 0x544   : > { %v1620_v29 = vld [vmem:[%s10806_s9 + $0x510] sm:$0xff] }
 0x546   : > { %4093 = vmatpush1.bf16.msra.mxu0 %v8523_v40  ;;  %4308 = vmatpush1.bf16.msra.mxu1 %v8533_v41  ;;  %v8297_v40 = vcombine.low %v1589_v18, %v1601_v20  ;;  %v8312_v41 = vcombine.high %v1608_v28, %v1620_v29 }
 0x547   : > { %4148 = vmatprep.subr.bf16.mxu0 %v8168_v42  ;;  %4363 = vmatprep.subr.bf16.mxu1 %v8178_v43  ;;  %v8322_v43 = vcombine.high %v1613_v32, %v1625_v33 }
 0x549   : > { %4095 = vmatmul.mubr.bf16.vlgmr.msra.gmra.mrb[12].mxu0 %v10880_v9  ;;  %4310 = vmatmul.mubr.bf16.vlgmr.msra.gmra.mrb[12].mxu1 %v10880_v9 }
 0x54a   : > { %4149 = vmatpush1.bf16.msra.mxu0 %v8167_v48  ;;  %4364 = vmatpush1.bf16.msra.mxu1 %v8177_v49  ;;  %v1649_v48 = vld [vmem:[%s10806_s9 + $0x5f8] sm:$0xff] }
 0x54b   : > { %4150 = vmatprep.subr.bf16.mxu0 %v8192_v50  ;;  %4365 = vmatprep.subr.bf16.mxu1 %v8202_v51  ;;  %v8311_v51 = vcombine.low %v1608_v28, %v1620_v29  ;;  %v8346_v55 = vcombine.high %v1637_v47, %v1649_v48  ;;  %v8345_v61 = vcombine.low %v1637_v47, %v1649_v48  ;;  %v1776_v48 = vld [vmem:[%s10806_s9 + $0x9f0] sm:$0xff] }
 0x54c   : > { %4395 = vmatprep.mubr.bf16.mxu1 %v10802_v37  ;;  %4180 = vmatprep.mubr.bf16.mxu0 %v10802_v37 }
 0x54e   : > { %4151 = vmatpush1.bf16.msra.mxu0 %v8191_v56  ;;  %4366 = vmatpush1.bf16.msra.mxu1 %v8201_v57  ;;  %v1656_v56 = vld [vmem:[%s10806_s9 + $0x630] sm:$0xff] }
 0x54f   : > { %4152 = vmatprep.subr.bf16.mxu0 %v8216_v58  ;;  %4367 = vmatprep.subr.bf16.mxu1 %v8226_v59  ;;  %v1668_v57 = vld [vmem:[%s10806_s9 + $0x690] sm:$0xff]  ;;  %v1661_v58 = vld [vmem:[%s10806_s9 + $0x658] sm:$0xff] }
 0x550   : > { %v1673_v59 = vld [vmem:[%s10806_s9 + $0x6b8] sm:$0xff]  ;;  %v8360_v62 = vcombine.high %v1656_v56, %v1668_v57  ;;  %v8359_v7 = vcombine.low %v1656_v56, %v1668_v57 }
 0x551   : > { %v8370_v63 = vcombine.high %v1661_v58, %v1673_v59  ;;  %v8369_v8 = vcombine.low %v1661_v58, %v1673_v59  ;;  %v1800_v59 = vld [vmem:[%s10806_s9 + $0xab0] sm:$0xff] }
 0x552   : > { %4153 = vmatpush1.bf16.msra.mxu0 %v8215_v0  ;;  %4368 = vmatpush1.bf16.msra.mxu1 %v8225_v4  ;;  %v1680_v0 = vld [vmem:[%s10806_s9 + $0x6f0] sm:$0xff] }
 0x553   : > { %4154 = vmatprep.subr.bf16.mxu0 %v8240_v5  ;;  %4369 = vmatprep.subr.bf16.mxu1 %v8250_v6  ;;  %v1692_v4 = vld [vmem:[%s10806_s9 + $0x750] sm:$0xff]  ;;  %v1685_v5 = vld [vmem:[%s10806_s9 + $0x718] sm:$0xff] }
 0x554   : > { %v1697_v6 = vld [vmem:[%s10806_s9 + $0x778] sm:$0xff]  ;;  %v8384_v10 = vcombine.high %v1680_v0, %v1692_v4  ;;  %v8383_v16 = vcombine.low %v1680_v0, %v1692_v4 }
 0x555   : > { %v8394_v11 = vcombine.high %v1685_v5, %v1697_v6  ;;  %v8393_v17 = vcombine.low %v1685_v5, %v1697_v6  ;;  %v1824_v6 = vld [vmem:[%s10806_s9 + $0xb70] sm:$0xff] }
 0x556   : > { %4155 = vmatpush1.bf16.msra.mxu0 %v8239_v12  ;;  %4370 = vmatpush1.bf16.msra.mxu1 %v8249_v13  ;;  %v1704_v12 = vld [vmem:[%s10806_s9 + $0x7b0] sm:$0xff] }
 0x557   : > { %4156 = vmatprep.subr.bf16.mxu0 %v8264_v14  ;;  %4371 = vmatprep.subr.bf16.mxu1 %v8274_v15  ;;  %v1716_v13 = vld [vmem:[%s10806_s9 + $0x810] sm:$0xff]  ;;  %v1709_v14 = vld [vmem:[%s10806_s9 + $0x7d8] sm:$0xff] }
 0x558   : > { %v1721_v15 = vld [vmem:[%s10806_s9 + $0x838] sm:$0xff]  ;;  %v8408_v18 = vcombine.high %v1704_v12, %v1716_v13  ;;  %v8407_v28 = vcombine.low %v1704_v12, %v1716_v13 }
 0x559   : > { %v8418_v20 = vcombine.high %v1709_v14, %v1721_v15  ;;  %v8417_v29 = vcombine.low %v1709_v14, %v1721_v15  ;;  %v1466_v15 = vld [vmem:[%s10806_s9 + $0x40] sm:$0xff] }
 0x55a   : > { %4157 = vmatpush1.bf16.msra.mxu0 %v8263_v21  ;;  %4372 = vmatpush1.bf16.msra.mxu1 %v8273_v22  ;;  %v1728_v21 = vld [vmem:[%s10806_s9 + $0x870] sm:$0xff] }
 0x55b   : > { %4158 = vmatprep.subr.bf16.mxu0 %v8288_v24  ;;  %4373 = vmatprep.subr.bf16.mxu1 %v8298_v25  ;;  %v1740_v22 = vld [vmem:[%s10806_s9 + $0x8d0] sm:$0xff]  ;;  %v1733_v24 = vld [vmem:[%s10806_s9 + $0x898] sm:$0xff] }
 0x55c   : > { %v11122_v42 = vpop.f32.mrb[0].mxu0  ;;  %v1745_v25 = vld [vmem:[%s10806_s9 + $0x8f8] sm:$0xff]  ;;  %v8432_v32 = vcombine.high %v1728_v21, %v1740_v22  ;;  %v8431_v44 = vcombine.low %v1728_v21, %v1740_v22  ;;  %v1490_v22 = vld [vmem:[%s10806_s9 + $0x100] sm:$0xff] }
 0x55d   : > { %v3926_v46 = vpop.f32.mrb[1].mxu0  ;;  %v8442_v33 = vcombine.high %v1733_v24, %v1745_v25  ;;  %v8441_v45 = vcombine.low %v1733_v24, %v1745_v25  ;;  %v1502_v24 = vld [vmem:[%s10806_s9 + $0x160] sm:$0xff] }
 0x55e   : > { %v11129_v49 = vadd.f32 %v3926_v46, %v11120_v38  ;;  %v11131_v50 = vpop.f32.mrb[2].mxu0  ;;  %4159 = vmatpush1.bf16.msra.mxu0 %v8287_v39  ;;  %4374 = vmatpush1.bf16.msra.mxu1 %v8297_v40  ;;  %v1752_v39 = vld [vmem:[%s10806_s9 + $0x930] sm:$0xff] }
 0x55f   : > { %v11133_v52 = vpop.f32.mrb[3].mxu0  ;;  %4160 = vmatprep.subr.bf16.mxu0 %v8312_v41  ;;  %4375 = vmatprep.subr.bf16.mxu1 %v8322_v43  ;;  %v1764_v40 = vld [vmem:[%s10806_s9 + $0x990] sm:$0xff]  ;;  %v1757_v41 = vld [vmem:[%s10806_s9 + $0x958] sm:$0xff] }
 0x560   : > { %v1769_v43 = vld [vmem:[%s10806_s9 + $0x9b8] sm:$0xff]  ;;  %v8456_v46 = vcombine.high %v1752_v39, %v1764_v40 }
 0x561   : > { %v8466_v47 = vcombine.high %v1757_v41, %v1769_v43  ;;  %v8465_v56 = vcombine.low %v1757_v41, %v1769_v43  ;;  %v1538_v43 = vld [vmem:[%s10806_s9 + $0x280] sm:$0xff] }
 0x562   : > { %4161 = vmatpush1.bf16.msra.mxu0 %v8311_v51  ;;  %4376 = vmatpush1.bf16.msra.mxu1 %v8321_v53  ;;  %v1788_v51 = vld [vmem:[%s10806_s9 + $0xa50] sm:$0xff]  ;;  %v1781_v53 = vld [vmem:[%s10806_s9 + $0xa18] sm:$0xff] }
 0x563   : > { %4162 = vmatprep.subr.bf16.mxu0 %v8336_v54  ;;  %4377 = vmatprep.subr.bf16.mxu1 %v8346_v55  ;;  %v1793_v54 = vld [vmem:[%s10806_s9 + $0xa78] sm:$0xff]  ;;  %v8455_v55 = vcombine.low %v1752_v39, %v1764_v40  ;;  %v8480_v57 = vcombine.high %v1776_v48, %v1788_v51  ;;  %v11177_v39 = vpop.f32.mrb[0].mxu1 }
 0x564   : > { %v8490_v58 = vcombine.high %v1781_v53, %v1793_v54  ;;  %v8489_v0 = vcombine.low %v1781_v53, %v1793_v54  ;;  %v11179_v41 = vpop.f32.mrb[1].mxu1  ;;  %v1574_v53 = vld [vmem:[%s10806_s9 + $0x3a0] sm:$0xff] }
 0x566   : > { %4163 = vmatpush1.bf16.msra.mxu0 %v8335_v60  ;;  %4378 = vmatpush1.bf16.msra.mxu1 %v8345_v61  ;;  %v1812_v60 = vld [vmem:[%s10806_s9 + $0xb10] sm:$0xff]  ;;  %v1805_v61 = vld [vmem:[%s10806_s9 + $0xad8] sm:$0xff] }
 0x567   : > { %4164 = vmatprep.subr.bf16.mxu0 %v8360_v62  ;;  %4379 = vmatprep.subr.bf16.mxu1 %v8370_v63  ;;  %v1817_v62 = vld [vmem:[%s10806_s9 + $0xb38] sm:$0xff]  ;;  %v8479_v63 = vcombine.low %v1776_v48, %v1788_v51  ;;  %v8504_v4 = vcombine.high %v1800_v59, %v1812_v60  ;;  %v1562_v51 = vld [vmem:[%s10806_s9 + $0x340] sm:$0xff] }
 0x568   : > { %v8514_v5 = vcombine.high %v1805_v61, %v1817_v62  ;;  %v8513_v12 = vcombine.low %v1805_v61, %v1817_v62  ;;  %v1622_v61 = vld [vmem:[%s10806_s9 + $0x520] sm:$0xff] }
 0x56a   : > { %4165 = vmatpush1.bf16.msra.mxu0 %v8359_v7  ;;  %4380 = vmatpush1.bf16.msra.mxu1 %v8369_v8  ;;  %v1836_v7 = vld [vmem:[%s10806_s9 + $0xbd0] sm:$0xff]  ;;  %v1829_v8 = vld [vmem:[%s10806_s9 + $0xb98] sm:$0xff] }
 0x56b   : > { %4166 = vmatprep.subr.bf16.mxu0 %v8384_v10  ;;  %4381 = vmatprep.subr.bf16.mxu1 %v8394_v11  ;;  %v1841_v10 = vld [vmem:[%s10806_s9 + $0xbf8] sm:$0xff]  ;;  %v8503_v11 = vcombine.low %v1800_v59, %v1812_v60  ;;  %v8528_v13 = vcombine.high %v1824_v6, %v1836_v7  ;;  %v1610_v60 = vld [vmem:[%s10806_s9 + $0x4c0] sm:$0xff] }
 0x56c   : > { %v8538_v14 = vcombine.high %v1829_v8, %v1841_v10 }
 0x56e   : > { %4167 = vmatpush1.bf16.msra.mxu0 %v8383_v16  ;;  %4382 = vmatpush1.bf16.msra.mxu1 %v8393_v17  ;;  %v1478_v16 = vld [vmem:[%s10806_s9 + $0xa0] sm:$0xff]  ;;  %v3931_v17 = vadd.f32 %v11133_v52, %v11120_v38 }
 0x56f   : > { %4168 = vmatprep.subr.bf16.mxu0 %v8408_v18  ;;  %4383 = vmatprep.subr.bf16.mxu1 %v8418_v20  ;;  %v8527_v18 = vcombine.low %v1824_v6, %v1836_v7  ;;  %v8537_v20 = vcombine.low %v1829_v8, %v1841_v10  ;;  %v8172_v21 = vcombine.high %v1466_v15, %v1478_v16  ;;  %v1514_v38 = vld [vmem:[%s10806_s9 + $0x1c0] sm:$0xff] }
 0x570   : > { %v4415_v25 = vmul.f32 0.0625, %v3931_v17  ;;  %v1526_v52 = vld [vmem:[%s10806_s9 + $0x220] sm:$0xff]  ;;  %v8315_v8 = vcombine.low %v1610_v60, %v1622_v61 }
 0x571   : > { %v8220_v40 = vcombine.high %v1514_v38, %v1526_v52  ;;  %v1694_v17 = vld [vmem:[%s10806_s9 + $0x760] sm:$0xff] }
 0x572   : > { %4169 = vmatpush1.bf16.msra.mxu0 %v8407_v28  ;;  %4384 = vmatpush1.bf16.msra.mxu1 %v8417_v29  ;;  %v8171_v28 = vcombine.low %v1466_v15, %v1478_v16  ;;  %v8196_v29 = vcombine.high %v1490_v22, %v1502_v24  ;;  %v1682_v16 = vld [vmem:[%s10806_s9 + $0x700] sm:$0xff] }
 0x573   : > { %4170 = vmatprep.subr.bf16.mxu0 %v8432_v32  ;;  %4385 = vmatprep.subr.bf16.mxu1 %v8442_v33  ;;  %v4431_v32 = vpack.c.bf16 %v4415_v25, %v4415_v25  ;;  %v8195_v33 = vcombine.low %v1490_v22, %v1502_v24  ;;  %v1718_v22 = vld [vmem:[%s10806_s9 + $0x820] sm:$0xff]  ;;  %v8387_v24 = vcombine.low %v1682_v16, %v1694_v17 }
 0x576   : > { %4171 = vmatpush1.bf16.msra.mxu0 %v8431_v44  ;;  %4386 = vmatpush1.bf16.msra.mxu1 %v8441_v45  ;;  %v1550_v44 = vld [vmem:[%s10806_s9 + $0x2e0] sm:$0xff]  ;;  %v11184_v45 = vpop.f32.mrb[2].mxu1 }
 0x577   : > { %4172 = vmatprep.subr.bf16.mxu0 %v8456_v46  ;;  %4387 = vmatprep.subr.bf16.mxu1 %v8466_v47  ;;  %v11186_v46 = vpop.f32.mrb[3].mxu1  ;;  %v8219_v47 = vcombine.low %v1514_v38, %v1526_v52  ;;  %v8244_v48 = vcombine.high %v1538_v43, %v1550_v44  ;;  %v8243_v54 = vcombine.low %v1538_v43, %v1550_v44  ;;  %v1754_v44 = vld [vmem:[%s10806_s9 + $0x940] sm:$0xff] }
 0x57a   : > { %4173 = vmatpush1.bf16.msra.mxu0 %v8455_v55  ;;  %4388 = vmatpush1.bf16.msra.mxu1 %v8465_v56  ;;  %v8268_v55 = vcombine.high %v1562_v51, %v1574_v53  ;;  %v1586_v56 = vld [vmem:[%s10806_s9 + $0x400] sm:$0xff] }
 0x57b   : > { %4174 = vmatprep.subr.bf16.mxu0 %v8480_v57  ;;  %4389 = vmatprep.subr.bf16.mxu1 %v8490_v58  ;;  %v1598_v57 = vld [vmem:[%s10806_s9 + $0x460] sm:$0xff]  ;;  %v8267_v58 = vcombine.low %v1562_v51, %v1574_v53 }
 0x57c   : > { %v8292_v59 = vcombine.high %v1586_v56, %v1598_v57  ;;  %v8291_v62 = vcombine.low %v1586_v56, %v1598_v57  ;;  %v1778_v53 = vld [vmem:[%s10806_s9 + $0xa00] sm:$0xff] }
 0x57d   : > { %v1802_v57 = vld [vmem:[%s10806_s9 + $0xac0] sm:$0xff] }
 0x57e   : > { %4175 = vmatpush1.bf16.msra.mxu0 %v8479_v63  ;;  %4390 = vmatpush1.bf16.msra.mxu1 %v8489_v0  ;;  %v8316_v63 = vcombine.high %v1610_v60, %v1622_v61  ;;  %v1826_v61 = vld [vmem:[%s10806_s9 + $0xb80] sm:$0xff] }
 0x57f   : > { %4176 = vmatprep.subr.bf16.mxu0 %v8504_v4  ;;  %4391 = vmatprep.subr.bf16.mxu1 %v8514_v5  ;;  %v1634_v4 = vld [vmem:[%s10806_s9 + $0x580] sm:$0xff] }
 0x580   : > { %v1646_v5 = vld [vmem:[%s10806_s9 + $0x5e0] sm:$0xff] }
 0x582   : > { %4177 = vmatpush1.bf16.msra.mxu0 %v8503_v11  ;;  %4392 = vmatpush1.bf16.msra.mxu1 %v8513_v12  ;;  %v8340_v11 = vcombine.high %v1634_v4, %v1646_v5  ;;  %v1658_v12 = vld [vmem:[%s10806_s9 + $0x640] sm:$0xff] }
 0x583   : > { %4178 = vmatprep.subr.bf16.mxu0 %v8528_v13  ;;  %4393 = vmatprep.subr.bf16.mxu1 %v8538_v14  ;;  %v1670_v13 = vld [vmem:[%s10806_s9 + $0x6a0] sm:$0xff]  ;;  %v8339_v14 = vcombine.low %v1634_v4, %v1646_v5  ;;  %v1468_v5 = vld [vmem:[%s10806_s9 + $0x50] sm:$0xff] }
 0x584   : > { %v8364_v15 = vcombine.high %v1658_v12, %v1670_v13 }
 0x586   : > { %4179 = vmatpush1.bf16.msra.mxu0 %v8527_v18  ;;  %4394 = vmatpush1.bf16.msra.mxu1 %v8537_v20  ;;  %v8363_v18 = vcombine.low %v1658_v12, %v1670_v13  ;;  %v8388_v20 = vcombine.high %v1682_v16, %v1694_v17  ;;  %v1492_v13 = vld [vmem:[%s10806_s9 + $0x110] sm:$0xff] }
 0x587   : > { %4234 = vmatprep.subr.bf16.mxu0 %v8172_v21  ;;  %v1706_v21 = vld [vmem:[%s10806_s9 + $0x7c0] sm:$0xff]  ;;  %v1516_v17 = vld [vmem:[%s10806_s9 + $0x1d0] sm:$0xff] }
 0x588   : > { %v8412_v25 = vcombine.high %v1706_v21, %v1718_v22 }
 0x589   : > { %4181 = vmatmul.mubr.bf16.vlgmr.msra.gmra.mrb[16].mxu0 %v10880_v9  ;;  %4396 = vmatmul.mubr.bf16.vlgmr.msra.gmra.mrb[16].mxu1 %v10880_v9 }
 0x58a   : > { %4235 = vmatpush1.bf16.msra.mxu0 %v8171_v28  ;;  %4542 = vmatprep.mubr.bf16.mxu1 %v4431_v32  ;;  %v1730_v28 = vld [vmem:[%s10806_s9 + $0x880] sm:$0xff]  ;;  %v8411_v32 = vcombine.low %v1706_v21, %v1718_v22  ;;  %v1540_v22 = vld [vmem:[%s10806_s9 + $0x290] sm:$0xff] }
 0x58b   : > { %4236 = vmatprep.subr.bf16.mxu0 %v8196_v29  ;;  %4266 = vmatprep.mubr.bf16.mxu0 %v10802_v37  ;;  %v1742_v29 = vld [vmem:[%s10806_s9 + $0x8e0] sm:$0xff] }
 0x58e   : > { %4237 = vmatpush1.bf16.msra.mxu0 %v8195_v33 }
 0x58f   : > { %4238 = vmatprep.subr.bf16.mxu0 %v8220_v40  ;;  %v8436_v40 = vcombine.high %v1730_v28, %v1742_v29 }
 0x592   : > { %4239 = vmatpush1.bf16.msra.mxu0 %v8219_v47  ;;  %v1766_v47 = vld [vmem:[%s10806_s9 + $0x9a0] sm:$0xff] }
 0x593   : > { %4240 = vmatprep.subr.bf16.mxu0 %v8244_v48  ;;  %v8435_v48 = vcombine.low %v1730_v28, %v1742_v29  ;;  %v8460_v51 = vcombine.high %v1754_v44, %v1766_v47  ;;  %v1564_v29 = vld [vmem:[%s10806_s9 + $0x350] sm:$0xff] }
 0x596   : > { %4241 = vmatpush1.bf16.msra.mxu0 %v8243_v54  ;;  %v1790_v54 = vld [vmem:[%s10806_s9 + $0xa60] sm:$0xff] }
 0x597   : > { %4242 = vmatprep.subr.bf16.mxu0 %v8268_v55  ;;  %v8459_v55 = vcombine.low %v1754_v44, %v1766_v47  ;;  %v8484_v56 = vcombine.high %v1778_v53, %v1790_v54  ;;  %v1600_v47 = vld [vmem:[%s10806_s9 + $0x470] sm:$0xff] }
 0x59a   : > { %4243 = vmatpush1.bf16.msra.mxu0 %v8267_v58  ;;  %v1814_v58 = vld [vmem:[%s10806_s9 + $0xb20] sm:$0xff] }
 0x59b   : > { %4244 = vmatprep.subr.bf16.mxu0 %v8292_v59  ;;  %v8483_v59 = vcombine.low %v1778_v53, %v1790_v54  ;;  %v8508_v60 = vcombine.high %v1802_v57, %v1814_v58  ;;  %v1612_v53 = vld [vmem:[%s10806_s9 + $0x4d0] sm:$0xff] }
 0x59c   : > { %v11194_v0 = vpop.f32.mrb[4].mxu0  ;;  %v11212_v38 = vpop.f32.mrb[4].mxu1  ;;  %v1624_v54 = vld [vmem:[%s10806_s9 + $0x530] sm:$0xff] }
 0x59d   : > { %v11198_v6 = vpop.f32.mrb[5].mxu0  ;;  %v11214_v52 = vpop.f32.mrb[5].mxu1 }
 0x59e   : > { %v11200_v7 = vpop.f32.mrb[6].mxu0  ;;  %4245 = vmatpush1.bf16.msra.mxu0 %v8291_v62  ;;  %v11216_v33 = vpop.f32.mrb[6].mxu1  ;;  %v1838_v62 = vld [vmem:[%s10806_s9 + $0xbe0] sm:$0xff] }
 0x59f   : > { %v11202_v10 = vpop.f32.mrb[7].mxu0  ;;  %4246 = vmatprep.subr.bf16.mxu0 %v8316_v63  ;;  %v11218_v43 = vpop.f32.mrb[7].mxu1  ;;  %v8507_v63 = vcombine.low %v1802_v57, %v1814_v58  ;;  %v8532_v4 = vcombine.high %v1826_v61, %v1838_v62  ;;  %v1636_v58 = vld [vmem:[%s10806_s9 + $0x590] sm:$0xff] }
 0x5a2   : > { %4247 = vmatpush1.bf16.msra.mxu0 %v8315_v8  ;;  %v1480_v8 = vld [vmem:[%s10806_s9 + $0xb0] sm:$0xff] }
 0x5a3   : > { %4248 = vmatprep.subr.bf16.mxu0 %v8340_v11  ;;  %v8531_v11 = vcombine.low %v1826_v61, %v1838_v62  ;;  %v8176_v12 = vcombine.high %v1468_v5, %v1480_v8  ;;  %v8319_v62 = vcombine.low %v1612_v53, %v1624_v54 }
 0x5a6   : > { %4249 = vmatpush1.bf16.msra.mxu0 %v8339_v14  ;;  %v1504_v14 = vld [vmem:[%s10806_s9 + $0x170] sm:$0xff] }
 0x5a7   : > { %4250 = vmatprep.subr.bf16.mxu0 %v8364_v15  ;;  %v8175_v15 = vcombine.low %v1468_v5, %v1480_v8  ;;  %v8200_v16 = vcombine.high %v1492_v13, %v1504_v14  ;;  %v1660_v5 = vld [vmem:[%s10806_s9 + $0x650] sm:$0xff] }
 0x5a8   : > { %v1672_v8 = vld [vmem:[%s10806_s9 + $0x6b0] sm:$0xff] }
 0x5aa   : > { %4251 = vmatpush1.bf16.msra.mxu0 %v8363_v18  ;;  %v1528_v18 = vld [vmem:[%s10806_s9 + $0x230] sm:$0xff] }
 0x5ab   : > { %4252 = vmatprep.subr.bf16.mxu0 %v8388_v20  ;;  %v8199_v20 = vcombine.low %v1492_v13, %v1504_v14  ;;  %v8224_v21 = vcombine.high %v1516_v17, %v1528_v18  ;;  %v8368_v13 = vcombine.high %v1660_v5, %v1672_v8 }
 0x5ae   : > { %4253 = vmatpush1.bf16.msra.mxu0 %v8387_v24  ;;  %v1552_v24 = vld [vmem:[%s10806_s9 + $0x2f0] sm:$0xff] }
 0x5af   : > { %4254 = vmatprep.subr.bf16.mxu0 %v8412_v25  ;;  %v8223_v25 = vcombine.low %v1516_v17, %v1528_v18  ;;  %v8248_v28 = vcombine.high %v1540_v22, %v1552_v24 }
 0x5b2   : > { %4255 = vmatpush1.bf16.msra.mxu0 %v8411_v32  ;;  %v1576_v32 = vld [vmem:[%s10806_s9 + $0x3b0] sm:$0xff] }
 0x5b3   : > { %4256 = vmatprep.subr.bf16.mxu0 %v8436_v40  ;;  %v8247_v40 = vcombine.low %v1540_v22, %v1552_v24  ;;  %v8272_v44 = vcombine.high %v1564_v29, %v1576_v32  ;;  %v1708_v22 = vld [vmem:[%s10806_s9 + $0x7d0] sm:$0xff] }
 0x5b4   : > { %v1720_v24 = vld [vmem:[%s10806_s9 + $0x830] sm:$0xff] }
 0x5b6   : > { %4257 = vmatpush1.bf16.msra.mxu0 %v8435_v48  ;;  %v8271_v48 = vcombine.low %v1564_v29, %v1576_v32  ;;  %v1732_v29 = vld [vmem:[%s10806_s9 + $0x890] sm:$0xff] }
 0x5b7   : > { %4258 = vmatprep.subr.bf16.mxu0 %v8460_v51  ;;  %v1744_v32 = vld [vmem:[%s10806_s9 + $0x8f0] sm:$0xff] }
 0x5ba   : > { %4259 = vmatpush1.bf16.msra.mxu0 %v8459_v55 }
 0x5bb   : > { %4260 = vmatprep.subr.bf16.mxu0 %v8484_v56  ;;  %v8320_v56 = vcombine.high %v1612_v53, %v1624_v54  ;;  %v1780_v53 = vld [vmem:[%s10806_s9 + $0xa10] sm:$0xff] }
 0x5bc   : > { %v1792_v54 = vld [vmem:[%s10806_s9 + $0xa70] sm:$0xff] }
 0x5be   : > { %4261 = vmatpush1.bf16.msra.mxu0 %v8483_v59  ;;  %v1648_v59 = vld [vmem:[%s10806_s9 + $0x5f0] sm:$0xff] }
 0x5bf   : > { %4262 = vmatprep.subr.bf16.mxu0 %v8508_v60 }
 0x5c2   : > { %4263 = vmatpush1.bf16.msra.mxu0 %v8507_v63 }
 0x5c3   : > { %4264 = vmatprep.subr.bf16.mxu0 %v8532_v4  ;;  %v8344_v4 = vcombine.high %v1636_v58, %v1648_v59 }
 0x5c6   : > { %4265 = vmatpush1.bf16.msra.mxu0 %v8531_v11  ;;  %v8343_v11 = vcombine.low %v1636_v58, %v1648_v59  ;;  %v1804_v58 = vld [vmem:[%s10806_s9 + $0xad0] sm:$0xff] }
 0x5c7   : > { %4320 = vmatprep.subr.bf16.mxu0 %v8176_v12  ;;  %v1816_v59 = vld [vmem:[%s10806_s9 + $0xb30] sm:$0xff] }
 0x5c9   : > { %4267 = vmatmul.mubr.bf16.vlgmr.msra.gmra.mrb[20].mxu0 %v10880_v9 }
 0x5ca   : > { %4321 = vmatpush1.bf16.msra.mxu0 %v8175_v15  ;;  %4352 = vmatprep.mubr.bf16.mxu0 %v10802_v37  ;;  %v1588_v37 = vld [vmem:[%s10806_s9 + $0x410] sm:$0xff] }
 0x5cb   : > { %4322 = vmatprep.subr.bf16.mxu0 %v8200_v16  ;;  %v8296_v51 = vcombine.high %v1588_v37, %v1600_v47  ;;  %v8295_v55 = vcombine.low %v1588_v37, %v1600_v47  ;;  %v1684_v15 = vld [vmem:[%s10806_s9 + $0x710] sm:$0xff] }
 0x5cc   : > { %v1696_v16 = vld [vmem:[%s10806_s9 + $0x770] sm:$0xff] }
 0x5cd   : > { %v1756_v37 = vld [vmem:[%s10806_s9 + $0x950] sm:$0xff] }
 0x5ce   : > { %4323 = vmatpush1.bf16.msra.mxu0 %v8199_v20  ;;  %v8367_v20 = vcombine.low %v1660_v5, %v1672_v8  ;;  %v1768_v47 = vld [vmem:[%s10806_s9 + $0x9b0] sm:$0xff] }
 0x5cf   : > { %4324 = vmatprep.subr.bf16.mxu0 %v8224_v21  ;;  %v8392_v21 = vcombine.high %v1684_v15, %v1696_v16  ;;  %v1828_v5 = vld [vmem:[%s10806_s9 + $0xb90] sm:$0xff] }
 0x5d0   : > { %v1840_v8 = vld [vmem:[%s10806_s9 + $0xbf0] sm:$0xff] }
 0x5d2   : > { %4325 = vmatpush1.bf16.msra.mxu0 %v8223_v25  ;;  %v8391_v25 = vcombine.low %v1684_v15, %v1696_v16  ;;  %v8535_v15 = vcombine.low %v1828_v5, %v1840_v8  ;;  %v4407_v16 = vmul.f32 0.0625, %v11129_v49 }
 0x5d3   : > { %4326 = vmatprep.subr.bf16.mxu0 %v8248_v28  ;;  %v8416_v28 = vcombine.high %v1708_v22, %v1720_v24 }
 0x5d6   : > { %4327 = vmatpush1.bf16.msra.mxu0 %v8247_v40  ;;  %v8415_v40 = vcombine.low %v1708_v22, %v1720_v24 }
 0x5d7   : > { %4328 = vmatprep.subr.bf16.mxu0 %v8272_v44  ;;  %v8440_v44 = vcombine.high %v1732_v29, %v1744_v32 }
 0x5da   : > { %4329 = vmatpush1.bf16.msra.mxu0 %v8271_v48  ;;  %v8439_v48 = vcombine.low %v1732_v29, %v1744_v32 }
 0x5db   : > { %4330 = vmatprep.subr.bf16.mxu0 %v8296_v51  ;;  %v8464_v51 = vcombine.high %v1756_v37, %v1768_v47 }
 0x5dc   : > { %v11244_v57 = vpop.f32.mrb[8].mxu0  ;;  %v11256_v12 = vpop.f32.mrb[8].mxu1 }
 0x5dd   : > { %v11248_v60 = vpop.f32.mrb[9].mxu0  ;;  %v11258_v14 = vpop.f32.mrb[9].mxu1 }
 0x5de   : > { %v11250_v61 = vpop.f32.mrb[10].mxu0  ;;  %4331 = vmatpush1.bf16.msra.mxu0 %v8295_v55  ;;  %v11262_v17 = vpop.f32.mrb[10].mxu1  ;;  %v8463_v55 = vcombine.low %v1756_v37, %v1768_v47 }
 0x5df   : > { %v11252_v63 = vpop.f32.mrb[11].mxu0  ;;  %4332 = vmatprep.subr.bf16.mxu0 %v8320_v56  ;;  %v11264_v18 = vpop.f32.mrb[11].mxu1  ;;  %v8488_v56 = vcombine.high %v1780_v53, %v1792_v54 }
 0x5e2   : > { %4333 = vmatpush1.bf16.msra.mxu0 %v8319_v62  ;;  %v8487_v62 = vcombine.low %v1780_v53, %v1792_v54 }
 0x5e3   : > { %4334 = vmatprep.subr.bf16.mxu0 %v8344_v4  ;;  %v8512_v4 = vcombine.high %v1804_v58, %v1816_v59 }
 0x5e6   : > { %4335 = vmatpush1.bf16.msra.mxu0 %v8343_v11  ;;  %v8511_v11 = vcombine.low %v1804_v58, %v1816_v59 }
 0x5e7   : > { %4336 = vmatprep.subr.bf16.mxu0 %v8368_v13  ;;  %v8536_v13 = vcombine.high %v1828_v5, %v1840_v8 }
 0x5ea   : > { %4337 = vmatpush1.bf16.msra.mxu0 %v8367_v20  ;;  %v4423_v20 = vpack.c.bf16 %v4407_v16, %v4407_v16 }
 0x5eb   : > { %4338 = vmatprep.subr.bf16.mxu0 %v8392_v21  ;;  %v11281_v21 = vld [vmem:[%s11109_s21 + $0x8] sm:$0xff] }
 0x5ec   : > { %v1885_v22 = vrot.slane %v11281_v21, %v10767_v35  ;;  %v1889_v24 = vrot.slane %v11281_v21, %v10763_v31 }
 0x5ee   : > { %4339 = vmatpush1.bf16.msra.mxu0 %v8391_v25  ;;  %v1853_v25 = vrot.slane %v11112_v23, %v10767_v35 }
 0x5ef   : > { %4340 = vmatprep.subr.bf16.mxu0 %v8416_v28 }
 0x5f0   : > { %v3929_v53 = vadd.f32 %v11131_v50, %v1853_v25 }
 0x5f2   : > { %4341 = vmatpush1.bf16.msra.mxu0 %v8415_v40  ;;  %v4414_v58 = vmul.f32 0.0625, %v3929_v53 }
 0x5f3   : > { %4342 = vmatprep.subr.bf16.mxu0 %v8440_v44 }
 0x5f4   : > { %v4430_v8 = vpack.c.bf16 %v4414_v58, %v4414_v58 }
 0x5f6   : > { %4343 = vmatpush1.bf16.msra.mxu0 %v8439_v48 }
 0x5f7   : > { %4344 = vmatprep.subr.bf16.mxu0 %v8464_v51 }
 0x5fa   : > { %4345 = vmatpush1.bf16.msra.mxu0 %v8463_v55 }
 0x5fb   : > { %4346 = vmatprep.subr.bf16.mxu0 %v8488_v56 }
 0x5fe   : > { %4347 = vmatpush1.bf16.msra.mxu0 %v8487_v62 }
 0x5ff   : > { %4348 = vmatprep.subr.bf16.mxu0 %v8512_v4 }
 0x602   : > { %4349 = vmatpush1.bf16.msra.mxu0 %v8511_v11 }
 0x603   : > { %4350 = vmatprep.subr.bf16.mxu0 %v8536_v13 }
 0x606   : > { %4351 = vmatpush1.bf16.msra.mxu0 %v8535_v15 }
 0x609   : > { %4353 = vmatmul.mubr.bf16.vlgmr.msra.gmra.mrb[24].mxu0 %v10880_v9  ;;  %v3925_v9 = vadd.f32 %v11122_v42, %v1853_v25 }
 0x60a   : > { %4502 = vmatprep.mubr.bf16.mxu0 %v4423_v20 }
 0x60b   : > { %v4406_v56 = vmul.f32 0.0625, %v3925_v9 }
 0x60d   : > { %v4422_v4 = vpack.c.bf16 %v4406_v56, %v4406_v56 }
 0x61c   : > { %v4096_v28 = vpop.f32.mrb[12].mxu0  ;;  %v11291_v59 = vpop.f32.mrb[12].mxu1 }
 0x61d   : > { %v4097_v29 = vadd.f32 %v4096_v28, %v1885_v22  ;;  %v4098_v32 = vpop.f32.mrb[13].mxu0  ;;  %v11293_v62 = vpop.f32.mrb[13].mxu1  ;;  %v11318_v28 = vld [vmem:[%s11109_s21 + $0x10] sm:$0xff] }
 0x61e   : > { %v4099_v49 = vadd.f32 %v4098_v32, %v1889_v24  ;;  %v4100_v40 = vpop.f32.mrb[14].mxu0  ;;  %v11295_v5 = vpop.f32.mrb[14].mxu1  ;;  %v1917_v32 = vrot.slane %v11318_v28, %v10767_v35 }
 0x61f   : > { %v4101_v44 = vadd.f32 %v4100_v40, %v1885_v22  ;;  %v4102_v37 = vpop.f32.mrb[15].mxu0  ;;  %v4438_v51 = vpack.c.bf16 %v4097_v29, %v4097_v29  ;;  %v11297_v42 = vpop.f32.mrb[15].mxu1  ;;  %v11321_v29 = vsub.s32 3, %v10760_v30  ;;  %v1921_v40 = vrot.slane %v11318_v28, %v10763_v31 }
 0x620   : > { %v4439_v47 = vpack.c.bf16 %v4099_v49, %v4099_v49  ;;  %v4103_v48 = vadd.f32 %v4102_v37, %v1889_v24  ;;  %v12013_v24 = vmov 0  }
 0x621   : > { %v4446_v55 = vpack.c.bf16 %v4101_v44, %v4101_v44  ;;  %12044 = vst [vmem:[#allocation53_spill] sm:$0xff] %v11321_v29  ;;  %v1897_v49 = vrot.slane %v11281_v21, %v11321_v29 }
 0x622   : > { %v4447_v54 = vpack.c.bf16 %v4103_v48, %v4103_v48  ;;  %4470 = vmatprep.subr.bf16.mxu0 %v4439_v47 }
 0x623   : > { %4471 = vmatpush1.bf16.xpose.msra.mxu0 %v4438_v51  ;;  %v4142_v47 = vadd.f32 %v11214_v52, %v1897_v49  ;;  %v4146_v56 = vadd.f32 %v11218_v43, %v1897_v49 }
 0x624   : > { %4510 = vmatprep.subr.bf16.mxu1 %v4447_v54 }
 0x625   : > { %4511 = vmatpush1.bf16.xpose.msra.mxu1 %v4446_v55  ;;  %v4449_v52 = vpack.c.bf16 %v4146_v56, %v4146_v56 }
 0x62a   : > { %4503 = vmatmul.mubr.bf16.vlgmr.msra.gmra.mrb[28].mxu0 %v4422_v4 }
 0x62b   : > { %4633 = vmatprep.mubr.bf16.mxu0 %v12013_v24 }
 0x62c   : > { %4543 = vmatmul.mubr.bf16.vlgmr.msra.gmra.mrb[20].mxu1 %v4430_v8 }
 0x62d   : > { %4683 = vmatprep.mubr.bf16.mxu1 %v12013_v24  ;;  %v4441_v24 = vpack.c.bf16 %v4142_v47, %v4142_v47 }
 0x65c   : > { %v11299_v50 = vpop.f32.mrb[16].mxu0  ;;  %v11307_v16 = vpop.f32.mrb[16].mxu1 }
 0x65d   : > { %v11301_v11 = vpop.f32.mrb[17].mxu0  ;;  %v11309_v20 = vpop.f32.mrb[17].mxu1 }
 0x65e   : > { %v11303_v13 = vpop.f32.mrb[18].mxu0  ;;  %v11311_v22 = vpop.f32.mrb[18].mxu1 }
 0x65f   : > { %v11305_v15 = vpop.f32.mrb[19].mxu0  ;;  %v11315_v25 = vpop.f32.mrb[19].mxu1 }
 0x69c   : > { %v4268_v44 = vpop.f32.mrb[20].mxu0 }
 0x69d   : > { %v4269_v37 = vadd.f32 %v4268_v44, %v1917_v32  ;;  %v4270_v9 = vpop.f32.mrb[21].mxu0 }
 0x69e   : > { %v4271_v48 = vadd.f32 %v4270_v9, %v1921_v40  ;;  %v4272_v51 = vpop.f32.mrb[22].mxu0 }
 0x69f   : > { %v4454_v53 = vpack.c.bf16 %v4269_v37, %v4269_v37  ;;  %v4273_v54 = vadd.f32 %v4272_v51, %v1917_v32  ;;  %v4274_v55 = vpop.f32.mrb[23].mxu0 }
 0x6a0   : > { %v4455_v58 = vpack.c.bf16 %v4271_v48, %v4271_v48  ;;  %v4275_v4 = vadd.f32 %v4274_v55, %v1921_v40 }
 0x6a1   : > { %v4596_v8 = vsel %vm4594_vm14, %v4454_v53, 0  ;;  %v4462_v1 = vpack.c.bf16 %v4273_v54, %v4273_v54 }
 0x6a2   : > { %v4463_v19 = vpack.c.bf16 %v4275_v4, %v4275_v4  ;;  %8539 = vmatprep.subr.msk.bf16.mxu0 %vm4594_vm14, %v4455_v58 }
 0x6a3   : > { %v4646_v44 = vsel %vm4594_vm14, %v4462_v1, 0  ;;  %4602 = vmatpush1.bf16.msra.mxu0 %v4596_v8  ;;  %v12047_v1 = vmov 0  }
 0x6a4   : > { %8541 = vmatprep.subr.msk.bf16.mxu1 %vm4594_vm14, %v4463_v19  ;;  %4692 = vmatprep.subr.bf16.mxu0 %v4441_v24  ;;  %v4552_v37 = vsel %vm4550_vm15, 1, %v12047_v1  ;;  %v4553_v9 = vsel %vm4551_vm0, 1, %v12047_v1 }
 0x6a5   : > { %4652 = vmatpush1.bf16.msra.mxu1 %v4646_v44  ;;  %v4557_v19 = vrot.slane %v4552_v37, %v10767_v35  ;;  %v4561_v24 = vrot.slane %v4553_v9, %v10767_v35 }
 0x6a6   : > { %4732 = vmatprep.subr.bf16.mxu1 %v4449_v52 }
 0x6a7   : > { %vm11349_vm1 = vcmp.eq.s32.totalorder %v4557_v19, 1  ;;  %vm11353_vm3 = vcmp.eq.s32.totalorder %v4561_v24, 1 }
 0x6dc   : > { %v11335_v32 = vpop.f32.mrb[24].mxu0 }
 0x6dd   : > { %v11337_v43 = vpop.f32.mrb[25].mxu0 }
 0x6de   : > { %v11339_v49 = vpop.f32.mrb[26].mxu0 }
 0x6df   : > { %v11341_v40 = vpop.f32.mrb[27].mxu0 }
 0x6fd   : > { %v4504_v48 = vpop.f32.mrb[28].mxu0 }
 0x6fe   : > { %v4564_v53 = vsel %vm11349_vm1, -10000.0, %v4504_v48  ;;  %v4506_v54 = vpop.f32.mrb[29].mxu0 }
 0x6ff   : > { %v4507_v55 = vpop.f32.mrb[30].mxu0  ;;  %v4544_v56 = vpop.f32.mrb[20].mxu1  ;;  %v4567_v58 = vsel %vm4566_vm2, %v4564_v53, -inf }
 0x700   : > { %v4565_v4 = vsel %vm11353_vm3, -10000.0, %v4544_v56  ;;  %v4546_v8 = vpop.f32.mrb[21].mxu1  ;;  %4568 = vmax.xlane.f32.xlu0 %v4567_v58  ;;  %v4508_v44 = vpop.f32.mrb[31].mxu0 }
 0x701   : > { %v4547_v52 = vpop.f32.mrb[22].mxu1  ;;  %v4570_v9 = vsel %vm4566_vm2, %v4565_v4, -inf  ;;  %v1865_v44 = vrot.slane %v11112_v23, %v11321_v29 }
 0x702   : > { %v4548_v37 = vpop.f32.mrb[23].mxu1  ;;  %v11368_v52 = vsub.s32 2, %v10760_v30 }
 0x704   : > { %4571 = vmax.xlane.f32.xlu0 %v4570_v9  ;;  %12052 = vst [vmem:[#allocation54_spill] sm:$0xff] %v11368_v52  ;;  %v1861_v37 = vrot.slane %v11112_v23, %v11368_v52 }
 0x78d   : > { %v4569_v19 = vpop.xlane.xlu0 %4568 }
 0x78e   : > { %v4573_v24 = vsub.f32 %v4564_v53, %v4569_v19 }
 0x790   : > { %v4575_v2 = vmul.f32 1.442695, %v4573_v24  ;;  %v3974_v24 = vadd.f32 %v11202_v10, %v1865_v44 }
 0x791   : > { %v4572_v48 = vpop.xlane.xlu0 %4571 }
 0x792   : > { %9691 = vpow2.f32 %v4575_v2  ;;  %v4574_v54 = vsub.f32 %v4565_v4, %v4572_v48  ;;  %v3970_v2 = vadd.f32 %v11198_v6, %v1865_v44  ;;  %v1893_v4 = vrot.slane %v11281_v21, %v11368_v52 }
 0x794   : > { %v4577_v55 = vmul.f32 1.442695, %v4574_v54  ;;  %v4409_v9 = vmul.f32 0.0625, %v3970_v2  ;;  %v4140_v48 = vadd.f32 %v11212_v38, %v1893_v4  ;;  %v1925_v54 = vrot.slane %v11318_v28, %v11368_v52 }
 0x795   : > { %v4417_v2 = vmul.f32 0.0625, %v3974_v24  ;;  %v4144_v10 = vadd.f32 %v11216_v33, %v1893_v4 }
 0x796   : > { %9693 = vpow2.f32 %v4577_v55  ;;  %v4440_v34 = vpack.c.bf16 %v4140_v48, %v4140_v48  ;;  %v4312_v44 = vadd.f32 %v11291_v59, %v1925_v54  ;;  %v4316_v59 = vadd.f32 %v11295_v5, %v1925_v54 }
 0x797   : > { %v4433_v33 = vpack.c.bf16 %v4417_v2, %v4417_v2  ;;  %v4448_v4 = vpack.c.bf16 %v4144_v10, %v4144_v10 }
 0x798   : > { %v4456_v48 = vpack.c.bf16 %v4312_v44, %v4312_v44 }
 0x79c   : > { %v9692_v3 = vpop.eup %9691 }
 0x79d   : > { %v4579_v36 = vsel %vm4566_vm2, %v9692_v3, 0.0 }
 0x79e   : > { %4580 = vadd.xlane.f32.xlu1 %v4579_v36  ;;  %v1929_v36 = vrot.slane %v11318_v28, %v11321_v29 }
 0x7a0   : > { %v9694_v56 = vpop.eup %9693  ;;  %v4314_v6 = vadd.f32 %v11293_v62, %v1929_v36 }
 0x7a1   : > { %v4582_v58 = vsel %vm4566_vm2, %v9694_v56, 0.0 }
 0x7a2   : > { %4583 = vadd.xlane.f32.xlu1 %v4582_v58  ;;  %v11383_v58 = vsub.s32 5, %v10760_v30  ;;  %v4457_v52 = vpack.c.bf16 %v4314_v6, %v4314_v6 }
 0x7a4   : > { %v1905_v38 = vrot.slane %v11281_v21, %v11383_v58 }
 0x7a6   : > { %v4185_v24 = vadd.f32 %v11301_v11, %v1905_v38 }
 0x82b   : > { %v4581_v8 = vpop.xlane.xlu1 %4580 }
 0x82c   : > { %9695 = vrcp.f32 %v4581_v8  ;;  %v3968_v8 = vadd.f32 %v11194_v0, %v1861_v37 }
 0x82e   : > { %v4408_v0 = vmul.f32 0.0625, %v3968_v8 }
 0x82f   : > { %v4584_v53 = vpop.xlane.xlu1 %4583 }
 0x830   : > { %9697 = vrcp.f32 %v4584_v53  ;;  %v4425_v53 = vpack.c.bf16 %v4409_v9, %v4409_v9  ;;  %v3972_v9 = vadd.f32 %v11200_v7, %v1861_v37  ;;  %v4443_v7 = vpack.c.bf16 %v4185_v24, %v4185_v24 }
 0x836   : > { %v9696_v19 = vpop.eup %9695 }
 0x837   : > { %v4587_v55 = vmul.f32 %v9696_v19, %v9692_v3  ;;  %v4318_v3 = vadd.f32 %v11297_v42, %v1929_v36  ;;  %v4416_v42 = vmul.f32 0.0625, %v3972_v9 }
 0x839   : > { %v4589_v29 = vpack.c.bf16 %v4587_v55, %v4587_v55  ;;  %v4465_v6 = vpack.c.bf16 %v4318_v3, %v4318_v3  ;;  %v4432_v5 = vpack.c.bf16 %v4416_v42, %v4416_v42 }
 0x83a   : > { %v9698_v23 = vpop.eup %9697 }
 0x83b   : > { %v4588_v62 = vmul.f32 %v9698_v23, %v9694_v56  ;;  %8540 = vmatmul.mubr.msk.bf16.vlgmr.msra.gmra.mrb[32].mxu0 %vm4566_vm2, %v4589_v29  ;;  %v4189_v29 = vadd.f32 %v11305_v15, %v1905_v38  ;;  %v4802_v56 = vsel %vm4594_vm14, %v4456_v48, 0 }
 0x83c   : > { %4693 = vmatpush1.bf16.xpose.msra.mxu0 %v4440_v34  ;;  %4724 = vmatprep.mubr.bf16.mxu0 %v4425_v53  ;;  %v4424_v34 = vpack.c.bf16 %v4408_v0, %v4408_v0 }
 0x83d   : > { %8543 = vmatprep.subr.msk.bf16.mxu0 %vm4594_vm14, %v4457_v52  ;;  %v4590_v19 = vpack.c.bf16 %v4588_v62, %v4588_v62  ;;  %v4464_v52 = vpack.c.bf16 %v4316_v59, %v4316_v59  ;;  %v4451_v11 = vpack.c.bf16 %v4189_v29, %v4189_v29 }
 0x83f   : > { %8542 = vmatmul.mubr.msk.bf16.vlgmr.msra.gmra.mrb[24].mxu1 %vm4566_vm2, %v4590_v19  ;;  %v4852_v36 = vsel %vm4594_vm14, %v4464_v52, 0 }
 0x840   : > { %4733 = vmatpush1.bf16.xpose.msra.mxu1 %v4448_v4  ;;  %4764 = vmatprep.mubr.bf16.mxu1 %v4433_v33 }
 0x841   : > { %8545 = vmatprep.subr.msk.bf16.mxu1 %vm4594_vm14, %v4465_v6 }
 0x843   : > { %4725 = vmatmul.mubr.bf16.vlgmr.msra.gmra.mrb[36].mxu0 %v4424_v34 }
 0x844   : > { %4808 = vmatpush1.bf16.msra.mxu0 %v4802_v56  ;;  %4839 = vmatprep.mubr.bf16.mxu0 %v12047_v1 }
 0x845   : > { %4898 = vmatprep.subr.bf16.mxu0 %v4443_v7 }
 0x847   : > { %4765 = vmatmul.mubr.bf16.vlgmr.msra.gmra.mrb[28].mxu1 %v4432_v5 }
 0x848   : > { %4858 = vmatpush1.bf16.msra.mxu1 %v4852_v36  ;;  %4889 = vmatprep.mubr.bf16.mxu1 %v12047_v1 }
 0x849   : > { %4938 = vmatprep.subr.bf16.mxu1 %v4451_v11 }
 0x90e   : > { %v11403_v37 = vpop.f32.mrb[32].mxu0 }
 0x90f   : > { %v11405_v15 = vpop.f32.mrb[33].mxu0 }
 0x910   : > { %v4639_v54 = vpop.f32.mrb[34].mxu0 }
 0x911   : > { %v4640_v55 = vpop.f32.mrb[35].mxu0 }
 0x912   : > { %v11407_v8 = vpop.f32.mrb[24].mxu1 }
 0x913   : > { %v5310_v53 = vpack.c.bf16 %v11407_v8, %v11403_v37  ;;  %v11411_v23 = vpop.f32.mrb[25].mxu1  ;;  %v9268_v37 = vld [vmem:[%s11531_s3 + $0x130] ss:$8 sps:$4 sm:$0xff]   ;;  %v9273_v8 = vld [vmem:[%s11531_s3 + $0x144] ss:$8 sps:$4 sm:$0xff]  }
 0x914   : > { %v5311_v2 = vpack.c.bf16 %v11411_v23, %v11405_v15  ;;  %v4689_v10 = vpop.f32.mrb[26].mxu1  ;;  %v9225_v15 = vld [vmem:[%s11531_s3 + $0x44] ss:$8 sps:$4 sm:$0xff]   ;;  %v9223_v23 = vld [vmem:[%s11531_s3 + $0x40] ss:$8 sps:$4 sm:$0xff]  }
 0x915   : > { %v4690_v38 = vpop.f32.mrb[27].mxu1  ;;  %v11424_v10 = vld [vmem:[%s11109_s21] sm:$0xff] }
 0x916   : > { %v4726_v44 = vpop.f32.mrb[36].mxu0  ;;  %v1873_v38 = vrot.slane %v11424_v10, %v11383_v58 }
 0x917   : > { %v4772_v3 = vsel %vm11349_vm1, -10000.0, %v4726_v44  ;;  %v4728_v62 = vpop.f32.mrb[37].mxu0 }
 0x918   : > { %v4729_v0 = vpop.f32.mrb[38].mxu0  ;;  %v4774_v9 = vsel %vm4566_vm2, %v4772_v3, -inf  ;;  %v4013_v62 = vadd.f32 %v11248_v60, %v1873_v38 }
 0x919   : > { %4775 = vmax.xlane.f32.xlu0 %v4774_v9  ;;  %v4730_v19 = vpop.f32.mrb[39].mxu0  ;;  %v1937_v9 = vrot.slane %v11318_v28, %v11383_v58 }
 0x91a   : > { %v4766_v33 = vpop.f32.mrb[28].mxu1 }
 0x91b   : > { %v4773_v4 = vsel %vm11353_vm3, -10000.0, %v4766_v33  ;;  %v4768_v24 = vpop.f32.mrb[29].mxu1  ;;  %v4411_v33 = vmul.f32 0.0625, %v4013_v62  ;;  %v4357_v60 = vadd.f32 %v11337_v43, %v1937_v9  ;;  %v4361_v43 = vadd.f32 %v11341_v40, %v1937_v9 }
 0x91c   : > { %v4769_v48 = vpop.f32.mrb[30].mxu1  ;;  %v4777_v59 = vsel %vm4566_vm2, %v4773_v4, -inf  ;;  %v4017_v24 = vadd.f32 %v11252_v63, %v1873_v38 }
 0x91d   : > { %4778 = vmax.xlane.f32.xlu1 %v4777_v59  ;;  %v4770_v6 = vpop.f32.mrb[31].mxu1 }
 0x9a6   : > { %v4776_v34 = vpop.xlane.xlu0 %4775 }
 0x9a7   : > { %v4780_v42 = vsub.f32 %v4772_v3, %v4776_v34  ;;  %v11429_v3 = vsub.s32 4, %v10760_v30  ;;  %v11444_v34 = vsub.s32 7, %v10760_v30 }
 0x9a9   : > { %v4782_v7 = vmul.f32 1.442695, %v4780_v42  ;;  %v1901_v0 = vrot.slane %v11281_v21, %v11429_v3  ;;  %v1869_v19 = vrot.slane %v11424_v10, %v11429_v3  ;;  %v1933_v59 = vrot.slane %v11318_v28, %v11429_v3 }
 0x9aa   : > { %v4779_v29 = vpop.xlane.xlu1 %4778 }
 0x9ab   : > { %9699 = vpow2.f32 %v4782_v7  ;;  %v4781_v56 = vsub.f32 %v4773_v4, %v4779_v29  ;;  %v4183_v48 = vadd.f32 %v11299_v50, %v1901_v0  ;;  %v4011_v42 = vadd.f32 %v11244_v57, %v1869_v19 }
 0x9ac   : > { %v4427_v7 = vpack.c.bf16 %v4411_v33, %v4411_v33  ;;  %v4187_v63 = vadd.f32 %v11303_v13, %v1901_v0  ;;  %v1913_v50 = vrot.slane %v11281_v21, %v11444_v34  ;;  %v4015_v38 = vadd.f32 %v11250_v61, %v1869_v19 }
 0x9ad   : > { %v4784_v52 = vmul.f32 1.442695, %v4781_v56  ;;  %v4410_v57 = vmul.f32 0.0625, %v4011_v42 }
 0x9ae   : > { %v4450_v62 = vpack.c.bf16 %v4187_v63, %v4187_v63  ;;  %v4228_v0 = vadd.f32 %v11258_v14, %v1913_v50  ;;  %v4232_v9 = vadd.f32 %v11264_v18, %v1913_v50 }
 0x9af   : > { %9701 = vpow2.f32 %v4784_v52  ;;  %v4419_v52 = vmul.f32 0.0625, %v4017_v24  ;;  %v4426_v40 = vpack.c.bf16 %v4410_v57, %v4410_v57 }
 0x9b0   : > { %v4445_v61 = vpack.c.bf16 %v4228_v0, %v4228_v0 }
 0x9b1   : > { %v4435_v13 = vpack.c.bf16 %v4419_v52, %v4419_v52 }
 0x9b5   : > { %v9700_v5 = vpop.eup %9699 }
 0x9b6   : > { %v4786_v11 = vsel %vm4566_vm2, %v9700_v5, 0.0 }
 0x9b7   : > { %4787 = vadd.xlane.f32.xlu0 %v4786_v11  ;;  %v4442_v11 = vpack.c.bf16 %v4183_v48, %v4183_v48 }
 0x9b9   : > { %v9702_v36 = vpop.eup %9701 }
 0x9ba   : > { %v4789_v54 = vsel %vm4566_vm2, %v9702_v36, 0.0 }
 0x9bb   : > { %4790 = vadd.xlane.f32.xlu1 %v4789_v54  ;;  %v4355_v54 = vadd.f32 %v11335_v32, %v1933_v59  ;;  %v4359_v32 = vadd.f32 %v11339_v49, %v1933_v59  ;;  %v4453_v49 = vpack.c.bf16 %v4232_v9, %v4232_v9 }
 0x9bd   : > { %v4458_v33 = vpack.c.bf16 %v4355_v54, %v4355_v54  ;;  %v4466_v24 = vpack.c.bf16 %v4359_v32, %v4359_v32 }
 0x9bf   : > { %v5008_v19 = vsel %vm4594_vm14, %v4458_v33, 0  ;;  %v5058_v48 = vsel %vm4594_vm14, %v4466_v24, 0 }
 0xa44   : > { %v4788_v55 = vpop.xlane.xlu0 %4787 }
 0xa45   : > { %9703 = vrcp.f32 %v4788_v55  ;;  %v4459_v55 = vpack.c.bf16 %v4357_v60, %v4357_v60 }
 0xa48   : > { %v4791_v44 = vpop.xlane.xlu1 %4790 }
 0xa49   : > { %9705 = vrcp.f32 %v4791_v44 }
 0xa4f   : > { %v9704_v4 = vpop.eup %9703 }
 0xa50   : > { %v4794_v6 = vmul.f32 %v9704_v4, %v9700_v5  ;;  %v4467_v4 = vpack.c.bf16 %v4361_v43, %v4361_v43 }
 0xa52   : > { %v4796_v29 = vpack.c.bf16 %v4794_v6, %v4794_v6 }
 0xa53   : > { %v9706_v56 = vpop.eup %9705 }
 0xa54   : > { %v4795_v5 = vmul.f32 %v9706_v56, %v9702_v36  ;;  %8544 = vmatmul.mubr.msk.bf16.vlgmr.msra.gmra.mrb[40].mxu0 %vm4566_vm2, %v4796_v29  ;;  %v4418_v36 = vmul.f32 0.0625, %v4015_v38 }
 0xa55   : > { %4899 = vmatpush1.bf16.xpose.msra.mxu0 %v4442_v11  ;;  %4930 = vmatprep.mubr.bf16.mxu0 %v4427_v7 }
 0xa56   : > { %8547 = vmatprep.subr.msk.bf16.mxu0 %vm4594_vm14, %v4459_v55  ;;  %v4797_v44 = vpack.c.bf16 %v4795_v5, %v4795_v5  ;;  %v4434_v14 = vpack.c.bf16 %v4418_v36, %v4418_v36 }
 0xa58   : > { %8546 = vmatmul.mubr.msk.bf16.vlgmr.msra.gmra.mrb[32].mxu1 %vm4566_vm2, %v4797_v44 }
 0xa59   : > { %4939 = vmatpush1.bf16.xpose.msra.mxu1 %v4450_v62  ;;  %4970 = vmatprep.mubr.bf16.mxu1 %v4435_v13 }
 0xa5a   : > { %8549 = vmatprep.subr.msk.bf16.mxu1 %vm4594_vm14, %v4467_v4 }
 0xa5c   : > { %4931 = vmatmul.mubr.bf16.vlgmr.msra.gmra.mrb[44].mxu0 %v4426_v40 }
 0xa5d   : > { %5014 = vmatpush1.bf16.msra.mxu0 %v5008_v19  ;;  %5045 = vmatprep.mubr.bf16.mxu0 %v12047_v1 }
 0xa5e   : > { %5104 = vmatprep.subr.bf16.mxu0 %v4445_v61 }
 0xa60   : > { %4971 = vmatmul.mubr.bf16.vlgmr.msra.gmra.mrb[36].mxu1 %v4434_v14 }
 0xa61   : > { %5064 = vmatpush1.bf16.msra.mxu1 %v5058_v48  ;;  %5095 = vmatprep.mubr.bf16.mxu1 %v12047_v1  ;;  %v1881_v48 = vrot.slane %v11424_v10, %v11444_v34 }
 0xa62   : > { %5144 = vmatprep.subr.bf16.mxu1 %v4453_v49 }
 0xb27   : > { %v11464_v59 = vpop.f32.mrb[40].mxu0 }
 0xb28   : > { %v11466_v18 = vpop.f32.mrb[41].mxu0 }
 0xb29   : > { %v4845_v60 = vpop.f32.mrb[42].mxu0 }
 0xb2a   : > { %v4846_v6 = vpop.f32.mrb[43].mxu0 }
 0xb2b   : > { %v11468_v42 = vpop.f32.mrb[32].mxu1  ;;  %v1876_v6 = vsub.s32 6, %v10760_v30 }
 0xb2c   : > { %v5312_v7 = vpack.c.bf16 %v11468_v42, %v11464_v59  ;;  %v11472_v29 = vpop.f32.mrb[33].mxu1  ;;  %v9316_v59 = vld [vmem:[%s11531_s3 + $0x230] ss:$8 sps:$4 sm:$0xff]   ;;  %v9321_v42 = vld [vmem:[%s11531_s3 + $0x244] ss:$8 sps:$4 sm:$0xff]  }
 0xb2d   : > { %v5313_v56 = vpack.c.bf16 %v11472_v29, %v11466_v18  ;;  %v4895_v52 = vpop.f32.mrb[34].mxu1  ;;  %v9276_v18 = vld [vmem:[%s11531_s3 + $0x154] ss:$8 sps:$4 sm:$0xff]   ;;  %v9274_v29 = vld [vmem:[%s11531_s3 + $0x150] ss:$8 sps:$4 sm:$0xff]  }
 0xb2e   : > { %v4896_v11 = vpop.f32.mrb[35].mxu1  ;;  %v4056_v52 = vadd.f32 %v11179_v41, %v1881_v48 }
 0xb2f   : > { %v4932_v63 = vpop.f32.mrb[44].mxu0  ;;  %v1909_v11 = vrot.slane %v11281_v21, %v1876_v6 }
 0xb30   : > { %v4978_v50 = vsel %vm11349_vm1, -10000.0, %v4932_v63  ;;  %v4934_v54 = vpop.f32.mrb[45].mxu0  ;;  %v1945_v63 = vrot.slane %v11318_v28, %v11444_v34 }
 0xb31   : > { %v4935_v55 = vpop.f32.mrb[46].mxu0  ;;  %v4980_v43 = vsel %vm4566_vm2, %v4978_v50, -inf }
 0xb32   : > { %4981 = vmax.xlane.f32.xlu0 %v4980_v43  ;;  %v4936_v5 = vpop.f32.mrb[47].mxu0  ;;  %v4413_v55 = vmul.f32 0.0625, %v4056_v52  ;;  %v4060_v43 = vadd.f32 %v11186_v46, %v1881_v48  ;;  %v4404_v46 = vadd.f32 %v11315_v25, %v1945_v63 }
 0xb33   : > { %v4972_v57 = vpop.f32.mrb[36].mxu1  ;;  %v4226_v5 = vadd.f32 %v11256_v12, %v1909_v11 }
 0xb34   : > { %v4979_v38 = vsel %vm11353_vm3, -10000.0, %v4972_v57  ;;  %v4974_v44 = vpop.f32.mrb[37].mxu1  ;;  %v1941_v57 = vrot.slane %v11318_v28, %v1876_v6 }
 0xb35   : > { %v4975_v13 = vpop.f32.mrb[38].mxu1  ;;  %v4983_v62 = vsel %vm4566_vm2, %v4979_v38, -inf  ;;  %v4444_v34 = vpack.c.bf16 %v4226_v5, %v4226_v5 }
 0xb36   : > { %4984 = vmax.xlane.f32.xlu1 %v4983_v62  ;;  %v4976_v0 = vpop.f32.mrb[39].mxu1  ;;  %v4429_v62 = vpack.c.bf16 %v4413_v55, %v4413_v55 }
 0xb37   : > { %v4421_v0 = vmul.f32 0.0625, %v4060_v43 }
 0xbbf   : > { %v4982_v33 = vpop.xlane.xlu0 %4981 }
 0xbc0   : > { %v4986_v32 = vsub.f32 %v4978_v50, %v4982_v33  ;;  %v1877_v50 = vrot.slane %v11424_v10, %v1876_v6  ;;  %v4230_v10 = vadd.f32 %v11262_v17, %v1909_v11  ;;  %v4398_v33 = vadd.f32 %v11307_v16, %v1941_v57 }
 0xbc1   : > { %v4402_v17 = vadd.f32 %v11311_v22, %v1941_v57  ;;  %v4469_v16 = vpack.c.bf16 %v4404_v46, %v4404_v46 }
 0xbc2   : > { %v4988_v4 = vmul.f32 1.442695, %v4986_v32  ;;  %v4054_v41 = vadd.f32 %v11177_v39, %v1877_v50  ;;  %v4058_v39 = vadd.f32 %v11184_v45, %v1877_v50 }
 0xbc3   : > { %v4985_v40 = vpop.xlane.xlu1 %4984  ;;  %v4468_v45 = vpack.c.bf16 %v4402_v17, %v4402_v17  ;;  %v9211_v17 = vld [vmem:[%s11531_s3] ss:$8 sps:$4 sm:$0xff]  }
 0xbc4   : > { %9707 = vpow2.f32 %v4988_v4  ;;  %v4987_v36 = vsub.f32 %v4979_v38, %v4985_v40  ;;  %v4400_v38 = vadd.f32 %v11309_v20, %v1945_v63  ;;  %v4412_v20 = vmul.f32 0.0625, %v4054_v41 }
 0xbc5   : > { %v4437_v4 = vpack.c.bf16 %v4421_v0, %v4421_v0  ;;  %v4452_v40 = vpack.c.bf16 %v4230_v10, %v4230_v10 }
 0xbc6   : > { %v4990_v61 = vmul.f32 1.442695, %v4987_v36  ;;  %v4461_v32 = vpack.c.bf16 %v4400_v38, %v4400_v38  ;;  %v4460_v36 = vpack.c.bf16 %v4398_v33, %v4398_v33  ;;  %v4428_v25 = vpack.c.bf16 %v4412_v20, %v4412_v20 }
 0xbc8   : > { %9709 = vpow2.f32 %v4990_v61  ;;  %v4420_v61 = vmul.f32 0.0625, %v4058_v39  ;;  %v9213_v39 = vld [vmem:[%s11531_s3 + $0x4] ss:$8 sps:$4 sm:$0xff]  }
 0xbce   : > { %v9708_v9 = vpop.eup %9707 }
 0xbcf   : > { %v4992_v19 = vsel %vm4566_vm2, %v9708_v9, 0.0 }
 0xbd0   : > { %4993 = vadd.xlane.f32.xlu0 %v4992_v19  ;;  %v4436_v19 = vpack.c.bf16 %v4420_v61, %v4420_v61 }
 0xbd2   : > { %v9710_v24 = vpop.eup %9709 }
 0xbd3   : > { %v4995_v14 = vsel %vm4566_vm2, %v9710_v24, 0.0 }
 0xbd4   : > { %4996 = vadd.xlane.f32.xlu1 %v4995_v14 }
 0xc5d   : > { %v4994_v49 = vpop.xlane.xlu0 %4993 }
 0xc5e   : > { %9711 = vrcp.f32 %v4994_v49 }
 0xc61   : > { %v4997_v60 = vpop.xlane.xlu1 %4996 }
 0xc62   : > { %9713 = vrcp.f32 %v4997_v60 }
 0xc68   : > { %v9712_v54 = vpop.eup %9711 }
 0xc69   : > { %v5000_v44 = vmul.f32 %v9712_v54, %v9708_v9  ;;  %v5214_v9 = vsel %vm4594_vm14, %v4460_v36, 0 }
 0xc6b   : > { %v5002_v13 = vpack.c.bf16 %v5000_v44, %v5000_v44 }
 0xc6c   : > { %v9714_v21 = vpop.eup %9713 }
 0xc6d   : > { %v5001_v12 = vmul.f32 %v9714_v21, %v9710_v24  ;;  %8548 = vmatmul.mubr.msk.bf16.vlgmr.msra.gmra.mrb[48].mxu0 %vm4566_vm2, %v5002_v13  ;;  %v5264_v24 = vsel %vm4594_vm14, %v4468_v45, 0  ;;  %v9214_v45 = vld [vmem:[%s11531_s3 + $0x10] ss:$8 sps:$4 sm:$0xff]  }
 0xc6e   : > { %5105 = vmatpush1.bf16.xpose.msra.mxu0 %v4444_v34  ;;  %5136 = vmatprep.mubr.bf16.mxu0 %v4429_v62 }
 0xc6f   : > { %8551 = vmatprep.subr.msk.bf16.mxu0 %vm4594_vm14, %v4461_v32  ;;  %v5003_v28 = vpack.c.bf16 %v5001_v12, %v5001_v12 }
 0xc71   : > { %8550 = vmatmul.mubr.msk.bf16.vlgmr.msra.gmra.mrb[40].mxu1 %vm4566_vm2, %v5003_v28 }
 0xc72   : > { %5145 = vmatpush1.bf16.xpose.msra.mxu1 %v4452_v40  ;;  %5176 = vmatprep.mubr.bf16.mxu1 %v4437_v4 }
 0xc73   : > { %8553 = vmatprep.subr.msk.bf16.mxu1 %vm4594_vm14, %v4469_v16 }
 0xc75   : > { %5137 = vmatmul.mubr.bf16.vlgmr.msra.gmra.mrb[52].mxu0 %v4428_v25  ;;  %v9216_v25 = vld [vmem:[%s11531_s3 + $0x14] ss:$8 sps:$4 sm:$0xff]  }
 0xc76   : > { %5220 = vmatpush1.bf16.msra.mxu0 %v5214_v9  ;;  %5251 = vmatprep.mubr.bf16.mxu0 %v12047_v1 }
 0xc77   : > { %6103 = vmatprep.subr.bf16.mxu0 %v9213_v39  ;;  %v9264_v39 = vld [vmem:[%s11531_s3 + $0x114] ss:$8 sps:$4 sm:$0xff]  }
 0xc79   : > { %5177 = vmatmul.mubr.bf16.vlgmr.msra.gmra.mrb[44].mxu1 %v4436_v19 }
 0xc7a   : > { %5270 = vmatpush1.bf16.msra.mxu1 %v5264_v24  ;;  %5301 = vmatprep.mubr.bf16.mxu1 %v12047_v1  ;;  %v9219_v24 = vld [vmem:[%s11531_s3 + $0x24] ss:$8 sps:$4 sm:$0xff]  }
 0xd40   : > { %v11510_v22 = vpop.f32.mrb[48].mxu0 }
 0xd41   : > { %v11512_v14 = vpop.f32.mrb[49].mxu0 }
 0xd42   : > { %v5051_v49 = vpop.f32.mrb[50].mxu0 }
 0xd43   : > { %v5052_v48 = vpop.f32.mrb[51].mxu0  ;;  %v9217_v49 = vld [vmem:[%s11531_s3 + $0x20] ss:$8 sps:$4 sm:$0xff]  }
 0xd44   : > { %v11514_v60 = vpop.f32.mrb[40].mxu1  ;;  %v9222_v48 = vld [vmem:[%s11531_s3 + $0x34] ss:$8 sps:$4 sm:$0xff]  }
 0xd45   : > { %v5314_v6 = vpack.c.bf16 %v11514_v60, %v11510_v22  ;;  %v11518_v52 = vpop.f32.mrb[41].mxu1  ;;  %v9367_v22 = vld [vmem:[%s11531_s3 + $0x340] ss:$8 sps:$4 sm:$0xff]   ;;  %v9372_v60 = vld [vmem:[%s11531_s3 + $0x354] ss:$8 sps:$4 sm:$0xff]  }
 0xd46   : > { %v5315_v11 = vpack.c.bf16 %v11518_v52, %v11512_v14  ;;  %v5101_v63 = vpop.f32.mrb[42].mxu1  ;;  %v9324_v14 = vld [vmem:[%s11531_s3 + $0x254] ss:$8 sps:$4 sm:$0xff]   ;;  %v9322_v52 = vld [vmem:[%s11531_s3 + $0x250] ss:$8 sps:$4 sm:$0xff]  }
 0xd47   : > { %v5102_v50 = vpop.f32.mrb[43].mxu1  ;;  %v9220_v63 = vld [vmem:[%s11531_s3 + $0x30] ss:$8 sps:$4 sm:$0xff]  }
 0xd48   : > { %v5138_v54 = vpop.f32.mrb[52].mxu0  ;;  %v9226_v50 = vld [vmem:[%s11531_s3 + $0x50] ss:$8 sps:$4 sm:$0xff]  }
 0xd49   : > { %v5184_v1 = vsel %vm11349_vm1, -10000.0, %v5138_v54  ;;  %v5140_v55 = vpop.f32.mrb[53].mxu0  ;;  %v9231_v54 = vld [vmem:[%s11531_s3 + $0x64] ss:$8 sps:$4 sm:$0xff]  }
 0xd4a   : > { %v5141_v43 = vpop.f32.mrb[54].mxu0  ;;  %v5186_v5 = vsel %vm4566_vm2, %v5184_v1, -inf  ;;  %v9234_v55 = vld [vmem:[%s11531_s3 + $0x74] ss:$8 sps:$4 sm:$0xff]  }
 0xd4b   : > { %5187 = vmax.xlane.f32.xlu0 %v5186_v5  ;;  %v5142_v57 = vpop.f32.mrb[55].mxu0  ;;  %v9232_v43 = vld [vmem:[%s11531_s3 + $0x70] ss:$8 sps:$4 sm:$0xff]   ;;  %v9237_v5 = vld [vmem:[%s11531_s3 + $0x84] ss:$8 sps:$4 sm:$0xff]  }
 0xd4c   : > { %v5178_v38 = vpop.f32.mrb[44].mxu1  ;;  %v9235_v57 = vld [vmem:[%s11531_s3 + $0x80] ss:$8 sps:$4 sm:$0xff]  }
 0xd4d   : > { %v5185_v44 = vsel %vm11353_vm3, -10000.0, %v5178_v38  ;;  %v5180_v41 = vpop.f32.mrb[45].mxu1  ;;  %v9240_v38 = vld [vmem:[%s11531_s3 + $0x94] ss:$8 sps:$4 sm:$0xff]  }
 0xd4e   : > { %v5181_v13 = vpop.f32.mrb[46].mxu1  ;;  %v5189_v21 = vsel %vm4566_vm2, %v5185_v44, -inf  ;;  %v9243_v41 = vld [vmem:[%s11531_s3 + $0xa4] ss:$8 sps:$4 sm:$0xff]  }
 0xd4f   : > { %5190 = vmax.xlane.f32.xlu1 %v5189_v21  ;;  %v5182_v62 = vpop.f32.mrb[47].mxu1  ;;  %v9241_v13 = vld [vmem:[%s11531_s3 + $0xa0] ss:$8 sps:$4 sm:$0xff]   ;;  %v9246_v21 = vld [vmem:[%s11531_s3 + $0xb4] ss:$8 sps:$4 sm:$0xff]  }
 0xd50   : > { %v9244_v62 = vld [vmem:[%s11531_s3 + $0xb0] ss:$8 sps:$4 sm:$0xff]  }
 0xdd8   : > { %v5188_v0 = vpop.xlane.xlu0 %5187 }
 0xdd9   : > { %v5192_v47 = vsub.f32 %v5184_v1, %v5188_v0  ;;  %v9229_v1 = vld [vmem:[%s11531_s3 + $0x60] ss:$8 sps:$4 sm:$0xff]   ;;  %v9249_v0 = vld [vmem:[%s11531_s3 + $0xc4] ss:$8 sps:$4 sm:$0xff]  }
 0xddb   : > { %v5194_v34 = vmul.f32 1.442695, %v5192_v47  ;;  %v9247_v47 = vld [vmem:[%s11531_s3 + $0xc0] ss:$8 sps:$4 sm:$0xff]  }
 0xddc   : > { %v5191_v10 = vpop.xlane.xlu1 %5190 }
 0xddd   : > { %9715 = vpow2.f32 %v5194_v34  ;;  %v5193_v33 = vsub.f32 %v5185_v44, %v5191_v10  ;;  %v9238_v44 = vld [vmem:[%s11531_s3 + $0x90] ss:$8 sps:$4 sm:$0xff]   ;;  %v9252_v34 = vld [vmem:[%s11531_s3 + $0xd4] ss:$8 sps:$4 sm:$0xff]  }
 0xdde   : > { %v9250_v10 = vld [vmem:[%s11531_s3 + $0xd0] ss:$8 sps:$4 sm:$0xff]  }
 0xddf   : > { %v5196_v32 = vmul.f32 1.442695, %v5193_v33  ;;  %v9255_v33 = vld [vmem:[%s11531_s3 + $0xe4] ss:$8 sps:$4 sm:$0xff]  }
 0xde1   : > { %9717 = vpow2.f32 %v5196_v32  ;;  %v9253_v32 = vld [vmem:[%s11531_s3 + $0xe0] ss:$8 sps:$4 sm:$0xff]  }
 0xde7   : > { %v9716_v46 = vpop.eup %9715 }
 0xde8   : > { %v5198_v12 = vsel %vm4566_vm2, %v9716_v46, 0.0 }
 0xde9   : > { %5199 = vadd.xlane.f32.xlu0 %v5198_v12  ;;  %v9256_v12 = vld [vmem:[%s11531_s3 + $0xf0] ss:$8 sps:$4 sm:$0xff]  }
 0xdeb   : > { %v9718_v51 = vpop.eup %9717 }
 0xdec   : > { %v5201_v20 = vsel %vm4566_vm2, %v9718_v51, 0.0 }
 0xded   : > { %5202 = vadd.xlane.f32.xlu1 %v5201_v20  ;;  %v9259_v20 = vld [vmem:[%s11531_s3 + $0x100] ss:$8 sps:$4 sm:$0xff]  }
 0xe76   : > { %v5200_v28 = vpop.xlane.xlu0 %5199 }
 0xe77   : > { %9719 = vrcp.f32 %v5200_v28  ;;  %v9262_v28 = vld [vmem:[%s11531_s3 + $0x110] ss:$8 sps:$4 sm:$0xff]  }
 0xe7a   : > { %v5203_v4 = vpop.xlane.xlu1 %5202 }
 0xe7b   : > { %9721 = vrcp.f32 %v5203_v4  ;;  %v9267_v4 = vld [vmem:[%s11531_s3 + $0x124] ss:$8 sps:$4 sm:$0xff]  }
 0xe81   : > { %v9720_v40 = vpop.eup %9719 }
 0xe82   : > { %v5206_v36 = vmul.f32 %v9720_v40, %v9716_v46  ;;  %v9258_v46 = vld [vmem:[%s11531_s3 + $0xf4] ss:$8 sps:$4 sm:$0xff]   ;;  %v9265_v40 = vld [vmem:[%s11531_s3 + $0x120] ss:$8 sps:$4 sm:$0xff]  }
 0xe84   : > { %v5208_v16 = vpack.c.bf16 %v5206_v36, %v5206_v36  ;;  %v9270_v36 = vld [vmem:[%s11531_s3 + $0x134] ss:$8 sps:$4 sm:$0xff]  }
 0xe85   : > { %v9722_v61 = vpop.eup %9721 }
 0xe86   : > { %v5207_v9 = vmul.f32 %v9722_v61, %v9718_v51  ;;  %8552 = vmatmul.mubr.msk.bf16.vlgmr.msra.gmra.mrb[56].mxu0 %vm4566_vm2, %v5208_v16  ;;  %v9261_v51 = vld [vmem:[%s11531_s3 + $0x104] ss:$8 sps:$4 sm:$0xff]   ;;  %v9282_v16 = vld [vmem:[%s11531_s3 + $0x174] ss:$8 sps:$4 sm:$0xff]  }
 0xe87   : > { %6104 = vmatpush1.bf16.msra.mxu0 %v9211_v17  ;;  %6135 = vmatprep.mubr.bf16.mxu0 %v5311_v2  ;;  %v9228_v2 = vld [vmem:[%s11531_s3 + $0x54] ss:$8 sps:$4 sm:$0xff]   ;;  %v9277_v17 = vld [vmem:[%s11531_s3 + $0x160] ss:$8 sps:$4 sm:$0xff]   ;;  %v9285_v61 = vld [vmem:[%s11531_s3 + $0x184] ss:$8 sps:$4 sm:$0xff]  }
 0xe88   : > { %6105 = vmatprep.subr.bf16.mxu0 %v9216_v25  ;;  %v5209_v19 = vpack.c.bf16 %v5207_v9, %v5207_v9  ;;  %v9280_v25 = vld [vmem:[%s11531_s3 + $0x170] ss:$8 sps:$4 sm:$0xff]   ;;  %v9283_v9 = vld [vmem:[%s11531_s3 + $0x180] ss:$8 sps:$4 sm:$0xff]  }
 0xe8a   : > { %8554 = vmatmul.mubr.msk.bf16.vlgmr.msra.gmra.mrb[48].mxu1 %vm4566_vm2, %v5209_v19  ;;  %v9286_v19 = vld [vmem:[%s11531_s3 + $0x190] ss:$8 sps:$4 sm:$0xff]  }
 0xe8b   : > { %6106 = vmatpush1.bf16.msra.mxu0 %v9214_v45  ;;  %v9288_v45 = vld [vmem:[%s11531_s3 + $0x194] ss:$8 sps:$4 sm:$0xff]  }
 0xe8c   : > { %6107 = vmatprep.subr.bf16.mxu0 %v9219_v24  ;;  %v9291_v24 = vld [vmem:[%s11531_s3 + $0x1a4] ss:$8 sps:$4 sm:$0xff]  }
 0xe8f   : > { %6108 = vmatpush1.bf16.msra.mxu0 %v9217_v49  ;;  %v9289_v49 = vld [vmem:[%s11531_s3 + $0x1a0] ss:$8 sps:$4 sm:$0xff]  }
 0xe90   : > { %6109 = vmatprep.subr.bf16.mxu0 %v9222_v48  ;;  %v9294_v48 = vld [vmem:[%s11531_s3 + $0x1b4] ss:$8 sps:$4 sm:$0xff]  }
 0xe93   : > { %6110 = vmatpush1.bf16.msra.mxu0 %v9220_v63  ;;  %v9292_v63 = vld [vmem:[%s11531_s3 + $0x1b0] ss:$8 sps:$4 sm:$0xff]  }
 0xe94   : > { %6111 = vmatprep.subr.bf16.mxu0 %v9225_v15  ;;  %v9297_v15 = vld [vmem:[%s11531_s3 + $0x1c4] ss:$8 sps:$4 sm:$0xff]  }
 0xe97   : > { %6112 = vmatpush1.bf16.msra.mxu0 %v9223_v23  ;;  %v9295_v23 = vld [vmem:[%s11531_s3 + $0x1c0] ss:$8 sps:$4 sm:$0xff]  }
 0xe98   : > { %6113 = vmatprep.subr.bf16.mxu0 %v9228_v2  ;;  %v9300_v2 = vld [vmem:[%s11531_s3 + $0x1d4] ss:$8 sps:$4 sm:$0xff]  }
 0xe9b   : > { %6114 = vmatpush1.bf16.msra.mxu0 %v9226_v50  ;;  %v9298_v50 = vld [vmem:[%s11531_s3 + $0x1d0] ss:$8 sps:$4 sm:$0xff]  }
 0xe9c   : > { %6115 = vmatprep.subr.bf16.mxu0 %v9231_v54  ;;  %v9303_v54 = vld [vmem:[%s11531_s3 + $0x1e4] ss:$8 sps:$4 sm:$0xff]  }
 0xe9f   : > { %6116 = vmatpush1.bf16.msra.mxu0 %v9229_v1  ;;  %v9301_v1 = vld [vmem:[%s11531_s3 + $0x1e0] ss:$8 sps:$4 sm:$0xff]  }
 0xea0   : > { %6117 = vmatprep.subr.bf16.mxu0 %v9234_v55  ;;  %v9306_v55 = vld [vmem:[%s11531_s3 + $0x1f4] ss:$8 sps:$4 sm:$0xff]  }
 0xea3   : > { %6118 = vmatpush1.bf16.msra.mxu0 %v9232_v43  ;;  %v9304_v43 = vld [vmem:[%s11531_s3 + $0x1f0] ss:$8 sps:$4 sm:$0xff]  }
 0xea4   : > { %6119 = vmatprep.subr.bf16.mxu0 %v9237_v5  ;;  %v9309_v5 = vld [vmem:[%s11531_s3 + $0x204] ss:$8 sps:$4 sm:$0xff]  }
 0xea7   : > { %6120 = vmatpush1.bf16.msra.mxu0 %v9235_v57  ;;  %v9307_v57 = vld [vmem:[%s11531_s3 + $0x200] ss:$8 sps:$4 sm:$0xff]  }
 0xea8   : > { %6121 = vmatprep.subr.bf16.mxu0 %v9240_v38  ;;  %v9312_v38 = vld [vmem:[%s11531_s3 + $0x214] ss:$8 sps:$4 sm:$0xff]  }
 0xeab   : > { %6122 = vmatpush1.bf16.msra.mxu0 %v9238_v44  ;;  %v9310_v44 = vld [vmem:[%s11531_s3 + $0x210] ss:$8 sps:$4 sm:$0xff]  }
 0xeac   : > { %6123 = vmatprep.subr.bf16.mxu0 %v9243_v41  ;;  %v9315_v41 = vld [vmem:[%s11531_s3 + $0x224] ss:$8 sps:$4 sm:$0xff]  }
 0xeaf   : > { %6124 = vmatpush1.bf16.msra.mxu0 %v9241_v13  ;;  %v9313_v13 = vld [vmem:[%s11531_s3 + $0x220] ss:$8 sps:$4 sm:$0xff]  }
 0xeb0   : > { %6125 = vmatprep.subr.bf16.mxu0 %v9246_v21  ;;  %v9318_v21 = vld [vmem:[%s11531_s3 + $0x234] ss:$8 sps:$4 sm:$0xff]  }
 0xeb3   : > { %6126 = vmatpush1.bf16.msra.mxu0 %v9244_v62  ;;  %v9325_v62 = vld [vmem:[%s11531_s3 + $0x260] ss:$8 sps:$4 sm:$0xff]  }
 0xeb4   : > { %6127 = vmatprep.subr.bf16.mxu0 %v9249_v0  ;;  %v9330_v0 = vld [vmem:[%s11531_s3 + $0x274] ss:$8 sps:$4 sm:$0xff]  }
 0xeb7   : > { %6128 = vmatpush1.bf16.msra.mxu0 %v9247_v47  ;;  %v9328_v47 = vld [vmem:[%s11531_s3 + $0x270] ss:$8 sps:$4 sm:$0xff]  }
 0xeb8   : > { %6129 = vmatprep.subr.bf16.mxu0 %v9252_v34  ;;  %v9333_v34 = vld [vmem:[%s11531_s3 + $0x284] ss:$8 sps:$4 sm:$0xff]  }
 0xebb   : > { %6130 = vmatpush1.bf16.msra.mxu0 %v9250_v10  ;;  %v9331_v10 = vld [vmem:[%s11531_s3 + $0x280] ss:$8 sps:$4 sm:$0xff]  }
 0xebc   : > { %6131 = vmatprep.subr.bf16.mxu0 %v9255_v33  ;;  %v9336_v33 = vld [vmem:[%s11531_s3 + $0x294] ss:$8 sps:$4 sm:$0xff]  }
 0xebf   : > { %6132 = vmatpush1.bf16.msra.mxu0 %v9253_v32  ;;  %v9334_v32 = vld [vmem:[%s11531_s3 + $0x290] ss:$8 sps:$4 sm:$0xff]  }
 0xec0   : > { %6133 = vmatprep.subr.bf16.mxu0 %v9258_v46  ;;  %v9339_v46 = vld [vmem:[%s11531_s3 + $0x2a4] ss:$8 sps:$4 sm:$0xff]  }
 0xec3   : > { %6134 = vmatpush1.bf16.msra.mxu0 %v9256_v12  ;;  %v9337_v12 = vld [vmem:[%s11531_s3 + $0x2a0] ss:$8 sps:$4 sm:$0xff]  }
 0xec4   : > { %6146 = vmatprep.subr.bf16.mxu0 %v9261_v51  ;;  %v9342_v51 = vld [vmem:[%s11531_s3 + $0x2b4] ss:$8 sps:$4 sm:$0xff]  }
 0xec6   : > { %6136 = vmatmul.mubr.bf16.vlgmr.msra.gmra.mrb[60].mxu0 %v5310_v53  ;;  %v9271_v53 = vld [vmem:[%s11531_s3 + $0x140] ss:$8 sps:$4 sm:$0xff]  }
 0xec7   : > { %6147 = vmatpush1.bf16.msra.mxu0 %v9259_v20  ;;  %6178 = vmatprep.mubr.bf16.mxu0 %v5313_v56  ;;  %v9279_v56 = vld [vmem:[%s11531_s3 + $0x164] ss:$8 sps:$4 sm:$0xff]   ;;  %v9340_v20 = vld [vmem:[%s11531_s3 + $0x2b0] ss:$8 sps:$4 sm:$0xff]  }
 0xec8   : > { %6148 = vmatprep.subr.bf16.mxu0 %v9264_v39  ;;  %v9345_v39 = vld [vmem:[%s11531_s3 + $0x2c4] ss:$8 sps:$4 sm:$0xff]  }
 0xecb   : > { %6149 = vmatpush1.bf16.msra.mxu0 %v9262_v28  ;;  %v9343_v28 = vld [vmem:[%s11531_s3 + $0x2c0] ss:$8 sps:$4 sm:$0xff]  }
 0xecc   : > { %6150 = vmatprep.subr.bf16.mxu0 %v9267_v4  ;;  %v9348_v4 = vld [vmem:[%s11531_s3 + $0x2d4] ss:$8 sps:$4 sm:$0xff]  }
 0xecf   : > { %6151 = vmatpush1.bf16.msra.mxu0 %v9265_v40  ;;  %v9346_v40 = vld [vmem:[%s11531_s3 + $0x2d0] ss:$8 sps:$4 sm:$0xff]  }
 0xed0   : > { %6152 = vmatprep.subr.bf16.mxu0 %v9270_v36  ;;  %v9351_v36 = vld [vmem:[%s11531_s3 + $0x2e4] ss:$8 sps:$4 sm:$0xff]  }
 0xed3   : > { %6153 = vmatpush1.bf16.msra.mxu0 %v9268_v37  ;;  %v9349_v37 = vld [vmem:[%s11531_s3 + $0x2e0] ss:$8 sps:$4 sm:$0xff]  }
 0xed4   : > { %6154 = vmatprep.subr.bf16.mxu0 %v9273_v8  ;;  %v9354_v8 = vld [vmem:[%s11531_s3 + $0x2f4] ss:$8 sps:$4 sm:$0xff]  }
 0xed7   : > { %6155 = vmatpush1.bf16.msra.mxu0 %v9271_v53  ;;  %v9352_v53 = vld [vmem:[%s11531_s3 + $0x2f0] ss:$8 sps:$4 sm:$0xff]  }
 0xed8   : > { %6156 = vmatprep.subr.bf16.mxu0 %v9276_v18  ;;  %v9357_v18 = vld [vmem:[%s11531_s3 + $0x304] ss:$8 sps:$4 sm:$0xff]  }
 0xedb   : > { %6157 = vmatpush1.bf16.msra.mxu0 %v9274_v29  ;;  %v9355_v29 = vld [vmem:[%s11531_s3 + $0x300] ss:$8 sps:$4 sm:$0xff]  }
 0xedc   : > { %6158 = vmatprep.subr.bf16.mxu0 %v9279_v56  ;;  %v9360_v56 = vld [vmem:[%s11531_s3 + $0x314] ss:$8 sps:$4 sm:$0xff]  }
 0xedf   : > { %6159 = vmatpush1.bf16.msra.mxu0 %v9277_v17  ;;  %v9358_v17 = vld [vmem:[%s11531_s3 + $0x310] ss:$8 sps:$4 sm:$0xff]  }
 0xee0   : > { %6160 = vmatprep.subr.bf16.mxu0 %v9282_v16  ;;  %v9363_v16 = vld [vmem:[%s11531_s3 + $0x324] ss:$8 sps:$4 sm:$0xff]  }
 0xee3   : > { %6161 = vmatpush1.bf16.msra.mxu0 %v9280_v25  ;;  %v9361_v25 = vld [vmem:[%s11531_s3 + $0x320] ss:$8 sps:$4 sm:$0xff]  }
 0xee4   : > { %6162 = vmatprep.subr.bf16.mxu0 %v9285_v61  ;;  %v9366_v61 = vld [vmem:[%s11531_s3 + $0x334] ss:$8 sps:$4 sm:$0xff]  }
 0xee7   : > { %6163 = vmatpush1.bf16.msra.mxu0 %v9283_v9  ;;  %v9364_v9 = vld [vmem:[%s11531_s3 + $0x330] ss:$8 sps:$4 sm:$0xff]  }
 0xee8   : > { %6164 = vmatprep.subr.bf16.mxu0 %v9288_v45  ;;  %v9369_v45 = vld [vmem:[%s11531_s3 + $0x344] ss:$8 sps:$4 sm:$0xff]  }
 0xeeb   : > { %6165 = vmatpush1.bf16.msra.mxu0 %v9286_v19  ;;  %v9375_v19 = vld [vmem:[%s11531_s3 + $0x364] ss:$8 sps:$4 sm:$0xff]  }
 0xeec   : > { %6166 = vmatprep.subr.bf16.mxu0 %v9291_v24 }
 0xeef   : > { %6167 = vmatpush1.bf16.msra.mxu0 %v9289_v49 }
 0xef0   : > { %6168 = vmatprep.subr.bf16.mxu0 %v9294_v48 }
 0xef3   : > { %6169 = vmatpush1.bf16.msra.mxu0 %v9292_v63  ;;  %v9373_v63 = vld [vmem:[%s11531_s3 + $0x360] ss:$8 sps:$4 sm:$0xff]  }
 0xef4   : > { %6170 = vmatprep.subr.bf16.mxu0 %v9297_v15 }
 0xef7   : > { %6171 = vmatpush1.bf16.msra.mxu0 %v9295_v23  ;;  %v9378_v23 = vld [vmem:[%s11531_s3 + $0x374] ss:$8 sps:$4 sm:$0xff]  }
 0xef8   : > { %6172 = vmatprep.subr.bf16.mxu0 %v9300_v2 }
 0xefb   : > { %6173 = vmatpush1.bf16.msra.mxu0 %v9298_v50 }
 0xefc   : > { %6174 = vmatprep.subr.bf16.mxu0 %v9303_v54 }
 0xeff   : > { %6175 = vmatpush1.bf16.msra.mxu0 %v9301_v1 }
 0xf00   : > { %6176 = vmatprep.subr.bf16.mxu0 %v9306_v55 }
 0xf03   : > { %6177 = vmatpush1.bf16.msra.mxu0 %v9304_v43  ;;  %v9376_v43 = vld [vmem:[%s11531_s3 + $0x370] ss:$8 sps:$4 sm:$0xff]  }
 0xf04   : > { %6189 = vmatprep.subr.bf16.mxu0 %v9309_v5 }
 0xf06   : > { %6179 = vmatmul.mubr.bf16.vlgmr.msra.gmra.mrb[60].mxu0 %v5312_v7  ;;  %v9319_v7 = vld [vmem:[%s11531_s3 + $0x240] ss:$8 sps:$4 sm:$0xff]  }
 0xf07   : > { %6190 = vmatpush1.bf16.msra.mxu0 %v9307_v57  ;;  %6221 = vmatprep.mubr.bf16.mxu0 %v5315_v11  ;;  %v9327_v11 = vld [vmem:[%s11531_s3 + $0x264] ss:$8 sps:$4 sm:$0xff]  }
 0xf08   : > { %6191 = vmatprep.subr.bf16.mxu0 %v9312_v38  ;;  %v9381_v57 = vld [vmem:[%s11531_s3 + $0x384] ss:$8 sps:$4 sm:$0xff]   ;;  %v9379_v38 = vld [vmem:[%s11531_s3 + $0x380] ss:$8 sps:$4 sm:$0xff]  }
 0xf0b   : > { %6192 = vmatpush1.bf16.msra.mxu0 %v9310_v44  ;;  %v9384_v44 = vld [vmem:[%s11531_s3 + $0x394] ss:$8 sps:$4 sm:$0xff]  }
 0xf0c   : > { %6193 = vmatprep.subr.bf16.mxu0 %v9315_v41  ;;  %v9382_v41 = vld [vmem:[%s11531_s3 + $0x390] ss:$8 sps:$4 sm:$0xff]  }
 0xf0f   : > { %6194 = vmatpush1.bf16.msra.mxu0 %v9313_v13  ;;  %v9387_v13 = vld [vmem:[%s11531_s3 + $0x3a4] ss:$8 sps:$4 sm:$0xff]  }
 0xf10   : > { %6195 = vmatprep.subr.bf16.mxu0 %v9318_v21  ;;  %v9385_v21 = vld [vmem:[%s11531_s3 + $0x3a0] ss:$8 sps:$4 sm:$0xff]  }
 0xf13   : > { %6196 = vmatpush1.bf16.msra.mxu0 %v9316_v59  ;;  %v9390_v59 = vld [vmem:[%s11531_s3 + $0x3b4] ss:$8 sps:$4 sm:$0xff]  }
 0xf14   : > { %6197 = vmatprep.subr.bf16.mxu0 %v9321_v42  ;;  %v9388_v42 = vld [vmem:[%s11531_s3 + $0x3b0] ss:$8 sps:$4 sm:$0xff]  }
 0xf17   : > { %6198 = vmatpush1.bf16.msra.mxu0 %v9319_v7  ;;  %v9393_v7 = vld [vmem:[%s11531_s3 + $0x3c4] ss:$8 sps:$4 sm:$0xff]  }
 0xf18   : > { %6199 = vmatprep.subr.bf16.mxu0 %v9324_v14  ;;  %v9391_v14 = vld [vmem:[%s11531_s3 + $0x3c0] ss:$8 sps:$4 sm:$0xff]  }
 0xf1b   : > { %6200 = vmatpush1.bf16.msra.mxu0 %v9322_v52  ;;  %v9396_v52 = vld [vmem:[%s11531_s3 + $0x3d4] ss:$8 sps:$4 sm:$0xff]  }
 0xf1c   : > { %6201 = vmatprep.subr.bf16.mxu0 %v9327_v11  ;;  %v9394_v11 = vld [vmem:[%s11531_s3 + $0x3d0] ss:$8 sps:$4 sm:$0xff]  }
 0xf1f   : > { %6202 = vmatpush1.bf16.msra.mxu0 %v9325_v62  ;;  %v9399_v62 = vld [vmem:[%s11531_s3 + $0x3e4] ss:$8 sps:$4 sm:$0xff]  }
 0xf20   : > { %6203 = vmatprep.subr.bf16.mxu0 %v9330_v0  ;;  %v9397_v0 = vld [vmem:[%s11531_s3 + $0x3e0] ss:$8 sps:$4 sm:$0xff]  }
 0xf23   : > { %6204 = vmatpush1.bf16.msra.mxu0 %v9328_v47  ;;  %v9402_v47 = vld [vmem:[%s11531_s3 + $0x3f4] ss:$8 sps:$4 sm:$0xff]  }
 0xf24   : > { %6205 = vmatprep.subr.bf16.mxu0 %v9333_v34  ;;  %v9400_v34 = vld [vmem:[%s11531_s3 + $0x3f0] ss:$8 sps:$4 sm:$0xff]  }
 0xf27   : > { %6206 = vmatpush1.bf16.msra.mxu0 %v9331_v10  ;;  %v5451_v10 = vld [vmem:[%s5450_s15] sm:$0x3] }
 0xf28   : > { %6207 = vmatprep.subr.bf16.mxu0 %v9336_v33  ;;  %v5456_v33 = vrot.slane %v5451_v10, %v10767_v35 }
 0xf2b   : > { %6208 = vmatpush1.bf16.msra.mxu0 %v9334_v32  ;;  %v5460_v32 = vrot.slane %v5451_v10, %v10763_v31  ;;  %v9444_v10 = vld [vmem:[%s11694_s14 + $0x274] ss:$24 sps:$4 sm:$0xff]  }
 0xf2c   : > { %6209 = vmatprep.subr.bf16.mxu0 %v9339_v46 }
 0xf2f   : > { %6210 = vmatpush1.bf16.msra.mxu0 %v9337_v12 }
 0xf30   : > { %6211 = vmatprep.subr.bf16.mxu0 %v9342_v51 }
 0xf33   : > { %6212 = vmatpush1.bf16.msra.mxu0 %v9340_v20 }
 0xf34   : > { %6213 = vmatprep.subr.bf16.mxu0 %v9345_v39 }
 0xf37   : > { %6214 = vmatpush1.bf16.msra.mxu0 %v9343_v28 }
 0xf38   : > { %6215 = vmatprep.subr.bf16.mxu0 %v9348_v4 }
 0xf3b   : > { %6216 = vmatpush1.bf16.msra.mxu0 %v9346_v40 }
 0xf3c   : > { %6217 = vmatprep.subr.bf16.mxu0 %v9351_v36 }
 0xf3f   : > { %6218 = vmatpush1.bf16.msra.mxu0 %v9349_v37 }
 0xf40   : > { %6219 = vmatprep.subr.bf16.mxu0 %v9354_v8  ;;  %v12053_v8 = vld [vmem:[#allocation52_spill] sm:$0xff] }
 0xf43   : > { %6220 = vmatpush1.bf16.msra.mxu0 %v9352_v53 }
 0xf44   : > { %6232 = vmatprep.subr.bf16.mxu0 %v9357_v18  ;;  %v12054_v18 = vld [vmem:[#allocation51_spill] sm:$0xff] }
 0xf46   : > { %6222 = vmatmul.mubr.bf16.vlgmr.msra.gmra.mrb[60].mxu0 %v5314_v6  ;;  %v9370_v6 = vld [vmem:[%s11531_s3 + $0x350] ss:$8 sps:$4 sm:$0xff]  }
 0xf47   : > { %6233 = vmatpush1.bf16.msra.mxu0 %v9355_v29 }
 0xf48   : > { %6234 = vmatprep.subr.bf16.mxu0 %v9360_v56 }
 0xf4b   : > { %6235 = vmatpush1.bf16.msra.mxu0 %v9358_v17 }
 0xf4c   : > { %6236 = vmatprep.subr.bf16.mxu0 %v9363_v16  ;;  %v9408_v16 = vld [vmem:[%s11694_s14 + $0x34] ss:$24 sps:$4 sm:$0xff]  }
 0xf4f   : > { %6237 = vmatpush1.bf16.msra.mxu0 %v9361_v25  ;;  %v9406_v25 = vld [vmem:[%s11694_s14 + $0x30] ss:$24 sps:$4 sm:$0xff]  }
 0xf50   : > { %6238 = vmatprep.subr.bf16.mxu0 %v9366_v61  ;;  %v9411_v61 = vld [vmem:[%s11694_s14 + $0x64] ss:$24 sps:$4 sm:$0xff]  }
 0xf53   : > { %6239 = vmatpush1.bf16.msra.mxu0 %v9364_v9  ;;  %v9409_v9 = vld [vmem:[%s11694_s14 + $0x60] ss:$24 sps:$4 sm:$0xff]  }
 0xf54   : > { %6240 = vmatprep.subr.bf16.mxu0 %v9369_v45  ;;  %v9414_v45 = vld [vmem:[%s11694_s14 + $0x94] ss:$24 sps:$4 sm:$0xff]  }
 0xf57   : > { %6241 = vmatpush1.bf16.msra.mxu0 %v9367_v22  ;;  %v9412_v22 = vld [vmem:[%s11694_s14 + $0x90] ss:$24 sps:$4 sm:$0xff]  }
 0xf58   : > { %6242 = vmatprep.subr.bf16.mxu0 %v9372_v60  ;;  %v9417_v60 = vld [vmem:[%s11694_s14 + $0xc4] ss:$24 sps:$4 sm:$0xff]  }
 0xf59   : > { %v5253_v24 = vpop.f32.mrb[56].mxu0 }
 0xf5a   : > { %v5255_v49 = vpop.f32.mrb[57].mxu0 }
 0xf5b   : > { %6243 = vmatpush1.bf16.msra.mxu0 %v9370_v6  ;;  %v5257_v48 = vpop.f32.mrb[58].mxu0  ;;  %v9415_v6 = vld [vmem:[%s11694_s14 + $0xc0] ss:$24 sps:$4 sm:$0xff]  }
 0xf5c   : > { %v5258_v15 = vpop.f32.mrb[59].mxu0  ;;  %6244 = vmatprep.subr.bf16.mxu0 %v9375_v19  ;;  %v9420_v19 = vld [vmem:[%s11694_s14 + $0xf4] ss:$24 sps:$4 sm:$0xff]   ;;  %v9421_v48 = vld [vmem:[%s11694_s14 + $0x120] ss:$24 sps:$4 sm:$0xff]  }
 0xf5d   : > { %v5303_v2 = vpop.f32.mrb[48].mxu1  ;;  %v9424_v15 = vld [vmem:[%s11694_s14 + $0x150] ss:$24 sps:$4 sm:$0xff]  }
 0xf5e   : > { %v5316_v50 = vpack.c.bf16 %v5303_v2, %v5253_v24  ;;  %v5305_v54 = vpop.f32.mrb[49].mxu1  ;;  %v9418_v24 = vld [vmem:[%s11694_s14 + $0xf0] ss:$24 sps:$4 sm:$0xff]   ;;  %v9427_v2 = vld [vmem:[%s11694_s14 + $0x180] ss:$24 sps:$4 sm:$0xff]  }
 0xf5f   : > { %v5317_v1 = vpack.c.bf16 %v5305_v54, %v5255_v49  ;;  %6245 = vmatpush1.bf16.msra.mxu0 %v9373_v63  ;;  %v5307_v55 = vpop.f32.mrb[50].mxu1  ;;  %v9423_v49 = vld [vmem:[%s11694_s14 + $0x124] ss:$24 sps:$4 sm:$0xff]   ;;  %v9426_v63 = vld [vmem:[%s11694_s14 + $0x154] ss:$24 sps:$4 sm:$0xff]  }
 0xf60   : > { %v5308_v5 = vpop.f32.mrb[51].mxu1  ;;  %6246 = vmatprep.subr.bf16.mxu0 %v9378_v23  ;;  %v9429_v23 = vld [vmem:[%s11694_s14 + $0x184] ss:$24 sps:$4 sm:$0xff]   ;;  %v9430_v54 = vld [vmem:[%s11694_s14 + $0x1b0] ss:$24 sps:$4 sm:$0xff]  }
 0xf61   : > { %6264 = vmatprep.mubr.bf16.mxu0 %v5317_v1 }
 0xf63   : > { %6247 = vmatpush1.bf16.msra.mxu0 %v9376_v43 }
 0xf64   : > { %6248 = vmatprep.subr.bf16.mxu0 %v9381_v57 }
 0xf67   : > { %6249 = vmatpush1.bf16.msra.mxu0 %v9379_v38 }
 0xf68   : > { %6250 = vmatprep.subr.bf16.mxu0 %v9384_v44 }
 0xf6b   : > { %6251 = vmatpush1.bf16.msra.mxu0 %v9382_v41 }
 0xf6c   : > { %6252 = vmatprep.subr.bf16.mxu0 %v9387_v13 }
 0xf6f   : > { %6253 = vmatpush1.bf16.msra.mxu0 %v9385_v21 }
 0xf70   : > { %6254 = vmatprep.subr.bf16.mxu0 %v9390_v59 }
 0xf73   : > { %6255 = vmatpush1.bf16.msra.mxu0 %v9388_v42 }
 0xf74   : > { %6256 = vmatprep.subr.bf16.mxu0 %v9393_v7 }
 0xf77   : > { %6257 = vmatpush1.bf16.msra.mxu0 %v9391_v14 }
 0xf78   : > { %6258 = vmatprep.subr.bf16.mxu0 %v9396_v52  ;;  %v9435_v52 = vld [vmem:[%s11694_s14 + $0x1e4] ss:$24 sps:$4 sm:$0xff]  }
 0xf7b   : > { %6259 = vmatpush1.bf16.msra.mxu0 %v9394_v11  ;;  %v9433_v11 = vld [vmem:[%s11694_s14 + $0x1e0] ss:$24 sps:$4 sm:$0xff]  }
 0xf7c   : > { %6260 = vmatprep.subr.bf16.mxu0 %v9399_v62  ;;  %v9438_v62 = vld [vmem:[%s11694_s14 + $0x214] ss:$24 sps:$4 sm:$0xff]  }
 0xf7f   : > { %6261 = vmatpush1.bf16.msra.mxu0 %v9397_v0  ;;  %v9436_v0 = vld [vmem:[%s11694_s14 + $0x210] ss:$24 sps:$4 sm:$0xff]  }
 0xf80   : > { %6262 = vmatprep.subr.bf16.mxu0 %v9402_v47  ;;  %v9441_v47 = vld [vmem:[%s11694_s14 + $0x244] ss:$24 sps:$4 sm:$0xff]  }
 0xf83   : > { %6263 = vmatpush1.bf16.msra.mxu0 %v9400_v34  ;;  %v9439_v34 = vld [vmem:[%s11694_s14 + $0x240] ss:$24 sps:$4 sm:$0xff]  }
 0xf86   : > { %6265 = vmatmul.mubr.bf16.vlgmr.msra.gmra.mrb[60].mxu0 %v5316_v50  ;;  %v9432_v50 = vld [vmem:[%s11694_s14 + $0x1b4] ss:$24 sps:$4 sm:$0xff]  }
0x1059   : > { %v6266_v46 = vpop.f32.mrb[60].mxu0 }
0x105a   : > { %v8901_v12 = vadd.f32 %v6266_v46, %v5456_v33  ;;  %v6268_v51 = vpop.f32.mrb[61].mxu0  ;;  %v9445_v46 = vld [vmem:[%s11694_s14 + $0x2a0] ss:$24 sps:$4 sm:$0xff]  }
0x105b   : > { %v8902_v20 = vadd.f32 %v6268_v51, %v5460_v32  ;;  %v6270_v39 = vpop.f32.mrb[62].mxu0  ;;  %v9448_v51 = vld [vmem:[%s11694_s14 + $0x2d0] ss:$24 sps:$4 sm:$0xff]  }
0x105c   : > { %v6275_v28 = vadd.f32 %v10254_v26, %v8901_v12  ;;  %v8903_v4 = vadd.f32 %v6270_v39, %v5456_v33  ;;  %v6272_v40 = vpop.f32.mrb[63].mxu0  ;;  %v9403_v26 = vld [vmem:[%s11694_s14] ss:$24 sps:$4 sm:$0xff]   ;;  %v9442_v33 = vld [vmem:[%s11694_s14 + $0x270] ss:$24 sps:$4 sm:$0xff]  }
0x105d   : > { %v6276_v36 = vadd.f32 %v10250_v27, %v8902_v20  ;;  %v8904_v37 = vadd.f32 %v6272_v40, %v5460_v32  ;;  %v9405_v27 = vld [vmem:[%s11694_s14 + $0x4] ss:$24 sps:$4 sm:$0xff]   ;;  %v9450_v12 = vld [vmem:[%s11694_s14 + $0x2d4] ss:$24 sps:$4 sm:$0xff]  }
0x105e   : > { %v6277_v53 = vadd.f32 %v12053_v8, %v8903_v4  ;;  %6960 = vmatprep.subr.bf16.mxu1 %v9405_v27  ;;  %v9447_v32 = vld [vmem:[%s11694_s14 + $0x2a4] ss:$24 sps:$4 sm:$0xff]   ;;  %v6280_v8 = vld [vmem:[%s6279_s27] sm:$0x3] }
0x105f   : > { %v6278_v29 = vadd.f32 %v12054_v18, %v8904_v37  ;;  %v6283_v56 = vadd.f32 %v6276_v36, %v6275_v28  ;;  %6961 = vmatpush1.bf16.msra.mxu1 %v9403_v26  ;;  %v9453_v20 = vld [vmem:[%s11694_s14 + $0xc] ss:$24 sps:$4 sm:$0xff]   ;;  %v6319_v18 = vrot.slane %v6280_v8, %v10767_v35 }
0x1060   : > { %6962 = vmatprep.subr.bf16.mxu1 %v9408_v16 }
0x1061   : > { %6284 = vadd.xlane.f32.xlu0 %v6283_v56  ;;  %v6286_v17 = vadd.f32 %v6278_v29, %v6277_v53 }
0x1063   : > { %6287 = vadd.xlane.f32.xlu1 %v6286_v17  ;;  %6963 = vmatpush1.bf16.msra.mxu1 %v9406_v25 }
0x1064   : > { %6964 = vmatprep.subr.bf16.mxu1 %v9411_v61 }
0x1067   : > { %6965 = vmatpush1.bf16.msra.mxu1 %v9409_v9 }
0x1068   : > { %6966 = vmatprep.subr.bf16.mxu1 %v9414_v45 }
0x106b   : > { %6967 = vmatpush1.bf16.msra.mxu1 %v9412_v22 }
0x106c   : > { %6968 = vmatprep.subr.bf16.mxu1 %v9417_v60 }
0x106f   : > { %6969 = vmatpush1.bf16.msra.mxu1 %v9415_v6 }
0x1070   : > { %6970 = vmatprep.subr.bf16.mxu1 %v9420_v19 }
0x1073   : > { %6971 = vmatpush1.bf16.msra.mxu1 %v9418_v24 }
0x1074   : > { %6972 = vmatprep.subr.bf16.mxu1 %v9423_v49 }
0x1077   : > { %6973 = vmatpush1.bf16.msra.mxu1 %v9421_v48 }
0x1078   : > { %6974 = vmatprep.subr.bf16.mxu1 %v9426_v63 }
0x107b   : > { %6975 = vmatpush1.bf16.msra.mxu1 %v9424_v15  ;;  %v9451_v15 = vld [vmem:[%s11694_s14 + $0x8] ss:$24 sps:$4 sm:$0xff]  }
0x107c   : > { %6976 = vmatprep.subr.bf16.mxu1 %v9429_v23 }
0x107f   : > { %6977 = vmatpush1.bf16.msra.mxu1 %v9427_v2  ;;  %v9456_v2 = vld [vmem:[%s11694_s14 + $0x3c] ss:$24 sps:$4 sm:$0xff]  }
0x1080   : > { %6978 = vmatprep.subr.bf16.mxu1 %v9432_v50  ;;  %v9454_v50 = vld [vmem:[%s11694_s14 + $0x38] ss:$24 sps:$4 sm:$0xff]  }
0x1083   : > { %6979 = vmatpush1.bf16.msra.mxu1 %v9430_v54  ;;  %v9459_v54 = vld [vmem:[%s11694_s14 + $0x6c] ss:$24 sps:$4 sm:$0xff]  }
0x1084   : > { %6980 = vmatprep.subr.bf16.mxu1 %v9435_v52  ;;  %v9478_v52 = vld [vmem:[%s11694_s14 + $0x1b8] ss:$24 sps:$4 sm:$0xff]  }
0x1087   : > { %6981 = vmatpush1.bf16.msra.mxu1 %v9433_v11  ;;  %v9483_v11 = vld [vmem:[%s11694_s14 + $0x1ec] ss:$24 sps:$4 sm:$0xff]  }
0x1088   : > { %6982 = vmatprep.subr.bf16.mxu1 %v9438_v62  ;;  %v9481_v62 = vld [vmem:[%s11694_s14 + $0x1e8] ss:$24 sps:$4 sm:$0xff]  }
0x108b   : > { %6983 = vmatpush1.bf16.msra.mxu1 %v9436_v0  ;;  %v9486_v0 = vld [vmem:[%s11694_s14 + $0x21c] ss:$24 sps:$4 sm:$0xff]  }
0x108c   : > { %6984 = vmatprep.subr.bf16.mxu1 %v9441_v47  ;;  %v9484_v47 = vld [vmem:[%s11694_s14 + $0x218] ss:$24 sps:$4 sm:$0xff]  }
0x108f   : > { %6985 = vmatpush1.bf16.msra.mxu1 %v9439_v34  ;;  %v9489_v34 = vld [vmem:[%s11694_s14 + $0x24c] ss:$24 sps:$4 sm:$0xff]  }
0x1090   : > { %6986 = vmatprep.subr.bf16.mxu1 %v9444_v10  ;;  %v9487_v10 = vld [vmem:[%s11694_s14 + $0x248] ss:$24 sps:$4 sm:$0xff]  }
0x1093   : > { %6987 = vmatpush1.bf16.msra.mxu1 %v9442_v33  ;;  %v9492_v33 = vld [vmem:[%s11694_s14 + $0x27c] ss:$24 sps:$4 sm:$0xff]  }
0x1094   : > { %6988 = vmatprep.subr.bf16.mxu1 %v9447_v32  ;;  %v9490_v32 = vld [vmem:[%s11694_s14 + $0x278] ss:$24 sps:$4 sm:$0xff]  }
0x1097   : > { %6989 = vmatpush1.bf16.msra.mxu1 %v9445_v46  ;;  %v9495_v46 = vld [vmem:[%s11694_s14 + $0x2ac] ss:$24 sps:$4 sm:$0xff]  }
0x1098   : > { %6990 = vmatprep.subr.bf16.mxu1 %v9450_v12  ;;  %v9493_v12 = vld [vmem:[%s11694_s14 + $0x2a8] ss:$24 sps:$4 sm:$0xff]  }
0x109b   : > { %6991 = vmatpush1.bf16.msra.mxu1 %v9448_v51  ;;  %v9498_v51 = vld [vmem:[%s11694_s14 + $0x2dc] ss:$24 sps:$4 sm:$0xff]  }
0x109c   : > { %7003 = vmatprep.subr.bf16.mxu1 %v9453_v20  ;;  %v9496_v20 = vld [vmem:[%s11694_s14 + $0x2d8] ss:$24 sps:$4 sm:$0xff]  }
0x10ee   : > { %v6285_v1 = vpop.xlane.xlu0 %6284 }
0x10ef   : > { %v6289_v55 = vmul.f32 0.00390625, %v6285_v1  ;;  %v9457_v1 = vld [vmem:[%s11694_s14 + $0x68] ss:$24 sps:$4 sm:$0xff]  }
0x10f0   : > { %v6288_v43 = vpop.xlane.xlu1 %6287 }
0x10f1   : > { %v6291_v5 = vsub.f32 %v6275_v28, %v6289_v55  ;;  %v6292_v57 = vsub.f32 %v6276_v36, %v6289_v55  ;;  %v6290_v38 = vmul.f32 0.00390625, %v6288_v43  ;;  %v9462_v55 = vld [vmem:[%s11694_s14 + $0x9c] ss:$24 sps:$4 sm:$0xff]   ;;  %v9460_v43 = vld [vmem:[%s11694_s14 + $0x98] ss:$24 sps:$4 sm:$0xff]  }
0x10f3   : > { %v6293_v44 = vsub.f32 %v6277_v53, %v6290_v38  ;;  %v6294_v41 = vsub.f32 %v6278_v29, %v6290_v38  ;;  %v6295_v13 = vmul.f32 %v6291_v5, %v6291_v5  ;;  %v6296_v21 = vmul.f32 %v6292_v57, %v6292_v57  ;;  %v6282_v53 = vld [vmem:[%s6281_s1] sm:$0x3]  ;;  %v9468_v38 = vld [vmem:[%s11694_s14 + $0xfc] ss:$24 sps:$4 sm:$0xff]  }
0x10f4   : > { %v6323_v29 = vrot.slane %v6280_v8, %v10763_v31  ;;  %v6334_v16 = vrot.slane %v6282_v53, %v10767_v35  ;;  %v6338_v25 = vrot.slane %v6282_v53, %v10763_v31  ;;  %v9510_v8 = vld [vmem:[%s11694_s14 + $0xa4] ss:$24 sps:$4 sm:$0xff]   ;;  %v9508_v53 = vld [vmem:[%s11694_s14 + $0xa0] ss:$24 sps:$4 sm:$0xff]  }
0x10f5   : > { %v6299_v59 = vadd.f32 %v6296_v21, %v6295_v13  ;;  %v6297_v42 = vmul.f32 %v6293_v44, %v6293_v44  ;;  %v6298_v7 = vmul.f32 %v6294_v41, %v6294_v41  ;;  %v9469_v13 = vld [vmem:[%s11694_s14 + $0x128] ss:$24 sps:$4 sm:$0xff]   ;;  %v9474_v21 = vld [vmem:[%s11694_s14 + $0x15c] ss:$24 sps:$4 sm:$0xff]  }
0x10f7   : > { %6300 = vadd.xlane.f32.xlu0 %v6299_v59  ;;  %v6302_v14 = vadd.f32 %v6298_v7, %v6297_v42  ;;  %v9472_v59 = vld [vmem:[%s11694_s14 + $0x158] ss:$24 sps:$4 sm:$0xff]   ;;  %v9477_v42 = vld [vmem:[%s11694_s14 + $0x18c] ss:$24 sps:$4 sm:$0xff]   ;;  %v9475_v7 = vld [vmem:[%s11694_s14 + $0x188] ss:$24 sps:$4 sm:$0xff]  }
0x10f9   : > { %6303 = vadd.xlane.f32.xlu1 %v6302_v14  ;;  %v9480_v14 = vld [vmem:[%s11694_s14 + $0x1bc] ss:$24 sps:$4 sm:$0xff]  }
0x1184   : > { %v6301_v39 = vpop.xlane.xlu0 %6300 }
0x1185   : > { %v6305_v28 = vmul.f32 0.00390625, %v6301_v39  ;;  %v9501_v39 = vld [vmem:[%s11694_s14 + $0x14] ss:$24 sps:$4 sm:$0xff]  }
0x1186   : > { %v6304_v4 = vpop.xlane.xlu1 %6303 }
0x1187   : > { %v6307_v40 = vadd.f32 1e-05, %v6305_v28  ;;  %v6306_v36 = vmul.f32 0.00390625, %v6304_v4  ;;  %v9499_v28 = vld [vmem:[%s11694_s14 + $0x10] ss:$24 sps:$4 sm:$0xff]  }
0x1188   : > { %v9504_v4 = vld [vmem:[%s11694_s14 + $0x44] ss:$24 sps:$4 sm:$0xff]  }
0x1189   : > { %9723 = vrsqrt.f32 %v6307_v40  ;;  %v6308_v37 = vadd.f32 1e-05, %v6306_v36  ;;  %v9502_v40 = vld [vmem:[%s11694_s14 + $0x40] ss:$24 sps:$4 sm:$0xff]   ;;  %v9507_v36 = vld [vmem:[%s11694_s14 + $0x74] ss:$24 sps:$4 sm:$0xff]  }
0x118b   : > { %9725 = vrsqrt.f32 %v6308_v37  ;;  %v9505_v37 = vld [vmem:[%s11694_s14 + $0x70] ss:$24 sps:$4 sm:$0xff]  }
0x1193   : > { %v9724_v56 = vpop.eup %9723 }
0x1194   : > { %v6311_v17 = vmul.f32 %v9724_v56, %v6291_v5  ;;  %v6312_v26 = vmul.f32 %v9724_v56, %v6292_v57  ;;  %v9465_v5 = vld [vmem:[%s11694_s14 + $0xcc] ss:$24 sps:$4 sm:$0xff]   ;;  %v9463_v57 = vld [vmem:[%s11694_s14 + $0xc8] ss:$24 sps:$4 sm:$0xff]  }
0x1195   : > { %v9726_v27 = vpop.eup %9725  ;;  %v9516_v56 = vld [vmem:[%s11694_s14 + $0x104] ss:$24 sps:$4 sm:$0xff]  }
0x1196   : > { %v6313_v61 = vmul.f32 %v9726_v27, %v6293_v44  ;;  %v6314_v9 = vmul.f32 %v9726_v27, %v6294_v41  ;;  %v6327_v45 = vmul.f32 %v6323_v29, %v6312_v26  ;;  %v6326_v22 = vmul.f32 %v6319_v18, %v6311_v17  ;;  %v9466_v44 = vld [vmem:[%s11694_s14 + $0xf8] ss:$24 sps:$4 sm:$0xff]   ;;  %v9471_v41 = vld [vmem:[%s11694_s14 + $0x12c] ss:$24 sps:$4 sm:$0xff]  }
0x1197   : > { %v9514_v17 = vld [vmem:[%s11694_s14 + $0x100] ss:$24 sps:$4 sm:$0xff]   ;;  %v9519_v26 = vld [vmem:[%s11694_s14 + $0x134] ss:$24 sps:$4 sm:$0xff]   ;;  %v9517_v27 = vld [vmem:[%s11694_s14 + $0x130] ss:$24 sps:$4 sm:$0xff]  }
0x1198   : > { %v6329_v60 = vmul.f32 %v6323_v29, %v6314_v9  ;;  %v6328_v6 = vmul.f32 %v6319_v18, %v6313_v61  ;;  %v11735_v19 = vadd.f32 %v6338_v25, %v6327_v45  ;;  %v11739_v49 = vadd.f32 %v6334_v16, %v6326_v22  ;;  %v9513_v18 = vld [vmem:[%s11694_s14 + $0xd4] ss:$24 sps:$4 sm:$0xff]   ;;  %v9511_v29 = vld [vmem:[%s11694_s14 + $0xd0] ss:$24 sps:$4 sm:$0xff]   ;;  %v9528_v45 = vld [vmem:[%s11694_s14 + $0x1c4] ss:$24 sps:$4 sm:$0xff]  }
0x1199   : > { %v9525_v61 = vld [vmem:[%s11694_s14 + $0x194] ss:$24 sps:$4 sm:$0xff]   ;;  %v9523_v9 = vld [vmem:[%s11694_s14 + $0x190] ss:$24 sps:$4 sm:$0xff]   ;;  %v9526_v22 = vld [vmem:[%s11694_s14 + $0x1c0] ss:$24 sps:$4 sm:$0xff]  }
0x119a   : > { %v11737_v24 = vadd.f32 %v6338_v25, %v6329_v60  ;;  %v11741_v48 = vadd.f32 %v6334_v16, %v6328_v6  ;;  %v9522_v16 = vld [vmem:[%s11694_s14 + $0x164] ss:$24 sps:$4 sm:$0xff]   ;;  %v9520_v25 = vld [vmem:[%s11694_s14 + $0x160] ss:$24 sps:$4 sm:$0xff]   ;;  %v9531_v60 = vld [vmem:[%s11694_s14 + $0x1f4] ss:$24 sps:$4 sm:$0xff]  }
0x119b   : > { %v9529_v6 = vld [vmem:[%s11694_s14 + $0x1f0] ss:$24 sps:$4 sm:$0xff]  }
0x119c   : > { %v11745_v63 = vpack.c.bf16 %v11737_v24, %v11735_v19  ;;  %v11750_v23 = vpack.c.bf16 %v11741_v48, %v11739_v49 }
0x119e   : > { %6992 = vmatprep.mubr.bf16.mxu1 %v11745_v63 }
0x119f   : > { %6993 = vmatmul.mubr.bf16.vlgmr.msra.gmra.mrb[52].mxu1 %v11750_v23 }
0x11a0   : > { %7004 = vmatpush1.bf16.msra.mxu1 %v9451_v15  ;;  %7035 = vmatprep.mubr.bf16.mxu1 %v11745_v63  ;;  %v9532_v15 = vld [vmem:[%s11694_s14 + $0x220] ss:$24 sps:$4 sm:$0xff]  }
0x11a1   : > { %7005 = vmatprep.subr.bf16.mxu1 %v9456_v2  ;;  %v9537_v2 = vld [vmem:[%s11694_s14 + $0x254] ss:$24 sps:$4 sm:$0xff]  }
0x11a4   : > { %7006 = vmatpush1.bf16.msra.mxu1 %v9454_v50  ;;  %v9535_v50 = vld [vmem:[%s11694_s14 + $0x250] ss:$24 sps:$4 sm:$0xff]  }
0x11a5   : > { %7007 = vmatprep.subr.bf16.mxu1 %v9459_v54  ;;  %v9540_v54 = vld [vmem:[%s11694_s14 + $0x284] ss:$24 sps:$4 sm:$0xff]  }
0x11a8   : > { %7008 = vmatpush1.bf16.msra.mxu1 %v9457_v1  ;;  %v9538_v1 = vld [vmem:[%s11694_s14 + $0x280] ss:$24 sps:$4 sm:$0xff]  }
0x11a9   : > { %7009 = vmatprep.subr.bf16.mxu1 %v9462_v55  ;;  %v9543_v55 = vld [vmem:[%s11694_s14 + $0x2b4] ss:$24 sps:$4 sm:$0xff]  }
0x11ac   : > { %7010 = vmatpush1.bf16.msra.mxu1 %v9460_v43  ;;  %v9541_v43 = vld [vmem:[%s11694_s14 + $0x2b0] ss:$24 sps:$4 sm:$0xff]  }
0x11ad   : > { %7011 = vmatprep.subr.bf16.mxu1 %v9465_v5  ;;  %v9546_v5 = vld [vmem:[%s11694_s14 + $0x2e4] ss:$24 sps:$4 sm:$0xff]  }
0x11b0   : > { %7012 = vmatpush1.bf16.msra.mxu1 %v9463_v57  ;;  %v9544_v57 = vld [vmem:[%s11694_s14 + $0x2e0] ss:$24 sps:$4 sm:$0xff]  }
0x11b1   : > { %7013 = vmatprep.subr.bf16.mxu1 %v9468_v38  ;;  %v9549_v38 = vld [vmem:[%s11759_s25 + $0x4] ss:$8 sps:$4 sm:$0xff]  }
0x11b4   : > { %7014 = vmatpush1.bf16.msra.mxu1 %v9466_v44  ;;  %v9547_v44 = vld [vmem:[%s11759_s25] ss:$8 sps:$4 sm:$0xff]  }
0x11b5   : > { %7015 = vmatprep.subr.bf16.mxu1 %v9471_v41  ;;  %v9552_v41 = vld [vmem:[%s11759_s25 + $0x14] ss:$8 sps:$4 sm:$0xff]  }
0x11b8   : > { %7016 = vmatpush1.bf16.msra.mxu1 %v9469_v13  ;;  %v9550_v13 = vld [vmem:[%s11759_s25 + $0x10] ss:$8 sps:$4 sm:$0xff]  }
0x11b9   : > { %7017 = vmatprep.subr.bf16.mxu1 %v9474_v21  ;;  %v9555_v21 = vld [vmem:[%s11759_s25 + $0x24] ss:$8 sps:$4 sm:$0xff]  }
0x11bc   : > { %7018 = vmatpush1.bf16.msra.mxu1 %v9472_v59  ;;  %v9553_v59 = vld [vmem:[%s11759_s25 + $0x20] ss:$8 sps:$4 sm:$0xff]  }
0x11bd   : > { %7019 = vmatprep.subr.bf16.mxu1 %v9477_v42  ;;  %v9558_v42 = vld [vmem:[%s11759_s25 + $0x34] ss:$8 sps:$4 sm:$0xff]  }
0x11c0   : > { %7020 = vmatpush1.bf16.msra.mxu1 %v9475_v7  ;;  %v9556_v7 = vld [vmem:[%s11759_s25 + $0x30] ss:$8 sps:$4 sm:$0xff]  }
0x11c1   : > { %7021 = vmatprep.subr.bf16.mxu1 %v9480_v14  ;;  %v9561_v14 = vld [vmem:[%s11759_s25 + $0x44] ss:$8 sps:$4 sm:$0xff]  }
0x11c4   : > { %7022 = vmatpush1.bf16.msra.mxu1 %v9478_v52  ;;  %v9564_v52 = vld [vmem:[%s11759_s25 + $0x54] ss:$8 sps:$4 sm:$0xff]  }
0x11c5   : > { %7023 = vmatprep.subr.bf16.mxu1 %v9483_v11  ;;  %v9562_v11 = vld [vmem:[%s11759_s25 + $0x50] ss:$8 sps:$4 sm:$0xff]  }
0x11c8   : > { %7024 = vmatpush1.bf16.msra.mxu1 %v9481_v62  ;;  %v9567_v62 = vld [vmem:[%s11759_s25 + $0x64] ss:$8 sps:$4 sm:$0xff]  }
0x11c9   : > { %7025 = vmatprep.subr.bf16.mxu1 %v9486_v0  ;;  %v9565_v0 = vld [vmem:[%s11759_s25 + $0x60] ss:$8 sps:$4 sm:$0xff]  }
0x11cc   : > { %7026 = vmatpush1.bf16.msra.mxu1 %v9484_v47  ;;  %v9570_v47 = vld [vmem:[%s11759_s25 + $0x74] ss:$8 sps:$4 sm:$0xff]  }
0x11cd   : > { %7027 = vmatprep.subr.bf16.mxu1 %v9489_v34  ;;  %v9568_v34 = vld [vmem:[%s11759_s25 + $0x70] ss:$8 sps:$4 sm:$0xff]  }
0x11d0   : > { %7028 = vmatpush1.bf16.msra.mxu1 %v9487_v10  ;;  %v9573_v10 = vld [vmem:[%s11759_s25 + $0x84] ss:$8 sps:$4 sm:$0xff]  }
0x11d1   : > { %7029 = vmatprep.subr.bf16.mxu1 %v9492_v33  ;;  %v9571_v33 = vld [vmem:[%s11759_s25 + $0x80] ss:$8 sps:$4 sm:$0xff]  }
0x11d4   : > { %7030 = vmatpush1.bf16.msra.mxu1 %v9490_v32  ;;  %v9576_v32 = vld [vmem:[%s11759_s25 + $0x94] ss:$8 sps:$4 sm:$0xff]  }
0x11d5   : > { %7031 = vmatprep.subr.bf16.mxu1 %v9495_v46  ;;  %v9574_v46 = vld [vmem:[%s11759_s25 + $0x90] ss:$8 sps:$4 sm:$0xff]  }
0x11d8   : > { %7032 = vmatpush1.bf16.msra.mxu1 %v9493_v12  ;;  %v9579_v12 = vld [vmem:[%s11759_s25 + $0xa4] ss:$8 sps:$4 sm:$0xff]  }
0x11d9   : > { %7033 = vmatprep.subr.bf16.mxu1 %v9498_v51  ;;  %v9577_v51 = vld [vmem:[%s11759_s25 + $0xa0] ss:$8 sps:$4 sm:$0xff]  }
0x11dc   : > { %7034 = vmatpush1.bf16.msra.mxu1 %v9496_v20  ;;  %v9582_v20 = vld [vmem:[%s11759_s25 + $0xb4] ss:$8 sps:$4 sm:$0xff]  }
0x11dd   : > { %7046 = vmatprep.subr.bf16.mxu1 %v9501_v39  ;;  %v9580_v39 = vld [vmem:[%s11759_s25 + $0xb0] ss:$8 sps:$4 sm:$0xff]  }
0x11df   : > { %7036 = vmatmul.mubr.bf16.vlgmr.msra.gmra.mrb[56].mxu1 %v11750_v23 }
0x11e0   : > { %7047 = vmatpush1.bf16.msra.mxu1 %v9499_v28  ;;  %7078 = vmatprep.mubr.bf16.mxu1 %v11745_v63  ;;  %v9534_v63 = vld [vmem:[%s11694_s14 + $0x224] ss:$24 sps:$4 sm:$0xff]  }
0x11e1   : > { %7048 = vmatprep.subr.bf16.mxu1 %v9504_v4  ;;  %v9585_v28 = vld [vmem:[%s11759_s25 + $0xc4] ss:$8 sps:$4 sm:$0xff]   ;;  %v9583_v4 = vld [vmem:[%s11759_s25 + $0xc0] ss:$8 sps:$4 sm:$0xff]  }
0x11e4   : > { %7049 = vmatpush1.bf16.msra.mxu1 %v9502_v40  ;;  %v9588_v40 = vld [vmem:[%s11759_s25 + $0xd4] ss:$8 sps:$4 sm:$0xff]  }
0x11e5   : > { %7050 = vmatprep.subr.bf16.mxu1 %v9507_v36  ;;  %v9586_v36 = vld [vmem:[%s11759_s25 + $0xd0] ss:$8 sps:$4 sm:$0xff]  }
0x11e8   : > { %7051 = vmatpush1.bf16.msra.mxu1 %v9505_v37  ;;  %v9591_v37 = vld [vmem:[%s11759_s25 + $0xe4] ss:$8 sps:$4 sm:$0xff]  }
0x11e9   : > { %7052 = vmatprep.subr.bf16.mxu1 %v9510_v8  ;;  %v9589_v8 = vld [vmem:[%s11759_s25 + $0xe0] ss:$8 sps:$4 sm:$0xff]  }
0x11ec   : > { %7053 = vmatpush1.bf16.msra.mxu1 %v9508_v53  ;;  %v9594_v53 = vld [vmem:[%s11759_s25 + $0xf4] ss:$8 sps:$4 sm:$0xff]  }
0x11ed   : > { %7054 = vmatprep.subr.bf16.mxu1 %v9513_v18  ;;  %v9592_v18 = vld [vmem:[%s11759_s25 + $0xf0] ss:$8 sps:$4 sm:$0xff]  }
0x11f0   : > { %7055 = vmatpush1.bf16.msra.mxu1 %v9511_v29  ;;  %v9597_v29 = vld [vmem:[%s11759_s25 + $0x104] ss:$8 sps:$4 sm:$0xff]  }
0x11f1   : > { %7056 = vmatprep.subr.bf16.mxu1 %v9516_v56  ;;  %v11858_v56 = vld [vmem:[%s6447_s30] sm:$0x3f] }
0x11f4   : > { %7057 = vmatpush1.bf16.msra.mxu1 %v9514_v17  ;;  %v6453_v17 = vrot.slane %v11858_v56, %v10767_v35 }
0x11f5   : > { %7058 = vmatprep.subr.bf16.mxu1 %v9519_v26  ;;  %v6457_v26 = vrot.slane %v11858_v56, %v10763_v31 }
0x11f8   : > { %7059 = vmatpush1.bf16.msra.mxu1 %v9517_v27 }
0x11f9   : > { %7060 = vmatprep.subr.bf16.mxu1 %v9522_v16 }
0x11fc   : > { %7061 = vmatpush1.bf16.msra.mxu1 %v9520_v25 }
0x11fd   : > { %7062 = vmatprep.subr.bf16.mxu1 %v9525_v61 }
0x1200   : > { %7063 = vmatpush1.bf16.msra.mxu1 %v9523_v9 }
0x1201   : > { %7064 = vmatprep.subr.bf16.mxu1 %v9528_v45 }
0x1204   : > { %7065 = vmatpush1.bf16.msra.mxu1 %v9526_v22 }
0x1205   : > { %7066 = vmatprep.subr.bf16.mxu1 %v9531_v60 }
0x1208   : > { %7067 = vmatpush1.bf16.msra.mxu1 %v9529_v6 }
0x1209   : > { %7068 = vmatprep.subr.bf16.mxu1 %v9534_v63 }
0x120c   : > { %7069 = vmatpush1.bf16.msra.mxu1 %v9532_v15 }
0x120d   : > { %7070 = vmatprep.subr.bf16.mxu1 %v9537_v2 }
0x1210   : > { %7071 = vmatpush1.bf16.msra.mxu1 %v9535_v50 }
0x1211   : > { %7072 = vmatprep.subr.bf16.mxu1 %v9540_v54 }
0x1214   : > { %7073 = vmatpush1.bf16.msra.mxu1 %v9538_v1  ;;  %v9595_v1 = vld [vmem:[%s11759_s25 + $0x100] ss:$8 sps:$4 sm:$0xff]  }
0x1215   : > { %7074 = vmatprep.subr.bf16.mxu1 %v9543_v55  ;;  %v9600_v55 = vld [vmem:[%s11759_s25 + $0x114] ss:$8 sps:$4 sm:$0xff]  }
0x1218   : > { %7075 = vmatpush1.bf16.msra.mxu1 %v9541_v43  ;;  %v9598_v43 = vld [vmem:[%s11759_s25 + $0x110] ss:$8 sps:$4 sm:$0xff]  }
0x1219   : > { %7076 = vmatprep.subr.bf16.mxu1 %v9546_v5  ;;  %v9603_v5 = vld [vmem:[%s11759_s25 + $0x124] ss:$8 sps:$4 sm:$0xff]  }
0x121c   : > { %7077 = vmatpush1.bf16.msra.mxu1 %v9544_v57  ;;  %v9601_v57 = vld [vmem:[%s11759_s25 + $0x120] ss:$8 sps:$4 sm:$0xff]  }
0x121d   : > { %7698 = vmatprep.subr.bf16.mxu1 %v9549_v38  ;;  %v9606_v38 = vld [vmem:[%s11759_s25 + $0x134] ss:$8 sps:$4 sm:$0xff]  }
0x121f   : > { %7079 = vmatmul.mubr.bf16.vlgmr.msra.gmra.mrb[60].mxu1 %v11750_v23  ;;  %v9559_v23 = vld [vmem:[%s11759_s25 + $0x40] ss:$8 sps:$4 sm:$0xff]  }
0x1220   : > { %7699 = vmatpush1.bf16.msra.mxu1 %v9547_v44  ;;  %v9604_v44 = vld [vmem:[%s11759_s25 + $0x130] ss:$8 sps:$4 sm:$0xff]  }
0x1221   : > { %7700 = vmatprep.subr.bf16.mxu1 %v9552_v41  ;;  %v9609_v41 = vld [vmem:[%s11759_s25 + $0x144] ss:$8 sps:$4 sm:$0xff]  }
0x1224   : > { %7701 = vmatpush1.bf16.msra.mxu1 %v9550_v13  ;;  %v9607_v13 = vld [vmem:[%s11759_s25 + $0x140] ss:$8 sps:$4 sm:$0xff]  }
0x1225   : > { %7702 = vmatprep.subr.bf16.mxu1 %v9555_v21  ;;  %v9612_v21 = vld [vmem:[%s11759_s25 + $0x154] ss:$8 sps:$4 sm:$0xff]  }
0x1228   : > { %7703 = vmatpush1.bf16.msra.mxu1 %v9553_v59  ;;  %v9610_v59 = vld [vmem:[%s11759_s25 + $0x150] ss:$8 sps:$4 sm:$0xff]  }
0x1229   : > { %7704 = vmatprep.subr.bf16.mxu1 %v9558_v42  ;;  %v9615_v42 = vld [vmem:[%s11759_s25 + $0x164] ss:$8 sps:$4 sm:$0xff]  }
0x122c   : > { %7705 = vmatpush1.bf16.msra.mxu1 %v9556_v7  ;;  %v9613_v7 = vld [vmem:[%s11759_s25 + $0x160] ss:$8 sps:$4 sm:$0xff]  }
0x122d   : > { %7706 = vmatprep.subr.bf16.mxu1 %v9561_v14  ;;  %v9618_v14 = vld [vmem:[%s11759_s25 + $0x174] ss:$8 sps:$4 sm:$0xff]  }
0x1230   : > { %7707 = vmatpush1.bf16.msra.mxu1 %v9559_v23  ;;  %v9616_v23 = vld [vmem:[%s11759_s25 + $0x170] ss:$8 sps:$4 sm:$0xff]  }
0x1231   : > { %7708 = vmatprep.subr.bf16.mxu1 %v9564_v52  ;;  %v9621_v52 = vld [vmem:[%s11759_s25 + $0x184] ss:$8 sps:$4 sm:$0xff]  }
0x1234   : > { %7709 = vmatpush1.bf16.msra.mxu1 %v9562_v11  ;;  %v9619_v11 = vld [vmem:[%s11759_s25 + $0x180] ss:$8 sps:$4 sm:$0xff]  }
0x1235   : > { %7710 = vmatprep.subr.bf16.mxu1 %v9567_v62  ;;  %v9624_v62 = vld [vmem:[%s11759_s25 + $0x194] ss:$8 sps:$4 sm:$0xff]  }
0x1238   : > { %7711 = vmatpush1.bf16.msra.mxu1 %v9565_v0  ;;  %v9622_v0 = vld [vmem:[%s11759_s25 + $0x190] ss:$8 sps:$4 sm:$0xff]  }
0x1239   : > { %7712 = vmatprep.subr.bf16.mxu1 %v9570_v47  ;;  %v9627_v47 = vld [vmem:[%s11759_s25 + $0x1a4] ss:$8 sps:$4 sm:$0xff]  }
0x123c   : > { %7713 = vmatpush1.bf16.msra.mxu1 %v9568_v34  ;;  %v9625_v34 = vld [vmem:[%s11759_s25 + $0x1a0] ss:$8 sps:$4 sm:$0xff]  }
0x123d   : > { %7714 = vmatprep.subr.bf16.mxu1 %v9573_v10  ;;  %v9630_v10 = vld [vmem:[%s11759_s25 + $0x1b4] ss:$8 sps:$4 sm:$0xff]  }
0x1240   : > { %7715 = vmatpush1.bf16.msra.mxu1 %v9571_v33  ;;  %v9628_v33 = vld [vmem:[%s11759_s25 + $0x1b0] ss:$8 sps:$4 sm:$0xff]  }
0x1241   : > { %7716 = vmatprep.subr.bf16.mxu1 %v9576_v32  ;;  %v9633_v32 = vld [vmem:[%s11759_s25 + $0x1c4] ss:$8 sps:$4 sm:$0xff]  }
0x1244   : > { %7717 = vmatpush1.bf16.msra.mxu1 %v9574_v46  ;;  %v9631_v46 = vld [vmem:[%s11759_s25 + $0x1c0] ss:$8 sps:$4 sm:$0xff]  }
0x1245   : > { %7718 = vmatprep.subr.bf16.mxu1 %v9579_v12  ;;  %v9636_v12 = vld [vmem:[%s11759_s25 + $0x1d4] ss:$8 sps:$4 sm:$0xff]  }
0x1248   : > { %7719 = vmatpush1.bf16.msra.mxu1 %v9577_v51  ;;  %v9634_v51 = vld [vmem:[%s11759_s25 + $0x1d0] ss:$8 sps:$4 sm:$0xff]  }
0x1249   : > { %7720 = vmatprep.subr.bf16.mxu1 %v9582_v20  ;;  %v12055_v20 = vld [vmem:[#allocation54_spill] sm:$0xff] }
0x124c   : > { %7721 = vmatpush1.bf16.msra.mxu1 %v9580_v39  ;;  %v6461_v39 = vrot.slane %v11858_v56, %v12055_v20  ;;  %v9685_v20 = vld [vmem:[%s11759_s25 + $0x2e0] ss:$8 sps:$4 sm:$0xff]  }
0x124d   : > { %7722 = vmatprep.subr.bf16.mxu1 %v9585_v28  ;;  %v9639_v28 = vld [vmem:[%s11759_s25 + $0x1e4] ss:$8 sps:$4 sm:$0xff]  }
0x1250   : > { %7723 = vmatpush1.bf16.msra.mxu1 %v9583_v4  ;;  %v12056_v4 = vld [vmem:[#allocation53_spill] sm:$0xff] }
0x1251   : > { %7724 = vmatprep.subr.bf16.mxu1 %v9588_v40  ;;  %v6465_v40 = vrot.slane %v11858_v56, %v12056_v4  ;;  %v9690_v4 = vld [vmem:[%s11759_s25 + $0x2f4] ss:$8 sps:$4 sm:$0xff]  }
0x1254   : > { %7725 = vmatpush1.bf16.msra.mxu1 %v9586_v36 }
0x1255   : > { %7726 = vmatprep.subr.bf16.mxu1 %v9591_v37  ;;  %v9637_v37 = vld [vmem:[%s11759_s25 + $0x1e0] ss:$8 sps:$4 sm:$0xff]  }
0x1258   : > { %7727 = vmatpush1.bf16.msra.mxu1 %v9589_v8 }
0x1259   : > { %7728 = vmatprep.subr.bf16.mxu1 %v9594_v53 }
0x125c   : > { %7729 = vmatpush1.bf16.msra.mxu1 %v9592_v18  ;;  %v9642_v18 = vld [vmem:[%s11759_s25 + $0x1f4] ss:$8 sps:$4 sm:$0xff]  }
0x125d   : > { %7741 = vmatprep.subr.bf16.mxu1 %v9597_v29 }
0x1272   : > { %v6994_v27 = vpop.f32.mrb[52].mxu1 }
0x1273   : > { %v6995_v16 = vadd.f32 %v6994_v27, %v6453_v17  ;;  %v6996_v25 = vpop.f32.mrb[53].mxu1 }
0x1274   : > { %v6997_v61 = vadd.f32 %v6996_v25, %v6457_v26  ;;  %v6998_v9 = vpop.f32.mrb[54].mxu1  ;;  %v9640_v25 = vld [vmem:[%s11759_s25 + $0x1f0] ss:$8 sps:$4 sm:$0xff]  }
0x1275   : > { %v6999_v45 = vadd.f32 %v6998_v9, %v6453_v17  ;;  %v7000_v22 = vpop.f32.mrb[55].mxu1  ;;  %v7089_v6 = vmax.f32 %v6995_v16, 0.0 }
0x1276   : > { %v7001_v60 = vadd.f32 %v7000_v22, %v6457_v26  ;;  %v7090_v15 = vmax.f32 %v6997_v61, 0.0 }
0x1277   : > { %v7095_v63 = vmax.f32 %v6999_v45, 0.0  ;;  %v9645_v45 = vld [vmem:[%s11759_s25 + $0x204] ss:$8 sps:$4 sm:$0xff]  }
0x1278   : > { %v7096_v2 = vmax.f32 %v7001_v60, 0.0 }
0x1279   : > { %v7101_v50 = vpack.c.bf16 %v7095_v63, %v7089_v6 }
0x127a   : > { %v7102_v54 = vpack.c.bf16 %v7096_v2, %v7090_v15  ;;  %v9643_v15 = vld [vmem:[%s11759_s25 + $0x200] ss:$8 sps:$4 sm:$0xff]   ;;  %v9648_v2 = vld [vmem:[%s11759_s25 + $0x214] ss:$8 sps:$4 sm:$0xff]  }
0x127c   : > { %7730 = vmatprep.mubr.bf16.mxu1 %v7102_v54  ;;  %v9651_v54 = vld [vmem:[%s11759_s25 + $0x224] ss:$8 sps:$4 sm:$0xff]  }
0x127d   : > { %7731 = vmatmul.mubr.bf16.vlgmr.msra.gmra.mrb[64].mxu1 %v7101_v50  ;;  %v9646_v50 = vld [vmem:[%s11759_s25 + $0x210] ss:$8 sps:$4 sm:$0xff]  }
0x127e   : > { %7742 = vmatpush1.bf16.msra.mxu1 %v9595_v1  ;;  %v9649_v1 = vld [vmem:[%s11759_s25 + $0x220] ss:$8 sps:$4 sm:$0xff]  }
0x127f   : > { %7743 = vmatprep.subr.bf16.mxu1 %v9600_v55  ;;  %v9654_v55 = vld [vmem:[%s11759_s25 + $0x234] ss:$8 sps:$4 sm:$0xff]  }
0x1282   : > { %7744 = vmatpush1.bf16.msra.mxu1 %v9598_v43  ;;  %v9652_v43 = vld [vmem:[%s11759_s25 + $0x230] ss:$8 sps:$4 sm:$0xff]  }
0x1283   : > { %7745 = vmatprep.subr.bf16.mxu1 %v9603_v5  ;;  %v9657_v5 = vld [vmem:[%s11759_s25 + $0x244] ss:$8 sps:$4 sm:$0xff]  }
0x1286   : > { %7746 = vmatpush1.bf16.msra.mxu1 %v9601_v57  ;;  %v9655_v57 = vld [vmem:[%s11759_s25 + $0x240] ss:$8 sps:$4 sm:$0xff]  }
0x1287   : > { %7747 = vmatprep.subr.bf16.mxu1 %v9606_v38  ;;  %v9660_v38 = vld [vmem:[%s11759_s25 + $0x254] ss:$8 sps:$4 sm:$0xff]  }
0x128a   : > { %7748 = vmatpush1.bf16.msra.mxu1 %v9604_v44  ;;  %v9658_v44 = vld [vmem:[%s11759_s25 + $0x250] ss:$8 sps:$4 sm:$0xff]  }
0x128b   : > { %7749 = vmatprep.subr.bf16.mxu1 %v9609_v41  ;;  %v9663_v41 = vld [vmem:[%s11759_s25 + $0x264] ss:$8 sps:$4 sm:$0xff]  }
0x128e   : > { %7750 = vmatpush1.bf16.msra.mxu1 %v9607_v13  ;;  %v9661_v13 = vld [vmem:[%s11759_s25 + $0x260] ss:$8 sps:$4 sm:$0xff]  }
0x128f   : > { %7751 = vmatprep.subr.bf16.mxu1 %v9612_v21  ;;  %v9666_v21 = vld [vmem:[%s11759_s25 + $0x274] ss:$8 sps:$4 sm:$0xff]  }
0x1292   : > { %7752 = vmatpush1.bf16.msra.mxu1 %v9610_v59  ;;  %v9664_v59 = vld [vmem:[%s11759_s25 + $0x270] ss:$8 sps:$4 sm:$0xff]  }
0x1293   : > { %7753 = vmatprep.subr.bf16.mxu1 %v9615_v42  ;;  %v9669_v42 = vld [vmem:[%s11759_s25 + $0x284] ss:$8 sps:$4 sm:$0xff]  }
0x1296   : > { %7754 = vmatpush1.bf16.msra.mxu1 %v9613_v7  ;;  %v9667_v7 = vld [vmem:[%s11759_s25 + $0x280] ss:$8 sps:$4 sm:$0xff]  }
0x1297   : > { %7755 = vmatprep.subr.bf16.mxu1 %v9618_v14  ;;  %v9672_v14 = vld [vmem:[%s11759_s25 + $0x294] ss:$8 sps:$4 sm:$0xff]  }
0x129a   : > { %7756 = vmatpush1.bf16.msra.mxu1 %v9616_v23  ;;  %v9670_v23 = vld [vmem:[%s11759_s25 + $0x290] ss:$8 sps:$4 sm:$0xff]  }
0x129b   : > { %7757 = vmatprep.subr.bf16.mxu1 %v9621_v52  ;;  %v9675_v52 = vld [vmem:[%s11759_s25 + $0x2a4] ss:$8 sps:$4 sm:$0xff]  }
0x129e   : > { %7758 = vmatpush1.bf16.msra.mxu1 %v9619_v11  ;;  %v9673_v11 = vld [vmem:[%s11759_s25 + $0x2a0] ss:$8 sps:$4 sm:$0xff]  }
0x129f   : > { %7759 = vmatprep.subr.bf16.mxu1 %v9624_v62  ;;  %v9678_v62 = vld [vmem:[%s11759_s25 + $0x2b4] ss:$8 sps:$4 sm:$0xff]  }
0x12a2   : > { %7760 = vmatpush1.bf16.msra.mxu1 %v9622_v0  ;;  %v9676_v0 = vld [vmem:[%s11759_s25 + $0x2b0] ss:$8 sps:$4 sm:$0xff]  }
0x12a3   : > { %7761 = vmatprep.subr.bf16.mxu1 %v9627_v47  ;;  %v9681_v47 = vld [vmem:[%s11759_s25 + $0x2c4] ss:$8 sps:$4 sm:$0xff]  }
0x12a6   : > { %7762 = vmatpush1.bf16.msra.mxu1 %v9625_v34  ;;  %v9679_v34 = vld [vmem:[%s11759_s25 + $0x2c0] ss:$8 sps:$4 sm:$0xff]  }
0x12a7   : > { %7763 = vmatprep.subr.bf16.mxu1 %v9630_v10  ;;  %v9684_v10 = vld [vmem:[%s11759_s25 + $0x2d4] ss:$8 sps:$4 sm:$0xff]  }
0x12aa   : > { %7764 = vmatpush1.bf16.msra.mxu1 %v9628_v33  ;;  %v9682_v33 = vld [vmem:[%s11759_s25 + $0x2d0] ss:$8 sps:$4 sm:$0xff]  }
0x12ab   : > { %7765 = vmatprep.subr.bf16.mxu1 %v9633_v32  ;;  %v6469_v32 = vrot.slane %v11858_v56, %v11429_v3  ;;  %v9688_v3 = vld [vmem:[%s11759_s25 + $0x2f0] ss:$8 sps:$4 sm:$0xff]  }
0x12ae   : > { %7766 = vmatpush1.bf16.msra.mxu1 %v9631_v46  ;;  %v9687_v46 = vld [vmem:[%s11759_s25 + $0x2e4] ss:$8 sps:$4 sm:$0xff]  }
0x12af   : > { %7767 = vmatprep.subr.bf16.mxu1 %v9636_v12  ;;  %v6473_v12 = vrot.slane %v11858_v56, %v11383_v58 }
0x12b2   : > { %v7037_v36 = vpop.f32.mrb[56].mxu1  ;;  %7768 = vmatpush1.bf16.msra.mxu1 %v9634_v51 }
0x12b3   : > { %v7038_v8 = vadd.f32 %v7037_v36, %v6461_v39  ;;  %v7039_v53 = vpop.f32.mrb[57].mxu1  ;;  %7769 = vmatprep.subr.bf16.mxu1 %v9639_v28 }
0x12b4   : > { %v7040_v29 = vadd.f32 %v7039_v53, %v6465_v40  ;;  %v7041_v17 = vpop.f32.mrb[58].mxu1 }
0x12b5   : > { %v7042_v26 = vadd.f32 %v7041_v17, %v6461_v39  ;;  %v7043_v27 = vpop.f32.mrb[59].mxu1  ;;  %v7091_v61 = vmax.f32 %v7038_v8, 0.0 }
0x12b6   : > { %v7044_v16 = vadd.f32 %v7043_v27, %v6465_v40  ;;  %7770 = vmatpush1.bf16.msra.mxu1 %v9637_v37  ;;  %v7092_v22 = vmax.f32 %v7040_v29, 0.0  ;;  %v7206_v27 = vld [vmem:[%s7205_s6] sm:$0x3] }
0x12b7   : > { %v7097_v9 = vmax.f32 %v7042_v26, 0.0  ;;  %7771 = vmatprep.subr.bf16.mxu1 %v9642_v18 }
0x12b8   : > { %v7098_v60 = vmax.f32 %v7044_v16, 0.0  ;;  %v7211_v16 = vrot.slane %v7206_v27, %v10767_v35 }
0x12b9   : > { %v7103_v6 = vpack.c.bf16 %v7097_v9, %v7091_v61 }
0x12ba   : > { %v7104_v63 = vpack.c.bf16 %v7098_v60, %v7092_v22  ;;  %7772 = vmatpush1.bf16.msra.mxu1 %v9640_v25  ;;  %v7215_v25 = vrot.slane %v7206_v27, %v10763_v31 }
0x12bb   : > { %7784 = vmatprep.subr.bf16.mxu1 %v9645_v45 }
0x12bc   : > { %7773 = vmatprep.mubr.bf16.mxu1 %v7104_v63 }
0x12bd   : > { %7774 = vmatmul.mubr.bf16.vlgmr.msra.gmra.mrb[64].mxu1 %v7103_v6 }
0x12be   : > { %7785 = vmatpush1.bf16.msra.mxu1 %v9643_v15 }
0x12bf   : > { %7786 = vmatprep.subr.bf16.mxu1 %v9648_v2 }
0x12c2   : > { %7787 = vmatpush1.bf16.msra.mxu1 %v9646_v50 }
0x12c3   : > { %7788 = vmatprep.subr.bf16.mxu1 %v9651_v54 }
0x12c6   : > { %7789 = vmatpush1.bf16.msra.mxu1 %v9649_v1 }
0x12c7   : > { %7790 = vmatprep.subr.bf16.mxu1 %v9654_v55 }
0x12ca   : > { %7791 = vmatpush1.bf16.msra.mxu1 %v9652_v43 }
0x12cb   : > { %7792 = vmatprep.subr.bf16.mxu1 %v9657_v5 }
0x12ce   : > { %7793 = vmatpush1.bf16.msra.mxu1 %v9655_v57 }
0x12cf   : > { %7794 = vmatprep.subr.bf16.mxu1 %v9660_v38 }
0x12d2   : > { %7795 = vmatpush1.bf16.msra.mxu1 %v9658_v44 }
0x12d3   : > { %7796 = vmatprep.subr.bf16.mxu1 %v9663_v41 }
0x12d6   : > { %7797 = vmatpush1.bf16.msra.mxu1 %v9661_v13 }
0x12d7   : > { %7798 = vmatprep.subr.bf16.mxu1 %v9666_v21 }
0x12da   : > { %7799 = vmatpush1.bf16.msra.mxu1 %v9664_v59 }
0x12db   : > { %7800 = vmatprep.subr.bf16.mxu1 %v9669_v42 }
0x12de   : > { %7801 = vmatpush1.bf16.msra.mxu1 %v9667_v7 }
0x12df   : > { %7802 = vmatprep.subr.bf16.mxu1 %v9672_v14 }
0x12e2   : > { %7803 = vmatpush1.bf16.msra.mxu1 %v9670_v23 }
0x12e3   : > { %7804 = vmatprep.subr.bf16.mxu1 %v9675_v52 }
0x12e6   : > { %7805 = vmatpush1.bf16.msra.mxu1 %v9673_v11 }
0x12e7   : > { %7806 = vmatprep.subr.bf16.mxu1 %v9678_v62 }
0x12ea   : > { %7807 = vmatpush1.bf16.msra.mxu1 %v9676_v0 }
0x12eb   : > { %7808 = vmatprep.subr.bf16.mxu1 %v9681_v47  ;;  %v7832_v47 = vld [vmem:[%s7831_s0] sm:$0x3] }
0x12ee   : > { %7809 = vmatpush1.bf16.msra.mxu1 %v9679_v34  ;;  %v7834_v34 = vld [vmem:[%s7833_s23] sm:$0x3] }
0x12ef   : > { %7810 = vmatprep.subr.bf16.mxu1 %v9684_v10  ;;  %v7871_v10 = vrot.slane %v7832_v47, %v10767_v35 }
0x12f2   : > { %v7080_v51 = vpop.f32.mrb[60].mxu1  ;;  %7811 = vmatpush1.bf16.msra.mxu1 %v9682_v33  ;;  %v7875_v33 = vrot.slane %v7832_v47, %v10763_v31 }
0x12f3   : > { %v7081_v39 = vadd.f32 %v7080_v51, %v6469_v32  ;;  %v7082_v28 = vpop.f32.mrb[61].mxu1  ;;  %7812 = vmatprep.subr.bf16.mxu1 %v9687_v46  ;;  %v7886_v46 = vrot.slane %v7834_v34, %v10767_v35 }
0x12f4   : > { %v7083_v40 = vadd.f32 %v7082_v28, %v6473_v12  ;;  %v7084_v36 = vpop.f32.mrb[62].mxu1 }
0x12f5   : > { %v7085_v37 = vadd.f32 %v7084_v36, %v6469_v32  ;;  %v7086_v8 = vpop.f32.mrb[63].mxu1  ;;  %v7093_v18 = vmax.f32 %v7081_v39, 0.0 }
0x12f6   : > { %v7087_v53 = vadd.f32 %v7086_v8, %v6473_v12  ;;  %7813 = vmatpush1.bf16.msra.mxu1 %v9685_v20  ;;  %v7094_v17 = vmax.f32 %v7083_v40, 0.0  ;;  %v7890_v12 = vrot.slane %v7834_v34, %v10763_v31 }
0x12f7   : > { %v7099_v29 = vmax.f32 %v7085_v37, 0.0  ;;  %7814 = vmatprep.subr.bf16.mxu1 %v9690_v4 }
0x12f8   : > { %v7100_v58 = vmax.f32 %v7087_v53, 0.0 }
0x12f9   : > { %v7105_v56 = vpack.c.bf16 %v7099_v29, %v7093_v18 }
0x12fa   : > { %v7106_v26 = vpack.c.bf16 %v7100_v58, %v7094_v17  ;;  %7815 = vmatpush1.bf16.msra.mxu1 %v9688_v3  ;;  %v7897_v17 = vld [vmem:[#allocation33] sm:$0x3] (%p1445_p6)  ;;  %v12061_v58 = vmov (%p1445_p6), 0  }
0x12fb   :  { %9732 = vset.pattern.permute.xlu1 (%p1445_p6), %v12061_v58  ;;  %9733 = vset.pattern.permute.xlu0 (%p1445_p6), %v12061_v58 }
0x12fc   : > { %7816 = vmatprep.mubr.bf16.mxu1 %v7106_v26 }
0x12fd   : > { %7817 = vmatmul.mubr.bf16.vlgmr.msra.gmra.mrb[64].mxu1 %v7105_v56  ;;  %v8880_v56 = vld [vmem:[#allocation2] ss:$0 sm:$0xff] (%p1445_p6) }
0x13d0   : > { %v7818_v61 = vpop.f32.mrb[64].mxu1 }
0x13d1   : > { %v8905_v9 = vadd.f32 %v7818_v61, %v7211_v16  ;;  %v7820_v45 = vpop.f32.mrb[65].mxu1 }
0x13d2   : > { %v8906_v22 = vadd.f32 %v7820_v45, %v7215_v25  ;;  %v7822_v60 = vpop.f32.mrb[66].mxu1 }
0x13d3   : > { %v7827_v6 = vadd.f32 %v8905_v9, %v11739_v49  ;;  %v8907_v63 = vadd.f32 %v7822_v60, %v7211_v16  ;;  %v7824_v15 = vpop.f32.mrb[67].mxu1  ;;  %v7906_v16 = vrot.slane (%p1445_p6), %v7897_v17, %v10763_v31 }
0x13d4   : > { %v7828_v2 = vadd.f32 %v8906_v22, %v11735_v19  ;;  %v8908_v50 = vadd.f32 %v7824_v15, %v7215_v25 }
0x13d5   : > { %v7829_v54 = vadd.f32 %v8907_v63, %v11741_v48  ;;  %v12062_v63 = vld [vmem:[#allocation50_spill] sm:$0xff] (%p1445_p6) }
0x13d6   : > { %v7830_v1 = vadd.f32 %v8908_v50, %v11737_v24  ;;  %v7835_v55 = vadd.f32 %v7828_v2, %v7827_v6  ;;  %v7935_v15 = vsub.s32 (%p1445_p6), %v12062_v63, %v10760_v30 }
0x13d8   : > { %7836 = vadd.xlane.f32.xlu0 %v7835_v55  ;;  %v7838_v43 = vadd.f32 %v7830_v1, %v7829_v54 }
0x13da   : > { %7839 = vadd.xlane.f32.xlu1 %v7838_v43 }
0x1465   : > { %v7837_v5 = vpop.xlane.xlu0 %7836 }
0x1466   : > { %v7841_v57 = vmul.f32 0.00390625, %v7837_v5 }
0x1467   : > { %v7840_v38 = vpop.xlane.xlu1 %7839 }
0x1468   : > { %v7843_v44 = vsub.f32 %v7827_v6, %v7841_v57  ;;  %v7844_v41 = vsub.f32 %v7828_v2, %v7841_v57  ;;  %v7842_v13 = vmul.f32 0.00390625, %v7840_v38 }
0x146a   : > { %v7845_v49 = vsub.f32 %v7829_v54, %v7842_v13  ;;  %v7846_v21 = vsub.f32 %v7830_v1, %v7842_v13  ;;  %v7847_v59 = vmul.f32 %v7843_v44, %v7843_v44  ;;  %v7848_v19 = vmul.f32 %v7844_v41, %v7844_v41 }
0x146c   : > { %v7851_v42 = vadd.f32 %v7848_v19, %v7847_v59  ;;  %v7849_v48 = vmul.f32 %v7845_v49, %v7845_v49  ;;  %v7850_v7 = vmul.f32 %v7846_v21, %v7846_v21 }
0x146e   : > { %7852 = vadd.xlane.f32.xlu0 %v7851_v42  ;;  %v7854_v24 = vadd.f32 %v7850_v7, %v7849_v48 }
0x1470   : > { %7855 = vadd.xlane.f32.xlu1 %v7854_v24 }
0x1481   :  { %7926 = vperm.xlu1 (%p1445_p6), %9732, %v8880_v56  }
0x14fb   : > { %v7853_v14 = vpop.xlane.xlu0 %7852 }
0x14fc   : > { %v7857_v23 = vmul.f32 0.00390625, %v7853_v14 }
0x14fd   : > { %v7856_v52 = vpop.xlane.xlu1 %7855 }
0x14fe   : > { %v7859_v11 = vadd.f32 1e-05, %v7857_v23  ;;  %v7858_v62 = vmul.f32 0.00390625, %v7856_v52 }
0x1500   : > { %9727 = vrsqrt.f32 %v7859_v11  ;;  %v7860_v0 = vadd.f32 1e-05, %v7858_v62 }
0x1501   :  { %v7927_v6 = vpop.permute.xlu1 (%p1445_p6), %7926 }
0x1502   : > { %9729 = vrsqrt.f32 %v7860_v0 }
0x150a   : > { %v9728_v32 = vpop.eup %9727 }
0x150b   : > { %v7863_v51 = vmul.f32 %v9728_v32, %v7843_v44  ;;  %v7864_v20 = vmul.f32 %v9728_v32, %v7844_v41 }
0x150c   : > { %v9730_v39 = vpop.eup %9729 }
0x150d   : > { %v7878_v28 = vmul.f32 %v7871_v10, %v7863_v51  ;;  %v7879_v4 = vmul.f32 %v7875_v33, %v7864_v20  ;;  %v7865_v40 = vmul.f32 %v9730_v39, %v7845_v49  ;;  %v7866_v36 = vmul.f32 %v9730_v39, %v7846_v21  ;;  %1447 = sbr.rel (!%p1445_p6) target bundleno = 1090 (0x442), region = 211 }
0x150f   : > { %v7893_v37 = vadd.f32 %v7886_v46, %v7878_v28   ;;  %v7894_v8 = vadd.f32 %v7890_v12, %v7879_v4   ;;  %v7880_v53 = vmul.f32 %v7871_v10, %v7865_v40  ;;  %v7881_v3 = vmul.f32 %v7875_v33, %v7866_v36 }
0x1511   : > { %v7895_v18 = vadd.f32 %v7886_v46, %v7880_v53   ;;  %v7896_v29 = vadd.f32 %v7890_v12, %v7881_v3   ;;  %v12059_v27 = vmov %v7894_v8  ;;  %v12060_v26 = vmov %v7893_v37 }
0x1512   :  { %v7902_v26 = vrot.slane (%p1445_p6), %v7897_v17, %v10767_v35  ;;  %v7910_v61 = vmul.f32 (%p1445_p6), %v7906_v16, %v7894_v8 }
0x1513   : > { %v12057_v36 = vmov %v7896_v29  ;;  %v12058_v34 = vmov %v7895_v18  ;;  %v7912_v45 = vmul.f32 (%p1445_p6), %v7906_v16, %v7896_v29 }
0x1514   :  { %v7909_v25 = vmul.f32 %v7902_v26, %v7893_v37  ;;  %v7911_v9 = vmul.f32 %v7902_v26, %v7895_v18 }
0x1516   :  { %v7913_v22 = vadd.f32 %v7910_v61, %v7909_v25  ;;  %v7916_v60 = vadd.f32 %v7912_v45, %v7911_v9 }
0x1518   :  { %7914 = vadd.xlane.f32.xlu0 %v7913_v22 }
0x151c   :  { %7917 = vadd.xlane.f32.xlu0 %v7916_v60 }
0x15a5   :  { %v7915_v27 = vpop.xlane.xlu0 %7914 }
0x15a6   :  { %v7929_v2 = vadd.f32 %v7927_v6, %v7915_v27 }
0x15a8   :  { %v7936_v31 = vrot.slane %v7929_v2, %v7935_v15 }
0x15a9   :  { %v7918_v50 = vpop.xlane.xlu0 %7917 }
0x15aa   :  { %v7930_v54 = vadd.f32 %v7927_v6, %v7918_v50 }
0x15ac   :  { %v7940_v35 = vrot.slane %v7930_v54, %v7935_v15 }
0x15ae   :  { %v7942_v1 = vsel %vm7941_vm4, %v7940_v35, %v7936_v31 }
0x15af   :  { %7945 = vst.msk [vmem:[#allocation35] sm:$0x3] %vm7944_vm5, %v7942_v1 }
0x15b0   :  { %10185 = shalt.err (!%p10182_p11)
}
0x15b1   :  { %s12063_s8 = sld [smem:[#allocation64_spill]] }
0x15b7   :  { %s10186_s16 = scalar_lea.hbm %s12063_s8, 32 }
0x15b8   :  { %p10187_p12 = scmp.ne.s32.totalorder %s12063_s8, %s10186_s16  ;;  %p10190_p13 = scmp.lt.u32.totalorder %s10186_s16, %s12063_s8 }
0x15ba   :  { %p10192_p0 = pnand %p10190_p13, %p10187_p12 }
0x15bc   :  { %10195 = shalt.err (!%p10192_p0)
}
0x15bd   :  { %7955 = dma.vmem_to_hbm [thread:$0]  %s7953_s11, 32, %s12063_s8, [#allocation5]  }
0x15be   :  { %10238 = dma.done.wait [#allocation5], 32  }
0x15bf   :  { %10239 = vsyncadd [#allocation5], 4294967264 }
0x15c0   :  { %7959 = vsyncpa [#allocation4], 1 }
0x15c1   :  { %7960 = vsyncpa [#allocation7], 1 }
0x15c2   :  { %7961 = vsyncpa [#allocation10], 1 }
0x15c3   :  { %7962 = vsyncpa [#allocation13], 1 }
0x15c4   :  { %7963 = vsyncpa [#allocation16], 1 }
0x15c5   :  { %7964 = vsyncpa [#allocation19], 1 }
0x15c6   :  { %7965 = vsyncpa [#allocation22], 1 }
0x15c7   :  { %7966 = vsyncpa [#allocation25], 1 }
0x15c8   :  { %7967 = vsyncpa [#allocation28], 1 }
0x15c9   :  { %7968 = vsyncpa [#allocation31], 1 }
0x15ca   :  { %7969 = vsyncpa [#allocation34], 1 }
0x15cb   :  { %7970 = vsyncpa [#allocation5], 1 }

</bundles_post_ra>
